<compile_context>
chip_gen: v6e
topology: v6e:2x2x1
jax: 0.10.0
libtpu: 0.0.40
codegen_flags: <defaults>
</compile_context>

<pallas_src>
import jax
import jax.numpy as jnp
from jax.experimental import pallas as pl
from jax.experimental.pallas import tpu as pltpu

HIDDEN = 600          # logical hidden width (PyTorch module)
HP = 640              # padded hidden width (multiple of 128)
IN_FEATURES = 23
OUT_PAD = 128         # lane-dense output slab width
EPS = 1e-5


def _round_up(x, m):
    return ((x + m - 1) // m) * m


# ----------------------------------------------------------------------------
# Kernel
# ----------------------------------------------------------------------------
def mlp_kernel(x_ref, w1_ref, b1_ref, wh_ref, bh_ref, w7_ref, b7_ref, out_ref):
    # x: (TB, 23) f32.  w1/wh are bf16 (BN already folded in), biases f32.
    x = x_ref[...]

    # Layer 1: (TB, 23) @ (23, HP) -- bf16 operands, f32 accumulate.
    h = jnp.dot(x.astype(jnp.bfloat16), w1_ref[...],
                preferred_element_type=jnp.float32) + b1_ref[...]
    h = jnp.maximum(h, 0.0)

    # Layers 2..6: (TB, HP) @ (HP, HP), statically unrolled.
    for i in range(5):
        h = jnp.dot(h.astype(jnp.bfloat16), wh_ref[i],
                    preferred_element_type=jnp.float32) + bh_ref[i, :][None, :]
        h = jnp.maximum(h, 0.0)

    # Layer 7 (N=1): VPU multiply + XLU lane reduction instead of a wasted MXU
    # pass; b7 is a scalar read from SMEM.
    out = jnp.sum(h * w7_ref[...], axis=-1, keepdims=True) + b7_ref[0, 0]

    # Lane-dense store: broadcast the scalar column across the 128-lane slab.
    out_ref[...] = jnp.broadcast_to(out, out_ref.shape)


# ----------------------------------------------------------------------------
# Wrapper
# ----------------------------------------------------------------------------
def _choose_batch_tile(B, tb):
    """Batch tile: multiple of 16 (bf16 sublane packing), >=2 grid steps when
    the batch allows it (v7x second TensorCore), small padding waste (v5e)."""
    tb_eff = min(tb, _round_up(B, 16))
    tb_eff = _round_up(tb_eff, 16)
    if B > 16 and pl.cdiv(B, tb_eff) < 2:
        tb_eff = _round_up(pl.cdiv(B, 2), 16)
    return tb_eff


def _make_in_specs(tb_eff, single_buffer_weights):
    # Weight/bias specs use constant index_maps -> resident in VMEM.  With
    # single buffering the second pipeline buffer is dropped (~4 MiB saved).
    wkw = {}
    if single_buffer_weights and hasattr(pl, "Buffered"):
        wkw = {"pipeline_mode": pl.Buffered(1)}
    return [
        pl.BlockSpec((tb_eff, IN_FEATURES), lambda i: (i, 0)),          # x tile
        pl.BlockSpec((IN_FEATURES, HP), lambda i: (0, 0), **wkw),       # w1
        pl.BlockSpec((1, HP), lambda i: (0, 0), **wkw),                 # b1
        pl.BlockSpec((5, HP, HP), lambda i: (0, 0, 0), **wkw),          # wh
        pl.BlockSpec((5, HP), lambda i: (0, 0), **wkw),                 # bh
        pl.BlockSpec((1, HP), lambda i: (0, 0), **wkw),                 # w7 row
        pl.BlockSpec(memory_space=pltpu.MemorySpace.SMEM),              # b7 scalar
    ]


def mlp_forward(x, folded_params, *, tb=512, single_buffer_weights=True):
    w1, b1, wh, bh, w7, b7 = folded_params
    B = x.shape[0]
    tb_eff = _choose_batch_tile(B, tb)
    b_pad = _round_up(B, tb_eff)
    if b_pad != B:
        x = jnp.pad(x, ((0, b_pad - B), (0, 0)))
    grid = (b_pad // tb_eff,)

    out = pl.pallas_call(
        mlp_kernel,
        out_shape=jax.ShapeDtypeStruct((b_pad, OUT_PAD), jnp.float32),
        grid=grid,
        in_specs=_make_in_specs(tb_eff, single_buffer_weights),
        out_specs=pl.BlockSpec((tb_eff, OUT_PAD), lambda i: (i, 0)),
        compiler_params=pltpu.CompilerParams(
            dimension_semantics=("parallel",),
            vmem_limit_bytes=32 << 20,
        ),
    )(x, w1, b1, wh, bh, w7, b7)
    return out[:B, :1]


# ----------------------------------------------------------------------------
# Parameters: raw (PyTorch-like) init + BN-folding / padding / bf16 cast
# ----------------------------------------------------------------------------
def init_params(key):
    ks = jax.random.split(key, 16)
    # Linear weights stored already transposed: (in, out), so forward does x @ W.
    w1 = jax.random.normal(ks[0], (IN_FEATURES, HIDDEN), jnp.float32) * 0.05
    b1 = jax.random.normal(ks[1], (HIDDEN,), jnp.float32) * 0.01
    wh = jax.random.normal(ks[2], (5, HIDDEN, HIDDEN), jnp.float32) * 0.02
    bh = jax.random.normal(ks[3], (5, HIDDEN), jnp.float32) * 0.01
    w7 = jax.random.normal(ks[4], (HIDDEN, 1), jnp.float32) * 0.02
    b7 = jax.random.normal(ks[5], (1,), jnp.float32) * 0.01
    # BatchNorm1d (eval) params / running stats for the 6 norm layers.
    gamma = 1.0 + 0.1 * jax.random.normal(ks[6], (6, HIDDEN), jnp.float32)
    beta = 0.1 * jax.random.normal(ks[7], (6, HIDDEN), jnp.float32)
    mean = 0.1 * jax.random.normal(ks[8], (6, HIDDEN), jnp.float32)
    var = jnp.abs(1.0 + 0.1 * jax.random.normal(ks[9], (6, HIDDEN), jnp.float32))
    return (w1, b1, wh, bh, w7, b7, gamma, beta, mean, var)


def fold_and_pad_params(params):
    """Fold eval-mode BN into the preceding Linear, pad HIDDEN->HP, cast to bf16."""
    (w1, b1, wh, bh, w7, b7, gamma, beta, mean, var) = params
    scale = gamma * jax.lax.rsqrt(var + EPS)        # (6, HIDDEN)

    # Layer 1 folded.
    w1f = w1 * scale[0][None, :]
    b1f = (b1 - mean[0]) * scale[0] + beta[0]
    # Layers 2..6 folded.
    whf = wh * scale[1:][:, None, :]
    bhf = (bh - mean[1:]) * scale[1:] + beta[1:]

    pad_h = HP - HIDDEN
    w1p = jnp.pad(w1f, ((0, 0), (0, pad_h))).astype(jnp.bfloat16)        # (23, HP)
    b1p = jnp.pad(b1f, ((0, pad_h),)).reshape(1, HP)                     # (1, HP) f32
    whp = jnp.pad(whf, ((0, 0), (0, pad_h), (0, pad_h))).astype(jnp.bfloat16)  # (5,HP,HP)
    bhp = jnp.pad(bhf, ((0, 0), (0, pad_h)))                             # (5, HP) f32
    w7p = jnp.pad(w7[:, 0], ((0, pad_h),)).reshape(1, HP)                # (1, HP) f32
    b7p = b7.reshape(1, 1)                                               # (1, 1) f32
    return (w1p, b1p, whp, bhp, w7p, b7p)


# ----------------------------------------------------------------------------
# References
# ----------------------------------------------------------------------------
def reference_forward_f32(x, params):
    """Original eval-mode semantics, all f32, unfolded BN."""
    (w1, b1, wh, bh, w7, b7, gamma, beta, mean, var) = params

    def bn_relu(h, i):
        inv = jax.lax.rsqrt(var[i] + EPS)
        h = (h - mean[i]) * (gamma[i] * inv) + beta[i]
        return jnp.maximum(h, 0.0)

    h = x @ w1 + b1
    h = bn_relu(h, 0)
    for i in range(5):
        h = h @ wh[i] + bh[i]
        h = bn_relu(h, i + 1)
    return h @ w7 + b7


def reference_forward_matched(x, folded):
    """Same folded/padded bf16 math as the kernel (apples-to-apples check)."""
    w1, b1, wh, bh, w7, b7 = folded
    h = jnp.dot(x.astype(jnp.bfloat16), w1, preferred_element_type=jnp.float32) + b1
    h = jnp.maximum(h, 0.0)
    for i in range(5):
        h = jnp.dot(h.astype(jnp.bfloat16), wh[i],
                    preferred_element_type=jnp.float32) + bh[i]
        h = jnp.maximum(h, 0.0)
    return jnp.sum(h * w7, axis=-1, keepdims=True) + b7[0, 0]


# ----------------------------------------------------------------------------
if __name__ == "__main__":
    key = jax.random.PRNGKey(0)
    kx, kp = jax.random.split(key)
    B = 8
    x = jax.random.normal(kx, (B, IN_FEATURES), jnp.float32)

    params = init_params(kp)
    folded = fold_and_pad_params(params)

    try:
        out = jax.block_until_ready(mlp_forward(x, folded))
    except Exception:
        # pl.Buffered(1) single-buffering not supported by this jax/libtpu build:
        # fall back to default double-buffered weight specs (still correct).
        out = jax.block_until_ready(
            mlp_forward(x, folded, single_buffer_weights=False))
    assert out.shape == (B, 1)

    # Tight check against the identical (folded, bf16-operand) math.
    ref_bf16 = reference_forward_matched(x, folded)
    assert jnp.allclose(out, ref_bf16, atol=5e-3, rtol=5e-3), (out, ref_bf16)

    # Looser check against the original f32 BN-eval semantics (bf16 weight cast).
    ref_f32 = reference_forward_f32(x, params)
    assert jnp.allclose(out, ref_f32, atol=5e-2, rtol=5e-2), (out, ref_f32)

    print("KERNEL_OK")
</pallas_src>

<mosaic_0001>
module attributes {stable_mosaic.version = 11 : i64} {
  func.func @mlp_kernel(%arg0: i32, %arg1: memref<16x23xf32, #tpu.memory_space<vmem>>, %arg2: memref<23x640xbf16, #tpu.memory_space<vmem>>, %arg3: memref<1x640xf32, #tpu.memory_space<vmem>>, %arg4: memref<5x640x640xbf16, #tpu.memory_space<vmem>>, %arg5: memref<5x640xf32, #tpu.memory_space<vmem>>, %arg6: memref<1x640xf32, #tpu.memory_space<vmem>>, %arg7: memref<1x1xf32, #tpu.memory_space<smem>>, %arg8: memref<16x128xf32, #tpu.memory_space<vmem>>) attributes {dimension_semantics = [#tpu.dimension_semantics<parallel>], iteration_bounds = array<i64: 1>, scalar_prefetch = 0 : i64, scratch_operands = 0 : i64, tpu.core_type = #tpu.core_type<tc>, window_params = [{transform_indices = @transform_0, window_bounds = array<i64: 16, 23>}, {pipeline_mode = #tpu.pipeline_mode<synchronous>, transform_indices = @transform_1, window_bounds = array<i64: 23, 640>}, {pipeline_mode = #tpu.pipeline_mode<synchronous>, transform_indices = @transform_2, window_bounds = array<i64: 1, 640>}, {pipeline_mode = #tpu.pipeline_mode<synchronous>, transform_indices = @transform_3, window_bounds = array<i64: 5, 640, 640>}, {pipeline_mode = #tpu.pipeline_mode<synchronous>, transform_indices = @transform_4, window_bounds = array<i64: 5, 640>}, {pipeline_mode = #tpu.pipeline_mode<synchronous>, transform_indices = @transform_5, window_bounds = array<i64: 1, 640>}, {transform_indices = @transform_6, window_bounds = array<i64: 1, 1>}, {transform_indices = @transform_7, window_bounds = array<i64: 16, 128>}]} {
    %c0 = arith.constant 0 : index
    %c0_0 = arith.constant 0 : index
    %0 = vector.load %arg1[%c0, %c0_0] : memref<16x23xf32, #tpu.memory_space<vmem>>, vector<16x23xf32>
    %1 = arith.truncf %0 : vector<16x23xf32> to vector<16x23xbf16>
    %c0_1 = arith.constant 0 : index
    %c0_2 = arith.constant 0 : index
    %2 = vector.load %arg2[%c0_1, %c0_2] : memref<23x640xbf16, #tpu.memory_space<vmem>>, vector<23x640xbf16>
    %cst = arith.constant dense<0.000000e+00> : vector<16x640xf32>
    %3 = tpu.matmul %1, %2, %cst {dimension_numbers = #tpu.dot_dimension_numbers<[1], [0], [0], [1], [0, 0, 1, 1], [], []>} : vector<16x23xbf16>, vector<23x640xbf16>, vector<16x640xf32> -> vector<16x640xf32>
    %c0_3 = arith.constant 0 : index
    %c0_4 = arith.constant 0 : index
    %4 = vector.load %arg3[%c0_3, %c0_4] : memref<1x640xf32, #tpu.memory_space<vmem>>, vector<1x640xf32>
    %5 = vector.broadcast %4 : vector<1x640xf32> to vector<16x640xf32>
    %6 = arith.addf %3, %5 : vector<16x640xf32>
    %cst_5 = arith.constant 0.000000e+00 : f32
    %7 = vector.broadcast %cst_5 : f32 to vector<16x640xf32>
    %8 = arith.maximumf %6, %7 : vector<16x640xf32>
    %9 = arith.truncf %8 : vector<16x640xf32> to vector<16x640xbf16>
    %c0_6 = arith.constant 0 : index
    %c0_7 = arith.constant 0 : index
    %c0_8 = arith.constant 0 : index
    %10 = vector.load %arg4[%c0_6, %c0_7, %c0_8] : memref<5x640x640xbf16, #tpu.memory_space<vmem>>, vector<1x640x640xbf16>
    %11 = vector.shape_cast %10 : vector<1x640x640xbf16> to vector<640x640xbf16>
    %cst_9 = arith.constant dense<0.000000e+00> : vector<16x640xf32>
    %12 = tpu.matmul %9, %11, %cst_9 {dimension_numbers = #tpu.dot_dimension_numbers<[1], [0], [0], [1], [0, 0, 1, 1], [], []>} : vector<16x640xbf16>, vector<640x640xbf16>, vector<16x640xf32> -> vector<16x640xf32>
    %c0_10 = arith.constant 0 : index
    %c0_11 = arith.constant 0 : index
    %13 = vector.load %arg5[%c0_10, %c0_11] : memref<5x640xf32, #tpu.memory_space<vmem>>, vector<1x640xf32>
    %14 = vector.shape_cast %13 : vector<1x640xf32> to vector<640xf32>
    %15 = vector.shape_cast %14 : vector<640xf32> to vector<1x640xf32>
    %16 = vector.broadcast %15 : vector<1x640xf32> to vector<16x640xf32>
    %17 = arith.addf %12, %16 : vector<16x640xf32>
    %cst_12 = arith.constant 0.000000e+00 : f32
    %18 = vector.broadcast %cst_12 : f32 to vector<16x640xf32>
    %19 = arith.maximumf %17, %18 : vector<16x640xf32>
    %20 = arith.truncf %19 : vector<16x640xf32> to vector<16x640xbf16>
    %c1 = arith.constant 1 : index
    %c0_13 = arith.constant 0 : index
    %c0_14 = arith.constant 0 : index
    %21 = vector.load %arg4[%c1, %c0_13, %c0_14] : memref<5x640x640xbf16, #tpu.memory_space<vmem>>, vector<1x640x640xbf16>
    %22 = vector.shape_cast %21 : vector<1x640x640xbf16> to vector<640x640xbf16>
    %cst_15 = arith.constant dense<0.000000e+00> : vector<16x640xf32>
    %23 = tpu.matmul %20, %22, %cst_15 {dimension_numbers = #tpu.dot_dimension_numbers<[1], [0], [0], [1], [0, 0, 1, 1], [], []>} : vector<16x640xbf16>, vector<640x640xbf16>, vector<16x640xf32> -> vector<16x640xf32>
    %c1_16 = arith.constant 1 : index
    %c0_17 = arith.constant 0 : index
    %24 = vector.load %arg5[%c1_16, %c0_17] : memref<5x640xf32, #tpu.memory_space<vmem>>, vector<1x640xf32>
    %25 = vector.shape_cast %24 : vector<1x640xf32> to vector<640xf32>
    %26 = vector.shape_cast %25 : vector<640xf32> to vector<1x640xf32>
    %27 = vector.broadcast %26 : vector<1x640xf32> to vector<16x640xf32>
    %28 = arith.addf %23, %27 : vector<16x640xf32>
    %cst_18 = arith.constant 0.000000e+00 : f32
    %29 = vector.broadcast %cst_18 : f32 to vector<16x640xf32>
    %30 = arith.maximumf %28, %29 : vector<16x640xf32>
    %31 = arith.truncf %30 : vector<16x640xf32> to vector<16x640xbf16>
    %c2 = arith.constant 2 : index
    %c0_19 = arith.constant 0 : index
    %c0_20 = arith.constant 0 : index
    %32 = vector.load %arg4[%c2, %c0_19, %c0_20] : memref<5x640x640xbf16, #tpu.memory_space<vmem>>, vector<1x640x640xbf16>
    %33 = vector.shape_cast %32 : vector<1x640x640xbf16> to vector<640x640xbf16>
    %cst_21 = arith.constant dense<0.000000e+00> : vector<16x640xf32>
    %34 = tpu.matmul %31, %33, %cst_21 {dimension_numbers = #tpu.dot_dimension_numbers<[1], [0], [0], [1], [0, 0, 1, 1], [], []>} : vector<16x640xbf16>, vector<640x640xbf16>, vector<16x640xf32> -> vector<16x640xf32>
    %c2_22 = arith.constant 2 : index
    %c0_23 = arith.constant 0 : index
    %35 = vector.load %arg5[%c2_22, %c0_23] : memref<5x640xf32, #tpu.memory_space<vmem>>, vector<1x640xf32>
    %36 = vector.shape_cast %35 : vector<1x640xf32> to vector<640xf32>
    %37 = vector.shape_cast %36 : vector<640xf32> to vector<1x640xf32>
    %38 = vector.broadcast %37 : vector<1x640xf32> to vector<16x640xf32>
    %39 = arith.addf %34, %38 : vector<16x640xf32>
    %cst_24 = arith.constant 0.000000e+00 : f32
    %40 = vector.broadcast %cst_24 : f32 to vector<16x640xf32>
    %41 = arith.maximumf %39, %40 : vector<16x640xf32>
    %42 = arith.truncf %41 : vector<16x640xf32> to vector<16x640xbf16>
    %c3 = arith.constant 3 : index
    %c0_25 = arith.constant 0 : index
    %c0_26 = arith.constant 0 : index
    %43 = vector.load %arg4[%c3, %c0_25, %c0_26] : memref<5x640x640xbf16, #tpu.memory_space<vmem>>, vector<1x640x640xbf16>
    %44 = vector.shape_cast %43 : vector<1x640x640xbf16> to vector<640x640xbf16>
    %cst_27 = arith.constant dense<0.000000e+00> : vector<16x640xf32>
    %45 = tpu.matmul %42, %44, %cst_27 {dimension_numbers = #tpu.dot_dimension_numbers<[1], [0], [0], [1], [0, 0, 1, 1], [], []>} : vector<16x640xbf16>, vector<640x640xbf16>, vector<16x640xf32> -> vector<16x640xf32>
    %c3_28 = arith.constant 3 : index
    %c0_29 = arith.constant 0 : index
    %46 = vector.load %arg5[%c3_28, %c0_29] : memref<5x640xf32, #tpu.memory_space<vmem>>, vector<1x640xf32>
    %47 = vector.shape_cast %46 : vector<1x640xf32> to vector<640xf32>
    %48 = vector.shape_cast %47 : vector<640xf32> to vector<1x640xf32>
    %49 = vector.broadcast %48 : vector<1x640xf32> to vector<16x640xf32>
    %50 = arith.addf %45, %49 : vector<16x640xf32>
    %cst_30 = arith.constant 0.000000e+00 : f32
    %51 = vector.broadcast %cst_30 : f32 to vector<16x640xf32>
    %52 = arith.maximumf %50, %51 : vector<16x640xf32>
    %53 = arith.truncf %52 : vector<16x640xf32> to vector<16x640xbf16>
    %c4 = arith.constant 4 : index
    %c0_31 = arith.constant 0 : index
    %c0_32 = arith.constant 0 : index
    %54 = vector.load %arg4[%c4, %c0_31, %c0_32] : memref<5x640x640xbf16, #tpu.memory_space<vmem>>, vector<1x640x640xbf16>
    %55 = vector.shape_cast %54 : vector<1x640x640xbf16> to vector<640x640xbf16>
    %cst_33 = arith.constant dense<0.000000e+00> : vector<16x640xf32>
    %56 = tpu.matmul %53, %55, %cst_33 {dimension_numbers = #tpu.dot_dimension_numbers<[1], [0], [0], [1], [0, 0, 1, 1], [], []>} : vector<16x640xbf16>, vector<640x640xbf16>, vector<16x640xf32> -> vector<16x640xf32>
    %c4_34 = arith.constant 4 : index
    %c0_35 = arith.constant 0 : index
    %57 = vector.load %arg5[%c4_34, %c0_35] : memref<5x640xf32, #tpu.memory_space<vmem>>, vector<1x640xf32>
    %58 = vector.shape_cast %57 : vector<1x640xf32> to vector<640xf32>
    %59 = vector.shape_cast %58 : vector<640xf32> to vector<1x640xf32>
    %60 = vector.broadcast %59 : vector<1x640xf32> to vector<16x640xf32>
    %61 = arith.addf %56, %60 : vector<16x640xf32>
    %cst_36 = arith.constant 0.000000e+00 : f32
    %62 = vector.broadcast %cst_36 : f32 to vector<16x640xf32>
    %63 = arith.maximumf %61, %62 : vector<16x640xf32>
    %c0_37 = arith.constant 0 : index
    %c0_38 = arith.constant 0 : index
    %64 = vector.load %arg6[%c0_37, %c0_38] : memref<1x640xf32, #tpu.memory_space<vmem>>, vector<1x640xf32>
    %65 = vector.broadcast %64 : vector<1x640xf32> to vector<16x640xf32>
    %66 = arith.mulf %63, %65 : vector<16x640xf32>
    %cst_39 = arith.constant dense<0.000000e+00> : vector<16xf32>
    %67 = vector.multi_reduction <add>, %66, %cst_39 [1] : vector<16x640xf32> to vector<16xf32>
    %68 = vector.shape_cast %67 : vector<16xf32> to vector<16x1xf32>
    %c0_40 = arith.constant 0 : index
    %c0_41 = arith.constant 0 : index
    %69 = memref.load %arg7[%c0_40, %c0_41] : memref<1x1xf32, #tpu.memory_space<smem>>
    %70 = vector.broadcast %69 : f32 to vector<16x1xf32>
    %71 = arith.addf %68, %70 : vector<16x1xf32>
    %72 = vector.shape_cast %71 : vector<16x1xf32> to vector<16x1xf32>
    %73 = vector.broadcast %72 : vector<16x1xf32> to vector<16x128xf32>
    %c0_42 = arith.constant 0 : index
    %c0_43 = arith.constant 0 : index
    %74 = vector.load %arg8[%c0_42, %c0_43] : memref<16x128xf32, #tpu.memory_space<vmem>>, vector<16x128xf32>
    tpu.vector_store %arg8[%c0_42, %c0_43], %73 {strides = array<i32>} : memref<16x128xf32, #tpu.memory_space<vmem>>, vector<16x128xf32>,
    return
  }
  func.func @transform_0(%arg0: i32) -> (i32, i32) {
    %c0_i32 = arith.constant 0 : i32
    %c0_i32_0 = arith.constant 0 : i32
    return %arg0, %c0_i32 : i32, i32
  }
  func.func @transform_1(%arg0: i32) -> (i32, i32) {
    %c0_i32 = arith.constant 0 : i32
    %c0_i32_0 = arith.constant 0 : i32
    %c0_i32_1 = arith.constant 0 : i32
    return %c0_i32, %c0_i32_0 : i32, i32
  }
  func.func @transform_2(%arg0: i32) -> (i32, i32) {
    %c0_i32 = arith.constant 0 : i32
    %c0_i32_0 = arith.constant 0 : i32
    %c0_i32_1 = arith.constant 0 : i32
    return %c0_i32, %c0_i32_0 : i32, i32
  }
  func.func @transform_3(%arg0: i32) -> (i32, i32, i32) {
    %c0_i32 = arith.constant 0 : i32
    %c0_i32_0 = arith.constant 0 : i32
    %c0_i32_1 = arith.constant 0 : i32
    %c0_i32_2 = arith.constant 0 : i32
    return %c0_i32, %c0_i32_0, %c0_i32_1 : i32, i32, i32
  }
  func.func @transform_4(%arg0: i32) -> (i32, i32) {
    %c0_i32 = arith.constant 0 : i32
    %c0_i32_0 = arith.constant 0 : i32
    %c0_i32_1 = arith.constant 0 : i32
    return %c0_i32, %c0_i32_0 : i32, i32
  }
  func.func @transform_5(%arg0: i32) -> (i32, i32) {
    %c0_i32 = arith.constant 0 : i32
    %c0_i32_0 = arith.constant 0 : i32
    %c0_i32_1 = arith.constant 0 : i32
    return %c0_i32, %c0_i32_0 : i32, i32
  }
  func.func @transform_6(%arg0: i32) -> (i32, i32) {
    %c0_i32 = arith.constant 0 : i32
    %c0_i32_0 = arith.constant 0 : i32
    %c0_i32_1 = arith.constant 0 : i32
    return %c0_i32, %c0_i32_0 : i32, i32
  }
  func.func @transform_7(%arg0: i32) -> (i32, i32) {
    %c0_i32 = arith.constant 0 : i32
    %c0_i32_0 = arith.constant 0 : i32
    return %arg0, %c0_i32 : i32, i32
  }
}

module attributes {stable_mosaic.version = 11 : i64} {
  func.func @mlp_kernel(%arg0: i32, %arg1: memref<16x23xf32, #tpu.memory_space<vmem>>, %arg2: memref<23x640xbf16, #tpu.memory_space<vmem>>, %arg3: memref<1x640xf32, #tpu.memory_space<vmem>>, %arg4: memref<5x640x640xbf16, #tpu.memory_space<vmem>>, %arg5: memref<5x640xf32, #tpu.memory_space<vmem>>, %arg6: memref<1x640xf32, #tpu.memory_space<vmem>>, %arg7: memref<1x1xf32, #tpu.memory_space<smem>>, %arg8: memref<16x128xf32, #tpu.memory_space<vmem>>) attributes {dimension_semantics = [#tpu.dimension_semantics<parallel>], iteration_bounds = array<i64: 1>, scalar_prefetch = 0 : i64, scratch_operands = 0 : i64, tpu.core_type = #tpu.core_type<tc>, window_params = [{transform_indices = @transform_0, window_bounds = array<i64: 16, 23>}, {pipeline_mode = #tpu.pipeline_mode<synchronous>, transform_indices = @transform_1, window_bounds = array<i64: 23, 640>}, {pipeline_mode = #tpu.pipeline_mode<synchronous>, transform_indices = @transform_2, window_bounds = array<i64: 1, 640>}, {pipeline_mode = #tpu.pipeline_mode<synchronous>, transform_indices = @transform_3, window_bounds = array<i64: 5, 640, 640>}, {pipeline_mode = #tpu.pipeline_mode<synchronous>, transform_indices = @transform_4, window_bounds = array<i64: 5, 640>}, {pipeline_mode = #tpu.pipeline_mode<synchronous>, transform_indices = @transform_5, window_bounds = array<i64: 1, 640>}, {transform_indices = @transform_6, window_bounds = array<i64: 1, 1>}, {transform_indices = @transform_7, window_bounds = array<i64: 16, 128>}]} {
    %c0 = arith.constant 0 : index
    %c0_0 = arith.constant 0 : index
    %0 = vector.load %arg1[%c0, %c0_0] : memref<16x23xf32, #tpu.memory_space<vmem>>, vector<16x23xf32>
    %1 = arith.truncf %0 : vector<16x23xf32> to vector<16x23xbf16>
    %c0_1 = arith.constant 0 : index
    %c0_2 = arith.constant 0 : index
    %2 = vector.load %arg2[%c0_1, %c0_2] : memref<23x640xbf16, #tpu.memory_space<vmem>>, vector<23x640xbf16>
    %cst = arith.constant dense<0.000000e+00> : vector<16x640xf32>
    %3 = tpu.matmul %1, %2, %cst {dimension_numbers = #tpu.dot_dimension_numbers<[1], [0], [0], [1], [0, 0, 1, 1], [], []>} : vector<16x23xbf16>, vector<23x640xbf16>, vector<16x640xf32> -> vector<16x640xf32>
    %c0_3 = arith.constant 0 : index
    %c0_4 = arith.constant 0 : index
    %4 = vector.load %arg3[%c0_3, %c0_4] : memref<1x640xf32, #tpu.memory_space<vmem>>, vector<1x640xf32>
    %5 = vector.broadcast %4 : vector<1x640xf32> to vector<16x640xf32>
    %6 = arith.addf %3, %5 : vector<16x640xf32>
    %cst_5 = arith.constant 0.000000e+00 : f32
    %7 = vector.broadcast %cst_5 : f32 to vector<16x640xf32>
    %8 = arith.maximumf %6, %7 : vector<16x640xf32>
    %9 = arith.truncf %8 : vector<16x640xf32> to vector<16x640xbf16>
    %c0_6 = arith.constant 0 : index
    %c0_7 = arith.constant 0 : index
    %c0_8 = arith.constant 0 : index
    %10 = vector.load %arg4[%c0_6, %c0_7, %c0_8] : memref<5x640x640xbf16, #tpu.memory_space<vmem>>, vector<1x640x640xbf16>
    %11 = vector.shape_cast %10 : vector<1x640x640xbf16> to vector<640x640xbf16>
    %cst_9 = arith.constant dense<0.000000e+00> : vector<16x640xf32>
    %12 = tpu.matmul %9, %11, %cst_9 {dimension_numbers = #tpu.dot_dimension_numbers<[1], [0], [0], [1], [0, 0, 1, 1], [], []>} : vector<16x640xbf16>, vector<640x640xbf16>, vector<16x640xf32> -> vector<16x640xf32>
    %c0_10 = arith.constant 0 : index
    %c0_11 = arith.constant 0 : index
    %13 = vector.load %arg5[%c0_10, %c0_11] : memref<5x640xf32, #tpu.memory_space<vmem>>, vector<1x640xf32>
    %14 = vector.shape_cast %13 : vector<1x640xf32> to vector<640xf32>
    %15 = vector.shape_cast %14 : vector<640xf32> to vector<1x640xf32>
    %16 = vector.broadcast %15 : vector<1x640xf32> to vector<16x640xf32>
    %17 = arith.addf %12, %16 : vector<16x640xf32>
    %cst_12 = arith.constant 0.000000e+00 : f32
    %18 = vector.broadcast %cst_12 : f32 to vector<16x640xf32>
    %19 = arith.maximumf %17, %18 : vector<16x640xf32>
    %20 = arith.truncf %19 : vector<16x640xf32> to vector<16x640xbf16>
    %c1 = arith.constant 1 : index
    %c0_13 = arith.constant 0 : index
    %c0_14 = arith.constant 0 : index
    %21 = vector.load %arg4[%c1, %c0_13, %c0_14] : memref<5x640x640xbf16, #tpu.memory_space<vmem>>, vector<1x640x640xbf16>
    %22 = vector.shape_cast %21 : vector<1x640x640xbf16> to vector<640x640xbf16>
    %cst_15 = arith.constant dense<0.000000e+00> : vector<16x640xf32>
    %23 = tpu.matmul %20, %22, %cst_15 {dimension_numbers = #tpu.dot_dimension_numbers<[1], [0], [0], [1], [0, 0, 1, 1], [], []>} : vector<16x640xbf16>, vector<640x640xbf16>, vector<16x640xf32> -> vector<16x640xf32>
    %c1_16 = arith.constant 1 : index
    %c0_17 = arith.constant 0 : index
    %24 = vector.load %arg5[%c1_16, %c0_17] : memref<5x640xf32, #tpu.memory_space<vmem>>, vector<1x640xf32>
    %25 = vector.shape_cast %24 : vector<1x640xf32> to vector<640xf32>
    %26 = vector.shape_cast %25 : vector<640xf32> to vector<1x640xf32>
    %27 = vector.broadcast %26 : vector<1x640xf32> to vector<16x640xf32>
    %28 = arith.addf %23, %27 : vector<16x640xf32>
    %cst_18 = arith.constant 0.000000e+00 : f32
    %29 = vector.broadcast %cst_18 : f32 to vector<16x640xf32>
    %30 = arith.maximumf %28, %29 : vector<16x640xf32>
    %31 = arith.truncf %30 : vector<16x640xf32> to vector<16x640xbf16>
    %c2 = arith.constant 2 : index
    %c0_19 = arith.constant 0 : index
    %c0_20 = arith.constant 0 : index
    %32 = vector.load %arg4[%c2, %c0_19, %c0_20] : memref<5x640x640xbf16, #tpu.memory_space<vmem>>, vector<1x640x640xbf16>
    %33 = vector.shape_cast %32 : vector<1x640x640xbf16> to vector<640x640xbf16>
    %cst_21 = arith.constant dense<0.000000e+00> : vector<16x640xf32>
    %34 = tpu.matmul %31, %33, %cst_21 {dimension_numbers = #tpu.dot_dimension_numbers<[1], [0], [0], [1], [0, 0, 1, 1], [], []>} : vector<16x640xbf16>, vector<640x640xbf16>, vector<16x640xf32> -> vector<16x640xf32>
    %c2_22 = arith.constant 2 : index
    %c0_23 = arith.constant 0 : index
    %35 = vector.load %arg5[%c2_22, %c0_23] : memref<5x640xf32, #tpu.memory_space<vmem>>, vector<1x640xf32>
    %36 = vector.shape_cast %35 : vector<1x640xf32> to vector<640xf32>
    %37 = vector.shape_cast %36 : vector<640xf32> to vector<1x640xf32>
    %38 = vector.broadcast %37 : vector<1x640xf32> to vector<16x640xf32>
    %39 = arith.addf %34, %38 : vector<16x640xf32>
    %cst_24 = arith.constant 0.000000e+00 : f32
    %40 = vector.broadcast %cst_24 : f32 to vector<16x640xf32>
    %41 = arith.maximumf %39, %40 : vector<16x640xf32>
    %42 = arith.truncf %41 : vector<16x640xf32> to vector<16x640xbf16>
    %c3 = arith.constant 3 : index
    %c0_25 = arith.constant 0 : index
    %c0_26 = arith.constant 0 : index
    %43 = vector.load %arg4[%c3, %c0_25, %c0_26] : memref<5x640x640xbf16, #tpu.memory_space<vmem>>, vector<1x640x640xbf16>
    %44 = vector.shape_cast %43 : vector<1x640x640xbf16> to vector<640x640xbf16>
    %cst_27 = arith.constant dense<0.000000e+00> : vector<16x640xf32>
    %45 = tpu.matmul %42, %44, %cst_27 {dimension_numbers = #tpu.dot_dimension_numbers<[1], [0], [0], [1], [0, 0, 1, 1], [], []>} : vector<16x640xbf16>, vector<640x640xbf16>, vector<16x640xf32> -> vector<16x640xf32>
    %c3_28 = arith.constant 3 : index
    %c0_29 = arith.constant 0 : index
    %46 = vector.load %arg5[%c3_28, %c0_29] : memref<5x640xf32, #tpu.memory_space<vmem>>, vector<1x640xf32>
    %47 = vector.shape_cast %46 : vector<1x640xf32> to vector<640xf32>
    %48 = vector.shape_cast %47 : vector<640xf32> to vector<1x640xf32>
    %49 = vector.broadcast %48 : vector<1x640xf32> to vector<16x640xf32>
    %50 = arith.addf %45, %49 : vector<16x640xf32>
    %cst_30 = arith.constant 0.000000e+00 : f32
    %51 = vector.broadcast %cst_30 : f32 to vector<16x640xf32>
    %52 = arith.maximumf %50, %51 : vector<16x640xf32>
    %53 = arith.truncf %52 : vector<16x640xf32> to vector<16x640xbf16>
    %c4 = arith.constant 4 : index
    %c0_31 = arith.constant 0 : index
    %c0_32 = arith.constant 0 : index
    %54 = vector.load %arg4[%c4, %c0_31, %c0_32] : memref<5x640x640xbf16, #tpu.memory_space<vmem>>, vector<1x640x640xbf16>
    %55 = vector.shape_cast %54 : vector<1x640x640xbf16> to vector<640x640xbf16>
    %cst_33 = arith.constant dense<0.000000e+00> : vector<16x640xf32>
    %56 = tpu.matmul %53, %55, %cst_33 {dimension_numbers = #tpu.dot_dimension_numbers<[1], [0], [0], [1], [0, 0, 1, 1], [], []>} : vector<16x640xbf16>, vector<640x640xbf16>, vector<16x640xf32> -> vector<16x640xf32>
    %c4_34 = arith.constant 4 : index
    %c0_35 = arith.constant 0 : index
    %57 = vector.load %arg5[%c4_34, %c0_35] : memref<5x640xf32, #tpu.memory_space<vmem>>, vector<1x640xf32>
    %58 = vector.shape_cast %57 : vector<1x640xf32> to vector<640xf32>
    %59 = vector.shape_cast %58 : vector<640xf32> to vector<1x640xf32>
    %60 = vector.broadcast %59 : vector<1x640xf32> to vector<16x640xf32>
    %61 = arith.addf %56, %60 : vector<16x640xf32>
    %cst_36 = arith.constant 0.000000e+00 : f32
    %62 = vector.broadcast %cst_36 : f32 to vector<16x640xf32>
    %63 = arith.maximumf %61, %62 : vector<16x640xf32>
    %c0_37 = arith.constant 0 : index
    %c0_38 = arith.constant 0 : index
    %64 = vector.load %arg6[%c0_37, %c0_38] : memref<1x640xf32, #tpu.memory_space<vmem>>, vector<1x640xf32>
    %65 = vector.broadcast %64 : vector<1x640xf32> to vector<16x640xf32>
    %66 = arith.mulf %63, %65 : vector<16x640xf32>
    %cst_39 = arith.constant dense<0.000000e+00> : vector<16xf32>
    %67 = vector.multi_reduction <add>, %66, %cst_39 [1] : vector<16x640xf32> to vector<16xf32>
    %68 = vector.shape_cast %67 : vector<16xf32> to vector<16x1xf32>
    %c0_40 = arith.constant 0 : index
    %c0_41 = arith.constant 0 : index
    %69 = memref.load %arg7[%c0_40, %c0_41] : memref<1x1xf32, #tpu.memory_space<smem>>
    %70 = vector.broadcast %69 : f32 to vector<16x1xf32>
    %71 = arith.addf %68, %70 : vector<16x1xf32>
    %72 = vector.shape_cast %71 : vector<16x1xf32> to vector<16x1xf32>
    %73 = vector.broadcast %72 : vector<16x1xf32> to vector<16x128xf32>
    %c0_42 = arith.constant 0 : index
    %c0_43 = arith.constant 0 : index
    %74 = vector.load %arg8[%c0_42, %c0_43] : memref<16x128xf32, #tpu.memory_space<vmem>>, vector<16x128xf32>
    tpu.vector_store %arg8[%c0_42, %c0_43], %73 {strides = array<i32>} : memref<16x128xf32, #tpu.memory_space<vmem>>, vector<16x128xf32>,
    return
  }
  func.func @transform_0(%arg0: i32) -> (i32, i32) {
    %c0_i32 = arith.constant 0 : i32
    %c0_i32_0 = arith.constant 0 : i32
    return %arg0, %c0_i32 : i32, i32
  }
  func.func @transform_1(%arg0: i32) -> (i32, i32) {
    %c0_i32 = arith.constant 0 : i32
    %c0_i32_0 = arith.constant 0 : i32
    %c0_i32_1 = arith.constant 0 : i32
    return %c0_i32, %c0_i32_0 : i32, i32
  }
  func.func @transform_2(%arg0: i32) -> (i32, i32) {
    %c0_i32 = arith.constant 0 : i32
    %c0_i32_0 = arith.constant 0 : i32
    %c0_i32_1 = arith.constant 0 : i32
    return %c0_i32, %c0_i32_0 : i32, i32
  }
  func.func @transform_3(%arg0: i32) -> (i32, i32, i32) {
    %c0_i32 = arith.constant 0 : i32
    %c0_i32_0 = arith.constant 0 : i32
    %c0_i32_1 = arith.constant 0 : i32
    %c0_i32_2 = arith.constant 0 : i32
    return %c0_i32, %c0_i32_0, %c0_i32_1 : i32, i32, i32
  }
  func.func @transform_4(%arg0: i32) -> (i32, i32) {
    %c0_i32 = arith.constant 0 : i32
    %c0_i32_0 = arith.constant 0 : i32
    %c0_i32_1 = arith.constant 0 : i32
    return %c0_i32, %c0_i32_0 : i32, i32
  }
  func.func @transform_5(%arg0: i32) -> (i32, i32) {
    %c0_i32 = arith.constant 0 : i32
    %c0_i32_0 = arith.constant 0 : i32
    %c0_i32_1 = arith.constant 0 : i32
    return %c0_i32, %c0_i32_0 : i32, i32
  }
  func.func @transform_6(%arg0: i32) -> (i32, i32) {
    %c0_i32 = arith.constant 0 : i32
    %c0_i32_0 = arith.constant 0 : i32
    %c0_i32_1 = arith.constant 0 : i32
    return %c0_i32, %c0_i32_0 : i32, i32
  }
  func.func @transform_7(%arg0: i32) -> (i32, i32) {
    %c0_i32 = arith.constant 0 : i32
    %c0_i32_0 = arith.constant 0 : i32
    return %arg0, %c0_i32 : i32, i32
  }
}

</mosaic_0001>

<bundles_post_ra>
// kernel: tpu_custom_call.1
= control target key start
LH: loop header
LB: loop body
LE: loop exit
PB: predicated region body
PF: predicated region fallthrough
CT: control target
= control target key end

     0   :  { %13 = vsyncpa [#allocation4], 0  ;;  %s12283_s0 = inlined_call_operand.hbm [shape: f32[16,23], index: 0, kind: input, shape index: {}]   ;;  %s12284_s1 = inlined_call_operand.hbm [shape: bf16[23,640], index: 1, kind: input, shape index: {}]   ;;  %s12285_s2 = inlined_call_operand.hbm [shape: f32[1,640], index: 2, kind: input, shape index: {}]   ;;  %s12286_s3 = inlined_call_operand.hbm [shape: bf16[5,640,640], index: 3, kind: input, shape index: {}]   ;;  %s12287_s4 = inlined_call_operand.hbm [shape: f32[5,640], index: 4, kind: input, shape index: {}]   ;;  %s12288_s5 = inlined_call_operand.hbm [shape: f32[1,640], index: 5, kind: input, shape index: {}]   ;;  %s12289_s6 = inlined_call_operand.<no memory space> [shape: f32[1,1], index: 6, kind: input, shape index: {}]   ;;  %s12290_s7 = inlined_call_operand.hbm [shape: f32[16,128], index: 7, kind: output, shape index: {}]  }
   0x1   :  { %14 = vsyncpa [#allocation7], 0 }
   0x2   :  { %15 = vsyncpa [#allocation10], 0 }
   0x3   :  { %16 = vsyncpa [#allocation13], 0 }
   0x4   :  { %17 = vsyncpa [#allocation5], 0  ;;  %s11917_s24 = smov [#allocation6]  }
   0x5   :  { %s35_s25 = sshll.u32 %s11917_s24, 4  ;;  %s36_s25 = int_to_ptr.vmem [resolvable:$true] %s35_s25 }
   0x6   :  { %s11775_s26 = scalar_lea.vmem %s36_s25, 960  ;;  %p11780_p1 = scmp.lt.s32.totalorder %s36_s25, %s36_s25 }
   0x7   :  { %p11776_p0 = scmp.ne.s32.totalorder %s36_s25, %s11775_s26  ;;  %p11781_p2 = scmp.lt.s32.totalorder %s11775_s26, %s11775_s26 }
   0x9   :  { %p11782_p3 = por %p11781_p2, %p11780_p1 }
   0xb   :  { %p11783_p4 = pnand %p11782_p3, %p11776_p0 }
   0xd   :  { %11786 = shalt.err (!%p11783_p4)
}
   0xe   :  { %s11918_s27 = smov 320   ;;  %s11919_s28 = smov 20  }
   0xf   :  { %41 = dma.hbm_to_vmem [thread:$0]  %s12284_s1, 960, %s36_s25, [#allocation7], %s11918_s27, %s11918_s27, %s11919_s28  }
  0x10   :  { %s11920_s8 = smov [#allocation9]   ;;  %s11921_s10 = smov [#allocation3]  }
  0x11   :  { %s57_s9 = sshll.u32 %s11920_s8, 4  ;;  %s23_s11 = sshll.u32 %s11921_s10, 4  ;;  %s58_s9 = int_to_ptr.vmem [resolvable:$true] %s57_s9  ;;  %s24_s11 = int_to_ptr.vmem [resolvable:$true] %s23_s11 }
  0x12   :  { %s11795_s12 = scalar_lea.vmem %s58_s9, 128000  ;;  %p11800_p6 = scmp.lt.s32.totalorder %s58_s9, %s58_s9 }
  0x13   :  { %p11796_p5 = scmp.ne.s32.totalorder %s58_s9, %s11795_s12  ;;  %p11801_p7 = scmp.lt.s32.totalorder %s11795_s12, %s11795_s12 }
  0x15   :  { %p11802_p8 = por %p11801_p7, %p11800_p6 }
  0x17   :  { %p11803_p9 = pnand %p11802_p8, %p11796_p5 }
  0x19   :  { %11806 = shalt.err (!%p11803_p9)
}
  0x1a   :  { %63 = dma.hbm_to_vmem [thread:$0]  %s12286_s3, 128000, %s58_s9, [#allocation10], %s11918_s27, %s11918_s27, %s11919_s28  }
  0x1b   :  { %s11815_s15 = scalar_lea.vmem %s24_s11, 256  ;;  %p11820_p11 = scmp.lt.s32.totalorder %s24_s11, %s24_s11 }
  0x1c   :  { %p11816_p10 = scmp.ne.s32.totalorder %s24_s11, %s11815_s15  ;;  %p11821_p12 = scmp.lt.s32.totalorder %s11815_s15, %s11815_s15 }
  0x1e   :  { %p11822_p13 = por %p11821_p12, %p11820_p11 }
  0x20   :  { %p11823_p0 = pnand %p11822_p13, %p11816_p10 }
  0x22   :  { %11826 = shalt.err (!%p11823_p0)
}
  0x23   :  { %s11922_s1 = smov 128   ;;  %s11923_s16 = smov 8  }
  0x24   :  { %29 = dma.hbm_to_vmem [thread:$0]  %s12283_s0, 256, %s24_s11, [#allocation4], %s11922_s1, %s11922_s1, %s11923_s16  }
  0x25   :  { %s11924_s19 = smov [#allocation8]   ;;  %s11925_s3 = smov [#allocation11]  }
  0x26   :  { %s48_s20 = sshll.u32 %s11924_s19, 4  ;;  %s70_s21 = sshll.u32 %s11925_s3, 4  ;;  %s49_s20 = int_to_ptr.vmem [resolvable:$true] %s48_s20  ;;  %s71_s21 = int_to_ptr.vmem [resolvable:$true] %s70_s21 }
  0x27   :  { %s11835_s22 = scalar_lea.vmem %s49_s20, 80  ;;  %s11839_s23 = scalar_lea.vmem %s49_s20, 96 }
  0x28   :  { %p11836_p1 = scmp.ne.s32.totalorder %s49_s20, %s11835_s22  ;;  %p11840_p2 = scmp.lt.s32.totalorder %s49_s20, %s49_s20 }
  0x29   :  { %p11841_p3 = scmp.lt.s32.totalorder %s11839_s23, %s11835_s22 }
  0x2b   :  { %p11842_p4 = por %p11841_p3, %p11840_p2 }
  0x2d   :  { %p11843_p5 = pnand %p11842_p4, %p11836_p1 }
  0x2f   :  { %11846 = shalt.err (!%p11843_p5)
}
  0x30   :  { %51 = dma.hbm_to_vmem [thread:$0]  %s12285_s2, 80, %s49_s20, [#allocation7]  }
  0x31   :  { %s11855_s26 = scalar_lea.vmem %s71_s21, 640  ;;  %p11860_p7 = scmp.lt.s32.totalorder %s71_s21, %s71_s21 }
  0x32   :  { %p11856_p6 = scmp.ne.s32.totalorder %s71_s21, %s11855_s26  ;;  %p11861_p8 = scmp.lt.s32.totalorder %s11855_s26, %s11855_s26 }
  0x34   :  { %p11862_p9 = por %p11861_p8, %p11860_p7 }
  0x36   :  { %p11863_p10 = pnand %p11862_p9, %p11856_p6 }
  0x38   :  { %11866 = shalt.err (!%p11863_p10)
}
  0x39   :  { %73 = dma.hbm_to_vmem [thread:$0]  %s12287_s4, 640, %s71_s21, [#allocation10]  }
  0x3a   :  { %s11926_s28 = smov [#allocation12]  }
  0x3b   :  { %s80_s29 = sshll.u32 %s11926_s28, 4  ;;  %s81_s29 = int_to_ptr.vmem [resolvable:$true] %s80_s29 }
  0x3c   :  { %s11875_s30 = scalar_lea.vmem %s81_s29, 80  ;;  %s11879_s8 = scalar_lea.vmem %s81_s29, 96 }
  0x3d   :  { %p11876_p11 = scmp.ne.s32.totalorder %s81_s29, %s11875_s30  ;;  %p11880_p12 = scmp.lt.s32.totalorder %s81_s29, %s81_s29 }
  0x3e   :  { %p11881_p13 = scmp.lt.s32.totalorder %s11879_s8, %s11875_s30 }
  0x40   :  { %p11882_p0 = por %p11881_p13, %p11880_p12 }
  0x42   :  { %p11883_p1 = pnand %p11882_p0, %p11876_p11 }
  0x44   :  { %11886 = shalt.err (!%p11883_p1)
}
  0x45   :  { %83 = dma.hbm_to_vmem [thread:$0]  %s12288_s5, 80, %s81_s29, [#allocation13]  }
  0x46   :  { %11907 = dma.done.wait [#allocation4], 256  }
  0x47   :  { %11908 = vsyncadd [#allocation4], 4294967040 }
  0x48   :  { %11909 = dma.done.wait [#allocation7], 1040  }
  0x49   :  { %11910 = vsyncadd [#allocation7], 4294966256 }
  0x4a   :  { %11911 = dma.done.wait [#allocation10], 128640  }
  0x4b   :  { %11912 = vsyncadd [#allocation10], 4294838656 }
  0x4c   :  { %11913 = dma.done.wait [#allocation13], 80  }
  0x4d   :  { %11914 = vsyncadd [#allocation13], 4294967216  ;;  %vm187_vm0 = vcmask 1042432   ;;  %v11927_v0 = vmov 0   ;;  %vm188_vm1 = vcmask 1043456   ;;  %v11928_v1 = vmov 65535  }
  0x4e   :  { %238 = vmatprep.mubr.bf16.mxu0 %v11927_v0  ;;  %v189_v2 = vsel %vm187_vm0, 4294967295, %v11928_v1  ;;  %v114_v3 = vld [vmem:[#allocation6 + $0x28] sm:$0xff]  ;;  %v115_v7 = vld [vmem:[#allocation6 + $0x30] sm:$0xff]  ;;  %v10357_v10 = vld [vmem:[#allocation6 + $0x4] ss:$20 sps:$4 sm:$0xff]   ;;  %vm183_vm2 = vcmask 187392  }
  0x4f   :  { %v190_v4 = vsel %vm188_vm1, %v189_v2, 0  ;;  %v8957_v5 = vcombine.high %v114_v3, %v114_v3  ;;  %v8956_v6 = vcombine.low %v114_v3, %v114_v3  ;;  %v10359_v11 = vld [vmem:[#allocation6] ss:$20 sps:$4 sm:$0xff]   ;;  %v8959_v13 = vcombine.high %v115_v7, %v115_v7  ;;  %v106_v14 = vld [vmem:[#allocation3 + $0x8] sm:$0xff]  ;;  %v10366_v33 = vld [vmem:[#allocation6 + $0x10] ss:$20 sps:$4 sm:$0xff]  }
  0x50   :  { %v105_v12 = vld [vmem:[#allocation3] sm:$0xff]  ;;  %v8958_v15 = vcombine.low %v115_v7, %v115_v7  ;;  %v10364_v23 = vld [vmem:[#allocation6 + $0xc] ss:$20 sps:$4 sm:$0xff]   ;;  %v10362_v25 = vld [vmem:[#allocation6 + $0x8] ss:$20 sps:$4 sm:$0xff]   ;;  %v11929_v31 = vmov 0.0  }
  0x51   :  { %v195_v8 = vand.u32 %v8957_v5, %v190_v4  ;;  %v192_v9 = vand.u32 %v8956_v6, %v190_v4  ;;  %v10367_v16 = vld [vmem:[#allocation9 + $0x11c] ss:$20 sps:$4 sm:$0xff]   ;;  %v10369_v17 = vld [vmem:[#allocation9 + $0x118] ss:$20 sps:$4 sm:$0xff]   ;;  %v201_v18 = vand.u32 %v8959_v13, %v190_v4  ;;  %v10370_v19 = vld [vmem:[#allocation9 + $0xf4] ss:$20 sps:$4 sm:$0xff]   ;;  %v107_v20 = vpack.c.bf16 %v106_v14, %v105_v12 }
  0x52   :  { %1657 = vmatprep.subr.bf16.mxu1 %v10367_v16  ;;  %v10372_v21 = vld [vmem:[#allocation9 + $0xf0] ss:$20 sps:$4 sm:$0xff]   ;;  %v198_v22 = vand.u32 %v8958_v15, %v190_v4  ;;  %v10373_v24 = vld [vmem:[#allocation9 + $0xcc] ss:$20 sps:$4 sm:$0xff]   ;;  %v10365_v26 = vld [vmem:[#allocation6 + $0x38] ss:$0 sps:$4 sm:$0xff]  }
  0x53   :  { %218 = vmatprep.subr.bf16.mxu0 %v195_v8  ;;  %1658 = vmatpush1.bf16.msra.mxu1 %v10369_v17  ;;  %v10378_v27 = vld [vmem:[#allocation9 + $0xc8] ss:$20 sps:$4 sm:$0xff]   ;;  %v10379_v28 = vld [vmem:[#allocation9 + $0xa4] ss:$20 sps:$4 sm:$0xff]   ;;  %v10384_v29 = vld [vmem:[#allocation9 + $0xa0] ss:$20 sps:$4 sm:$0xff]   ;;  %v204_v30 = vand.u32 %v10365_v26, %v190_v4 }
  0x54   :  { %219 = vmatpush1.bf16.msra.mxu0 %v192_v9  ;;  %1659 = vmatprep.subr.bf16.mxu1 %v10370_v19  ;;  %v10385_v32 = vld [vmem:[#allocation9 + $0x7c] ss:$20 sps:$4 sm:$0xff]   ;;  %v10390_v34 = vld [vmem:[#allocation9 + $0x78] ss:$20 sps:$4 sm:$0xff]   ;;  %vm11930_vm3 = vmmov 0   ;;  %s11931_s10 = smov [#allocation14]  }
  0x55   :  { %220 = vmatprep.subr.bf16.mxu0 %v10357_v10  ;;  %v10391_v35 = vld [vmem:[#allocation9 + $0x54] ss:$20 sps:$4 sm:$0xff]   ;;  %v10377_v36 = vld [vmem:[#allocation9 + $0x39c] ss:$20 sps:$4 sm:$0xff]   ;;  %v10375_v38 = vld [vmem:[#allocation9 + $0x398] ss:$20 sps:$4 sm:$0xff]  }
  0x56   :  { %v10396_v37 = vld [vmem:[#allocation9 + $0x50] ss:$20 sps:$4 sm:$0xff]   ;;  %v10397_v39 = vld [vmem:[#allocation9 + $0x2c] ss:$20 sps:$4 sm:$0xff]   ;;  %v10383_v40 = vld [vmem:[#allocation9 + $0x374] ss:$20 sps:$4 sm:$0xff]  }
  0x57   :  { %1660 = vmatpush1.bf16.msra.mxu1 %v10372_v21  ;;  %v10381_v41 = vld [vmem:[#allocation9 + $0x370] ss:$20 sps:$4 sm:$0xff]   ;;  %v10402_v42 = vld [vmem:[#allocation9 + $0x28] ss:$20 sps:$4 sm:$0xff]   ;;  %v10389_v44 = vld [vmem:[#allocation9 + $0x34c] ss:$20 sps:$4 sm:$0xff]  }
  0x58   :  { %221 = vmatpush1.bf16.msra.mxu0 %v10359_v11  ;;  %1661 = vmatprep.subr.bf16.mxu1 %v10373_v24  ;;  %v10403_v43 = vld [vmem:[#allocation9 + $0x4] ss:$20 sps:$4 sm:$0xff]   ;;  %v10408_v45 = vld [vmem:[#allocation9] ss:$20 sps:$4 sm:$0xff]   ;;  %v10387_v46 = vld [vmem:[#allocation9 + $0x348] ss:$20 sps:$4 sm:$0xff]  }
  0x59   :  { %261 = vmatprep.subr.bf16.mxu0 %v201_v18  ;;  %v10409_v47 = vld [vmem:[#allocation9 + $0x25c] ss:$20 sps:$4 sm:$0xff]   ;;  %v10395_v48 = vld [vmem:[#allocation9 + $0x324] ss:$20 sps:$4 sm:$0xff]   ;;  %v10393_v49 = vld [vmem:[#allocation9 + $0x320] ss:$20 sps:$4 sm:$0xff]  }
  0x5a   :  { %v10401_v50 = vld [vmem:[#allocation9 + $0x2fc] ss:$20 sps:$4 sm:$0xff]   ;;  %v10414_v51 = vld [vmem:[#allocation9 + $0x258] ss:$20 sps:$4 sm:$0xff]   ;;  %v10415_v52 = vld [vmem:[#allocation9 + $0x234] ss:$20 sps:$4 sm:$0xff]  }
  0x5b   :  { %8961 = vmatmul.mubr.msk.bf16.vlgmr.msra.gmra.mxu0 %vm183_vm2, %v107_v20  ;;  %1662 = vmatpush1.bf16.msra.mxu1 %v10378_v27  ;;  %v10420_v53 = vld [vmem:[#allocation9 + $0x230] ss:$20 sps:$4 sm:$0xff]   ;;  %v10399_v54 = vld [vmem:[#allocation9 + $0x2f8] ss:$20 sps:$4 sm:$0xff]   ;;  %v10407_v56 = vld [vmem:[#allocation9 + $0x2d4] ss:$20 sps:$4 sm:$0xff]  }
  0x5c   :  { %262 = vmatpush1.bf16.msra.mxu0 %v198_v22  ;;  %281 = vmatprep.mubr.bf16.mxu0 %v11927_v0  ;;  %v10421_v55 = vld [vmem:[#allocation9 + $0x20c] ss:$20 sps:$4 sm:$0xff]   ;;  %v10426_v57 = vld [vmem:[#allocation9 + $0x208] ss:$20 sps:$4 sm:$0xff]   ;;  %v10405_v58 = vld [vmem:[#allocation9 + $0x2d0] ss:$20 sps:$4 sm:$0xff]  }
  0x5d   :  { %263 = vmatprep.subr.bf16.mxu0 %v10364_v23  ;;  %1663 = vmatprep.subr.bf16.mxu1 %v10379_v28  ;;  %v10427_v59 = vld [vmem:[#allocation9 + $0x1e4] ss:$20 sps:$4 sm:$0xff]   ;;  %v10413_v60 = vld [vmem:[#allocation9 + $0x2ac] ss:$20 sps:$4 sm:$0xff]   ;;  %v10411_v62 = vld [vmem:[#allocation9 + $0x2a8] ss:$20 sps:$4 sm:$0xff]   ;;  %v119_v28 = vlaneseq }
  0x5e   :  { %v10432_v61 = vld [vmem:[#allocation9 + $0x1e0] ss:$20 sps:$4 sm:$0xff]   ;;  %v10433_v63 = vld [vmem:[#allocation9 + $0x1bc] ss:$20 sps:$4 sm:$0xff]   ;;  %v10419_v1 = vld [vmem:[#allocation9 + $0x284] ss:$20 sps:$4 sm:$0xff]  }
  0x5f   :  { %1664 = vmatpush1.bf16.msra.mxu1 %v10384_v29  ;;  %v10438_v2 = vld [vmem:[#allocation9 + $0x1b8] ss:$20 sps:$4 sm:$0xff]   ;;  %v10417_v3 = vld [vmem:[#allocation9 + $0x280] ss:$20 sps:$4 sm:$0xff]   ;;  %v10425_v4 = vld [vmem:[#allocation9 + $0x4dc] ss:$20 sps:$4 sm:$0xff]  }
  0x60   :  { %264 = vmatpush1.bf16.msra.mxu0 %v10362_v25  ;;  %1665 = vmatprep.subr.bf16.mxu1 %v10385_v32  ;;  %v10423_v5 = vld [vmem:[#allocation9 + $0x4d8] ss:$20 sps:$4 sm:$0xff]   ;;  %v10431_v6 = vld [vmem:[#allocation9 + $0x4b4] ss:$20 sps:$4 sm:$0xff]   ;;  %v10429_v7 = vld [vmem:[#allocation9 + $0x4b0] ss:$20 sps:$4 sm:$0xff]  }
  0x61   :  { %10232 = vmatprep.subr.bf16.mxu0 %v11929_v31  ;;  %v10437_v8 = vld [vmem:[#allocation9 + $0x48c] ss:$20 sps:$4 sm:$0xff]   ;;  %v10435_v9 = vld [vmem:[#allocation9 + $0x488] ss:$20 sps:$4 sm:$0xff]   ;;  %v10443_v11 = vld [vmem:[#allocation9 + $0x464] ss:$20 sps:$4 sm:$0xff]  }
  0x62   :  { %v10439_v10 = vld [vmem:[#allocation9 + $0x194] ss:$20 sps:$4 sm:$0xff]   ;;  %v10444_v13 = vld [vmem:[#allocation9 + $0x190] ss:$20 sps:$4 sm:$0xff]   ;;  %v10445_v14 = vld [vmem:[#allocation9 + $0x16c] ss:$20 sps:$4 sm:$0xff]  }
  0x63   :  { %8962 = vmatmul.mubr.msk.bf16.vlgmr.msra.gmra.mxu0 %vm183_vm2, %v107_v20  ;;  %1666 = vmatpush1.bf16.msra.mxu1 %v10390_v34  ;;  %v10441_v12 = vld [vmem:[#allocation9 + $0x460] ss:$20 sps:$4 sm:$0xff]   ;;  %v10449_v15 = vld [vmem:[#allocation9 + $0x43c] ss:$20 sps:$4 sm:$0xff]   ;;  %v10447_v16 = vld [vmem:[#allocation9 + $0x438] ss:$20 sps:$4 sm:$0xff]  }
  0x64   :  { %10233 = vmatpush3.bf16.msra.mxu0 %v204_v30  ;;  %10236 = vmatprep.mubr.msk.bf16.mxu0 %vm11930_vm3, %v11929_v31  ;;  %v10450_v17 = vld [vmem:[#allocation9 + $0x168] ss:$20 sps:$4 sm:$0xff]   ;;  %v10451_v18 = vld [vmem:[#allocation9 + $0x144] ss:$20 sps:$4 sm:$0xff]   ;;  %v10456_v21 = vld [vmem:[#allocation9 + $0x140] ss:$20 sps:$4 sm:$0xff]  }
  0x65   :  { %10234 = vmatprep.subr.bf16.mxu0 %v11929_v31  ;;  %1667 = vmatprep.subr.bf16.mxu1 %v10391_v35  ;;  %v10455_v19 = vld [vmem:[#allocation9 + $0x414] ss:$20 sps:$4 sm:$0xff]   ;;  %v10459_v22 = vld [vmem:[#allocation9 + $0x3ec] ss:$20 sps:$4 sm:$0xff]   ;;  %v10462_v23 = vld [vmem:[#allocation9 + $0x61c] ss:$20 sps:$4 sm:$0xff]  }
  0x66   :  { %v10457_v24 = vld [vmem:[#allocation9 + $0x3e8] ss:$20 sps:$4 sm:$0xff]   ;;  %v10465_v25 = vld [vmem:[#allocation9 + $0x3c4] ss:$20 sps:$4 sm:$0xff]   ;;  %v10463_v26 = vld [vmem:[#allocation9 + $0x3c0] ss:$20 sps:$4 sm:$0xff]  }
  0x67   :  { %1668 = vmatpush1.bf16.msra.mxu1 %v10396_v37  ;;  %v10474_v27 = vld [vmem:[#allocation9 + $0x124] ss:$20 sps:$4 sm:$0xff]   ;;  %v12002_v29 = vshrl.u32 %v119_v28, 7  ;;  %v10495_v28 = vld [vmem:[#allocation9 + $0x52c] ss:$20 sps:$4 sm:$0xff]   ;;  %s8936_s11 = sshll.u32 %s11931_s10, 4  ;;  %s8937_s11 = int_to_ptr.vmem [resolvable:$true] %s8936_s11 }
  0x68   :  { %10235 = vmatpush3.bf16.msra.mxu0 %v10366_v33  ;;  %1669 = vmatprep.subr.bf16.mxu1 %v10397_v39  ;;  %v12010_v33 = vld [vmem:[#allocation8] sm:$0x1f]  ;;  %s11887_s12 = scalar_lea.vmem %s8937_s11, 256  ;;  %p11892_p3 = scmp.lt.s32.totalorder %s8937_s11, %s8937_s11 }
  0x69   :  { %1700 = vmatprep.subr.bf16.mxu0 %v10377_v36  ;;  %v12005_v30 = vsub.s32 1, %v12002_v29  ;;  %v12008_v32 = vsub.s32 0, %v12002_v29  ;;  %v12020_v39 = vsub.s32 3, %v12002_v29  ;;  %p11888_p2 = scmp.ne.s32.totalorder %s8937_s11, %s11887_s12  ;;  %p11893_p4 = scmp.lt.s32.totalorder %s11887_s12, %s11887_s12 }
  0x6b   :  { %10237 = vmatmul.mubr.msk.bf16.vlgmr.msra.gmra.mxu0 %vm183_vm2, %v107_v20  ;;  %1670 = vmatpush1.bf16.msra.mxu1 %v10402_v42  ;;  %v10453_v20 = vld [vmem:[#allocation9 + $0x410] ss:$20 sps:$4 sm:$0xff]   ;;  %v126_v35 = vrot.slane %v12010_v33, %v12005_v30  ;;  %v122_v36 = vrot.slane %v12010_v33, %v12008_v32  ;;  %p11894_p5 = por %p11893_p4, %p11892_p3 }
  0x6c   :  { %1701 = vmatpush1.bf16.msra.mxu0 %v10375_v38  ;;  %1671 = vmatprep.subr.bf16.mxu1 %v10403_v43  ;;  %v12017_v38 = vsub.s32 2, %v12002_v29 }
  0x6d   :  { %1702 = vmatprep.subr.bf16.mxu0 %v10383_v40  ;;  %p11895_p6 = pnand %p11894_p5, %p11888_p2 }
  0x6f   :  { %1672 = vmatpush1.bf16.msra.mxu1 %v10408_v45  ;;  %v130_v45 = vrot.slane %v12010_v33, %v12017_v38 }
  0x70   :  { %1703 = vmatpush1.bf16.msra.mxu0 %v10381_v41  ;;  %1673 = vmatprep.subr.bf16.mxu1 %v10409_v47  ;;  %v134_v47 = vrot.slane %v12010_v33, %v12020_v39 }
  0x71   :  { %1704 = vmatprep.subr.bf16.mxu0 %v10389_v44 }
  0x73   :  { %1674 = vmatpush2.bf16.msra.mxu1 %v10414_v51 }
  0x74   :  { %1705 = vmatpush1.bf16.msra.mxu0 %v10387_v46  ;;  %1675 = vmatprep.subr.bf16.mxu1 %v10415_v52  ;;  %v10460_v52 = vld [vmem:[#allocation9 + $0x618] ss:$20 sps:$4 sm:$0xff]  }
  0x75   :  { %1706 = vmatprep.subr.bf16.mxu0 %v10395_v48 }
  0x77   :  { %1676 = vmatpush2.bf16.msra.mxu1 %v10420_v53 }
  0x78   :  { %1707 = vmatpush1.bf16.msra.mxu0 %v10393_v49  ;;  %1677 = vmatprep.subr.bf16.mxu1 %v10421_v55 }
  0x79   :  { %1708 = vmatprep.subr.bf16.mxu0 %v10401_v50 }
  0x7b   :  { %1678 = vmatpush2.bf16.msra.mxu1 %v10426_v57 }
  0x7c   :  { %1709 = vmatpush1.bf16.msra.mxu0 %v10399_v54  ;;  %1679 = vmatprep.subr.bf16.mxu1 %v10427_v59 }
  0x7d   :  { %1710 = vmatprep.subr.bf16.mxu0 %v10407_v56  ;;  %v10468_v56 = vld [vmem:[#allocation9 + $0x5f4] ss:$20 sps:$4 sm:$0xff]  }
  0x7f   :  { %1680 = vmatpush2.bf16.msra.mxu1 %v10432_v61 }
  0x80   :  { %1711 = vmatpush1.bf16.msra.mxu0 %v10405_v58  ;;  %1681 = vmatprep.subr.bf16.mxu1 %v10433_v63 }
  0x81   :  { %1712 = vmatprep.subr.bf16.mxu0 %v10413_v60 }
  0x83   :  { %1682 = vmatpush2.bf16.msra.mxu1 %v10438_v2 }
  0x84   :  { %1713 = vmatpush1.bf16.msra.mxu0 %v10411_v62  ;;  %1683 = vmatprep.subr.bf16.mxu1 %v10439_v10 }
  0x85   :  { %1714 = vmatprep.subr.bf16.mxu0 %v10419_v1  ;;  %v10466_v1 = vld [vmem:[#allocation9 + $0x5f0] ss:$20 sps:$4 sm:$0xff]  }
  0x87   :  { %1684 = vmatpush2.bf16.msra.mxu1 %v10444_v13 }
  0x88   :  { %1715 = vmatpush1.bf16.msra.mxu0 %v10417_v3  ;;  %1685 = vmatprep.subr.bf16.mxu1 %v10445_v14  ;;  %v10480_v14 = vld [vmem:[#allocation9 + $0xfc] ss:$20 sps:$4 sm:$0xff]  }
  0x89   :  { %1716 = vmatprep.subr.bf16.mxu0 %v10425_v4 }
  0x8b   :  { %1686 = vmatpush2.bf16.msra.mxu1 %v10450_v17  ;;  %v10478_v17 = vld [vmem:[#allocation9 + $0xf8] ss:$20 sps:$4 sm:$0xff]  }
  0x8c   :  { %1717 = vmatpush2.bf16.msra.mxu0 %v10423_v5  ;;  %1687 = vmatprep.subr.bf16.mxu1 %v10451_v18  ;;  %v10471_v5 = vld [vmem:[#allocation9 + $0x5cc] ss:$20 sps:$4 sm:$0xff]   ;;  %v10483_v18 = vld [vmem:[#allocation9 + $0x57c] ss:$20 sps:$4 sm:$0xff]  }
  0x8d   :  { %1718 = vmatprep.subr.bf16.mxu0 %v10431_v6 }
  0x8f   :  { %1688 = vmatpush2.bf16.msra.mxu1 %v10456_v21  ;;  %v10486_v21 = vld [vmem:[#allocation9 + $0xd4] ss:$20 sps:$4 sm:$0xff]  }
  0x90   :  { %1719 = vmatpush2.bf16.msra.mxu0 %v10429_v7  ;;  %1743 = vmatprep.subr.bf16.mxu1 %v10462_v23  ;;  %v10484_v23 = vld [vmem:[#allocation9 + $0xd0] ss:$20 sps:$4 sm:$0xff]  }
  0x91   :  { %1720 = vmatprep.subr.bf16.mxu0 %v10437_v8  ;;  %v10469_v8 = vld [vmem:[#allocation9 + $0x5c8] ss:$20 sps:$4 sm:$0xff]  }
  0x94   :  { %1721 = vmatpush2.bf16.msra.mxu0 %v10435_v9  ;;  %v10472_v9 = vld [vmem:[#allocation9 + $0x120] ss:$20 sps:$4 sm:$0xff]  }
  0x95   :  { %1722 = vmatprep.subr.bf16.mxu0 %v10443_v11  ;;  %v10477_v11 = vld [vmem:[#allocation9 + $0x5a4] ss:$20 sps:$4 sm:$0xff]  }
  0x98   :  { %1723 = vmatpush2.bf16.msra.mxu0 %v10441_v12 }
  0x99   :  { %1724 = vmatprep.subr.bf16.mxu0 %v10449_v15 }
  0x9c   :  { %1725 = vmatpush2.bf16.msra.mxu0 %v10447_v16  ;;  %v10475_v16 = vld [vmem:[#allocation9 + $0x5a0] ss:$20 sps:$4 sm:$0xff]  }
  0x9d   :  { %1726 = vmatprep.subr.bf16.mxu0 %v10455_v19 }
  0xa0   :  { %1727 = vmatpush2.bf16.msra.mxu0 %v10453_v20  ;;  %v12040_v20 = vsub.s32 4, %v12002_v29 }
  0xa1   :  { %1728 = vmatprep.subr.bf16.mxu0 %v10459_v22  ;;  %v10481_v22 = vld [vmem:[#allocation9 + $0x578] ss:$20 sps:$4 sm:$0xff]  }
  0xa2   :  { %v138_v29 = vrot.slane %v12010_v33, %v12040_v20 }
  0xa4   :  { %1729 = vmatpush2.bf16.msra.mxu0 %v10457_v24  ;;  %v10489_v24 = vld [vmem:[#allocation9 + $0x554] ss:$20 sps:$4 sm:$0xff]  }
  0xa5   :  { %1730 = vmatprep.subr.bf16.mxu0 %v10465_v25  ;;  %v10492_v25 = vld [vmem:[#allocation9 + $0xac] ss:$20 sps:$4 sm:$0xff]  }
  0xa8   :  { %1731 = vmatpush2.bf16.msra.mxu0 %v10463_v26  ;;  %v10487_v26 = vld [vmem:[#allocation9 + $0x550] ss:$20 sps:$4 sm:$0xff]  }
  0xa9   :  { %1786 = vmatprep.subr.bf16.mxu0 %v10474_v27  ;;  %v10490_v27 = vld [vmem:[#allocation9 + $0xa8] ss:$20 sps:$4 sm:$0xff]  }
 0x11b   :  { %v240_v34 = vpop.f32.mrf.mxu0 }
 0x11c   :  { %v241_v43 = vadd.f32 %v240_v34, %v122_v36  ;;  %v10498_v34 = vld [vmem:[#allocation9 + $0x84] ss:$20 sps:$4 sm:$0xff]  }
 0x11d   :  { %v242_v37 = vpop.f32.mrf.mxu0 }
 0x11e   :  { %v243_v40 = vadd.f32 %v242_v37, %v126_v35  ;;  %v333_v53 = vmax.f32 %v241_v43, 0.0  ;;  %v10501_v37 = vld [vmem:[#allocation9 + $0x504] ss:$20 sps:$4 sm:$0xff]   ;;  %v10499_v43 = vld [vmem:[#allocation9 + $0x500] ss:$20 sps:$4 sm:$0xff]  }
 0x11f   :  { %v244_v41 = vpop.f32.mrf.mxu0 }
 0x120   :  { %v245_v42 = vadd.f32 %v244_v41, %v122_v36  ;;  %v334_v48 = vmax.f32 %v243_v40, 0.0  ;;  %v10496_v36 = vld [vmem:[#allocation9 + $0x80] ss:$20 sps:$4 sm:$0xff]  }
 0x121   :  { %v246_v44 = vpop.f32.mrf.mxu0 }
 0x122   :  { %v247_v46 = vadd.f32 %v246_v44, %v126_v35  ;;  %v338_v49 = vmax.f32 %v245_v42, 0.0  ;;  %v10493_v35 = vld [vmem:[#allocation9 + $0x528] ss:$20 sps:$4 sm:$0xff]   ;;  %v10502_v44 = vld [vmem:[#allocation9 + $0x58] ss:$20 sps:$4 sm:$0xff]  }
 0x123   :  { %v283_v50 = vpop.f32.mrf.mxu0  ;;  %v10504_v42 = vld [vmem:[#allocation9 + $0x5c] ss:$20 sps:$4 sm:$0xff]  }
 0x124   :  { %v339_v51 = vmax.f32 %v247_v46, 0.0  ;;  %v284_v54 = vadd.f32 %v283_v50, %v130_v45  ;;  %v12028_v59 = vpack.c.bf16 %v338_v49, %v333_v53  ;;  %v10508_v49 = vld [vmem:[#allocation9 + $0x3a0] ss:$20 sps:$4 sm:$0xff]   ;;  %v10511_v53 = vld [vmem:[#allocation9 + $0x8] ss:$20 sps:$4 sm:$0xff]  }
 0x125   :  { %v285_v55 = vpop.f32.mrf.mxu0  ;;  %v10513_v50 = vld [vmem:[#allocation9 + $0xc] ss:$20 sps:$4 sm:$0xff]  }
 0x126   :  { %v12026_v57 = vpack.c.bf16 %v339_v51, %v334_v48  ;;  %v286_v58 = vadd.f32 %v285_v55, %v134_v47  ;;  %v335_v62 = vmax.f32 %v284_v54, 0.0  ;;  %v10505_v48 = vld [vmem:[#allocation9 + $0x30] ss:$20 sps:$4 sm:$0xff]   ;;  %v10514_v54 = vld [vmem:[#allocation9 + $0x378] ss:$20 sps:$4 sm:$0xff]  }
 0x127   :  { %v287_v60 = vpop.f32.mrf.mxu0  ;;  %v10516_v51 = vld [vmem:[#allocation9 + $0x37c] ss:$20 sps:$4 sm:$0xff]   ;;  %v10519_v55 = vld [vmem:[#allocation9 + $0x264] ss:$20 sps:$4 sm:$0xff]  }
 0x128   :  { %v288_v61 = vadd.f32 %v287_v60, %v130_v45  ;;  %1689 = vmatprep.mubr.bf16.mxu1 %v12026_v57  ;;  %v336_v2 = vmax.f32 %v286_v58, 0.0  ;;  %v10507_v45 = vld [vmem:[#allocation9 + $0x34] ss:$20 sps:$4 sm:$0xff]   ;;  %v10520_v60 = vld [vmem:[#allocation9 + $0x350] ss:$20 sps:$4 sm:$0xff]  }
 0x129   :  { %v289_v63 = vpop.f32.mrf.mxu0  ;;  %1690 = vmatmul.mubr.bf16.vlgmr.msra.gmra.mxu1 %v12028_v59  ;;  %v10517_v58 = vld [vmem:[#allocation9 + $0x260] ss:$20 sps:$4 sm:$0xff]  }
 0x12a   :  { %v340_v3 = vmax.f32 %v288_v61, 0.0  ;;  %v290_v4 = vadd.f32 %v289_v63, %v134_v47  ;;  %1744 = vmatpush1.bf16.msra.mxu1 %v10460_v52  ;;  %1775 = vmatprep.mubr.bf16.mxu1 %v11927_v0  ;;  %v10510_v47 = vld [vmem:[#allocation9 + $0x3a4] ss:$20 sps:$4 sm:$0xff]   ;;  %v10525_v61 = vld [vmem:[#allocation9 + $0x23c] ss:$20 sps:$4 sm:$0xff]  }
 0x12b   :  { %1745 = vmatprep.subr.bf16.mxu1 %v10468_v56  ;;  %v326_v6 = vpop.f32.mrf.mxu0  ;;  %v10522_v56 = vld [vmem:[#allocation9 + $0x354] ss:$20 sps:$4 sm:$0xff]   ;;  %v10523_v63 = vld [vmem:[#allocation9 + $0x238] ss:$20 sps:$4 sm:$0xff]  }
 0x12c   :  { %v341_v7 = vmax.f32 %v290_v4, 0.0  ;;  %v12033_v10 = vpack.c.bf16 %v340_v3, %v335_v62  ;;  %v327_v40 = vadd.f32 %v326_v6, %v138_v29  ;;  %v10528_v62 = vld [vmem:[#allocation9 + $0x32c] ss:$20 sps:$4 sm:$0xff]   ;;  %v10534_v3 = vld [vmem:[#allocation9 + $0x304] ss:$20 sps:$4 sm:$0xff]  }
 0x12d   :  { %v10238_v12 = vpop.f32.mrf.mxu0  ;;  %v10529_v4 = vld [vmem:[#allocation9 + $0x210] ss:$20 sps:$4 sm:$0xff]   ;;  %v10537_v6 = vld [vmem:[#allocation9 + $0x1ec] ss:$20 sps:$4 sm:$0xff]  }
 0x12e   :  { %v12035_v13 = vpack.c.bf16 %v341_v7, %v336_v2  ;;  %1746 = vmatpush1.bf16.msra.mxu1 %v10466_v1  ;;  %v337_v46 = vmax.f32 %v327_v40, 0.0  ;;  %v10526_v1 = vld [vmem:[#allocation9 + $0x328] ss:$20 sps:$4 sm:$0xff]  }
 0x12f   :  { %1747 = vmatprep.subr.bf16.mxu1 %v10471_v5  ;;  %v329_v15 = vpop.f32.mrf.mxu0  ;;  %v10531_v2 = vld [vmem:[#allocation9 + $0x214] ss:$20 sps:$4 sm:$0xff]   ;;  %v10540_v7 = vld [vmem:[#allocation9 + $0x2dc] ss:$20 sps:$4 sm:$0xff]  }
 0x130   :  { %1732 = vmatprep.mubr.bf16.mxu0 %v12035_v13  ;;  %v330_v41 = vadd.f32 %v329_v15, %v138_v29  ;;  %v10532_v5 = vld [vmem:[#allocation9 + $0x300] ss:$20 sps:$4 sm:$0xff]   ;;  %v10544_v15 = vld [vmem:[#allocation9 + $0x2b0] ss:$20 sps:$4 sm:$0xff]  }
 0x131   :  { %1733 = vmatmul.mubr.bf16.vlgmr.msra.gmra.mxu0 %v12033_v10  ;;  %v10239_v19 = vpop.f32.mrf.mxu0  ;;  %v10546_v12 = vld [vmem:[#allocation9 + $0x2b4] ss:$20 sps:$4 sm:$0xff]   ;;  %v10576_v40 = vld [vmem:[#allocation9 + $0x5fc] ss:$20 sps:$4 sm:$0xff]  }
 0x132   :  { %1748 = vmatpush1.bf16.msra.mxu1 %v10469_v8  ;;  %1787 = vmatpush1.bf16.msra.mxu0 %v10472_v9  ;;  %v342_v33 = vmax.f32 %v330_v41, 0.0  ;;  %v10535_v8 = vld [vmem:[#allocation9 + $0x1e8] ss:$20 sps:$4 sm:$0xff]   ;;  %v10538_v9 = vld [vmem:[#allocation9 + $0x2d8] ss:$20 sps:$4 sm:$0xff]  }
 0x133   :  { %1818 = vmatprep.mubr.bf16.mxu0 %v12026_v57  ;;  %1749 = vmatprep.subr.bf16.mxu1 %v10477_v11  ;;  %v10543_v11 = vld [vmem:[#allocation9 + $0x1c4] ss:$20 sps:$4 sm:$0xff]   ;;  %v10550_v19 = vld [vmem:[#allocation9 + $0x288] ss:$20 sps:$4 sm:$0xff]  }
 0x134   :  { %1788 = vmatprep.subr.bf16.mxu0 %v10480_v14  ;;  %v12045_v52 = vpack.c.bf16 %v342_v33, %v337_v46  ;;  %v10541_v14 = vld [vmem:[#allocation9 + $0x1c0] ss:$20 sps:$4 sm:$0xff]   ;;  %v10571_v41 = vld [vmem:[#allocation9 + $0x468] ss:$20 sps:$4 sm:$0xff]   ;;  %v10580_v46 = vld [vmem:[#allocation9 + $0x5d0] ss:$20 sps:$4 sm:$0xff]  }
 0x135   :  { %v10567_v29 = vld [vmem:[#allocation9 + $0x494] ss:$20 sps:$4 sm:$0xff]   ;;  %v10585_v33 = vld [vmem:[#allocation9 + $0x41c] ss:$20 sps:$4 sm:$0xff]  }
 0x136   :  { %1750 = vmatpush1.bf16.msra.mxu1 %v10475_v16  ;;  %1789 = vmatpush1.bf16.msra.mxu0 %v10478_v17  ;;  %v10549_v16 = vld [vmem:[#allocation9 + $0x19c] ss:$20 sps:$4 sm:$0xff]   ;;  %v10552_v17 = vld [vmem:[#allocation9 + $0x28c] ss:$20 sps:$4 sm:$0xff]  }
 0x137   :  { %1751 = vmatprep.subr.bf16.mxu1 %v10483_v18  ;;  %1790 = vmatprep.subr.bf16.mxu0 %v10486_v21  ;;  %v10547_v18 = vld [vmem:[#allocation9 + $0x198] ss:$20 sps:$4 sm:$0xff]   ;;  %v10555_v21 = vld [vmem:[#allocation9 + $0x174] ss:$20 sps:$4 sm:$0xff]  }
 0x13a   :  { %1752 = vmatpush1.bf16.msra.mxu1 %v10481_v22  ;;  %1791 = vmatpush1.bf16.msra.mxu0 %v10484_v23  ;;  %v10558_v22 = vld [vmem:[#allocation9 + $0x4e4] ss:$20 sps:$4 sm:$0xff]  }
 0x13b   :  { %1753 = vmatprep.subr.bf16.mxu1 %v10489_v24  ;;  %1792 = vmatprep.subr.bf16.mxu0 %v10492_v25  ;;  %v10553_v23 = vld [vmem:[#allocation9 + $0x170] ss:$20 sps:$4 sm:$0xff]   ;;  %v10556_v24 = vld [vmem:[#allocation9 + $0x4e0] ss:$20 sps:$4 sm:$0xff]  }
 0x13c   :  { %v10561_v25 = vld [vmem:[#allocation9 + $0x14c] ss:$20 sps:$4 sm:$0xff]  }
 0x13e   :  { %1754 = vmatpush1.bf16.msra.mxu1 %v10487_v26  ;;  %1793 = vmatpush1.bf16.msra.mxu0 %v10490_v27  ;;  %v10564_v26 = vld [vmem:[#allocation9 + $0x4bc] ss:$20 sps:$4 sm:$0xff]  }
 0x13f   :  { %1755 = vmatprep.subr.bf16.mxu1 %v10495_v28  ;;  %1794 = vmatprep.subr.bf16.mxu0 %v10498_v34  ;;  %v10559_v27 = vld [vmem:[#allocation9 + $0x148] ss:$20 sps:$4 sm:$0xff]   ;;  %v10562_v28 = vld [vmem:[#allocation9 + $0x4b8] ss:$20 sps:$4 sm:$0xff]  }
 0x140   :  { %v10570_v34 = vld [vmem:[#allocation9 + $0x624] ss:$20 sps:$4 sm:$0xff]  }
 0x142   :  { %1756 = vmatpush1.bf16.msra.mxu1 %v10493_v35  ;;  %1795 = vmatpush1.bf16.msra.mxu0 %v10496_v36  ;;  %v10565_v35 = vld [vmem:[#allocation9 + $0x490] ss:$20 sps:$4 sm:$0xff]   ;;  %v10568_v36 = vld [vmem:[#allocation9 + $0x620] ss:$20 sps:$4 sm:$0xff]  }
 0x143   :  { %1757 = vmatprep.subr.bf16.mxu1 %v10501_v37  ;;  %1796 = vmatprep.subr.bf16.mxu0 %v10504_v42  ;;  %v10573_v37 = vld [vmem:[#allocation9 + $0x46c] ss:$20 sps:$4 sm:$0xff]  }
 0x144   :  { %v10574_v42 = vld [vmem:[#allocation9 + $0x5f8] ss:$20 sps:$4 sm:$0xff]  }
 0x146   :  { %1758 = vmatpush1.bf16.msra.mxu1 %v10499_v43  ;;  %1797 = vmatpush1.bf16.msra.mxu0 %v10502_v44  ;;  %v10579_v43 = vld [vmem:[#allocation9 + $0x444] ss:$20 sps:$4 sm:$0xff]   ;;  %v10582_v44 = vld [vmem:[#allocation9 + $0x5d4] ss:$20 sps:$4 sm:$0xff]  }
 0x147   :  { %1798 = vmatprep.subr.bf16.mxu0 %v10507_v45  ;;  %1829 = vmatprep.subr.bf16.mxu1 %v10510_v47  ;;  %v10577_v45 = vld [vmem:[#allocation9 + $0x440] ss:$20 sps:$4 sm:$0xff]  }
 0x148   :  { %v10588_v47 = vld [vmem:[#allocation9 + $0x5ac] ss:$20 sps:$4 sm:$0xff]  }
 0x149   :  { %1776 = vmatmul.mubr.bf16.vlgmr.msra.gmra.mxu1 %v12045_v52 }
 0x14a   :  { %1799 = vmatpush1.bf16.msra.mxu0 %v10505_v48  ;;  %1830 = vmatpush1.bf16.msra.mxu1 %v10508_v49  ;;  %v10583_v48 = vld [vmem:[#allocation9 + $0x418] ss:$20 sps:$4 sm:$0xff]   ;;  %v10586_v49 = vld [vmem:[#allocation9 + $0x5a8] ss:$20 sps:$4 sm:$0xff]  }
 0x14b   :  { %1861 = vmatprep.mubr.bf16.mxu1 %v12035_v13  ;;  %1800 = vmatprep.subr.bf16.mxu0 %v10513_v50  ;;  %v10591_v50 = vld [vmem:[#allocation9 + $0x3f4] ss:$20 sps:$4 sm:$0xff]  }
 0x14c   :  { %1831 = vmatprep.subr.bf16.mxu1 %v10516_v51  ;;  %v10594_v51 = vld [vmem:[#allocation9 + $0x584] ss:$20 sps:$4 sm:$0xff]  }
 0x14e   :  { %1801 = vmatpush1.bf16.msra.mxu0 %v10511_v53  ;;  %1832 = vmatpush1.bf16.msra.mxu1 %v10514_v54  ;;  %v10589_v53 = vld [vmem:[#allocation9 + $0x3f0] ss:$20 sps:$4 sm:$0xff]   ;;  %v10592_v54 = vld [vmem:[#allocation9 + $0x580] ss:$20 sps:$4 sm:$0xff]  }
 0x14f   :  { %1802 = vmatprep.subr.bf16.mxu0 %v10519_v55  ;;  %1833 = vmatprep.subr.bf16.mxu1 %v10522_v56  ;;  %v10597_v55 = vld [vmem:[#allocation9 + $0x3cc] ss:$20 sps:$4 sm:$0xff]   ;;  %v10600_v56 = vld [vmem:[#allocation9 + $0x55c] ss:$20 sps:$4 sm:$0xff]  }
 0x152   :  { %1803 = vmatpush2.bf16.msra.mxu0 %v10517_v58  ;;  %1834 = vmatpush1.bf16.msra.mxu1 %v10520_v60  ;;  %v10595_v58 = vld [vmem:[#allocation9 + $0x3c8] ss:$20 sps:$4 sm:$0xff]   ;;  %v10598_v60 = vld [vmem:[#allocation9 + $0x558] ss:$20 sps:$4 sm:$0xff]  }
 0x153   :  { %1804 = vmatprep.subr.bf16.mxu0 %v10525_v61  ;;  %1835 = vmatprep.subr.bf16.mxu1 %v10528_v62  ;;  %v10603_v61 = vld [vmem:[#allocation9 + $0x534] ss:$20 sps:$4 sm:$0xff]  }
 0x154   :  { %v10604_v62 = vld [vmem:[#allocation9 + $0x268] ss:$20 sps:$4 sm:$0xff]  }
 0x156   :  { %1805 = vmatpush2.bf16.msra.mxu0 %v10523_v63  ;;  %1836 = vmatpush1.bf16.msra.mxu1 %v10526_v1  ;;  %v10601_v63 = vld [vmem:[#allocation9 + $0x530] ss:$20 sps:$4 sm:$0xff]   ;;  %v10605_v1 = vld [vmem:[#allocation9 + $0x128] ss:$20 sps:$4 sm:$0xff]  }
 0x157   :  { %1806 = vmatprep.subr.bf16.mxu0 %v10531_v2  ;;  %1837 = vmatprep.subr.bf16.mxu1 %v10534_v3  ;;  %v10608_v2 = vld [vmem:[#allocation9 + $0x50c] ss:$20 sps:$4 sm:$0xff]  }
 0x158   :  { %v10609_v3 = vld [vmem:[#allocation9 + $0x240] ss:$20 sps:$4 sm:$0xff]  }
 0x15a   :  { %1807 = vmatpush2.bf16.msra.mxu0 %v10529_v4  ;;  %1838 = vmatpush1.bf16.msra.mxu1 %v10532_v5  ;;  %v10606_v4 = vld [vmem:[#allocation9 + $0x508] ss:$20 sps:$4 sm:$0xff]   ;;  %v10610_v5 = vld [vmem:[#allocation9 + $0x100] ss:$20 sps:$4 sm:$0xff]  }
 0x15b   :  { %1808 = vmatprep.subr.bf16.mxu0 %v10537_v6  ;;  %1839 = vmatprep.subr.bf16.mxu1 %v10540_v7  ;;  %v10611_v6 = vld [vmem:[#allocation9 + $0x218] ss:$20 sps:$4 sm:$0xff]   ;;  %v10612_v7 = vld [vmem:[#allocation9 + $0x4e8] ss:$20 sps:$4 sm:$0xff]  }
 0x15e   :  { %1809 = vmatpush2.bf16.msra.mxu0 %v10535_v8  ;;  %1840 = vmatpush1.bf16.msra.mxu1 %v10538_v9  ;;  %v10613_v8 = vld [vmem:[#allocation9 + $0xd8] ss:$20 sps:$4 sm:$0xff]   ;;  %v10614_v9 = vld [vmem:[#allocation9 + $0x3a8] ss:$20 sps:$4 sm:$0xff]  }
 0x15f   :  { %1810 = vmatprep.subr.bf16.mxu0 %v10543_v11  ;;  %1841 = vmatprep.subr.bf16.mxu1 %v10546_v12  ;;  %v10615_v11 = vld [vmem:[#allocation9 + $0x1f0] ss:$20 sps:$4 sm:$0xff]   ;;  %v10616_v12 = vld [vmem:[#allocation9 + $0x4c0] ss:$20 sps:$4 sm:$0xff]  }
 0x162   :  { %1811 = vmatpush2.bf16.msra.mxu0 %v10541_v14  ;;  %1842 = vmatpush1.bf16.msra.mxu1 %v10544_v15  ;;  %v10617_v14 = vld [vmem:[#allocation9 + $0xb0] ss:$20 sps:$4 sm:$0xff]   ;;  %v10618_v15 = vld [vmem:[#allocation9 + $0x380] ss:$20 sps:$4 sm:$0xff]  }
 0x163   :  { %1812 = vmatprep.subr.bf16.mxu0 %v10549_v16  ;;  %1843 = vmatprep.subr.bf16.mxu1 %v10552_v17  ;;  %v10619_v16 = vld [vmem:[#allocation9 + $0x1c8] ss:$20 sps:$4 sm:$0xff]  }
 0x164   :  { %v10621_v17 = vld [vmem:[#allocation9 + $0x88] ss:$20 sps:$4 sm:$0xff]  }
 0x166   :  { %1813 = vmatpush2.bf16.msra.mxu0 %v10547_v18  ;;  %1844 = vmatpush1.bf16.msra.mxu1 %v10550_v19  ;;  %v10622_v18 = vld [vmem:[#allocation9 + $0x358] ss:$20 sps:$4 sm:$0xff]   ;;  %v10623_v19 = vld [vmem:[#allocation9 + $0x1a0] ss:$20 sps:$4 sm:$0xff]  }
 0x167   :  { %1814 = vmatprep.subr.bf16.mxu0 %v10555_v21  ;;  %1845 = vmatprep.subr.bf16.mxu1 %v10558_v22  ;;  %v10624_v21 = vld [vmem:[#allocation9 + $0x470] ss:$20 sps:$4 sm:$0xff]   ;;  %v10625_v22 = vld [vmem:[#allocation9 + $0x60] ss:$20 sps:$4 sm:$0xff]  }
 0x16a   :  { %1815 = vmatpush2.bf16.msra.mxu0 %v10553_v23  ;;  %1846 = vmatpush2.bf16.msra.mxu1 %v10556_v24  ;;  %v10626_v23 = vld [vmem:[#allocation9 + $0x330] ss:$20 sps:$4 sm:$0xff]   ;;  %v10627_v24 = vld [vmem:[#allocation9 + $0x178] ss:$20 sps:$4 sm:$0xff]  }
 0x16b   :  { %1816 = vmatprep.subr.bf16.mxu0 %v10561_v25  ;;  %1847 = vmatprep.subr.bf16.mxu1 %v10564_v26  ;;  %v10628_v25 = vld [vmem:[#allocation9 + $0x448] ss:$20 sps:$4 sm:$0xff]  }
 0x16c   :  { %v10630_v26 = vld [vmem:[#allocation9 + $0x308] ss:$20 sps:$4 sm:$0xff]  }
 0x16e   :  { %1817 = vmatpush2.bf16.msra.mxu0 %v10559_v27  ;;  %1848 = vmatpush2.bf16.msra.mxu1 %v10562_v28  ;;  %v10631_v27 = vld [vmem:[#allocation9 + $0x150] ss:$20 sps:$4 sm:$0xff]   ;;  %v10632_v28 = vld [vmem:[#allocation9 + $0x420] ss:$20 sps:$4 sm:$0xff]  }
 0x16f   :  { %1849 = vmatprep.subr.bf16.mxu1 %v10567_v29  ;;  %1872 = vmatprep.subr.bf16.mxu0 %v10570_v34  ;;  %v10633_v29 = vld [vmem:[#allocation9 + $0x10] ss:$20 sps:$4 sm:$0xff]   ;;  %v10634_v34 = vld [vmem:[#allocation9 + $0x2e0] ss:$20 sps:$4 sm:$0xff]  }
 0x171   :  { %1819 = vmatmul.mubr.bf16.vlgmr.msra.gmra.mxu0 %v12028_v59 }
 0x172   :  { %1850 = vmatpush2.bf16.msra.mxu1 %v10565_v35  ;;  %1873 = vmatpush1.bf16.msra.mxu0 %v10568_v36  ;;  %v10635_v35 = vld [vmem:[#allocation9 + $0x3f8] ss:$20 sps:$4 sm:$0xff]  }
 0x173   :  { %1851 = vmatprep.subr.bf16.mxu1 %v10573_v37  ;;  %1874 = vmatprep.subr.bf16.mxu0 %v10576_v40  ;;  %v10636_v36 = vld [vmem:[#allocation9 + $0x2b8] ss:$20 sps:$4 sm:$0xff]   ;;  %v10637_v37 = vld [vmem:[#allocation9 + $0x628] ss:$20 sps:$4 sm:$0xff]   ;;  %v10638_v40 = vld [vmem:[#allocation9 + $0x3d0] ss:$20 sps:$4 sm:$0xff]  }
 0x174   :  { %1904 = vmatprep.mubr.bf16.mxu0 %v11927_v0 }
 0x176   :  { %1852 = vmatpush2.bf16.msra.mxu1 %v10571_v41  ;;  %1875 = vmatpush1.bf16.msra.mxu0 %v10574_v42  ;;  %v10639_v41 = vld [vmem:[#allocation9 + $0x290] ss:$20 sps:$4 sm:$0xff]   ;;  %v10640_v42 = vld [vmem:[#allocation9 + $0x600] ss:$20 sps:$4 sm:$0xff]  }
 0x177   :  { %1853 = vmatprep.subr.bf16.mxu1 %v10579_v43  ;;  %1876 = vmatprep.subr.bf16.mxu0 %v10582_v44  ;;  %v10649_v43 = vld [vmem:[#allocation9 + $0x75c] ss:$20 sps:$4 sm:$0xff]   ;;  %v10641_v44 = vld [vmem:[#allocation9 + $0x5d8] ss:$20 sps:$4 sm:$0xff]  }
 0x17a   :  { %1854 = vmatpush2.bf16.msra.mxu1 %v10577_v45  ;;  %1877 = vmatpush1.bf16.msra.mxu0 %v10580_v46  ;;  %v10647_v45 = vld [vmem:[#allocation9 + $0x758] ss:$20 sps:$4 sm:$0xff]   ;;  %v10652_v46 = vld [vmem:[#allocation9 + $0x734] ss:$20 sps:$4 sm:$0xff]  }
 0x17b   :  { %1855 = vmatprep.subr.bf16.mxu1 %v10585_v33  ;;  %1878 = vmatprep.subr.bf16.mxu0 %v10588_v47  ;;  %v10642_v33 = vld [vmem:[#allocation9 + $0x5b0] ss:$20 sps:$4 sm:$0xff]   ;;  %v10655_v47 = vld [vmem:[#allocation9 + $0x70c] ss:$20 sps:$4 sm:$0xff]  }
 0x17e   :  { %1856 = vmatpush2.bf16.msra.mxu1 %v10583_v48  ;;  %1879 = vmatpush1.bf16.msra.mxu0 %v10586_v49  ;;  %v10643_v48 = vld [vmem:[#allocation9 + $0x588] ss:$20 sps:$4 sm:$0xff]  }
 0x17f   :  { %1857 = vmatprep.subr.bf16.mxu1 %v10591_v50  ;;  %1880 = vmatprep.subr.bf16.mxu0 %v10594_v51  ;;  %v10653_v49 = vld [vmem:[#allocation9 + $0x708] ss:$20 sps:$4 sm:$0xff]   ;;  %v10658_v50 = vld [vmem:[#allocation9 + $0x6e4] ss:$20 sps:$4 sm:$0xff]   ;;  %v10644_v51 = vld [vmem:[#allocation9 + $0x560] ss:$20 sps:$4 sm:$0xff]  }
 0x182   :  { %1858 = vmatpush2.bf16.msra.mxu1 %v10589_v53  ;;  %1881 = vmatpush1.bf16.msra.mxu0 %v10592_v54  ;;  %v10656_v53 = vld [vmem:[#allocation9 + $0x6e0] ss:$20 sps:$4 sm:$0xff]   ;;  %v10645_v54 = vld [vmem:[#allocation9 + $0x538] ss:$20 sps:$4 sm:$0xff]  }
 0x183   :  { %1859 = vmatprep.subr.bf16.mxu1 %v10597_v55  ;;  %1882 = vmatprep.subr.bf16.mxu0 %v10600_v56  ;;  %v10659_v55 = vld [vmem:[#allocation9 + $0x6b8] ss:$20 sps:$4 sm:$0xff]   ;;  %v10664_v56 = vld [vmem:[#allocation9 + $0x694] ss:$20 sps:$4 sm:$0xff]  }
 0x186   :  { %1860 = vmatpush2.bf16.msra.mxu1 %v10595_v58  ;;  %1883 = vmatpush1.bf16.msra.mxu0 %v10598_v60  ;;  %v10646_v58 = vld [vmem:[#allocation9 + $0x510] ss:$20 sps:$4 sm:$0xff]  }
 0x187   :  { %1884 = vmatprep.subr.bf16.mxu0 %v10603_v61  ;;  %9967 = vmatprep.subr.bf16.mxu1 %v10604_v62  ;;  %v10662_v60 = vld [vmem:[#allocation9 + $0x690] ss:$20 sps:$4 sm:$0xff]   ;;  %v10667_v61 = vld [vmem:[#allocation9 + $0x66c] ss:$20 sps:$4 sm:$0xff]  }
 0x188   :  { %v10697_v62 = vld [vmem:[#allocation9 + $0x9dc] ss:$20 sps:$4 sm:$0xff]  }
 0x189   :  { %1862 = vmatmul.mubr.bf16.vlgmr.msra.gmra.mxu1 %v12033_v10 }
 0x18a   :  { %1885 = vmatpush1.bf16.msra.mxu0 %v10601_v63  ;;  %9968 = vmatpush3.bf16.msra.mxu1 %v10605_v1  ;;  %v10665_v63 = vld [vmem:[#allocation9 + $0x668] ss:$20 sps:$4 sm:$0xff]   ;;  %v10695_v1 = vld [vmem:[#allocation9 + $0x9d8] ss:$20 sps:$4 sm:$0xff]  }
 0x18b   :  { %1947 = vmatprep.mubr.bf16.mxu1 %v12026_v57  ;;  %1886 = vmatprep.subr.bf16.mxu0 %v10608_v2  ;;  %v10620_v57 = vld [vmem:[#allocation9 + $0x498] ss:$20 sps:$4 sm:$0xff]  }
 0x18c   :  { %9969 = vmatprep.subr.bf16.mxu1 %v10609_v3  ;;  %v10670_v2 = vld [vmem:[#allocation9 + $0x644] ss:$20 sps:$4 sm:$0xff]   ;;  %v10700_v3 = vld [vmem:[#allocation9 + $0x9b4] ss:$20 sps:$4 sm:$0xff]  }
 0x18e   :  { %1887 = vmatpush1.bf16.msra.mxu0 %v10606_v4  ;;  %9970 = vmatpush3.bf16.msra.mxu1 %v10610_v5  ;;  %v10668_v4 = vld [vmem:[#allocation9 + $0x640] ss:$20 sps:$4 sm:$0xff]   ;;  %v10673_v5 = vld [vmem:[#allocation9 + $0x89c] ss:$20 sps:$4 sm:$0xff]  }
 0x18f   :  { %9971 = vmatprep.subr.bf16.mxu1 %v10611_v6  ;;  %9989 = vmatprep.subr.bf16.mxu0 %v10612_v7  ;;  %v10698_v6 = vld [vmem:[#allocation9 + $0x9b0] ss:$20 sps:$4 sm:$0xff]   ;;  %v10703_v7 = vld [vmem:[#allocation9 + $0x98c] ss:$20 sps:$4 sm:$0xff]  }
 0x191   :  { %1905 = vmatmul.mubr.bf16.vlgmr.msra.gmra.mxu0 %v12045_v52 }
 0x192   :  { %9972 = vmatpush3.bf16.msra.mxu1 %v10613_v8  ;;  %9990 = vmatpush3.bf16.msra.mxu0 %v10614_v9  ;;  %v10671_v8 = vld [vmem:[#allocation9 + $0x898] ss:$20 sps:$4 sm:$0xff]   ;;  %v10676_v9 = vld [vmem:[#allocation9 + $0x874] ss:$20 sps:$4 sm:$0xff]  }
 0x193   :  { %1988 = vmatprep.mubr.bf16.mxu0 %v12035_v13  ;;  %9973 = vmatprep.subr.bf16.mxu1 %v10615_v11  ;;  %v10629_v13 = vld [vmem:[#allocation9 + $0x38] ss:$20 sps:$4 sm:$0xff]   ;;  %v10701_v11 = vld [vmem:[#allocation9 + $0x988] ss:$20 sps:$4 sm:$0xff]  }
 0x194   :  { %9991 = vmatprep.subr.bf16.mxu0 %v10616_v12  ;;  %v10706_v12 = vld [vmem:[#allocation9 + $0x964] ss:$20 sps:$4 sm:$0xff]  }
 0x196   :  { %9974 = vmatpush3.bf16.msra.mxu1 %v10617_v14  ;;  %9992 = vmatpush3.bf16.msra.mxu0 %v10618_v15  ;;  %v10674_v14 = vld [vmem:[#allocation9 + $0x870] ss:$20 sps:$4 sm:$0xff]   ;;  %v10679_v15 = vld [vmem:[#allocation9 + $0x84c] ss:$20 sps:$4 sm:$0xff]  }
 0x197   :  { %9975 = vmatprep.subr.bf16.mxu1 %v10619_v16  ;;  %9993 = vmatprep.subr.bf16.mxu0 %v10620_v57  ;;  %v10704_v16 = vld [vmem:[#allocation9 + $0x960] ss:$20 sps:$4 sm:$0xff]   ;;  %v10677_v57 = vld [vmem:[#allocation9 + $0x848] ss:$20 sps:$4 sm:$0xff]  }
 0x19a   :  { %9976 = vmatpush3.bf16.msra.mxu1 %v10621_v17  ;;  %9994 = vmatpush3.bf16.msra.mxu0 %v10622_v18  ;;  %v10682_v17 = vld [vmem:[#allocation9 + $0x824] ss:$20 sps:$4 sm:$0xff]  }
 0x19b   :  { %9977 = vmatprep.subr.bf16.mxu1 %v10623_v19  ;;  %9995 = vmatprep.subr.bf16.mxu0 %v10624_v21  ;;  %v10707_v18 = vld [vmem:[#allocation9 + $0x938] ss:$20 sps:$4 sm:$0xff]   ;;  %v10712_v19 = vld [vmem:[#allocation9 + $0x914] ss:$20 sps:$4 sm:$0xff]  }
 0x19c   :  { %v10680_v21 = vld [vmem:[#allocation9 + $0x820] ss:$20 sps:$4 sm:$0xff]  }
 0x19e   :  { %9978 = vmatpush3.bf16.msra.mxu1 %v10625_v22  ;;  %9996 = vmatpush3.bf16.msra.mxu0 %v10626_v23  ;;  %v10685_v22 = vld [vmem:[#allocation9 + $0x7fc] ss:$20 sps:$4 sm:$0xff]  }
 0x19f   :  { %9979 = vmatprep.subr.bf16.mxu1 %v10627_v24  ;;  %9997 = vmatprep.subr.bf16.mxu0 %v10628_v25  ;;  %v10710_v23 = vld [vmem:[#allocation9 + $0x910] ss:$20 sps:$4 sm:$0xff]   ;;  %v10715_v24 = vld [vmem:[#allocation9 + $0x8ec] ss:$20 sps:$4 sm:$0xff]  }
 0x1a0   :  { %v10683_v25 = vld [vmem:[#allocation9 + $0x7f8] ss:$20 sps:$4 sm:$0xff]  }
 0x1a2   :  { %9980 = vmatpush3.bf16.msra.mxu1 %v10629_v13  ;;  %9998 = vmatpush3.bf16.msra.mxu0 %v10630_v26  ;;  %v10688_v13 = vld [vmem:[#allocation9 + $0x7d4] ss:$20 sps:$4 sm:$0xff]  }
 0x1a3   :  { %9981 = vmatprep.subr.bf16.mxu1 %v10631_v27  ;;  %9999 = vmatprep.subr.bf16.mxu0 %v10632_v28  ;;  %v10713_v26 = vld [vmem:[#allocation9 + $0x8e8] ss:$20 sps:$4 sm:$0xff]   ;;  %v10718_v27 = vld [vmem:[#allocation9 + $0x8c4] ss:$20 sps:$4 sm:$0xff]  }
 0x1a4   :  { %v10686_v28 = vld [vmem:[#allocation9 + $0x7d0] ss:$20 sps:$4 sm:$0xff]  }
 0x1a6   :  { %9982 = vmatpush3.bf16.msra.mxu1 %v10633_v29  ;;  %10000 = vmatpush3.bf16.msra.mxu0 %v10634_v34  ;;  %v10716_v29 = vld [vmem:[#allocation9 + $0x8c0] ss:$20 sps:$4 sm:$0xff]  }
 0x1a7   :  { %10001 = vmatprep.subr.bf16.mxu0 %v10635_v35  ;;  %10240 = vmatprep.subr.bf16.mxu1 %v11929_v31  ;;  %v10691_v34 = vld [vmem:[#allocation9 + $0x7ac] ss:$20 sps:$4 sm:$0xff]   ;;  %v10721_v35 = vld [vmem:[#allocation9 + $0xb1c] ss:$20 sps:$4 sm:$0xff]  }
 0x1a9   :  { %1948 = vmatmul.mubr.bf16.vlgmr.msra.gmra.mxu1 %v12028_v59  ;;  %v10650_v59 = vld [vmem:[#allocation9 + $0x730] ss:$20 sps:$4 sm:$0xff]  }
 0x1aa   :  { %10002 = vmatpush3.bf16.msra.mxu0 %v10636_v36  ;;  %10241 = vmatpush3.bf16.msra.mxu1 %v10637_v37  ;;  %v10689_v36 = vld [vmem:[#allocation9 + $0x7a8] ss:$20 sps:$4 sm:$0xff]   ;;  %v10719_v37 = vld [vmem:[#allocation9 + $0xb18] ss:$20 sps:$4 sm:$0xff]  }
 0x1ab   :  { %10003 = vmatprep.subr.bf16.mxu0 %v10638_v40  ;;  %10242 = vmatprep.subr.bf16.mxu1 %v11929_v31  ;;  %v10694_v40 = vld [vmem:[#allocation9 + $0x784] ss:$20 sps:$4 sm:$0xff]  }
 0x1ac   :  { %10256 = vmatprep.mubr.msk.bf16.mxu1 %vm11930_vm3, %v11929_v31 }
 0x1ae   :  { %10004 = vmatpush3.bf16.msra.mxu0 %v10639_v41  ;;  %10243 = vmatpush3.bf16.msra.mxu1 %v10640_v42  ;;  %v10724_v41 = vld [vmem:[#allocation9 + $0xaf4] ss:$20 sps:$4 sm:$0xff]  }
 0x1af   :  { %10244 = vmatprep.subr.bf16.mxu1 %v11929_v31  ;;  %3364 = vmatprep.subr.bf16.mxu0 %v10649_v43  ;;  %v10692_v42 = vld [vmem:[#allocation9 + $0x780] ss:$20 sps:$4 sm:$0xff]   ;;  %v10722_v43 = vld [vmem:[#allocation9 + $0xaf0] ss:$20 sps:$4 sm:$0xff]  }
 0x1b1   :  { %1989 = vmatmul.mubr.bf16.vlgmr.msra.gmra.mxu0 %v12033_v10  ;;  %v10661_v10 = vld [vmem:[#allocation9 + $0x6bc] ss:$20 sps:$4 sm:$0xff]  }
 0x1b2   :  { %10245 = vmatpush3.bf16.msra.mxu1 %v10641_v44  ;;  %3365 = vmatpush1.bf16.msra.mxu0 %v10647_v45  ;;  %v10727_v44 = vld [vmem:[#allocation9 + $0xacc] ss:$20 sps:$4 sm:$0xff]   ;;  %v10725_v45 = vld [vmem:[#allocation9 + $0xac8] ss:$20 sps:$4 sm:$0xff]  }
 0x1b3   :  { %10246 = vmatprep.subr.bf16.mxu1 %v11929_v31  ;;  %3366 = vmatprep.subr.bf16.mxu0 %v10652_v46  ;;  %v10730_v46 = vld [vmem:[#allocation9 + $0xaa4] ss:$20 sps:$4 sm:$0xff]  }
 0x1b6   :  { %10247 = vmatpush3.bf16.msra.mxu1 %v10642_v33  ;;  %3367 = vmatpush1.bf16.msra.mxu0 %v10650_v59  ;;  %v10728_v33 = vld [vmem:[#allocation9 + $0xaa0] ss:$20 sps:$4 sm:$0xff]   ;;  %v10763_v59 = vld [vmem:[#allocation9 + $0xc5c] ss:$20 sps:$4 sm:$0xff]  }
 0x1b7   :  { %10248 = vmatprep.subr.bf16.mxu1 %v11929_v31  ;;  %3368 = vmatprep.subr.bf16.mxu0 %v10655_v47  ;;  %v10733_v47 = vld [vmem:[#allocation9 + $0xa7c] ss:$20 sps:$4 sm:$0xff]  }
 0x1ba   :  { %10249 = vmatpush3.bf16.msra.mxu1 %v10643_v48  ;;  %3369 = vmatpush1.bf16.msra.mxu0 %v10653_v49  ;;  %v10731_v48 = vld [vmem:[#allocation9 + $0xa78] ss:$20 sps:$4 sm:$0xff]   ;;  %v10736_v49 = vld [vmem:[#allocation9 + $0xa54] ss:$20 sps:$4 sm:$0xff]  }
 0x1bb   :  { %10250 = vmatprep.subr.bf16.mxu1 %v11929_v31  ;;  %3370 = vmatprep.subr.bf16.mxu0 %v10658_v50  ;;  %v10734_v50 = vld [vmem:[#allocation9 + $0xa50] ss:$20 sps:$4 sm:$0xff]  }
 0x1be   :  { %10251 = vmatpush3.bf16.msra.mxu1 %v10644_v51  ;;  %3371 = vmatpush1.bf16.msra.mxu0 %v10656_v53  ;;  %v10739_v51 = vld [vmem:[#allocation9 + $0xa2c] ss:$20 sps:$4 sm:$0xff]  }
 0x1bf   :  { %10252 = vmatprep.subr.bf16.mxu1 %v11929_v31  ;;  %3372 = vmatprep.subr.bf16.mxu0 %v10661_v10  ;;  %v10737_v10 = vld [vmem:[#allocation9 + $0xa28] ss:$20 sps:$4 sm:$0xff]  }
 0x1c2   :  { %10253 = vmatpush3.bf16.msra.mxu1 %v10645_v54  ;;  %3373 = vmatpush1.bf16.msra.mxu0 %v10659_v55  ;;  %v10742_v54 = vld [vmem:[#allocation9 + $0xa04] ss:$20 sps:$4 sm:$0xff]  }
 0x1c3   :  { %10254 = vmatprep.subr.bf16.mxu1 %v11929_v31  ;;  %3374 = vmatprep.subr.bf16.mxu0 %v10664_v56  ;;  %v588_v55 = vld [vmem:[#allocation11] ss:$8 sm:$0xf] }
 0x1c6   :  { %10255 = vmatpush3.bf16.msra.mxu1 %v10646_v58  ;;  %3375 = vmatpush1.bf16.msra.mxu0 %v10662_v60  ;;  %v589_v60 = vld [vmem:[#allocation11] ss:$8 sm:$0x10] }
 0x1c7   :  { %3376 = vmatprep.subr.bf16.mxu0 %v10667_v61  ;;  %3407 = vmatprep.subr.bf16.mxu1 %v10697_v62  ;;  %v10740_v61 = vld [vmem:[#allocation9 + $0xa00] ss:$20 sps:$4 sm:$0xff]   ;;  %v10745_v62 = vld [vmem:[#allocation9 + $0x764] ss:$20 sps:$4 sm:$0xff]  }
 0x1c9   :  { %10257 = vmatmul.mubr.bf16.vlgmr.msra.gmra.mxu1 %v12045_v52  ;;  %v10709_v52 = vld [vmem:[#allocation9 + $0x93c] ss:$20 sps:$4 sm:$0xff]  }
 0x1ca   :  { %3377 = vmatpush1.bf16.msra.mxu0 %v10665_v63  ;;  %3408 = vmatpush1.bf16.msra.mxu1 %v10695_v1  ;;  %v12068_v63 = vor.u32 %v589_v60, %v588_v55 }
 0x1cb   :  { %3378 = vmatprep.subr.bf16.mxu0 %v10670_v2  ;;  %3409 = vmatprep.subr.bf16.mxu1 %v10700_v3 }
 0x1cc   :  { %v599_v3 = vrot.slane %v12068_v63, %v12005_v30  ;;  %v607_v55 = vrot.slane %v12068_v63, %v12020_v39 }
 0x1ce   :  { %3379 = vmatpush1.bf16.msra.mxu0 %v10668_v4  ;;  %3410 = vmatpush1.bf16.msra.mxu1 %v10698_v6  ;;  %v595_v4 = vrot.slane %v12068_v63, %v12008_v32 }
 0x1cf   :  { %3380 = vmatprep.subr.bf16.mxu0 %v10673_v5  ;;  %3411 = vmatprep.subr.bf16.mxu1 %v10703_v7 }
 0x1d2   :  { %3381 = vmatpush2.bf16.msra.mxu0 %v10671_v8  ;;  %3412 = vmatpush1.bf16.msra.mxu1 %v10701_v11 }
 0x1d3   :  { %3382 = vmatprep.subr.bf16.mxu0 %v10676_v9  ;;  %3413 = vmatprep.subr.bf16.mxu1 %v10706_v12 }
 0x1d6   :  { %3383 = vmatpush2.bf16.msra.mxu0 %v10674_v14  ;;  %3414 = vmatpush1.bf16.msra.mxu1 %v10704_v16 }
 0x1d7   :  { %3384 = vmatprep.subr.bf16.mxu0 %v10679_v15  ;;  %3415 = vmatprep.subr.bf16.mxu1 %v10709_v52 }
 0x1da   :  { %3385 = vmatpush2.bf16.msra.mxu0 %v10677_v57  ;;  %3416 = vmatpush1.bf16.msra.mxu1 %v10707_v18 }
 0x1db   :  { %3386 = vmatprep.subr.bf16.mxu0 %v10682_v17  ;;  %3417 = vmatprep.subr.bf16.mxu1 %v10712_v19 }
 0x1de   :  { %3387 = vmatpush2.bf16.msra.mxu0 %v10680_v21  ;;  %3418 = vmatpush1.bf16.msra.mxu1 %v10710_v23 }
 0x1df   :  { %3388 = vmatprep.subr.bf16.mxu0 %v10685_v22  ;;  %3419 = vmatprep.subr.bf16.mxu1 %v10715_v24 }
 0x1e2   :  { %3389 = vmatpush2.bf16.msra.mxu0 %v10683_v25  ;;  %3420 = vmatpush1.bf16.msra.mxu1 %v10713_v26 }
 0x1e3   :  { %3390 = vmatprep.subr.bf16.mxu0 %v10688_v13  ;;  %3421 = vmatprep.subr.bf16.mxu1 %v10718_v27 }
 0x1e6   :  { %3391 = vmatpush2.bf16.msra.mxu0 %v10686_v28  ;;  %3422 = vmatpush1.bf16.msra.mxu1 %v10716_v29  ;;  %v10761_v28 = vld [vmem:[#allocation9 + $0xc58] ss:$20 sps:$4 sm:$0xff]  }
 0x1e7   :  { %3392 = vmatprep.subr.bf16.mxu0 %v10691_v34  ;;  %3423 = vmatprep.subr.bf16.mxu1 %v10721_v35  ;;  %v10769_v35 = vld [vmem:[#allocation9 + $0xc34] ss:$20 sps:$4 sm:$0xff]  }
 0x1e9   :  { %v1691_v53 = vpop.f32.mrf.mxu1 }
 0x1ea   :  { %3393 = vmatpush2.bf16.msra.mxu0 %v10689_v36  ;;  %3424 = vmatpush2.bf16.msra.mxu1 %v10719_v37  ;;  %v1692_v11 = vadd.f32 %v1691_v53, %v595_v4  ;;  %v10767_v36 = vld [vmem:[#allocation9 + $0xc30] ss:$20 sps:$4 sm:$0xff]   ;;  %v10775_v37 = vld [vmem:[#allocation9 + $0xc0c] ss:$20 sps:$4 sm:$0xff]  }
 0x1eb   :  { %3394 = vmatprep.subr.bf16.mxu0 %v10694_v40  ;;  %3425 = vmatprep.subr.bf16.mxu1 %v10724_v41  ;;  %v1693_v56 = vpop.f32.mrf.mxu1  ;;  %v10773_v40 = vld [vmem:[#allocation9 + $0xc08] ss:$20 sps:$4 sm:$0xff]   ;;  %v10781_v41 = vld [vmem:[#allocation9 + $0xbe4] ss:$20 sps:$4 sm:$0xff]  }
 0x1ec   :  { %v1694_v8 = vadd.f32 %v1693_v56, %v599_v3  ;;  %v603_v56 = vrot.slane %v12068_v63, %v12017_v38 }
 0x1ed   :  { %v1695_v1 = vpop.f32.mrf.mxu1 }
 0x1ee   :  { %3395 = vmatpush2.bf16.msra.mxu0 %v10692_v42  ;;  %3426 = vmatpush2.bf16.msra.mxu1 %v10722_v43  ;;  %v1696_v9 = vadd.f32 %v1695_v1, %v595_v4  ;;  %v10779_v42 = vld [vmem:[#allocation9 + $0xbe0] ss:$20 sps:$4 sm:$0xff]   ;;  %v10787_v43 = vld [vmem:[#allocation9 + $0xbbc] ss:$20 sps:$4 sm:$0xff]  }
 0x1ef   :  { %3427 = vmatprep.subr.bf16.mxu1 %v10727_v44  ;;  %3450 = vmatprep.subr.bf16.mxu0 %v10763_v59  ;;  %v1697_v5 = vpop.f32.mrf.mxu1  ;;  %v10785_v44 = vld [vmem:[#allocation9 + $0xbb8] ss:$20 sps:$4 sm:$0xff]   ;;  %v10797_v59 = vld [vmem:[#allocation9 + $0xb68] ss:$20 sps:$4 sm:$0xff]  }
 0x1f0   :  { %v1698_v15 = vadd.f32 %v1697_v5, %v599_v3 }
 0x1f1   :  { %v1734_v58 = vpop.f32.mrf.mxu0 }
 0x1f2   :  { %3428 = vmatpush2.bf16.msra.mxu1 %v10725_v45  ;;  %v1735_v57 = vadd.f32 %v1734_v58, %v1692_v11  ;;  %v10793_v45 = vld [vmem:[#allocation9 + $0xb94] ss:$20 sps:$4 sm:$0xff]  }
 0x1f3   :  { %3429 = vmatprep.subr.bf16.mxu1 %v10730_v46  ;;  %v1736_v2 = vpop.f32.mrf.mxu0  ;;  %v10791_v46 = vld [vmem:[#allocation9 + $0xb90] ss:$20 sps:$4 sm:$0xff]  }
 0x1f4   :  { %v1737_v16 = vadd.f32 %v1736_v2, %v1694_v8 }
 0x1f5   :  { %v1738_v6 = vpop.f32.mrf.mxu0 }
 0x1f6   :  { %3430 = vmatpush2.bf16.msra.mxu1 %v10728_v33  ;;  %v1739_v52 = vadd.f32 %v1738_v6, %v1696_v9  ;;  %v10799_v33 = vld [vmem:[#allocation9 + $0xb6c] ss:$20 sps:$4 sm:$0xff]  }
 0x1f7   :  { %3431 = vmatprep.subr.bf16.mxu1 %v10733_v47  ;;  %v1740_v12 = vpop.f32.mrf.mxu0  ;;  %v10805_v47 = vld [vmem:[#allocation9 + $0xb44] ss:$20 sps:$4 sm:$0xff]  }
 0x1f8   :  { %v1741_v18 = vadd.f32 %v1740_v12, %v1698_v15 }
 0x1fa   :  { %3432 = vmatpush2.bf16.msra.mxu1 %v10731_v48  ;;  %v10803_v48 = vld [vmem:[#allocation9 + $0xb40] ss:$20 sps:$4 sm:$0xff]  }
 0x1fb   :  { %3433 = vmatprep.subr.bf16.mxu1 %v10736_v49  ;;  %v10811_v49 = vld [vmem:[#allocation9 + $0x9e4] ss:$20 sps:$4 sm:$0xff]  }
 0x1fe   :  { %3434 = vmatpush2.bf16.msra.mxu1 %v10734_v50 }
 0x1ff   :  { %3435 = vmatprep.subr.bf16.mxu1 %v10739_v51 }
 0x202   :  { %3436 = vmatpush2.bf16.msra.mxu1 %v10737_v10 }
 0x203   :  { %3437 = vmatprep.subr.bf16.mxu1 %v10742_v54 }
 0x206   :  { %3438 = vmatpush2.bf16.msra.mxu1 %v10740_v61 }
 0x207   :  { %3493 = vmatprep.subr.bf16.mxu1 %v10745_v62 }
 0x209   :  { %v1777_v7 = vpop.f32.mrf.mxu1 }
 0x20a   :  { %v1778_v22 = vadd.f32 %v1777_v7, %v1735_v57 }
 0x20b   :  { %v1779_v14 = vpop.f32.mrf.mxu1 }
 0x20c   :  { %v1780_v19 = vadd.f32 %v1779_v14, %v1737_v16  ;;  %v2038_v27 = vmax.f32 %v1778_v22, 0.0  ;;  %v10748_v22 = vld [vmem:[#allocation9 + $0x73c] ss:$20 sps:$4 sm:$0xff]  }
 0x20d   :  { %v1781_v17 = vpop.f32.mrf.mxu1 }
 0x20e   :  { %v1782_v21 = vadd.f32 %v1781_v17, %v1739_v52  ;;  %v2039_v13 = vmax.f32 %v1780_v19, 0.0  ;;  %v10743_v19 = vld [vmem:[#allocation9 + $0x760] ss:$20 sps:$4 sm:$0xff]  }
 0x20f   :  { %v1783_v23 = vpop.f32.mrf.mxu1 }
 0x210   :  { %v1784_v24 = vadd.f32 %v1783_v23, %v1741_v18  ;;  %v2043_v25 = vmax.f32 %v1782_v21, 0.0 }
 0x212   :  { %v2044_v26 = vmax.f32 %v1784_v24, 0.0  ;;  %v12076_v34 = vpack.c.bf16 %v2043_v25, %v2038_v27  ;;  %v10746_v25 = vld [vmem:[#allocation9 + $0x738] ss:$20 sps:$4 sm:$0xff]  }
 0x213   :  { %v10754_v27 = vld [vmem:[#allocation9 + $0x6ec] ss:$20 sps:$4 sm:$0xff]  }
 0x214   :  { %v12074_v29 = vpack.c.bf16 %v2044_v26, %v2039_v13  ;;  %v10751_v13 = vld [vmem:[#allocation9 + $0x714] ss:$20 sps:$4 sm:$0xff]   ;;  %v10749_v26 = vld [vmem:[#allocation9 + $0x710] ss:$20 sps:$4 sm:$0xff]  }
 0x216   :  { %3396 = vmatprep.mubr.bf16.mxu0 %v12074_v29 }
 0x217   :  { %3397 = vmatmul.mubr.bf16.vlgmr.msra.gmra.mxu0 %v12076_v34 }
 0x218   :  { %3451 = vmatpush1.bf16.msra.mxu0 %v10761_v28  ;;  %3482 = vmatprep.mubr.bf16.mxu0 %v11927_v0  ;;  %v10752_v28 = vld [vmem:[#allocation9 + $0x6e8] ss:$20 sps:$4 sm:$0xff]  }
 0x219   :  { %3452 = vmatprep.subr.bf16.mxu0 %v10769_v35  ;;  %v10757_v35 = vld [vmem:[#allocation9 + $0x6c4] ss:$20 sps:$4 sm:$0xff]  }
 0x21c   :  { %3453 = vmatpush1.bf16.msra.mxu0 %v10767_v36  ;;  %v10755_v36 = vld [vmem:[#allocation9 + $0x6c0] ss:$20 sps:$4 sm:$0xff]  }
 0x21d   :  { %3454 = vmatprep.subr.bf16.mxu0 %v10775_v37  ;;  %v10760_v37 = vld [vmem:[#allocation9 + $0x69c] ss:$20 sps:$4 sm:$0xff]  }
 0x220   :  { %3455 = vmatpush1.bf16.msra.mxu0 %v10773_v40  ;;  %v10758_v40 = vld [vmem:[#allocation9 + $0x698] ss:$20 sps:$4 sm:$0xff]  }
 0x221   :  { %3456 = vmatprep.subr.bf16.mxu0 %v10781_v41  ;;  %v10766_v41 = vld [vmem:[#allocation9 + $0x674] ss:$20 sps:$4 sm:$0xff]  }
 0x224   :  { %3457 = vmatpush1.bf16.msra.mxu0 %v10779_v42  ;;  %v10764_v42 = vld [vmem:[#allocation9 + $0x670] ss:$20 sps:$4 sm:$0xff]  }
 0x225   :  { %3458 = vmatprep.subr.bf16.mxu0 %v10787_v43  ;;  %v10772_v43 = vld [vmem:[#allocation9 + $0x64c] ss:$20 sps:$4 sm:$0xff]  }
 0x228   :  { %3459 = vmatpush1.bf16.msra.mxu0 %v10785_v44 }
 0x229   :  { %3460 = vmatprep.subr.bf16.mxu0 %v10793_v45  ;;  %v10770_v45 = vld [vmem:[#allocation9 + $0x648] ss:$20 sps:$4 sm:$0xff]  }
 0x22c   :  { %3461 = vmatpush1.bf16.msra.mxu0 %v10791_v46 }
 0x22d   :  { %3462 = vmatprep.subr.bf16.mxu0 %v10799_v33  ;;  %v10778_v33 = vld [vmem:[#allocation9 + $0x8a4] ss:$20 sps:$4 sm:$0xff]  }
 0x230   :  { %3463 = vmatpush1.bf16.msra.mxu0 %v10797_v59 }
 0x231   :  { %3464 = vmatprep.subr.bf16.mxu0 %v10805_v47  ;;  %v1820_v50 = vpop.f32.mrf.mxu0  ;;  %v10776_v47 = vld [vmem:[#allocation9 + $0x8a0] ss:$20 sps:$4 sm:$0xff]  }
 0x232   :  { %v1821_v2 = vadd.f32 %v1820_v50, %v603_v56 }
 0x233   :  { %v1822_v51 = vpop.f32.mrf.mxu0 }
 0x234   :  { %3465 = vmatpush1.bf16.msra.mxu0 %v10803_v48  ;;  %v1823_v62 = vadd.f32 %v1822_v51, %v607_v55  ;;  %v10782_v51 = vld [vmem:[#allocation9 + $0x878] ss:$20 sps:$4 sm:$0xff]  }
 0x235   :  { %3536 = vmatprep.subr.bf16.mxu0 %v10811_v49  ;;  %v1824_v10 = vpop.f32.mrf.mxu0  ;;  %v10784_v49 = vld [vmem:[#allocation9 + $0x87c] ss:$20 sps:$4 sm:$0xff]  }
 0x236   :  { %v1825_v1 = vadd.f32 %v1824_v10, %v603_v56  ;;  %v10790_v10 = vld [vmem:[#allocation9 + $0x854] ss:$20 sps:$4 sm:$0xff]  }
 0x237   :  { %v1826_v58 = vpop.f32.mrf.mxu0 }
 0x238   :  { %v1827_v5 = vadd.f32 %v1826_v58, %v607_v55  ;;  %v611_v55 = vrot.slane %v12068_v63, %v12040_v20  ;;  %v10788_v58 = vld [vmem:[#allocation9 + $0x850] ss:$20 sps:$4 sm:$0xff]  }
 0x249   :  { %v1863_v53 = vpop.f32.mrf.mxu1 }
 0x24a   :  { %v1864_v8 = vadd.f32 %v1863_v53, %v1821_v2 }
 0x24b   :  { %v1865_v54 = vpop.f32.mrf.mxu1 }
 0x24c   :  { %v1866_v6 = vadd.f32 %v1865_v54, %v1823_v62 }
 0x24d   :  { %v1867_v60 = vpop.f32.mrf.mxu1 }
 0x24e   :  { %v1868_v7 = vadd.f32 %v1867_v60, %v1825_v1 }
 0x24f   :  { %v1869_v3 = vpop.f32.mrf.mxu1 }
 0x250   :  { %v1870_v11 = vadd.f32 %v1869_v3, %v1827_v5 }
 0x251   :  { %v1906_v61 = vpop.f32.mrf.mxu0 }
 0x252   :  { %v1907_v15 = vadd.f32 %v1906_v61, %v1864_v8  ;;  %v10796_v61 = vld [vmem:[#allocation9 + $0x82c] ss:$20 sps:$4 sm:$0xff]  }
 0x253   :  { %v1908_v4 = vpop.f32.mrf.mxu0 }
 0x254   :  { %v1909_v12 = vadd.f32 %v1908_v4, %v1866_v6  ;;  %v2040_v21 = vmax.f32 %v1907_v15, 0.0  ;;  %v10794_v4 = vld [vmem:[#allocation9 + $0x828] ss:$20 sps:$4 sm:$0xff]   ;;  %v10802_v6 = vld [vmem:[#allocation9 + $0x804] ss:$20 sps:$4 sm:$0xff]  }
 0x255   :  { %v1910_v9 = vpop.f32.mrf.mxu0  ;;  %v10808_v15 = vld [vmem:[#allocation9 + $0x7dc] ss:$20 sps:$4 sm:$0xff]  }
 0x256   :  { %v1911_v14 = vadd.f32 %v1910_v9, %v1868_v7  ;;  %v2041_v17 = vmax.f32 %v1909_v12, 0.0  ;;  %v10800_v12 = vld [vmem:[#allocation9 + $0x800] ss:$20 sps:$4 sm:$0xff]  }
 0x257   :  { %v1912_v16 = vpop.f32.mrf.mxu0 }
 0x258   :  { %v1913_v52 = vadd.f32 %v1912_v16, %v1870_v11  ;;  %v2045_v57 = vmax.f32 %v1911_v14, 0.0 }
 0x25a   :  { %v2046_v18 = vmax.f32 %v1913_v52, 0.0  ;;  %v12087_v24 = vpack.c.bf16 %v2045_v57, %v2040_v21 }
 0x25c   :  { %v12085_v23 = vpack.c.bf16 %v2046_v18, %v2041_v17  ;;  %v10806_v18 = vld [vmem:[#allocation9 + $0x7d8] ss:$20 sps:$4 sm:$0xff]  }
 0x25e   :  { %3439 = vmatprep.mubr.bf16.mxu1 %v12085_v23 }
 0x25f   :  { %3440 = vmatmul.mubr.bf16.vlgmr.msra.gmra.mxu1 %v12087_v24 }
 0x260   :  { %3494 = vmatpush1.bf16.msra.mxu1 %v10743_v19  ;;  %3525 = vmatprep.mubr.bf16.mxu1 %v12074_v29  ;;  %v10809_v19 = vld [vmem:[#allocation9 + $0x9e0] ss:$20 sps:$4 sm:$0xff]  }
 0x261   :  { %3495 = vmatprep.subr.bf16.mxu1 %v10748_v22  ;;  %v10814_v22 = vld [vmem:[#allocation9 + $0x7b4] ss:$20 sps:$4 sm:$0xff]  }
 0x264   :  { %3496 = vmatpush1.bf16.msra.mxu1 %v10746_v25  ;;  %v10817_v25 = vld [vmem:[#allocation9 + $0x9bc] ss:$20 sps:$4 sm:$0xff]  }
 0x265   :  { %3497 = vmatprep.subr.bf16.mxu1 %v10751_v13  ;;  %v10812_v13 = vld [vmem:[#allocation9 + $0x7b0] ss:$20 sps:$4 sm:$0xff]  }
 0x268   :  { %3498 = vmatpush1.bf16.msra.mxu1 %v10749_v26  ;;  %v10815_v26 = vld [vmem:[#allocation9 + $0x9b8] ss:$20 sps:$4 sm:$0xff]  }
 0x269   :  { %3499 = vmatprep.subr.bf16.mxu1 %v10754_v27  ;;  %v9983_v44 = vpop.f32.mrf.mxu1  ;;  %v10820_v27 = vld [vmem:[#allocation9 + $0x78c] ss:$20 sps:$4 sm:$0xff]  }
 0x26b   :  { %v9984_v59 = vpop.f32.mrf.mxu1 }
 0x26c   :  { %3500 = vmatpush1.bf16.msra.mxu1 %v10752_v28  ;;  %v9985_v56 = vadd.f32 %v9984_v59, %v9983_v44  ;;  %v10823_v28 = vld [vmem:[#allocation9 + $0x994] ss:$20 sps:$4 sm:$0xff]   ;;  %v10835_v44 = vld [vmem:[#allocation9 + $0x944] ss:$20 sps:$4 sm:$0xff]   ;;  %v10841_v59 = vld [vmem:[#allocation9 + $0x91c] ss:$20 sps:$4 sm:$0xff]  }
 0x26d   :  { %3501 = vmatprep.subr.bf16.mxu1 %v10757_v35  ;;  %v9986_v50 = vpop.f32.mrf.mxu1  ;;  %v10818_v35 = vld [vmem:[#allocation9 + $0x788] ss:$20 sps:$4 sm:$0xff]  }
 0x26e   :  { %v1950_v2 = vadd.f32 %v9985_v56, %v611_v55  ;;  %v10851_v56 = vld [vmem:[#allocation9 + $0x8c8] ss:$20 sps:$4 sm:$0xff]  }
 0x26f   :  { %v9987_v54 = vpop.f32.mrf.mxu1 }
 0x270   :  { %3502 = vmatpush1.bf16.msra.mxu1 %v10755_v36  ;;  %v9988_v62 = vadd.f32 %v9987_v54, %v9986_v50  ;;  %v10821_v36 = vld [vmem:[#allocation9 + $0x990] ss:$20 sps:$4 sm:$0xff]   ;;  %v10847_v50 = vld [vmem:[#allocation9 + $0x8f4] ss:$20 sps:$4 sm:$0xff]   ;;  %v10853_v54 = vld [vmem:[#allocation9 + $0x8cc] ss:$20 sps:$4 sm:$0xff]  }
 0x271   :  { %3503 = vmatprep.subr.bf16.mxu1 %v10760_v37  ;;  %v10005_v46 = vpop.f32.mrf.mxu0  ;;  %v10826_v37 = vld [vmem:[#allocation9 + $0xc64] ss:$20 sps:$4 sm:$0xff]  }
 0x272   :  { %v1953_v7 = vadd.f32 %v9988_v62, %v611_v55  ;;  %v10848_v55 = vld [vmem:[#allocation9 + $0xbc0] ss:$20 sps:$4 sm:$0xff]  }
 0x273   :  { %v10006_v48 = vpop.f32.mrf.mxu0  ;;  %v10857_v62 = vld [vmem:[#allocation9 + $0xb20] ss:$20 sps:$4 sm:$0xff]  }
 0x274   :  { %3504 = vmatpush1.bf16.msra.mxu1 %v10758_v40  ;;  %v10007_v1 = vadd.f32 %v10006_v48, %v10005_v46  ;;  %v10829_v40 = vld [vmem:[#allocation9 + $0x96c] ss:$20 sps:$4 sm:$0xff]  }
 0x275   :  { %3505 = vmatprep.subr.bf16.mxu1 %v10766_v41  ;;  %v10008_v53 = vpop.f32.mrf.mxu0  ;;  %v10824_v41 = vld [vmem:[#allocation9 + $0xc60] ss:$20 sps:$4 sm:$0xff]   ;;  %v10839_v48 = vld [vmem:[#allocation9 + $0x918] ss:$20 sps:$4 sm:$0xff]  }
 0x276   :  { %v1991_v8 = vadd.f32 %v10007_v1, %v1950_v2  ;;  %v10833_v46 = vld [vmem:[#allocation9 + $0x940] ss:$20 sps:$4 sm:$0xff]   ;;  %v10865_v2 = vld [vmem:[#allocation9 + $0xafc] ss:$20 sps:$4 sm:$0xff]  }
 0x277   :  { %v10009_v60 = vpop.f32.mrf.mxu0  ;;  %v10862_v1 = vld [vmem:[#allocation9 + $0xb74] ss:$20 sps:$4 sm:$0xff]  }
 0x278   :  { %3506 = vmatpush1.bf16.msra.mxu1 %v10764_v42  ;;  %v10010_v3 = vadd.f32 %v10009_v60, %v10008_v53  ;;  %v10827_v42 = vld [vmem:[#allocation9 + $0x968] ss:$20 sps:$4 sm:$0xff]   ;;  %v10845_v53 = vld [vmem:[#allocation9 + $0x8f0] ss:$20 sps:$4 sm:$0xff]  }
 0x279   :  { %3507 = vmatprep.subr.bf16.mxu1 %v10772_v43  ;;  %v10832_v43 = vld [vmem:[#allocation9 + $0xc3c] ss:$20 sps:$4 sm:$0xff]   ;;  %v10859_v60 = vld [vmem:[#allocation9 + $0xb24] ss:$20 sps:$4 sm:$0xff]  }
 0x27a   :  { %v1994_v63 = vadd.f32 %v10010_v3, %v1953_v7  ;;  %v10860_v3 = vld [vmem:[#allocation9 + $0xb70] ss:$20 sps:$4 sm:$0xff]   ;;  %v10866_v7 = vld [vmem:[#allocation9 + $0xb48] ss:$20 sps:$4 sm:$0xff]  }
 0x27c   :  { %3508 = vmatpush1.bf16.msra.mxu1 %v10770_v45  ;;  %v10830_v45 = vld [vmem:[#allocation9 + $0xc38] ss:$20 sps:$4 sm:$0xff]  }
 0x27d   :  { %3509 = vmatprep.subr.bf16.mxu1 %v10778_v33  ;;  %v10838_v33 = vld [vmem:[#allocation9 + $0xc14] ss:$20 sps:$4 sm:$0xff]  }
 0x280   :  { %3510 = vmatpush2.bf16.msra.mxu1 %v10776_v47  ;;  %v10836_v47 = vld [vmem:[#allocation9 + $0xc10] ss:$20 sps:$4 sm:$0xff]  }
 0x281   :  { %3511 = vmatprep.subr.bf16.mxu1 %v10784_v49  ;;  %v10844_v49 = vld [vmem:[#allocation9 + $0xbec] ss:$20 sps:$4 sm:$0xff]  }
 0x284   :  { %3512 = vmatpush2.bf16.msra.mxu1 %v10782_v51  ;;  %v10842_v51 = vld [vmem:[#allocation9 + $0xbe8] ss:$20 sps:$4 sm:$0xff]  }
 0x285   :  { %3513 = vmatprep.subr.bf16.mxu1 %v10790_v10  ;;  %v10850_v10 = vld [vmem:[#allocation9 + $0xbc4] ss:$20 sps:$4 sm:$0xff]  }
 0x288   :  { %3514 = vmatpush2.bf16.msra.mxu1 %v10788_v58  ;;  %v10856_v58 = vld [vmem:[#allocation9 + $0xb9c] ss:$20 sps:$4 sm:$0xff]  }
 0x289   :  { %v2031_v5 = vpop.f32.mrf.mxu1  ;;  %3515 = vmatprep.subr.bf16.mxu1 %v10796_v61  ;;  %v10854_v61 = vld [vmem:[#allocation9 + $0xb98] ss:$20 sps:$4 sm:$0xff]  }
 0x28a   :  { %v2032_v11 = vadd.f32 %v2031_v5, %v1991_v8  ;;  %v10868_v5 = vld [vmem:[#allocation9 + $0xb4c] ss:$20 sps:$4 sm:$0xff]   ;;  %v10869_v8 = vld [vmem:[#allocation9 + $0xad0] ss:$20 sps:$4 sm:$0xff]  }
 0x28b   :  { %v10258_v9 = vpop.f32.mrf.mxu1 }
 0x28c   :  { %3516 = vmatpush2.bf16.msra.mxu1 %v10794_v4  ;;  %v2042_v57 = vmax.f32 %v2032_v11, 0.0  ;;  %v10863_v4 = vld [vmem:[#allocation9 + $0xaf8] ss:$20 sps:$4 sm:$0xff]   ;;  %v10872_v9 = vld [vmem:[#allocation9 + $0xb28] ss:$20 sps:$4 sm:$0xff]  }
 0x28d   :  { %v2034_v14 = vpop.f32.mrf.mxu1  ;;  %3517 = vmatprep.subr.bf16.mxu1 %v10802_v6  ;;  %v10871_v6 = vld [vmem:[#allocation9 + $0xad4] ss:$20 sps:$4 sm:$0xff]   ;;  %v10875_v11 = vld [vmem:[#allocation9 + $0xaac] ss:$20 sps:$4 sm:$0xff]  }
 0x28e   :  { %v2035_v16 = vadd.f32 %v2034_v14, %v1994_v63  ;;  %v10876_v63 = vld [vmem:[#allocation9 + $0x9e8] ss:$20 sps:$4 sm:$0xff]   ;;  %v10877_v14 = vld [vmem:[#allocation9 + $0xb00] ss:$20 sps:$4 sm:$0xff]  }
 0x28f   :  { %v10259_v52 = vpop.f32.mrf.mxu1 }
 0x290   :  { %v2047_v17 = vmax.f32 %v2035_v16, 0.0  ;;  %3518 = vmatpush2.bf16.msra.mxu1 %v10800_v12  ;;  %v10873_v12 = vld [vmem:[#allocation9 + $0xaa8] ss:$20 sps:$4 sm:$0xff]   ;;  %v10881_v16 = vld [vmem:[#allocation9 + $0x9c0] ss:$20 sps:$4 sm:$0xff]  }
 0x291   :  { %3519 = vmatprep.subr.bf16.mxu1 %v10808_v15  ;;  %v10880_v15 = vld [vmem:[#allocation9 + $0xa84] ss:$20 sps:$4 sm:$0xff]   ;;  %v10878_v52 = vld [vmem:[#allocation9 + $0xa80] ss:$20 sps:$4 sm:$0xff]  }
 0x292   :  { %v12094_v21 = vpack.c.bf16 %v2047_v17, %v2042_v57  ;;  %v10882_v57 = vld [vmem:[#allocation9 + $0xad8] ss:$20 sps:$4 sm:$0xff]   ;;  %v10885_v17 = vld [vmem:[#allocation9 + $0xa5c] ss:$20 sps:$4 sm:$0xff]  }
 0x294   :  { %3520 = vmatpush2.bf16.msra.mxu1 %v10806_v18  ;;  %3483 = vmatmul.mubr.bf16.vlgmr.msra.gmra.mxu0 %v12094_v21  ;;  %v10886_v18 = vld [vmem:[#allocation9 + $0x998] ss:$20 sps:$4 sm:$0xff]  }
 0x295   :  { %3537 = vmatpush1.bf16.msra.mxu0 %v10809_v19  ;;  %3568 = vmatprep.mubr.bf16.mxu0 %v12085_v23  ;;  %v10883_v19 = vld [vmem:[#allocation9 + $0xa58] ss:$20 sps:$4 sm:$0xff]  }
 0x296   :  { %3521 = vmatprep.subr.bf16.mxu1 %v10814_v22  ;;  %3538 = vmatprep.subr.bf16.mxu0 %v10817_v25  ;;  %v10887_v22 = vld [vmem:[#allocation9 + $0xab0] ss:$20 sps:$4 sm:$0xff]   ;;  %v10890_v25 = vld [vmem:[#allocation9 + $0xa34] ss:$20 sps:$4 sm:$0xff]  }
 0x298   :  { %3522 = vmatpush2.bf16.msra.mxu1 %v10812_v13  ;;  %v10891_v13 = vld [vmem:[#allocation9 + $0x970] ss:$20 sps:$4 sm:$0xff]  }
 0x299   :  { %3539 = vmatpush1.bf16.msra.mxu0 %v10815_v26  ;;  %3523 = vmatprep.subr.bf16.mxu1 %v10820_v27  ;;  %v10892_v26 = vld [vmem:[#allocation9 + $0xa88] ss:$20 sps:$4 sm:$0xff]   ;;  %v10895_v27 = vld [vmem:[#allocation9 + $0xa0c] ss:$20 sps:$4 sm:$0xff]  }
 0x29a   :  { %3540 = vmatprep.subr.bf16.mxu0 %v10823_v28  ;;  %v10896_v28 = vld [vmem:[#allocation9 + $0x948] ss:$20 sps:$4 sm:$0xff]  }
 0x29c   :  { %3524 = vmatpush2.bf16.msra.mxu1 %v10818_v35  ;;  %v10893_v35 = vld [vmem:[#allocation9 + $0xa08] ss:$20 sps:$4 sm:$0xff]  }
 0x29d   :  { %3541 = vmatpush1.bf16.msra.mxu0 %v10821_v36  ;;  %3579 = vmatprep.subr.bf16.mxu1 %v10826_v37  ;;  %v10897_v36 = vld [vmem:[#allocation9 + $0xa60] ss:$20 sps:$4 sm:$0xff]   ;;  %v10898_v37 = vld [vmem:[#allocation9 + $0x8a8] ss:$20 sps:$4 sm:$0xff]  }
 0x29e   :  { %3542 = vmatprep.subr.bf16.mxu0 %v10829_v40  ;;  %v10899_v40 = vld [vmem:[#allocation9 + $0x920] ss:$20 sps:$4 sm:$0xff]  }
 0x29f   :  { %3526 = vmatmul.mubr.bf16.vlgmr.msra.gmra.mxu1 %v12076_v34 }
 0x2a0   :  { %3580 = vmatpush1.bf16.msra.mxu1 %v10824_v41  ;;  %3611 = vmatprep.mubr.bf16.mxu1 %v11927_v0  ;;  %v10900_v41 = vld [vmem:[#allocation9 + $0x768] ss:$20 sps:$4 sm:$0xff]  }
 0x2a1   :  { %3543 = vmatpush1.bf16.msra.mxu0 %v10827_v42  ;;  %3581 = vmatprep.subr.bf16.mxu1 %v10832_v43  ;;  %v10901_v42 = vld [vmem:[#allocation9 + $0xa38] ss:$20 sps:$4 sm:$0xff]   ;;  %v10902_v43 = vld [vmem:[#allocation9 + $0x880] ss:$20 sps:$4 sm:$0xff]  }
 0x2a2   :  { %3544 = vmatprep.subr.bf16.mxu0 %v10835_v44  ;;  %v10903_v44 = vld [vmem:[#allocation9 + $0x8f8] ss:$20 sps:$4 sm:$0xff]  }
 0x2a4   :  { %3582 = vmatpush1.bf16.msra.mxu1 %v10830_v45  ;;  %v10904_v45 = vld [vmem:[#allocation9 + $0x740] ss:$20 sps:$4 sm:$0xff]  }
 0x2a5   :  { %3545 = vmatpush1.bf16.msra.mxu0 %v10833_v46  ;;  %3583 = vmatprep.subr.bf16.mxu1 %v10838_v33  ;;  %v10905_v46 = vld [vmem:[#allocation9 + $0xa10] ss:$20 sps:$4 sm:$0xff]   ;;  %v10906_v33 = vld [vmem:[#allocation9 + $0x858] ss:$20 sps:$4 sm:$0xff]  }
 0x2a6   :  { %3546 = vmatprep.subr.bf16.mxu0 %v10841_v59  ;;  %v10907_v59 = vld [vmem:[#allocation9 + $0x8d0] ss:$20 sps:$4 sm:$0xff]  }
 0x2a8   :  { %3584 = vmatpush1.bf16.msra.mxu1 %v10836_v47  ;;  %v10908_v47 = vld [vmem:[#allocation9 + $0x718] ss:$20 sps:$4 sm:$0xff]  }
 0x2a9   :  { %3547 = vmatpush1.bf16.msra.mxu0 %v10839_v48  ;;  %3585 = vmatprep.subr.bf16.mxu1 %v10844_v49  ;;  %v10929_v48 = vld [vmem:[#allocation9 + $0xd9c] ss:$20 sps:$4 sm:$0xff]  }
 0x2aa   :  { %3548 = vmatprep.subr.bf16.mxu0 %v10847_v50  ;;  %v10909_v49 = vld [vmem:[#allocation9 + $0x830] ss:$20 sps:$4 sm:$0xff]   ;;  %v10927_v50 = vld [vmem:[#allocation9 + $0xd98] ss:$20 sps:$4 sm:$0xff]  }
 0x2ac   :  { %3586 = vmatpush1.bf16.msra.mxu1 %v10842_v51  ;;  %v10910_v51 = vld [vmem:[#allocation9 + $0x6f0] ss:$20 sps:$4 sm:$0xff]  }
 0x2ad   :  { %3549 = vmatpush1.bf16.msra.mxu0 %v10845_v53  ;;  %3587 = vmatprep.subr.bf16.mxu1 %v10850_v10  ;;  %v10932_v53 = vld [vmem:[#allocation9 + $0xd74] ss:$20 sps:$4 sm:$0xff]   ;;  %v10930_v10 = vld [vmem:[#allocation9 + $0xd70] ss:$20 sps:$4 sm:$0xff]  }
 0x2ae   :  { %3550 = vmatprep.subr.bf16.mxu0 %v10853_v54  ;;  %v10912_v54 = vld [vmem:[#allocation9 + $0x6c8] ss:$20 sps:$4 sm:$0xff]  }
 0x2b0   :  { %3588 = vmatpush1.bf16.msra.mxu1 %v10848_v55  ;;  %v10935_v55 = vld [vmem:[#allocation9 + $0xd4c] ss:$20 sps:$4 sm:$0xff]  }
 0x2b1   :  { %3551 = vmatpush1.bf16.msra.mxu0 %v10851_v56  ;;  %3589 = vmatprep.subr.bf16.mxu1 %v10856_v58  ;;  %v10913_v56 = vld [vmem:[#allocation9 + $0x7e0] ss:$20 sps:$4 sm:$0xff]   ;;  %v10933_v58 = vld [vmem:[#allocation9 + $0xd48] ss:$20 sps:$4 sm:$0xff]  }
 0x2b2   :  { %3552 = vmatprep.subr.bf16.mxu0 %v10859_v60  ;;  %v10914_v60 = vld [vmem:[#allocation9 + $0x6a0] ss:$20 sps:$4 sm:$0xff]  }
 0x2b4   :  { %3590 = vmatpush1.bf16.msra.mxu1 %v10854_v61  ;;  %v10938_v61 = vld [vmem:[#allocation9 + $0xd24] ss:$20 sps:$4 sm:$0xff]  }
 0x2b5   :  { %3553 = vmatpush2.bf16.msra.mxu0 %v10857_v62  ;;  %3591 = vmatprep.subr.bf16.mxu1 %v10862_v1  ;;  %v10915_v62 = vld [vmem:[#allocation9 + $0x7b8] ss:$20 sps:$4 sm:$0xff]   ;;  %v10936_v1 = vld [vmem:[#allocation9 + $0xd20] ss:$20 sps:$4 sm:$0xff]  }
 0x2b6   :  { %3554 = vmatprep.subr.bf16.mxu0 %v10865_v2  ;;  %v10941_v2 = vld [vmem:[#allocation9 + $0xcfc] ss:$20 sps:$4 sm:$0xff]  }
 0x2b8   :  { %3592 = vmatpush1.bf16.msra.mxu1 %v10860_v3  ;;  %v10917_v3 = vld [vmem:[#allocation9 + $0x790] ss:$20 sps:$4 sm:$0xff]  }
 0x2b9   :  { %3555 = vmatpush2.bf16.msra.mxu0 %v10863_v4  ;;  %3593 = vmatprep.subr.bf16.mxu1 %v10868_v5  ;;  %v10939_v4 = vld [vmem:[#allocation9 + $0xcf8] ss:$20 sps:$4 sm:$0xff]   ;;  %v10918_v5 = vld [vmem:[#allocation9 + $0x650] ss:$20 sps:$4 sm:$0xff]  }
 0x2ba   :  { %3556 = vmatprep.subr.bf16.mxu0 %v10871_v6  ;;  %v10944_v6 = vld [vmem:[#allocation9 + $0xcd4] ss:$20 sps:$4 sm:$0xff]  }
 0x2bc   :  { %3594 = vmatpush1.bf16.msra.mxu1 %v10866_v7  ;;  %v10942_v7 = vld [vmem:[#allocation9 + $0xcd0] ss:$20 sps:$4 sm:$0xff]  }
 0x2bd   :  { %3557 = vmatpush2.bf16.msra.mxu0 %v10869_v8  ;;  %10042 = vmatprep.subr.bf16.mxu1 %v10872_v9  ;;  %v10919_v8 = vld [vmem:[#allocation9 + $0xc68] ss:$20 sps:$4 sm:$0xff]   ;;  %v10947_v9 = vld [vmem:[#allocation9 + $0xcac] ss:$20 sps:$4 sm:$0xff]  }
 0x2be   :  { %3558 = vmatprep.subr.bf16.mxu0 %v10875_v11  ;;  %v10945_v11 = vld [vmem:[#allocation9 + $0xca8] ss:$20 sps:$4 sm:$0xff]  }
 0x2bf   :  { %3612 = vmatmul.mubr.bf16.vlgmr.msra.gmra.mxu1 %v12094_v21 }
 0x2c0   :  { %10043 = vmatpush3.bf16.msra.mxu1 %v10876_v63  ;;  %3695 = vmatprep.mubr.bf16.mxu1 %v12085_v23  ;;  %v10888_v23 = vld [vmem:[#allocation9 + $0xa30] ss:$20 sps:$4 sm:$0xff]   ;;  %v10920_v63 = vld [vmem:[#allocation9 + $0xc40] ss:$20 sps:$4 sm:$0xff]  }
 0x2c1   :  { %3559 = vmatpush2.bf16.msra.mxu0 %v10873_v12  ;;  %10044 = vmatprep.subr.bf16.mxu1 %v10877_v14  ;;  %v10950_v12 = vld [vmem:[#allocation9 + $0xc84] ss:$20 sps:$4 sm:$0xff]   ;;  %v10948_v14 = vld [vmem:[#allocation9 + $0xc80] ss:$20 sps:$4 sm:$0xff]  }
 0x2c2   :  { %3560 = vmatprep.subr.bf16.mxu0 %v10880_v15  ;;  %v10921_v15 = vld [vmem:[#allocation9 + $0xc18] ss:$20 sps:$4 sm:$0xff]  }
 0x2c4   :  { %10045 = vmatpush3.bf16.msra.mxu1 %v10881_v16  ;;  %v10953_v16 = vld [vmem:[#allocation9 + $0xedc] ss:$20 sps:$4 sm:$0xff]  }
 0x2c5   :  { %3561 = vmatpush2.bf16.msra.mxu0 %v10878_v52  ;;  %10046 = vmatprep.subr.bf16.mxu1 %v10882_v57  ;;  %v10922_v52 = vld [vmem:[#allocation9 + $0xbf0] ss:$20 sps:$4 sm:$0xff]   ;;  %v10956_v57 = vld [vmem:[#allocation9 + $0xeb4] ss:$20 sps:$4 sm:$0xff]  }
 0x2c6   :  { %3562 = vmatprep.subr.bf16.mxu0 %v10885_v17  ;;  %v10954_v17 = vld [vmem:[#allocation9 + $0xeb0] ss:$20 sps:$4 sm:$0xff]  }
 0x2c8   :  { %10047 = vmatpush3.bf16.msra.mxu1 %v10886_v18  ;;  %v10923_v18 = vld [vmem:[#allocation9 + $0xbc8] ss:$20 sps:$4 sm:$0xff]  }
 0x2c9   :  { %3563 = vmatpush2.bf16.msra.mxu0 %v10883_v19  ;;  %10048 = vmatprep.subr.bf16.mxu1 %v10887_v22  ;;  %v10959_v19 = vld [vmem:[#allocation9 + $0xe8c] ss:$20 sps:$4 sm:$0xff]   ;;  %v10957_v22 = vld [vmem:[#allocation9 + $0xe88] ss:$20 sps:$4 sm:$0xff]  }
 0x2ca   :  { %3564 = vmatprep.subr.bf16.mxu0 %v10890_v25  ;;  %v10924_v25 = vld [vmem:[#allocation9 + $0xba0] ss:$20 sps:$4 sm:$0xff]  }
 0x2cc   :  { %10049 = vmatpush3.bf16.msra.mxu1 %v10891_v13  ;;  %v10962_v13 = vld [vmem:[#allocation9 + $0xe64] ss:$20 sps:$4 sm:$0xff]  }
 0x2cd   :  { %3565 = vmatpush2.bf16.msra.mxu0 %v10888_v23  ;;  %10050 = vmatprep.subr.bf16.mxu1 %v10892_v26  ;;  %v10960_v23 = vld [vmem:[#allocation9 + $0xe60] ss:$20 sps:$4 sm:$0xff]   ;;  %v10925_v26 = vld [vmem:[#allocation9 + $0xb78] ss:$20 sps:$4 sm:$0xff]  }
 0x2ce   :  { %3566 = vmatprep.subr.bf16.mxu0 %v10895_v27  ;;  %v10965_v27 = vld [vmem:[#allocation9 + $0xe3c] ss:$20 sps:$4 sm:$0xff]  }
 0x2d0   :  { %10051 = vmatpush3.bf16.msra.mxu1 %v10896_v28  ;;  %v10963_v28 = vld [vmem:[#allocation9 + $0xe38] ss:$20 sps:$4 sm:$0xff]  }
 0x2d1   :  { %3567 = vmatpush2.bf16.msra.mxu0 %v10893_v35  ;;  %10052 = vmatprep.subr.bf16.mxu1 %v10897_v36  ;;  %v10926_v35 = vld [vmem:[#allocation9 + $0xb50] ss:$20 sps:$4 sm:$0xff]   ;;  %v10968_v36 = vld [vmem:[#allocation9 + $0xe14] ss:$20 sps:$4 sm:$0xff]  }
 0x2d2   :  { %10020 = vmatprep.subr.bf16.mxu0 %v10898_v37  ;;  %v10977_v37 = vld [vmem:[#allocation9 + $0x101c] ss:$20 sps:$4 sm:$0xff]  }
 0x2d4   :  { %3569 = vmatmul.mubr.bf16.vlgmr.msra.gmra.mxu0 %v12087_v24  ;;  %10053 = vmatpush3.bf16.msra.mxu1 %v10899_v40  ;;  %v10966_v40 = vld [vmem:[#allocation9 + $0xe10] ss:$20 sps:$4 sm:$0xff]  }
 0x2d5   :  { %10021 = vmatpush3.bf16.msra.mxu0 %v10900_v41  ;;  %3654 = vmatprep.mubr.bf16.mxu0 %v12074_v29  ;;  %v10911_v29 = vld [vmem:[#allocation9 + $0x808] ss:$20 sps:$4 sm:$0xff]   ;;  %v10971_v41 = vld [vmem:[#allocation9 + $0xdec] ss:$20 sps:$4 sm:$0xff]  }
 0x2d6   :  { %10054 = vmatprep.subr.bf16.mxu1 %v10901_v42  ;;  %10022 = vmatprep.subr.bf16.mxu0 %v10902_v43  ;;  %v10975_v42 = vld [vmem:[#allocation9 + $0x1018] ss:$20 sps:$4 sm:$0xff]   ;;  %v10980_v43 = vld [vmem:[#allocation9 + $0xff4] ss:$20 sps:$4 sm:$0xff]  }
 0x2d8   :  { %10055 = vmatpush3.bf16.msra.mxu1 %v10903_v44  ;;  %v10969_v44 = vld [vmem:[#allocation9 + $0xde8] ss:$20 sps:$4 sm:$0xff]  }
 0x2d9   :  { %10023 = vmatpush3.bf16.msra.mxu0 %v10904_v45  ;;  %10056 = vmatprep.subr.bf16.mxu1 %v10905_v46  ;;  %v10974_v45 = vld [vmem:[#allocation9 + $0xdc4] ss:$20 sps:$4 sm:$0xff]  }
 0x2da   :  { %10024 = vmatprep.subr.bf16.mxu0 %v10906_v33  ;;  %v10978_v46 = vld [vmem:[#allocation9 + $0xff0] ss:$20 sps:$4 sm:$0xff]   ;;  %v10983_v33 = vld [vmem:[#allocation9 + $0xfcc] ss:$20 sps:$4 sm:$0xff]  }
 0x2dc   :  { %10057 = vmatpush3.bf16.msra.mxu1 %v10907_v59  ;;  %v10972_v59 = vld [vmem:[#allocation9 + $0xdc0] ss:$20 sps:$4 sm:$0xff]  }
 0x2dd   :  { %10025 = vmatpush3.bf16.msra.mxu0 %v10908_v47  ;;  %5071 = vmatprep.subr.bf16.mxu1 %v10929_v48  ;;  %v10981_v47 = vld [vmem:[#allocation9 + $0xfc8] ss:$20 sps:$4 sm:$0xff]   ;;  %v10986_v48 = vld [vmem:[#allocation9 + $0xfa4] ss:$20 sps:$4 sm:$0xff]  }
 0x2de   :  { %10026 = vmatprep.subr.bf16.mxu0 %v10909_v49  ;;  %v10984_v49 = vld [vmem:[#allocation9 + $0xfa0] ss:$20 sps:$4 sm:$0xff]  }
 0x2df   :  { %3696 = vmatmul.mubr.bf16.vlgmr.msra.gmra.mxu1 %v12087_v24  ;;  %v10916_v24 = vld [vmem:[#allocation9 + $0x678] ss:$20 sps:$4 sm:$0xff]  }
 0x2e0   :  { %5072 = vmatpush1.bf16.msra.mxu1 %v10927_v50  ;;  %v10987_v50 = vld [vmem:[#allocation9 + $0xf78] ss:$20 sps:$4 sm:$0xff]  }
 0x2e1   :  { %10027 = vmatpush3.bf16.msra.mxu0 %v10910_v51  ;;  %5073 = vmatprep.subr.bf16.mxu1 %v10932_v53  ;;  %v10992_v51 = vld [vmem:[#allocation9 + $0xf54] ss:$20 sps:$4 sm:$0xff]   ;;  %v10990_v53 = vld [vmem:[#allocation9 + $0xf50] ss:$20 sps:$4 sm:$0xff]  }
 0x2e2   :  { %10028 = vmatprep.subr.bf16.mxu0 %v10911_v29  ;;  %v10995_v29 = vld [vmem:[#allocation9 + $0xf2c] ss:$20 sps:$4 sm:$0xff]  }
 0x2e4   :  { %5074 = vmatpush1.bf16.msra.mxu1 %v10930_v10  ;;  %v10993_v10 = vld [vmem:[#allocation9 + $0xf28] ss:$20 sps:$4 sm:$0xff]  }
 0x2e5   :  { %10029 = vmatpush3.bf16.msra.mxu0 %v10912_v54  ;;  %5075 = vmatprep.subr.bf16.mxu1 %v10935_v55  ;;  %v10998_v54 = vld [vmem:[#allocation9 + $0xf04] ss:$20 sps:$4 sm:$0xff]   ;;  %v10996_v55 = vld [vmem:[#allocation9 + $0xf00] ss:$20 sps:$4 sm:$0xff]  }
 0x2e6   :  { %10030 = vmatprep.subr.bf16.mxu0 %v10913_v56  ;;  %v11001_v56 = vld [vmem:[#allocation9 + $0x115c] ss:$20 sps:$4 sm:$0xff]  }
 0x2e8   :  { %5076 = vmatpush1.bf16.msra.mxu1 %v10933_v58  ;;  %v10999_v58 = vld [vmem:[#allocation9 + $0x1158] ss:$20 sps:$4 sm:$0xff]  }
 0x2e9   :  { %10031 = vmatpush3.bf16.msra.mxu0 %v10914_v60  ;;  %5077 = vmatprep.subr.bf16.mxu1 %v10938_v61  ;;  %v11004_v60 = vld [vmem:[#allocation9 + $0x1134] ss:$20 sps:$4 sm:$0xff]   ;;  %v11002_v61 = vld [vmem:[#allocation9 + $0x1130] ss:$20 sps:$4 sm:$0xff]  }
 0x2ea   :  { %10032 = vmatprep.subr.bf16.mxu0 %v10915_v62  ;;  %v11007_v62 = vld [vmem:[#allocation9 + $0x110c] ss:$20 sps:$4 sm:$0xff]  }
 0x2ec   :  { %5078 = vmatpush1.bf16.msra.mxu1 %v10936_v1  ;;  %v11005_v1 = vld [vmem:[#allocation9 + $0x1108] ss:$20 sps:$4 sm:$0xff]  }
 0x2ed   :  { %10033 = vmatpush3.bf16.msra.mxu0 %v10916_v24  ;;  %5079 = vmatprep.subr.bf16.mxu1 %v10941_v2  ;;  %v11010_v24 = vld [vmem:[#allocation9 + $0x10e4] ss:$20 sps:$4 sm:$0xff]   ;;  %v11008_v2 = vld [vmem:[#allocation9 + $0x10e0] ss:$20 sps:$4 sm:$0xff]  }
 0x2ee   :  { %10034 = vmatprep.subr.bf16.mxu0 %v10917_v3  ;;  %v11046_v3 = vld [vmem:[#allocation9 + $0x129c] ss:$20 sps:$4 sm:$0xff]  }
 0x2f0   :  { %5080 = vmatpush1.bf16.msra.mxu1 %v10939_v4  ;;  %v11013_v4 = vld [vmem:[#allocation9 + $0x10bc] ss:$20 sps:$4 sm:$0xff]  }
 0x2f1   :  { %10035 = vmatpush3.bf16.msra.mxu0 %v10918_v5  ;;  %5081 = vmatprep.subr.bf16.mxu1 %v10944_v6  ;;  %v11011_v5 = vld [vmem:[#allocation9 + $0x10b8] ss:$20 sps:$4 sm:$0xff]   ;;  %v11016_v6 = vld [vmem:[#allocation9 + $0x1094] ss:$20 sps:$4 sm:$0xff]  }
 0x2f2   :  { %10260 = vmatprep.subr.bf16.mxu0 %v11929_v31 }
 0x2f4   :  { %3655 = vmatmul.mubr.bf16.vlgmr.msra.gmra.mxu0 %v12076_v34  ;;  %5082 = vmatpush1.bf16.msra.mxu1 %v10942_v7  ;;  %v10951_v34 = vld [vmem:[#allocation9 + $0xed8] ss:$20 sps:$4 sm:$0xff]   ;;  %v11014_v7 = vld [vmem:[#allocation9 + $0x1090] ss:$20 sps:$4 sm:$0xff]  }
 0x2f5   :  { %10261 = vmatpush3.bf16.msra.mxu0 %v10919_v8  ;;  %10276 = vmatprep.mubr.msk.bf16.mxu0 %vm11930_vm3, %v11929_v31  ;;  %v3398_v8 = vpop.f32.mrf.mxu0 }
 0x2f6   :  { %10262 = vmatprep.subr.bf16.mxu0 %v11929_v31  ;;  %5083 = vmatprep.subr.bf16.mxu1 %v10947_v9  ;;  %v11019_v9 = vld [vmem:[#allocation9 + $0x106c] ss:$20 sps:$4 sm:$0xff]  }
 0x2f8   :  { %5084 = vmatpush1.bf16.msra.mxu1 %v10945_v11  ;;  %v11017_v11 = vld [vmem:[#allocation9 + $0x1068] ss:$20 sps:$4 sm:$0xff]  }
 0x2f9   :  { %10263 = vmatpush3.bf16.msra.mxu0 %v10920_v63  ;;  %5085 = vmatprep.subr.bf16.mxu1 %v10950_v12  ;;  %v3400_v63 = vpop.f32.mrf.mxu0 }
 0x2fa   :  { %10264 = vmatprep.subr.bf16.mxu0 %v11929_v31 }
 0x2fc   :  { %5086 = vmatpush1.bf16.msra.mxu1 %v10948_v14  ;;  %v11022_v14 = vld [vmem:[#allocation9 + $0x1044] ss:$20 sps:$4 sm:$0xff]  }
 0x2fd   :  { %10265 = vmatpush3.bf16.msra.mxu0 %v10921_v15  ;;  %5087 = vmatprep.subr.bf16.mxu1 %v10953_v16  ;;  %v2295_v15 = vld [vmem:[#allocation11 + $0x1] ss:$8 sm:$0xf] }
 0x2fe   :  { %10266 = vmatprep.subr.bf16.mxu0 %v11929_v31  ;;  %v2296_v16 = vld [vmem:[#allocation11 + $0x1] ss:$8 sm:$0x10] }
 0x300   :  { %5088 = vmatpush2.bf16.msra.mxu1 %v10951_v34  ;;  %v11020_v34 = vld [vmem:[#allocation9 + $0x1040] ss:$20 sps:$4 sm:$0xff]  }
 0x301   :  { %10267 = vmatpush3.bf16.msra.mxu0 %v10922_v52  ;;  %5089 = vmatprep.subr.bf16.mxu1 %v10956_v57  ;;  %v12117_v52 = vor.u32 %v2296_v16, %v2295_v15  ;;  %v3402_v57 = vpop.f32.mrf.mxu0 }
 0x302   :  { %10268 = vmatprep.subr.bf16.mxu0 %v11929_v31 }
 0x304   :  { %5090 = vmatpush2.bf16.msra.mxu1 %v10954_v17 }
 0x305   :  { %10269 = vmatpush3.bf16.msra.mxu0 %v10923_v18  ;;  %5091 = vmatprep.subr.bf16.mxu1 %v10959_v19  ;;  %v11025_v18 = vld [vmem:[#allocation9 + $0xda4] ss:$20 sps:$4 sm:$0xff]   ;;  %v2306_v19 = vrot.slane %v12117_v52, %v12005_v30 }
 0x306   :  { %10270 = vmatprep.subr.bf16.mxu0 %v11929_v31 }
 0x308   :  { %5092 = vmatpush2.bf16.msra.mxu1 %v10957_v22  ;;  %v2302_v22 = vrot.slane %v12117_v52, %v12008_v32 }
 0x309   :  { %10271 = vmatpush3.bf16.msra.mxu0 %v10924_v25  ;;  %5093 = vmatprep.subr.bf16.mxu1 %v10962_v13  ;;  %v3404_v25 = vpop.f32.mrf.mxu0 }
 0x30a   :  { %10272 = vmatprep.subr.bf16.mxu0 %v11929_v31 }
 0x30c   :  { %5094 = vmatpush2.bf16.msra.mxu1 %v10960_v23 }
 0x30d   :  { %10273 = vmatpush3.bf16.msra.mxu0 %v10925_v26  ;;  %5095 = vmatprep.subr.bf16.mxu1 %v10965_v27  ;;  %v3401_v26 = vadd.f32 %v3400_v63, %v2306_v19  ;;  %v3403_v27 = vadd.f32 %v3402_v57, %v2302_v22 }
 0x30e   :  { %10274 = vmatprep.subr.bf16.mxu0 %v11929_v31 }
 0x310   :  { %5096 = vmatpush2.bf16.msra.mxu1 %v10963_v28  ;;  %v3399_v28 = vadd.f32 %v3398_v8, %v2302_v22 }
 0x311   :  { %10275 = vmatpush3.bf16.msra.mxu0 %v10926_v35  ;;  %5097 = vmatprep.subr.bf16.mxu1 %v10968_v36 }
 0x312   :  { %5114 = vmatprep.subr.bf16.mxu0 %v10977_v37  ;;  %v3405_v37 = vadd.f32 %v3404_v25, %v2306_v19 }
 0x314   :  { %10277 = vmatmul.mubr.bf16.vlgmr.msra.gmra.mxu0 %v12094_v21  ;;  %5098 = vmatpush2.bf16.msra.mxu1 %v10966_v40  ;;  %v10989_v21 = vld [vmem:[#allocation9 + $0xf7c] ss:$20 sps:$4 sm:$0xff]  }
 0x315   :  { %5099 = vmatprep.subr.bf16.mxu1 %v10971_v41  ;;  %5115 = vmatpush1.bf16.msra.mxu0 %v10975_v42 }
 0x316   :  { %5116 = vmatprep.subr.bf16.mxu0 %v10980_v43 }
 0x318   :  { %5100 = vmatpush2.bf16.msra.mxu1 %v10969_v44 }
 0x319   :  { %5101 = vmatprep.subr.bf16.mxu1 %v10974_v45  ;;  %5117 = vmatpush1.bf16.msra.mxu0 %v10978_v46 }
 0x31a   :  { %5118 = vmatprep.subr.bf16.mxu0 %v10983_v33 }
 0x31c   :  { %5102 = vmatpush2.bf16.msra.mxu1 %v10972_v59 }
 0x31d   :  { %5119 = vmatpush1.bf16.msra.mxu0 %v10981_v47  ;;  %5157 = vmatprep.subr.bf16.mxu1 %v11046_v3  ;;  %v11080_v3 = vld [vmem:[#allocation9 + $0x11a8] ss:$20 sps:$4 sm:$0xff]  }
 0x31e   :  { %5120 = vmatprep.subr.bf16.mxu0 %v10986_v48 }
 0x31f   :  { %v3441_v12 = vpop.f32.mrf.mxu1 }
 0x320   :  { %v3442_v42 = vadd.f32 %v3441_v12, %v3399_v28  ;;  %v2314_v12 = vrot.slane %v12117_v52, %v12020_v39 }
 0x321   :  { %5121 = vmatpush1.bf16.msra.mxu0 %v10984_v49  ;;  %v3443_v17 = vpop.f32.mrf.mxu1 }
 0x322   :  { %5122 = vmatprep.subr.bf16.mxu0 %v10989_v21  ;;  %v3444_v40 = vadd.f32 %v3443_v17, %v3401_v26 }
 0x323   :  { %v3445_v13 = vpop.f32.mrf.mxu1 }
 0x324   :  { %v3446_v41 = vadd.f32 %v3445_v13, %v3403_v27 }
 0x325   :  { %5123 = vmatpush1.bf16.msra.mxu0 %v10987_v50  ;;  %v3447_v35 = vpop.f32.mrf.mxu1 }
 0x326   :  { %5124 = vmatprep.subr.bf16.mxu0 %v10992_v51  ;;  %v3448_v44 = vadd.f32 %v3447_v35, %v3405_v37 }
 0x329   :  { %5125 = vmatpush1.bf16.msra.mxu0 %v10990_v53  ;;  %v11044_v53 = vld [vmem:[#allocation9 + $0x1298] ss:$20 sps:$4 sm:$0xff]  }
 0x32a   :  { %5126 = vmatprep.subr.bf16.mxu0 %v10995_v29 }
 0x32d   :  { %5127 = vmatpush1.bf16.msra.mxu0 %v10993_v10  ;;  %v11052_v10 = vld [vmem:[#allocation9 + $0x1274] ss:$20 sps:$4 sm:$0xff]  }
 0x32e   :  { %5128 = vmatprep.subr.bf16.mxu0 %v10998_v54  ;;  %v11050_v54 = vld [vmem:[#allocation9 + $0x1270] ss:$20 sps:$4 sm:$0xff]  }
 0x331   :  { %5129 = vmatpush1.bf16.msra.mxu0 %v10996_v55  ;;  %v11058_v55 = vld [vmem:[#allocation9 + $0x124c] ss:$20 sps:$4 sm:$0xff]  }
 0x332   :  { %5130 = vmatprep.subr.bf16.mxu0 %v11001_v56  ;;  %v11056_v56 = vld [vmem:[#allocation9 + $0x1248] ss:$20 sps:$4 sm:$0xff]  }
 0x335   :  { %5131 = vmatpush2.bf16.msra.mxu0 %v10999_v58  ;;  %v11064_v58 = vld [vmem:[#allocation9 + $0x1224] ss:$20 sps:$4 sm:$0xff]  }
 0x336   :  { %5132 = vmatprep.subr.bf16.mxu0 %v11004_v60  ;;  %v11062_v60 = vld [vmem:[#allocation9 + $0x1220] ss:$20 sps:$4 sm:$0xff]  }
 0x339   :  { %5133 = vmatpush2.bf16.msra.mxu0 %v11002_v61  ;;  %v11070_v61 = vld [vmem:[#allocation9 + $0x11fc] ss:$20 sps:$4 sm:$0xff]  }
 0x33a   :  { %5134 = vmatprep.subr.bf16.mxu0 %v11007_v62  ;;  %v11068_v62 = vld [vmem:[#allocation9 + $0x11f8] ss:$20 sps:$4 sm:$0xff]  }
 0x33d   :  { %5135 = vmatpush2.bf16.msra.mxu0 %v11005_v1  ;;  %v11076_v1 = vld [vmem:[#allocation9 + $0x11d4] ss:$20 sps:$4 sm:$0xff]  }
 0x33e   :  { %5136 = vmatprep.subr.bf16.mxu0 %v11010_v24  ;;  %v11074_v24 = vld [vmem:[#allocation9 + $0x11d0] ss:$20 sps:$4 sm:$0xff]  }
 0x341   :  { %5137 = vmatpush2.bf16.msra.mxu0 %v11008_v2  ;;  %v11082_v2 = vld [vmem:[#allocation9 + $0x11ac] ss:$20 sps:$4 sm:$0xff]  }
 0x342   :  { %5138 = vmatprep.subr.bf16.mxu0 %v11013_v4  ;;  %v11088_v4 = vld [vmem:[#allocation9 + $0x1184] ss:$20 sps:$4 sm:$0xff]  }
 0x345   :  { %5139 = vmatpush2.bf16.msra.mxu0 %v11011_v5  ;;  %v11086_v5 = vld [vmem:[#allocation9 + $0x1180] ss:$20 sps:$4 sm:$0xff]  }
 0x346   :  { %5140 = vmatprep.subr.bf16.mxu0 %v11016_v6  ;;  %v11094_v6 = vld [vmem:[#allocation9 + $0x1024] ss:$20 sps:$4 sm:$0xff]  }
 0x349   :  { %5141 = vmatpush2.bf16.msra.mxu0 %v11014_v7 }
 0x34a   :  { %5142 = vmatprep.subr.bf16.mxu0 %v11019_v9 }
 0x34d   :  { %5143 = vmatpush2.bf16.msra.mxu0 %v11017_v11 }
 0x34e   :  { %5144 = vmatprep.subr.bf16.mxu0 %v11022_v14  ;;  %v2310_v14 = vrot.slane %v12117_v52, %v12017_v38 }
 0x351   :  { %5145 = vmatpush2.bf16.msra.mxu0 %v11020_v34 }
 0x352   :  { %5200 = vmatprep.subr.bf16.mxu0 %v11025_v18 }
 0x354   :  { %v3484_v23 = vpop.f32.mrf.mxu0 }
 0x355   :  { %v3485_v33 = vadd.f32 %v3484_v23, %v3442_v42 }
 0x356   :  { %v3486_v36 = vpop.f32.mrf.mxu0 }
 0x357   :  { %v3487_v45 = vadd.f32 %v3486_v36, %v3444_v40  ;;  %v3745_v50 = vmax.f32 %v3485_v33, 0.0  ;;  %v11023_v33 = vld [vmem:[#allocation9 + $0xda0] ss:$20 sps:$4 sm:$0xff]  }
 0x358   :  { %v3488_v43 = vpop.f32.mrf.mxu0 }
 0x359   :  { %v3489_v46 = vadd.f32 %v3488_v43, %v3446_v41  ;;  %v3746_v49 = vmax.f32 %v3487_v45, 0.0 }
 0x35a   :  { %v3490_v59 = vpop.f32.mrf.mxu0 }
 0x35b   :  { %v3491_v47 = vadd.f32 %v3490_v59, %v3448_v44  ;;  %v3750_v48 = vmax.f32 %v3489_v46, 0.0 }
 0x35d   :  { %v3751_v21 = vmax.f32 %v3491_v47, 0.0  ;;  %v12125_v29 = vpack.c.bf16 %v3750_v48, %v3745_v50  ;;  %v11028_v47 = vld [vmem:[#allocation9 + $0xd7c] ss:$20 sps:$4 sm:$0xff]   ;;  %v11026_v48 = vld [vmem:[#allocation9 + $0xd78] ss:$20 sps:$4 sm:$0xff]  }
 0x35e   :  { %v11034_v50 = vld [vmem:[#allocation9 + $0xd2c] ss:$20 sps:$4 sm:$0xff]  }
 0x35f   :  { %v12123_v51 = vpack.c.bf16 %v3751_v21, %v3746_v49  ;;  %v3527_v7 = vpop.f32.mrf.mxu1  ;;  %v11031_v49 = vld [vmem:[#allocation9 + $0xd54] ss:$20 sps:$4 sm:$0xff]   ;;  %v11029_v21 = vld [vmem:[#allocation9 + $0xd50] ss:$20 sps:$4 sm:$0xff]  }
 0x360   :  { %v3528_v57 = vadd.f32 %v3527_v7, %v2310_v14  ;;  %v11067_v7 = vld [vmem:[#allocation9 + $0xe94] ss:$20 sps:$4 sm:$0xff]  }
 0x361   :  { %5103 = vmatprep.mubr.bf16.mxu1 %v12123_v51  ;;  %v3529_v8 = vpop.f32.mrf.mxu1 }
 0x362   :  { %5104 = vmatmul.mubr.bf16.vlgmr.msra.gmra.mxu1 %v12125_v29  ;;  %v3530_v34 = vadd.f32 %v3529_v8, %v2314_v12 }
 0x363   :  { %5158 = vmatpush1.bf16.msra.mxu1 %v11044_v53  ;;  %5189 = vmatprep.mubr.bf16.mxu1 %v11927_v0  ;;  %v3531_v9 = vpop.f32.mrf.mxu1  ;;  %v11032_v53 = vld [vmem:[#allocation9 + $0xd28] ss:$20 sps:$4 sm:$0xff]  }
 0x364   :  { %5159 = vmatprep.subr.bf16.mxu1 %v11052_v10  ;;  %v3532_v18 = vadd.f32 %v3531_v9, %v2310_v14  ;;  %v11037_v10 = vld [vmem:[#allocation9 + $0xd04] ss:$20 sps:$4 sm:$0xff]   ;;  %v2318_v14 = vrot.slane %v12117_v52, %v12040_v20 }
 0x365   :  { %v3533_v11 = vpop.f32.mrf.mxu1  ;;  %v11065_v9 = vld [vmem:[#allocation9 + $0xe90] ss:$20 sps:$4 sm:$0xff]   ;;  %v11083_v52 = vld [vmem:[#allocation9 + $0xe18] ss:$20 sps:$4 sm:$0xff]  }
 0x366   :  { %v3534_v23 = vadd.f32 %v3533_v11, %v2314_v12 }
 0x367   :  { %5160 = vmatpush1.bf16.msra.mxu1 %v11050_v54  ;;  %v11035_v54 = vld [vmem:[#allocation9 + $0xd00] ss:$20 sps:$4 sm:$0xff]  }
 0x368   :  { %5161 = vmatprep.subr.bf16.mxu1 %v11058_v55  ;;  %v11040_v55 = vld [vmem:[#allocation9 + $0xcdc] ss:$20 sps:$4 sm:$0xff]  }
 0x36b   :  { %5162 = vmatpush1.bf16.msra.mxu1 %v11056_v56  ;;  %v11038_v56 = vld [vmem:[#allocation9 + $0xcd8] ss:$20 sps:$4 sm:$0xff]  }
 0x36c   :  { %5163 = vmatprep.subr.bf16.mxu1 %v11064_v58  ;;  %v11043_v58 = vld [vmem:[#allocation9 + $0xcb4] ss:$20 sps:$4 sm:$0xff]  }
 0x36f   :  { %5164 = vmatpush1.bf16.msra.mxu1 %v11062_v60  ;;  %v11041_v60 = vld [vmem:[#allocation9 + $0xcb0] ss:$20 sps:$4 sm:$0xff]  }
 0x370   :  { %5165 = vmatprep.subr.bf16.mxu1 %v11070_v61  ;;  %v11049_v61 = vld [vmem:[#allocation9 + $0xc8c] ss:$20 sps:$4 sm:$0xff]  }
 0x373   :  { %5166 = vmatpush1.bf16.msra.mxu1 %v11068_v62  ;;  %v11047_v62 = vld [vmem:[#allocation9 + $0xc88] ss:$20 sps:$4 sm:$0xff]  }
 0x374   :  { %5167 = vmatprep.subr.bf16.mxu1 %v11076_v1  ;;  %v11055_v1 = vld [vmem:[#allocation9 + $0xee4] ss:$20 sps:$4 sm:$0xff]  }
 0x377   :  { %5168 = vmatpush1.bf16.msra.mxu1 %v11074_v24 }
 0x378   :  { %5169 = vmatprep.subr.bf16.mxu1 %v11082_v2  ;;  %v11053_v2 = vld [vmem:[#allocation9 + $0xee0] ss:$20 sps:$4 sm:$0xff]  }
 0x37b   :  { %5170 = vmatpush1.bf16.msra.mxu1 %v11080_v3  ;;  %v11061_v3 = vld [vmem:[#allocation9 + $0xebc] ss:$20 sps:$4 sm:$0xff]  }
 0x37c   :  { %5171 = vmatprep.subr.bf16.mxu1 %v11088_v4 }
 0x37f   :  { %5172 = vmatpush1.bf16.msra.mxu1 %v11086_v5  ;;  %v3613_v63 = vpop.f32.mrf.mxu1  ;;  %v11059_v5 = vld [vmem:[#allocation9 + $0xeb8] ss:$20 sps:$4 sm:$0xff]  }
 0x380   :  { %5243 = vmatprep.subr.bf16.mxu1 %v11094_v6 }
 0x381   :  { %v3615_v15 = vpop.f32.mrf.mxu1 }
 0x383   :  { %v3617_v22 = vpop.f32.mrf.mxu1 }
 0x385   :  { %v3619_v37 = vpop.f32.mrf.mxu1 }
 0x394   :  { %v3570_v16 = vpop.f32.mrf.mxu0 }
 0x395   :  { %v3571_v25 = vadd.f32 %v3570_v16, %v3528_v57  ;;  %v11071_v16 = vld [vmem:[#allocation9 + $0xe68] ss:$20 sps:$4 sm:$0xff]   ;;  %v11079_v57 = vld [vmem:[#allocation9 + $0xe44] ss:$20 sps:$4 sm:$0xff]  }
 0x396   :  { %v3572_v17 = vpop.f32.mrf.mxu0 }
 0x397   :  { %v3573_v19 = vadd.f32 %v3572_v17, %v3530_v34  ;;  %v3614_v40 = vadd.f32 %v3613_v63, %v3571_v25  ;;  %v11073_v63 = vld [vmem:[#allocation9 + $0xe6c] ss:$20 sps:$4 sm:$0xff]   ;;  %v11085_v25 = vld [vmem:[#allocation9 + $0xe1c] ss:$20 sps:$4 sm:$0xff]  }
 0x398   :  { %v3574_v13 = vpop.f32.mrf.mxu0 }
 0x399   :  { %v3575_v26 = vadd.f32 %v3574_v13, %v3532_v18  ;;  %v3616_v28 = vadd.f32 %v3615_v15, %v3573_v19  ;;  %v3747_v45 = vmax.f32 %v3614_v40, 0.0  ;;  %v11077_v19 = vld [vmem:[#allocation9 + $0xe40] ss:$20 sps:$4 sm:$0xff]  }
 0x39a   :  { %v3576_v27 = vpop.f32.mrf.mxu0 }
 0x39b   :  { %v3618_v35 = vadd.f32 %v3617_v22, %v3575_v26  ;;  %v3577_v36 = vadd.f32 %v3576_v27, %v3534_v23  ;;  %v3748_v43 = vmax.f32 %v3616_v28, 0.0 }
 0x39d   :  { %v3620_v41 = vadd.f32 %v3619_v37, %v3577_v36  ;;  %v3752_v42 = vmax.f32 %v3618_v35, 0.0  ;;  %v11091_v36 = vld [vmem:[#allocation9 + $0xdf4] ss:$20 sps:$4 sm:$0xff]  }
 0x39f   :  { %v3753_v44 = vmax.f32 %v3620_v41, 0.0  ;;  %v12136_v59 = vpack.c.bf16 %v3752_v42, %v3747_v45  ;;  %v10058_v6 = vpop.f32.mrf.mxu1  ;;  %v11097_v45 = vld [vmem:[#allocation9 + $0xdcc] ss:$20 sps:$4 sm:$0xff]  }
 0x3a1   :  { %v12134_v46 = vpack.c.bf16 %v3753_v44, %v3748_v43  ;;  %v10059_v11 = vpop.f32.mrf.mxu1  ;;  %v11089_v43 = vld [vmem:[#allocation9 + $0xdf0] ss:$20 sps:$4 sm:$0xff]  }
 0x3a2   :  { %v10060_v13 = vadd.f32 %v10059_v11, %v10058_v6  ;;  %v11124_v6 = vld [vmem:[#allocation9 + $0xf5c] ss:$20 sps:$4 sm:$0xff]   ;;  %v11130_v11 = vld [vmem:[#allocation9 + $0xf34] ss:$20 sps:$4 sm:$0xff]  }
 0x3a3   :  { %5146 = vmatprep.mubr.bf16.mxu0 %v12134_v46  ;;  %v10061_v34 = vpop.f32.mrf.mxu1 }
 0x3a4   :  { %5147 = vmatmul.mubr.bf16.vlgmr.msra.gmra.mxu0 %v12136_v59 }
 0x3a5   :  { %5201 = vmatpush1.bf16.msra.mxu0 %v11023_v33  ;;  %5232 = vmatprep.mubr.bf16.mxu0 %v12123_v51  ;;  %v10062_v22 = vpop.f32.mrf.mxu1 }
 0x3a6   :  { %5202 = vmatprep.subr.bf16.mxu0 %v11028_v47  ;;  %v10063_v27 = vadd.f32 %v10062_v22, %v10061_v34  ;;  %v11134_v34 = vld [vmem:[#allocation9 + $0xf08] ss:$20 sps:$4 sm:$0xff]  }
 0x3a7   :  { %v11143_v22 = vld [vmem:[#allocation9 + $0x1188] ss:$20 sps:$4 sm:$0xff]  }
 0x3a9   :  { %5203 = vmatpush1.bf16.msra.mxu0 %v11026_v48  ;;  %v11092_v48 = vld [vmem:[#allocation9 + $0x1020] ss:$20 sps:$4 sm:$0xff]  }
 0x3aa   :  { %5204 = vmatprep.subr.bf16.mxu0 %v11031_v49 }
 0x3ad   :  { %5205 = vmatpush1.bf16.msra.mxu0 %v11029_v21  ;;  %v11095_v21 = vld [vmem:[#allocation9 + $0xdc8] ss:$20 sps:$4 sm:$0xff]  }
 0x3ae   :  { %5206 = vmatprep.subr.bf16.mxu0 %v11034_v50  ;;  %v11100_v50 = vld [vmem:[#allocation9 + $0xffc] ss:$20 sps:$4 sm:$0xff]  }
 0x3b1   :  { %5207 = vmatpush1.bf16.msra.mxu0 %v11032_v53  ;;  %v11103_v53 = vld [vmem:[#allocation9 + $0x12a4] ss:$20 sps:$4 sm:$0xff]  }
 0x3b2   :  { %5208 = vmatprep.subr.bf16.mxu0 %v11037_v10  ;;  %v11098_v10 = vld [vmem:[#allocation9 + $0xff8] ss:$20 sps:$4 sm:$0xff]  }
 0x3b4   :  { %v10036_v24 = vpop.f32.mrf.mxu0 }
 0x3b5   :  { %5209 = vmatpush1.bf16.msra.mxu0 %v11035_v54  ;;  %v11101_v54 = vld [vmem:[#allocation9 + $0x12a0] ss:$20 sps:$4 sm:$0xff]  }
 0x3b6   :  { %5210 = vmatprep.subr.bf16.mxu0 %v11040_v55  ;;  %v10037_v4 = vpop.f32.mrf.mxu0  ;;  %v11106_v55 = vld [vmem:[#allocation9 + $0xfd4] ss:$20 sps:$4 sm:$0xff]  }
 0x3b7   :  { %v10038_v15 = vadd.f32 %v10037_v4, %v10036_v24  ;;  %v11113_v24 = vld [vmem:[#allocation9 + $0x1250] ss:$20 sps:$4 sm:$0xff]   ;;  %v11116_v4 = vld [vmem:[#allocation9 + $0xf80] ss:$20 sps:$4 sm:$0xff]  }
 0x3b8   :  { %v10039_v8 = vpop.f32.mrf.mxu0 }
 0x3b9   :  { %5211 = vmatpush1.bf16.msra.mxu0 %v11038_v56  ;;  %v3657_v18 = vadd.f32 %v10038_v15, %v2318_v14  ;;  %v11109_v56 = vld [vmem:[#allocation9 + $0x127c] ss:$20 sps:$4 sm:$0xff]   ;;  %v11136_v15 = vld [vmem:[#allocation9 + $0xf0c] ss:$20 sps:$4 sm:$0xff]  }
 0x3ba   :  { %5212 = vmatprep.subr.bf16.mxu0 %v11043_v58  ;;  %v10040_v12 = vpop.f32.mrf.mxu0  ;;  %v11104_v58 = vld [vmem:[#allocation9 + $0xfd0] ss:$20 sps:$4 sm:$0xff]  }
 0x3bb   :  { %v10041_v17 = vadd.f32 %v10040_v12, %v10039_v8  ;;  %v3698_v28 = vadd.f32 %v10060_v13, %v3657_v18  ;;  %v11122_v8 = vld [vmem:[#allocation9 + $0xf58] ss:$20 sps:$4 sm:$0xff]   ;;  %v11128_v12 = vld [vmem:[#allocation9 + $0xf30] ss:$20 sps:$4 sm:$0xff]   ;;  %v11149_v13 = vld [vmem:[#allocation9 + $0x1168] ss:$20 sps:$4 sm:$0xff]  }
 0x3bc   :  { %v11145_v18 = vld [vmem:[#allocation9 + $0x118c] ss:$20 sps:$4 sm:$0xff]  }
 0x3bd   :  { %5213 = vmatpush1.bf16.msra.mxu0 %v11041_v60  ;;  %v3660_v23 = vadd.f32 %v10041_v17, %v2318_v14  ;;  %v11107_v60 = vld [vmem:[#allocation9 + $0x1278] ss:$20 sps:$4 sm:$0xff]  }
 0x3be   :  { %5214 = vmatprep.subr.bf16.mxu0 %v11049_v61  ;;  %v11112_v61 = vld [vmem:[#allocation9 + $0xfac] ss:$20 sps:$4 sm:$0xff]   ;;  %v11142_v17 = vld [vmem:[#allocation9 + $0x1164] ss:$20 sps:$4 sm:$0xff]  }
 0x3bf   :  { %v3701_v40 = vadd.f32 %v10063_v27, %v3660_v23  ;;  %v11131_v14 = vld [vmem:[#allocation9 + $0x11d8] ss:$20 sps:$4 sm:$0xff]   ;;  %v11153_v27 = vld [vmem:[#allocation9 + $0x1114] ss:$20 sps:$4 sm:$0xff]  }
 0x3c0   :  { %v11146_v23 = vld [vmem:[#allocation9 + $0x1138] ss:$20 sps:$4 sm:$0xff]  }
 0x3c1   :  { %5215 = vmatpush1.bf16.msra.mxu0 %v11047_v62  ;;  %v11115_v62 = vld [vmem:[#allocation9 + $0x1254] ss:$20 sps:$4 sm:$0xff]  }
 0x3c2   :  { %5216 = vmatprep.subr.bf16.mxu0 %v11055_v1  ;;  %v11110_v1 = vld [vmem:[#allocation9 + $0xfa8] ss:$20 sps:$4 sm:$0xff]  }
 0x3c5   :  { %5217 = vmatpush2.bf16.msra.mxu0 %v11053_v2  ;;  %v11118_v2 = vld [vmem:[#allocation9 + $0xf84] ss:$20 sps:$4 sm:$0xff]  }
 0x3c6   :  { %5218 = vmatprep.subr.bf16.mxu0 %v11061_v3  ;;  %v11121_v3 = vld [vmem:[#allocation9 + $0x122c] ss:$20 sps:$4 sm:$0xff]  }
 0x3c9   :  { %5219 = vmatpush2.bf16.msra.mxu0 %v11059_v5  ;;  %v11119_v5 = vld [vmem:[#allocation9 + $0x1228] ss:$20 sps:$4 sm:$0xff]  }
 0x3ca   :  { %5220 = vmatprep.subr.bf16.mxu0 %v11067_v7  ;;  %v11127_v7 = vld [vmem:[#allocation9 + $0x1204] ss:$20 sps:$4 sm:$0xff]  }
 0x3cd   :  { %5221 = vmatpush2.bf16.msra.mxu0 %v11065_v9  ;;  %v11125_v9 = vld [vmem:[#allocation9 + $0x1200] ss:$20 sps:$4 sm:$0xff]  }
 0x3ce   :  { %5222 = vmatprep.subr.bf16.mxu0 %v11073_v63  ;;  %v11133_v63 = vld [vmem:[#allocation9 + $0x11dc] ss:$20 sps:$4 sm:$0xff]  }
 0x3d1   :  { %5223 = vmatpush2.bf16.msra.mxu0 %v11071_v16  ;;  %v11139_v16 = vld [vmem:[#allocation9 + $0x11b4] ss:$20 sps:$4 sm:$0xff]  }
 0x3d2   :  { %5224 = vmatprep.subr.bf16.mxu0 %v11079_v57  ;;  %v11137_v57 = vld [vmem:[#allocation9 + $0x11b0] ss:$20 sps:$4 sm:$0xff]  }
 0x3d4   :  { %v3738_v26 = vpop.f32.mrf.mxu0 }
 0x3d5   :  { %5225 = vmatpush2.bf16.msra.mxu0 %v11077_v19  ;;  %v3739_v37 = vadd.f32 %v3738_v26, %v3698_v28  ;;  %v11140_v19 = vld [vmem:[#allocation9 + $0x1160] ss:$20 sps:$4 sm:$0xff]   ;;  %v11150_v26 = vld [vmem:[#allocation9 + $0x1028] ss:$20 sps:$4 sm:$0xff]  }
 0x3d6   :  { %v10278_v35 = vpop.f32.mrf.mxu0  ;;  %5226 = vmatprep.subr.bf16.mxu0 %v11085_v25  ;;  %v11148_v25 = vld [vmem:[#allocation9 + $0x113c] ss:$20 sps:$4 sm:$0xff]   ;;  %v11154_v28 = vld [vmem:[#allocation9 + $0x1140] ss:$20 sps:$4 sm:$0xff]  }
 0x3d7   :  { %v3749_v33 = vmax.f32 %v3739_v37, 0.0  ;;  %v11155_v35 = vld [vmem:[#allocation9 + $0x1000] ss:$20 sps:$4 sm:$0xff]   ;;  %v11159_v37 = vld [vmem:[#allocation9 + $0x1118] ss:$20 sps:$4 sm:$0xff]  }
 0x3d8   :  { %v3741_v41 = vpop.f32.mrf.mxu0 }
 0x3d9   :  { %v3742_v42 = vadd.f32 %v3741_v41, %v3701_v40  ;;  %5227 = vmatpush2.bf16.msra.mxu0 %v11083_v52  ;;  %v11151_v52 = vld [vmem:[#allocation9 + $0x1110] ss:$20 sps:$4 sm:$0xff]   ;;  %v11156_v40 = vld [vmem:[#allocation9 + $0x10e8] ss:$20 sps:$4 sm:$0xff]   ;;  %v11160_v41 = vld [vmem:[#allocation9 + $0xfd8] ss:$20 sps:$4 sm:$0xff]  }
 0x3da   :  { %v10279_v44 = vpop.f32.mrf.mxu0  ;;  %5228 = vmatprep.subr.bf16.mxu0 %v11091_v36  ;;  %v11158_v36 = vld [vmem:[#allocation9 + $0x10ec] ss:$20 sps:$4 sm:$0xff]  }
 0x3db   :  { %v3754_v47 = vmax.f32 %v3742_v42, 0.0  ;;  %v11163_v42 = vld [vmem:[#allocation9 + $0x10c4] ss:$20 sps:$4 sm:$0xff]   ;;  %v11161_v44 = vld [vmem:[#allocation9 + $0x10c0] ss:$20 sps:$4 sm:$0xff]  }
 0x3dd   :  { %v12143_v49 = vpack.c.bf16 %v3754_v47, %v3749_v33  ;;  %5229 = vmatpush2.bf16.msra.mxu0 %v11089_v43  ;;  %v11164_v43 = vld [vmem:[#allocation9 + $0x10f0] ss:$20 sps:$4 sm:$0xff]   ;;  %v11166_v47 = vld [vmem:[#allocation9 + $0x1098] ss:$20 sps:$4 sm:$0xff]  }
 0x3de   :  { %5230 = vmatprep.subr.bf16.mxu0 %v11097_v45  ;;  %v11165_v45 = vld [vmem:[#allocation9 + $0xfb0] ss:$20 sps:$4 sm:$0xff]  }
 0x3df   :  { %5190 = vmatmul.mubr.bf16.vlgmr.msra.gmra.mxu1 %v12143_v49  ;;  %v11168_v33 = vld [vmem:[#allocation9 + $0x109c] ss:$20 sps:$4 sm:$0xff]  }
 0x3e0   :  { %5244 = vmatpush1.bf16.msra.mxu1 %v11092_v48  ;;  %5275 = vmatprep.mubr.bf16.mxu1 %v12134_v46  ;;  %v11170_v48 = vld [vmem:[#allocation9 + $0xf88] ss:$20 sps:$4 sm:$0xff]  }
 0x3e1   :  { %5231 = vmatpush2.bf16.msra.mxu0 %v11095_v21  ;;  %5245 = vmatprep.subr.bf16.mxu1 %v11100_v50  ;;  %v11173_v21 = vld [vmem:[#allocation9 + $0x1074] ss:$20 sps:$4 sm:$0xff]  }
 0x3e2   :  { %5286 = vmatprep.subr.bf16.mxu0 %v11103_v53  ;;  %v11174_v50 = vld [vmem:[#allocation9 + $0x10a0] ss:$20 sps:$4 sm:$0xff]   ;;  %v11171_v53 = vld [vmem:[#allocation9 + $0x1070] ss:$20 sps:$4 sm:$0xff]  }
 0x3e4   :  { %5233 = vmatmul.mubr.bf16.vlgmr.msra.gmra.mxu0 %v12125_v29  ;;  %5246 = vmatpush1.bf16.msra.mxu1 %v11098_v10  ;;  %v11175_v10 = vld [vmem:[#allocation9 + $0xf60] ss:$20 sps:$4 sm:$0xff]  }
 0x3e5   :  { %5287 = vmatpush1.bf16.msra.mxu0 %v11101_v54  ;;  %5247 = vmatprep.subr.bf16.mxu1 %v11106_v55  ;;  %v11178_v54 = vld [vmem:[#allocation9 + $0x104c] ss:$20 sps:$4 sm:$0xff]  }
 0x3e6   :  { %5288 = vmatprep.subr.bf16.mxu0 %v11109_v56  ;;  %5318 = vmatprep.mubr.bf16.mxu0 %v11927_v0  ;;  %v11179_v55 = vld [vmem:[#allocation9 + $0x1078] ss:$20 sps:$4 sm:$0xff]   ;;  %v11176_v56 = vld [vmem:[#allocation9 + $0x1048] ss:$20 sps:$4 sm:$0xff]  }
 0x3e8   :  { %5248 = vmatpush1.bf16.msra.mxu1 %v11104_v58  ;;  %v11180_v58 = vld [vmem:[#allocation9 + $0xf38] ss:$20 sps:$4 sm:$0xff]  }
 0x3e9   :  { %5289 = vmatpush1.bf16.msra.mxu0 %v11107_v60  ;;  %5249 = vmatprep.subr.bf16.mxu1 %v11112_v61  ;;  %v11181_v60 = vld [vmem:[#allocation9 + $0xee8] ss:$20 sps:$4 sm:$0xff]   ;;  %v11183_v61 = vld [vmem:[#allocation9 + $0x1050] ss:$20 sps:$4 sm:$0xff]  }
 0x3ea   :  { %5290 = vmatprep.subr.bf16.mxu0 %v11115_v62  ;;  %v11182_v62 = vld [vmem:[#allocation9 + $0xda8] ss:$20 sps:$4 sm:$0xff]  }
 0x3ec   :  { %5250 = vmatpush1.bf16.msra.mxu1 %v11110_v1  ;;  %v11184_v1 = vld [vmem:[#allocation9 + $0xf10] ss:$20 sps:$4 sm:$0xff]  }
 0x3ed   :  { %5291 = vmatpush1.bf16.msra.mxu0 %v11113_v24  ;;  %5251 = vmatprep.subr.bf16.mxu1 %v11118_v2  ;;  %v11185_v24 = vld [vmem:[#allocation9 + $0xec0] ss:$20 sps:$4 sm:$0xff]   ;;  %v11209_v2 = vld [vmem:[#allocation9 + $0x13dc] ss:$20 sps:$4 sm:$0xff]  }
 0x3ee   :  { %5292 = vmatprep.subr.bf16.mxu0 %v11121_v3  ;;  %v11186_v3 = vld [vmem:[#allocation9 + $0xd80] ss:$20 sps:$4 sm:$0xff]  }
 0x3f0   :  { %5252 = vmatpush1.bf16.msra.mxu1 %v11116_v4  ;;  %v11187_v4 = vld [vmem:[#allocation9 + $0xe98] ss:$20 sps:$4 sm:$0xff]  }
 0x3f1   :  { %5293 = vmatpush1.bf16.msra.mxu0 %v11119_v5  ;;  %5253 = vmatprep.subr.bf16.mxu1 %v11124_v6  ;;  %v11207_v5 = vld [vmem:[#allocation9 + $0x13d8] ss:$20 sps:$4 sm:$0xff]   ;;  %v11212_v6 = vld [vmem:[#allocation9 + $0x13b4] ss:$20 sps:$4 sm:$0xff]  }
 0x3f2   :  { %5294 = vmatprep.subr.bf16.mxu0 %v11127_v7  ;;  %v11188_v7 = vld [vmem:[#allocation9 + $0xd58] ss:$20 sps:$4 sm:$0xff]  }
 0x3f4   :  { %5254 = vmatpush1.bf16.msra.mxu1 %v11122_v8  ;;  %v11189_v8 = vld [vmem:[#allocation9 + $0xe70] ss:$20 sps:$4 sm:$0xff]  }
 0x3f5   :  { %5295 = vmatpush1.bf16.msra.mxu0 %v11125_v9  ;;  %5255 = vmatprep.subr.bf16.mxu1 %v11130_v11  ;;  %v11210_v9 = vld [vmem:[#allocation9 + $0x13b0] ss:$20 sps:$4 sm:$0xff]   ;;  %v11215_v11 = vld [vmem:[#allocation9 + $0x138c] ss:$20 sps:$4 sm:$0xff]  }
 0x3f6   :  { %5296 = vmatprep.subr.bf16.mxu0 %v11133_v63  ;;  %v11190_v63 = vld [vmem:[#allocation9 + $0xd30] ss:$20 sps:$4 sm:$0xff]  }
 0x3f8   :  { %5256 = vmatpush1.bf16.msra.mxu1 %v11128_v12  ;;  %v11213_v12 = vld [vmem:[#allocation9 + $0x1388] ss:$20 sps:$4 sm:$0xff]  }
 0x3f9   :  { %5297 = vmatpush1.bf16.msra.mxu0 %v11131_v14  ;;  %5257 = vmatprep.subr.bf16.mxu1 %v11136_v15  ;;  %v11218_v14 = vld [vmem:[#allocation9 + $0x1364] ss:$20 sps:$4 sm:$0xff]   ;;  %v11192_v15 = vld [vmem:[#allocation9 + $0xd08] ss:$20 sps:$4 sm:$0xff]  }
 0x3fa   :  { %5298 = vmatprep.subr.bf16.mxu0 %v11139_v16  ;;  %v11193_v16 = vld [vmem:[#allocation9 + $0xe20] ss:$20 sps:$4 sm:$0xff]  }
 0x3fc   :  { %5258 = vmatpush1.bf16.msra.mxu1 %v11134_v34  ;;  %v11221_v34 = vld [vmem:[#allocation9 + $0x133c] ss:$20 sps:$4 sm:$0xff]  }
 0x3fd   :  { %5299 = vmatpush1.bf16.msra.mxu0 %v11137_v57  ;;  %5259 = vmatprep.subr.bf16.mxu1 %v11142_v17  ;;  %v11194_v57 = vld [vmem:[#allocation9 + $0xce0] ss:$20 sps:$4 sm:$0xff]   ;;  %v11195_v17 = vld [vmem:[#allocation9 + $0xdf8] ss:$20 sps:$4 sm:$0xff]  }
 0x3fe   :  { %5300 = vmatprep.subr.bf16.mxu0 %v11145_v18  ;;  %v11219_v18 = vld [vmem:[#allocation9 + $0x1338] ss:$20 sps:$4 sm:$0xff]  }
 0x400   :  { %5260 = vmatpush2.bf16.msra.mxu1 %v11140_v19  ;;  %v11224_v19 = vld [vmem:[#allocation9 + $0x1314] ss:$20 sps:$4 sm:$0xff]  }
 0x401   :  { %5301 = vmatpush1.bf16.msra.mxu0 %v11143_v22  ;;  %5261 = vmatprep.subr.bf16.mxu1 %v11148_v25  ;;  %v11196_v22 = vld [vmem:[#allocation9 + $0xcb8] ss:$20 sps:$4 sm:$0xff]   ;;  %v11197_v25 = vld [vmem:[#allocation9 + $0xdd0] ss:$20 sps:$4 sm:$0xff]  }
 0x402   :  { %10095 = vmatprep.subr.bf16.mxu0 %v11149_v13  ;;  %v11222_v13 = vld [vmem:[#allocation9 + $0x1310] ss:$20 sps:$4 sm:$0xff]  }
 0x404   :  { %5262 = vmatpush2.bf16.msra.mxu1 %v11146_v23  ;;  %5319 = vmatmul.mubr.bf16.vlgmr.msra.gmra.mxu0 %v12143_v49  ;;  %v11227_v23 = vld [vmem:[#allocation9 + $0x12ec] ss:$20 sps:$4 sm:$0xff]  }
 0x405   :  { %10096 = vmatpush3.bf16.msra.mxu0 %v11150_v26  ;;  %5402 = vmatprep.mubr.bf16.mxu0 %v12134_v46  ;;  %v11169_v46 = vld [vmem:[#allocation9 + $0x10c8] ss:$20 sps:$4 sm:$0xff]   ;;  %v11198_v26 = vld [vmem:[#allocation9 + $0xc90] ss:$20 sps:$4 sm:$0xff]  }
 0x406   :  { %5263 = vmatprep.subr.bf16.mxu1 %v11153_v27  ;;  %10097 = vmatprep.subr.bf16.mxu0 %v11154_v28  ;;  %v11225_v27 = vld [vmem:[#allocation9 + $0x12e8] ss:$20 sps:$4 sm:$0xff]   ;;  %v11230_v28 = vld [vmem:[#allocation9 + $0x12c4] ss:$20 sps:$4 sm:$0xff]  }
 0x408   :  { %5264 = vmatpush2.bf16.msra.mxu1 %v11151_v52  ;;  %v11199_v52 = vld [vmem:[#allocation9 + $0x12a8] ss:$20 sps:$4 sm:$0xff]  }
 0x409   :  { %10098 = vmatpush3.bf16.msra.mxu0 %v11155_v35  ;;  %5265 = vmatprep.subr.bf16.mxu1 %v11158_v36  ;;  %v11228_v35 = vld [vmem:[#allocation9 + $0x12c0] ss:$20 sps:$4 sm:$0xff]   ;;  %v11233_v36 = vld [vmem:[#allocation9 + $0x151c] ss:$20 sps:$4 sm:$0xff]  }
 0x40a   :  { %10099 = vmatprep.subr.bf16.mxu0 %v11159_v37  ;;  %v11200_v37 = vld [vmem:[#allocation9 + $0x1280] ss:$20 sps:$4 sm:$0xff]  }
 0x40c   :  { %5266 = vmatpush2.bf16.msra.mxu1 %v11156_v40  ;;  %v11231_v40 = vld [vmem:[#allocation9 + $0x1518] ss:$20 sps:$4 sm:$0xff]  }
 0x40d   :  { %10100 = vmatpush3.bf16.msra.mxu0 %v11160_v41  ;;  %5267 = vmatprep.subr.bf16.mxu1 %v11163_v42  ;;  %v11236_v41 = vld [vmem:[#allocation9 + $0x14f4] ss:$20 sps:$4 sm:$0xff]   ;;  %v11201_v42 = vld [vmem:[#allocation9 + $0x1258] ss:$20 sps:$4 sm:$0xff]  }
 0x40e   :  { %10101 = vmatprep.subr.bf16.mxu0 %v11164_v43  ;;  %v11234_v43 = vld [vmem:[#allocation9 + $0x14f0] ss:$20 sps:$4 sm:$0xff]  }
 0x410   :  { %5268 = vmatpush2.bf16.msra.mxu1 %v11161_v44  ;;  %v11239_v44 = vld [vmem:[#allocation9 + $0x14cc] ss:$20 sps:$4 sm:$0xff]  }
 0x411   :  { %10102 = vmatpush3.bf16.msra.mxu0 %v11165_v45  ;;  %5269 = vmatprep.subr.bf16.mxu1 %v11168_v33  ;;  %v11237_v45 = vld [vmem:[#allocation9 + $0x14c8] ss:$20 sps:$4 sm:$0xff]   ;;  %v11242_v33 = vld [vmem:[#allocation9 + $0x14a4] ss:$20 sps:$4 sm:$0xff]  }
 0x412   :  { %10103 = vmatprep.subr.bf16.mxu0 %v11169_v46  ;;  %v11203_v46 = vld [vmem:[#allocation9 + $0x1208] ss:$20 sps:$4 sm:$0xff]  }
 0x414   :  { %5270 = vmatpush2.bf16.msra.mxu1 %v11166_v47  ;;  %v11240_v47 = vld [vmem:[#allocation9 + $0x14a0] ss:$20 sps:$4 sm:$0xff]  }
 0x415   :  { %10104 = vmatpush3.bf16.msra.mxu0 %v11170_v48  ;;  %5271 = vmatprep.subr.bf16.mxu1 %v11173_v21  ;;  %v11245_v48 = vld [vmem:[#allocation9 + $0x147c] ss:$20 sps:$4 sm:$0xff]   ;;  %v11204_v21 = vld [vmem:[#allocation9 + $0x11e0] ss:$20 sps:$4 sm:$0xff]  }
 0x416   :  { %10105 = vmatprep.subr.bf16.mxu0 %v11174_v50  ;;  %v11243_v50 = vld [vmem:[#allocation9 + $0x1478] ss:$20 sps:$4 sm:$0xff]  }
 0x418   :  { %5272 = vmatpush2.bf16.msra.mxu1 %v11171_v53  ;;  %v11248_v53 = vld [vmem:[#allocation9 + $0x1454] ss:$20 sps:$4 sm:$0xff]  }
 0x419   :  { %10106 = vmatpush3.bf16.msra.mxu0 %v11175_v10  ;;  %5273 = vmatprep.subr.bf16.mxu1 %v11178_v54  ;;  %v11205_v10 = vld [vmem:[#allocation9 + $0x11b8] ss:$20 sps:$4 sm:$0xff]   ;;  %v11246_v54 = vld [vmem:[#allocation9 + $0x1450] ss:$20 sps:$4 sm:$0xff]  }
 0x41a   :  { %10107 = vmatprep.subr.bf16.mxu0 %v11179_v55  ;;  %v11251_v55 = vld [vmem:[#allocation9 + $0x142c] ss:$20 sps:$4 sm:$0xff]  }
 0x41c   :  { %5274 = vmatpush2.bf16.msra.mxu1 %v11176_v56  ;;  %v11206_v56 = vld [vmem:[#allocation9 + $0x1190] ss:$20 sps:$4 sm:$0xff]  }
 0x41d   :  { %10108 = vmatpush3.bf16.msra.mxu0 %v11180_v58  ;;  %10073 = vmatprep.subr.bf16.mxu1 %v11181_v60  ;;  %v11249_v58 = vld [vmem:[#allocation9 + $0x1428] ss:$20 sps:$4 sm:$0xff]  }
 0x41e   :  { %10109 = vmatprep.subr.bf16.mxu0 %v11183_v61  ;;  %v11257_v60 = vld [vmem:[#allocation9 + $0x165c] ss:$20 sps:$4 sm:$0xff]   ;;  %v11254_v61 = vld [vmem:[#allocation9 + $0x1404] ss:$20 sps:$4 sm:$0xff]  }
 0x41f   :  { %5276 = vmatmul.mubr.bf16.vlgmr.msra.gmra.mxu1 %v12136_v59 }
 0x420   :  { %10074 = vmatpush3.bf16.msra.mxu1 %v11182_v62  ;;  %5361 = vmatprep.mubr.bf16.mxu1 %v12123_v51  ;;  %v11191_v51 = vld [vmem:[#allocation9 + $0xe48] ss:$20 sps:$4 sm:$0xff]   ;;  %v11255_v62 = vld [vmem:[#allocation9 + $0x1658] ss:$20 sps:$4 sm:$0xff]  }
 0x421   :  { %10110 = vmatpush3.bf16.msra.mxu0 %v11184_v1  ;;  %10075 = vmatprep.subr.bf16.mxu1 %v11185_v24  ;;  %v11252_v1 = vld [vmem:[#allocation9 + $0x1400] ss:$20 sps:$4 sm:$0xff]  }
 0x422   :  { %6778 = vmatprep.subr.bf16.mxu0 %v11209_v2  ;;  %v11260_v24 = vld [vmem:[#allocation9 + $0x1634] ss:$20 sps:$4 sm:$0xff]   ;;  %v11258_v2 = vld [vmem:[#allocation9 + $0x1630] ss:$20 sps:$4 sm:$0xff]  }
 0x424   :  { %10076 = vmatpush3.bf16.msra.mxu1 %v11186_v3  ;;  %5403 = vmatmul.mubr.bf16.vlgmr.msra.gmra.mxu0 %v12136_v59  ;;  %v11216_v59 = vld [vmem:[#allocation9 + $0x1360] ss:$20 sps:$4 sm:$0xff]  }
 0x425   :  { %10077 = vmatprep.subr.bf16.mxu1 %v11187_v4  ;;  %6779 = vmatpush1.bf16.msra.mxu0 %v11207_v5  ;;  %v11263_v3 = vld [vmem:[#allocation9 + $0x160c] ss:$20 sps:$4 sm:$0xff]   ;;  %v11261_v4 = vld [vmem:[#allocation9 + $0x1608] ss:$20 sps:$4 sm:$0xff]   ;;  %v11266_v5 = vld [vmem:[#allocation9 + $0x15e4] ss:$20 sps:$4 sm:$0xff]  }
 0x426   :  { %6780 = vmatprep.subr.bf16.mxu0 %v11212_v6  ;;  %v11264_v6 = vld [vmem:[#allocation9 + $0x15e0] ss:$20 sps:$4 sm:$0xff]  }
 0x428   :  { %10078 = vmatpush3.bf16.msra.mxu1 %v11188_v7  ;;  %v11269_v7 = vld [vmem:[#allocation9 + $0x15bc] ss:$20 sps:$4 sm:$0xff]  }
 0x429   :  { %10079 = vmatprep.subr.bf16.mxu1 %v11189_v8  ;;  %6781 = vmatpush1.bf16.msra.mxu0 %v11210_v9  ;;  %v11267_v8 = vld [vmem:[#allocation9 + $0x15b8] ss:$20 sps:$4 sm:$0xff]   ;;  %v11272_v9 = vld [vmem:[#allocation9 + $0x1594] ss:$20 sps:$4 sm:$0xff]  }
 0x42a   :  { %6782 = vmatprep.subr.bf16.mxu0 %v11215_v11  ;;  %v11270_v11 = vld [vmem:[#allocation9 + $0x1590] ss:$20 sps:$4 sm:$0xff]  }
 0x42c   :  { %10080 = vmatpush3.bf16.msra.mxu1 %v11190_v63  ;;  %v11273_v63 = vld [vmem:[#allocation9 + $0x1568] ss:$20 sps:$4 sm:$0xff]  }
 0x42d   :  { %10081 = vmatprep.subr.bf16.mxu1 %v11191_v51  ;;  %6783 = vmatpush1.bf16.msra.mxu0 %v11213_v12  ;;  %v11278_v51 = vld [vmem:[#allocation9 + $0x1544] ss:$20 sps:$4 sm:$0xff]   ;;  %v11276_v12 = vld [vmem:[#allocation9 + $0x1540] ss:$20 sps:$4 sm:$0xff]  }
 0x42e   :  { %6784 = vmatprep.subr.bf16.mxu0 %v11218_v14  ;;  %v11281_v14 = vld [vmem:[#allocation9 + $0x179c] ss:$20 sps:$4 sm:$0xff]  }
 0x430   :  { %10082 = vmatpush3.bf16.msra.mxu1 %v11192_v15  ;;  %v11279_v15 = vld [vmem:[#allocation9 + $0x1798] ss:$20 sps:$4 sm:$0xff]  }
 0x431   :  { %10083 = vmatprep.subr.bf16.mxu1 %v11193_v16  ;;  %6785 = vmatpush1.bf16.msra.mxu0 %v11216_v59  ;;  %v11284_v16 = vld [vmem:[#allocation9 + $0x1774] ss:$20 sps:$4 sm:$0xff]   ;;  %v11282_v59 = vld [vmem:[#allocation9 + $0x1770] ss:$20 sps:$4 sm:$0xff]  }
 0x432   :  { %6786 = vmatprep.subr.bf16.mxu0 %v11221_v34  ;;  %v11287_v34 = vld [vmem:[#allocation9 + $0x174c] ss:$20 sps:$4 sm:$0xff]  }
 0x434   :  { %10084 = vmatpush3.bf16.msra.mxu1 %v11194_v57  ;;  %v11285_v57 = vld [vmem:[#allocation9 + $0x1748] ss:$20 sps:$4 sm:$0xff]  }
 0x435   :  { %10085 = vmatprep.subr.bf16.mxu1 %v11195_v17  ;;  %6787 = vmatpush1.bf16.msra.mxu0 %v11219_v18  ;;  %v11290_v17 = vld [vmem:[#allocation9 + $0x1724] ss:$20 sps:$4 sm:$0xff]   ;;  %v11288_v18 = vld [vmem:[#allocation9 + $0x1720] ss:$20 sps:$4 sm:$0xff]  }
 0x436   :  { %6788 = vmatprep.subr.bf16.mxu0 %v11224_v19  ;;  %v11326_v19 = vld [vmem:[#allocation9 + $0x18dc] ss:$20 sps:$4 sm:$0xff]  }
 0x438   :  { %10086 = vmatpush3.bf16.msra.mxu1 %v11196_v22  ;;  %v11293_v22 = vld [vmem:[#allocation9 + $0x16fc] ss:$20 sps:$4 sm:$0xff]  }
 0x439   :  { %10087 = vmatprep.subr.bf16.mxu1 %v11197_v25  ;;  %6789 = vmatpush1.bf16.msra.mxu0 %v11222_v13  ;;  %v11291_v25 = vld [vmem:[#allocation9 + $0x16f8] ss:$20 sps:$4 sm:$0xff]   ;;  %v11296_v13 = vld [vmem:[#allocation9 + $0x16d4] ss:$20 sps:$4 sm:$0xff]  }
 0x43a   :  { %6790 = vmatprep.subr.bf16.mxu0 %v11227_v23  ;;  %v11294_v23 = vld [vmem:[#allocation9 + $0x16d0] ss:$20 sps:$4 sm:$0xff]  }
 0x43c   :  { %10088 = vmatpush3.bf16.msra.mxu1 %v11198_v26  ;;  %v5105_v26 = vpop.f32.mrf.mxu1 }
 0x43d   :  { %10280 = vmatprep.subr.bf16.mxu1 %v11929_v31  ;;  %6791 = vmatpush1.bf16.msra.mxu0 %v11225_v27  ;;  %v11299_v27 = vld [vmem:[#allocation9 + $0x16ac] ss:$20 sps:$4 sm:$0xff]  }
 0x43e   :  { %6792 = vmatprep.subr.bf16.mxu0 %v11230_v28  ;;  %v11297_v28 = vld [vmem:[#allocation9 + $0x16a8] ss:$20 sps:$4 sm:$0xff]  }
 0x43f   :  { %5362 = vmatmul.mubr.bf16.vlgmr.msra.gmra.mxu1 %v12125_v29  ;;  %v11202_v29 = vld [vmem:[#allocation9 + $0x1230] ss:$20 sps:$4 sm:$0xff]  }
 0x440   :  { %10281 = vmatpush3.bf16.msra.mxu1 %v11199_v52  ;;  %10296 = vmatprep.mubr.msk.bf16.mxu1 %vm11930_vm3, %v11929_v31  ;;  %v5107_v52 = vpop.f32.mrf.mxu1 }
 0x441   :  { %10282 = vmatprep.subr.bf16.mxu1 %v11929_v31  ;;  %6793 = vmatpush1.bf16.msra.mxu0 %v11228_v35 }
 0x442   :  { %6794 = vmatprep.subr.bf16.mxu0 %v11233_v36  ;;  %v11302_v36 = vld [vmem:[#allocation9 + $0x1684] ss:$20 sps:$4 sm:$0xff]  }
 0x444   :  { %10283 = vmatpush3.bf16.msra.mxu1 %v11200_v37  ;;  %v4002_v37 = vld [vmem:[#allocation11 + $0x2] ss:$8 sm:$0xf] }
 0x445   :  { %10284 = vmatprep.subr.bf16.mxu1 %v11929_v31  ;;  %6795 = vmatpush2.bf16.msra.mxu0 %v11231_v40  ;;  %v4003_v40 = vld [vmem:[#allocation11 + $0x2] ss:$8 sm:$0x10] }
 0x446   :  { %6796 = vmatprep.subr.bf16.mxu0 %v11236_v41  ;;  %v11300_v41 = vld [vmem:[#allocation9 + $0x1680] ss:$20 sps:$4 sm:$0xff]  }
 0x448   :  { %10285 = vmatpush3.bf16.msra.mxu1 %v11201_v42  ;;  %v12166_v42 = vor.u32 %v4003_v40, %v4002_v37 }
 0x449   :  { %10286 = vmatprep.subr.bf16.mxu1 %v11929_v31  ;;  %6797 = vmatpush2.bf16.msra.mxu0 %v11234_v43  ;;  %v5109_v43 = vpop.f32.mrf.mxu1 }
 0x44a   :  { %6798 = vmatprep.subr.bf16.mxu0 %v11239_v44 }
 0x44c   :  { %10287 = vmatpush3.bf16.msra.mxu1 %v11202_v29  ;;  %v11305_v29 = vld [vmem:[#allocation9 + $0x13e4] ss:$20 sps:$4 sm:$0xff]  }
 0x44d   :  { %10288 = vmatprep.subr.bf16.mxu1 %v11929_v31  ;;  %6799 = vmatpush2.bf16.msra.mxu0 %v11237_v45  ;;  %v4013_v45 = vrot.slane %v12166_v42, %v12005_v30 }
 0x44e   :  { %6800 = vmatprep.subr.bf16.mxu0 %v11242_v33  ;;  %v4009_v33 = vrot.slane %v12166_v42, %v12008_v32 }
 0x450   :  { %10289 = vmatpush3.bf16.msra.mxu1 %v11203_v46  ;;  %v5111_v46 = vpop.f32.mrf.mxu1 }
 0x451   :  { %10290 = vmatprep.subr.bf16.mxu1 %v11929_v31  ;;  %6801 = vmatpush2.bf16.msra.mxu0 %v11240_v47 }
 0x452   :  { %6802 = vmatprep.subr.bf16.mxu0 %v11245_v48 }
 0x454   :  { %10291 = vmatpush3.bf16.msra.mxu1 %v11204_v21  ;;  %v5108_v21 = vadd.f32 %v5107_v52, %v4013_v45 }
 0x455   :  { %10292 = vmatprep.subr.bf16.mxu1 %v11929_v31  ;;  %6803 = vmatpush2.bf16.msra.mxu0 %v11243_v50  ;;  %v5110_v50 = vadd.f32 %v5109_v43, %v4009_v33 }
 0x456   :  { %6804 = vmatprep.subr.bf16.mxu0 %v11248_v53  ;;  %v5106_v53 = vadd.f32 %v5105_v26, %v4009_v33 }
 0x458   :  { %10293 = vmatpush3.bf16.msra.mxu1 %v11205_v10 }
 0x459   :  { %10294 = vmatprep.subr.bf16.mxu1 %v11929_v31  ;;  %6805 = vmatpush2.bf16.msra.mxu0 %v11246_v54 }
 0x45a   :  { %6806 = vmatprep.subr.bf16.mxu0 %v11251_v55  ;;  %v5112_v55 = vadd.f32 %v5111_v46, %v4013_v45 }
 0x45c   :  { %10295 = vmatpush3.bf16.msra.mxu1 %v11206_v56 }
 0x45d   :  { %6807 = vmatpush2.bf16.msra.mxu0 %v11249_v58  ;;  %6821 = vmatprep.subr.bf16.mxu1 %v11257_v60 }
 0x45e   :  { %6808 = vmatprep.subr.bf16.mxu0 %v11254_v61 }
 0x45f   :  { %10297 = vmatmul.mubr.bf16.vlgmr.msra.gmra.mxu1 %v12143_v49  ;;  %v11275_v49 = vld [vmem:[#allocation9 + $0x156c] ss:$20 sps:$4 sm:$0xff]  }
 0x460   :  { %6822 = vmatpush1.bf16.msra.mxu1 %v11255_v62 }
 0x461   :  { %6809 = vmatpush2.bf16.msra.mxu0 %v11252_v1  ;;  %6823 = vmatprep.subr.bf16.mxu1 %v11260_v24 }
 0x462   :  { %6864 = vmatprep.subr.bf16.mxu0 %v11326_v19  ;;  %v11360_v19 = vld [vmem:[#allocation9 + $0x17e8] ss:$20 sps:$4 sm:$0xff]  }
 0x464   :  { %6824 = vmatpush1.bf16.msra.mxu1 %v11258_v2  ;;  %v5148_v35 = vpop.f32.mrf.mxu0 }
 0x465   :  { %6825 = vmatprep.subr.bf16.mxu1 %v11263_v3  ;;  %v5149_v60 = vadd.f32 %v5148_v35, %v5106_v53  ;;  %v4021_v35 = vrot.slane %v12166_v42, %v12020_v39 }
 0x466   :  { %v5150_v44 = vpop.f32.mrf.mxu0 }
 0x467   :  { %v5151_v56 = vadd.f32 %v5150_v44, %v5108_v21 }
 0x468   :  { %6826 = vmatpush1.bf16.msra.mxu1 %v11261_v4  ;;  %v5152_v47 = vpop.f32.mrf.mxu0 }
 0x469   :  { %6827 = vmatprep.subr.bf16.mxu1 %v11266_v5  ;;  %v5153_v58 = vadd.f32 %v5152_v47, %v5110_v50 }
 0x46a   :  { %v5154_v10 = vpop.f32.mrf.mxu0 }
 0x46b   :  { %v5155_v62 = vadd.f32 %v5154_v10, %v5112_v55 }
 0x46c   :  { %6828 = vmatpush1.bf16.msra.mxu1 %v11264_v6 }
 0x46d   :  { %6829 = vmatprep.subr.bf16.mxu1 %v11269_v7 }
 0x470   :  { %6830 = vmatpush1.bf16.msra.mxu1 %v11267_v8 }
 0x471   :  { %6831 = vmatprep.subr.bf16.mxu1 %v11272_v9 }
 0x474   :  { %6832 = vmatpush1.bf16.msra.mxu1 %v11270_v11  ;;  %v11324_v11 = vld [vmem:[#allocation9 + $0x18d8] ss:$20 sps:$4 sm:$0xff]  }
 0x475   :  { %6833 = vmatprep.subr.bf16.mxu1 %v11275_v49 }
 0x478   :  { %6834 = vmatpush1.bf16.msra.mxu1 %v11273_v63  ;;  %v11332_v63 = vld [vmem:[#allocation9 + $0x18b4] ss:$20 sps:$4 sm:$0xff]  }
 0x479   :  { %6835 = vmatprep.subr.bf16.mxu1 %v11278_v51  ;;  %v11330_v51 = vld [vmem:[#allocation9 + $0x18b0] ss:$20 sps:$4 sm:$0xff]  }
 0x47c   :  { %6836 = vmatpush1.bf16.msra.mxu1 %v11276_v12  ;;  %v11338_v12 = vld [vmem:[#allocation9 + $0x188c] ss:$20 sps:$4 sm:$0xff]  }
 0x47d   :  { %6837 = vmatprep.subr.bf16.mxu1 %v11281_v14  ;;  %v11336_v14 = vld [vmem:[#allocation9 + $0x1888] ss:$20 sps:$4 sm:$0xff]  }
 0x480   :  { %6838 = vmatpush2.bf16.msra.mxu1 %v11279_v15  ;;  %v11344_v15 = vld [vmem:[#allocation9 + $0x1864] ss:$20 sps:$4 sm:$0xff]  }
 0x481   :  { %6839 = vmatprep.subr.bf16.mxu1 %v11284_v16  ;;  %v11342_v16 = vld [vmem:[#allocation9 + $0x1860] ss:$20 sps:$4 sm:$0xff]  }
 0x484   :  { %6840 = vmatpush2.bf16.msra.mxu1 %v11282_v59  ;;  %v11350_v59 = vld [vmem:[#allocation9 + $0x183c] ss:$20 sps:$4 sm:$0xff]  }
 0x485   :  { %6841 = vmatprep.subr.bf16.mxu1 %v11287_v34  ;;  %v11348_v34 = vld [vmem:[#allocation9 + $0x1838] ss:$20 sps:$4 sm:$0xff]  }
 0x488   :  { %6842 = vmatpush2.bf16.msra.mxu1 %v11285_v57  ;;  %v11356_v57 = vld [vmem:[#allocation9 + $0x1814] ss:$20 sps:$4 sm:$0xff]  }
 0x489   :  { %6843 = vmatprep.subr.bf16.mxu1 %v11290_v17  ;;  %v11354_v17 = vld [vmem:[#allocation9 + $0x1810] ss:$20 sps:$4 sm:$0xff]  }
 0x48c   :  { %6844 = vmatpush2.bf16.msra.mxu1 %v11288_v18  ;;  %v11362_v18 = vld [vmem:[#allocation9 + $0x17ec] ss:$20 sps:$4 sm:$0xff]  }
 0x48d   :  { %6845 = vmatprep.subr.bf16.mxu1 %v11293_v22  ;;  %v11368_v22 = vld [vmem:[#allocation9 + $0x17c4] ss:$20 sps:$4 sm:$0xff]  }
 0x490   :  { %6846 = vmatpush2.bf16.msra.mxu1 %v11291_v25  ;;  %v11366_v25 = vld [vmem:[#allocation9 + $0x17c0] ss:$20 sps:$4 sm:$0xff]  }
 0x491   :  { %6847 = vmatprep.subr.bf16.mxu1 %v11296_v13  ;;  %v11374_v13 = vld [vmem:[#allocation9 + $0x1664] ss:$20 sps:$4 sm:$0xff]  }
 0x494   :  { %6848 = vmatpush2.bf16.msra.mxu1 %v11294_v23 }
 0x495   :  { %6849 = vmatprep.subr.bf16.mxu1 %v11299_v27 }
 0x498   :  { %6850 = vmatpush2.bf16.msra.mxu1 %v11297_v28 }
 0x499   :  { %6851 = vmatprep.subr.bf16.mxu1 %v11302_v36  ;;  %v4017_v36 = vrot.slane %v12166_v42, %v12017_v38 }
 0x49c   :  { %6852 = vmatpush2.bf16.msra.mxu1 %v11300_v41 }
 0x49d   :  { %6907 = vmatprep.subr.bf16.mxu1 %v11305_v29 }
 0x49f   :  { %v5191_v48 = vpop.f32.mrf.mxu1 }
 0x4a0   :  { %v5192_v2 = vadd.f32 %v5191_v48, %v5149_v60 }
 0x4a1   :  { %v5193_v54 = vpop.f32.mrf.mxu1 }
 0x4a2   :  { %v5194_v1 = vadd.f32 %v5193_v54, %v5151_v56  ;;  %v5452_v8 = vmax.f32 %v5192_v2, 0.0  ;;  %v11303_v2 = vld [vmem:[#allocation9 + $0x13e0] ss:$20 sps:$4 sm:$0xff]  }
 0x4a3   :  { %v5195_v61 = vpop.f32.mrf.mxu1 }
 0x4a4   :  { %v5196_v24 = vadd.f32 %v5195_v61, %v5153_v58  ;;  %v5453_v6 = vmax.f32 %v5194_v1, 0.0  ;;  %v5234_v23 = vpop.f32.mrf.mxu0 }
 0x4a5   :  { %v5197_v3 = vpop.f32.mrf.mxu1  ;;  %v5235_v43 = vadd.f32 %v5234_v23, %v4017_v36  ;;  %v11347_v23 = vld [vmem:[#allocation9 + $0x14d4] ss:$20 sps:$4 sm:$0xff]  }
 0x4a6   :  { %v5198_v4 = vadd.f32 %v5197_v3, %v5155_v62  ;;  %v5457_v5 = vmax.f32 %v5196_v24, 0.0  ;;  %v5236_v26 = vpop.f32.mrf.mxu0 }
 0x4a7   :  { %v5237_v41 = vadd.f32 %v5236_v26, %v4021_v35 }
 0x4a8   :  { %v5458_v7 = vmax.f32 %v5198_v4, 0.0  ;;  %v12174_v49 = vpack.c.bf16 %v5457_v5, %v5452_v8  ;;  %v5238_v27 = vpop.f32.mrf.mxu0  ;;  %v11308_v4 = vld [vmem:[#allocation9 + $0x13bc] ss:$20 sps:$4 sm:$0xff]   ;;  %v11306_v5 = vld [vmem:[#allocation9 + $0x13b8] ss:$20 sps:$4 sm:$0xff]  }
 0x4a9   :  { %v5239_v29 = vadd.f32 %v5238_v27, %v4017_v36  ;;  %v11314_v8 = vld [vmem:[#allocation9 + $0x136c] ss:$20 sps:$4 sm:$0xff]   ;;  %v11345_v27 = vld [vmem:[#allocation9 + $0x14d0] ss:$20 sps:$4 sm:$0xff]   ;;  %v4025_v36 = vrot.slane %v12166_v42, %v12040_v20 }
 0x4aa   :  { %v12172_v9 = vpack.c.bf16 %v5458_v7, %v5453_v6  ;;  %v5240_v28 = vpop.f32.mrf.mxu0  ;;  %v11311_v6 = vld [vmem:[#allocation9 + $0x1394] ss:$20 sps:$4 sm:$0xff]   ;;  %v11309_v7 = vld [vmem:[#allocation9 + $0x1390] ss:$20 sps:$4 sm:$0xff]   ;;  %v11363_v42 = vld [vmem:[#allocation9 + $0x1458] ss:$20 sps:$4 sm:$0xff]  }
 0x4ab   :  { %v5241_v48 = vadd.f32 %v5240_v28, %v4021_v35 }
 0x4ac   :  { %6810 = vmatprep.mubr.bf16.mxu0 %v12172_v9 }
 0x4ad   :  { %6811 = vmatmul.mubr.bf16.vlgmr.msra.gmra.mxu0 %v12174_v49 }
 0x4ae   :  { %6865 = vmatpush1.bf16.msra.mxu0 %v11324_v11  ;;  %6896 = vmatprep.mubr.bf16.mxu0 %v11927_v0  ;;  %v11312_v11 = vld [vmem:[#allocation9 + $0x1368] ss:$20 sps:$4 sm:$0xff]  }
 0x4af   :  { %6866 = vmatprep.subr.bf16.mxu0 %v11332_v63  ;;  %v11317_v63 = vld [vmem:[#allocation9 + $0x1344] ss:$20 sps:$4 sm:$0xff]  }
 0x4b2   :  { %6867 = vmatpush1.bf16.msra.mxu0 %v11330_v51  ;;  %v11315_v51 = vld [vmem:[#allocation9 + $0x1340] ss:$20 sps:$4 sm:$0xff]  }
 0x4b3   :  { %6868 = vmatprep.subr.bf16.mxu0 %v11338_v12  ;;  %v11320_v12 = vld [vmem:[#allocation9 + $0x131c] ss:$20 sps:$4 sm:$0xff]  }
 0x4b6   :  { %6869 = vmatpush1.bf16.msra.mxu0 %v11336_v14  ;;  %v11318_v14 = vld [vmem:[#allocation9 + $0x1318] ss:$20 sps:$4 sm:$0xff]  }
 0x4b7   :  { %6870 = vmatprep.subr.bf16.mxu0 %v11344_v15  ;;  %v11323_v15 = vld [vmem:[#allocation9 + $0x12f4] ss:$20 sps:$4 sm:$0xff]  }
 0x4ba   :  { %6871 = vmatpush1.bf16.msra.mxu0 %v11342_v16  ;;  %v11321_v16 = vld [vmem:[#allocation9 + $0x12f0] ss:$20 sps:$4 sm:$0xff]  }
 0x4bb   :  { %6872 = vmatprep.subr.bf16.mxu0 %v11350_v59  ;;  %v11329_v59 = vld [vmem:[#allocation9 + $0x12cc] ss:$20 sps:$4 sm:$0xff]  }
 0x4be   :  { %6873 = vmatpush1.bf16.msra.mxu0 %v11348_v34  ;;  %v11327_v34 = vld [vmem:[#allocation9 + $0x12c8] ss:$20 sps:$4 sm:$0xff]  }
 0x4bf   :  { %6874 = vmatprep.subr.bf16.mxu0 %v11356_v57  ;;  %v11335_v57 = vld [vmem:[#allocation9 + $0x1524] ss:$20 sps:$4 sm:$0xff]  }
 0x4c2   :  { %6875 = vmatpush1.bf16.msra.mxu0 %v11354_v17 }
 0x4c3   :  { %6876 = vmatprep.subr.bf16.mxu0 %v11362_v18  ;;  %v11333_v18 = vld [vmem:[#allocation9 + $0x1520] ss:$20 sps:$4 sm:$0xff]  }
 0x4c4   :  { %v5320_v52 = vpop.f32.mrf.mxu0 }
 0x4c6   :  { %6877 = vmatpush1.bf16.msra.mxu0 %v11360_v19  ;;  %v5322_v37 = vpop.f32.mrf.mxu0  ;;  %v11341_v19 = vld [vmem:[#allocation9 + $0x14fc] ss:$20 sps:$4 sm:$0xff]  }
 0x4c7   :  { %6878 = vmatprep.subr.bf16.mxu0 %v11368_v22 }
 0x4c8   :  { %v5324_v33 = vpop.f32.mrf.mxu0 }
 0x4ca   :  { %6879 = vmatpush1.bf16.msra.mxu0 %v11366_v25  ;;  %v5326_v55 = vpop.f32.mrf.mxu0  ;;  %v11339_v25 = vld [vmem:[#allocation9 + $0x14f8] ss:$20 sps:$4 sm:$0xff]  }
 0x4cb   :  { %6950 = vmatprep.subr.bf16.mxu0 %v11374_v13 }
 0x4df   :  { %v5277_v40 = vpop.f32.mrf.mxu1 }
 0x4e0   :  { %v5278_v46 = vadd.f32 %v5277_v40, %v5235_v43  ;;  %v11351_v40 = vld [vmem:[#allocation9 + $0x14a8] ss:$20 sps:$4 sm:$0xff]   ;;  %v11359_v43 = vld [vmem:[#allocation9 + $0x1484] ss:$20 sps:$4 sm:$0xff]  }
 0x4e1   :  { %v5279_v44 = vpop.f32.mrf.mxu1 }
 0x4e2   :  { %v5280_v45 = vadd.f32 %v5279_v44, %v5237_v41  ;;  %v5321_v56 = vadd.f32 %v5320_v52, %v5278_v46  ;;  %v11353_v52 = vld [vmem:[#allocation9 + $0x14ac] ss:$20 sps:$4 sm:$0xff]   ;;  %v11365_v46 = vld [vmem:[#allocation9 + $0x145c] ss:$20 sps:$4 sm:$0xff]  }
 0x4e3   :  { %v5281_v47 = vpop.f32.mrf.mxu1 }
 0x4e4   :  { %v5282_v21 = vadd.f32 %v5281_v47, %v5239_v29  ;;  %v5323_v53 = vadd.f32 %v5322_v37, %v5280_v45  ;;  %v5454_v1 = vmax.f32 %v5321_v56, 0.0  ;;  %v10111_v13 = vpop.f32.mrf.mxu0  ;;  %v11357_v45 = vld [vmem:[#allocation9 + $0x1480] ss:$20 sps:$4 sm:$0xff]  }
 0x4e5   :  { %v5283_v50 = vpop.f32.mrf.mxu1 }
 0x4e6   :  { %v5325_v10 = vadd.f32 %v5324_v33, %v5282_v21  ;;  %v5284_v54 = vadd.f32 %v5283_v50, %v5241_v48  ;;  %v5455_v61 = vmax.f32 %v5323_v53, 0.0  ;;  %v10112_v28 = vpop.f32.mrf.mxu0 }
 0x4e7   :  { %v10113_v47 = vadd.f32 %v10112_v28, %v10111_v13  ;;  %v11404_v13 = vld [vmem:[#allocation9 + $0x159c] ss:$20 sps:$4 sm:$0xff]   ;;  %v11410_v28 = vld [vmem:[#allocation9 + $0x1574] ss:$20 sps:$4 sm:$0xff]  }
 0x4e8   :  { %v5327_v58 = vadd.f32 %v5326_v55, %v5284_v54  ;;  %v5459_v60 = vmax.f32 %v5325_v10, 0.0  ;;  %v10114_v41 = vpop.f32.mrf.mxu0  ;;  %v11371_v54 = vld [vmem:[#allocation9 + $0x1434] ss:$20 sps:$4 sm:$0xff]  }
 0x4ea   :  { %v5460_v62 = vmax.f32 %v5327_v58, 0.0  ;;  %v12185_v3 = vpack.c.bf16 %v5459_v60, %v5454_v1  ;;  %v10115_v33 = vpop.f32.mrf.mxu0  ;;  %v11377_v1 = vld [vmem:[#allocation9 + $0x140c] ss:$20 sps:$4 sm:$0xff]  }
 0x4eb   :  { %v10116_v50 = vadd.f32 %v10115_v33, %v10114_v41  ;;  %v11414_v41 = vld [vmem:[#allocation9 + $0x1548] ss:$20 sps:$4 sm:$0xff]  }
 0x4ec   :  { %v12183_v24 = vpack.c.bf16 %v5460_v62, %v5455_v61  ;;  %v11369_v61 = vld [vmem:[#allocation9 + $0x1430] ss:$20 sps:$4 sm:$0xff]   ;;  %v11423_v33 = vld [vmem:[#allocation9 + $0x17c8] ss:$20 sps:$4 sm:$0xff]  }
 0x4ee   :  { %6853 = vmatprep.mubr.bf16.mxu1 %v12183_v24 }
 0x4ef   :  { %6854 = vmatmul.mubr.bf16.vlgmr.msra.gmra.mxu1 %v12185_v3 }
 0x4f0   :  { %6908 = vmatpush1.bf16.msra.mxu1 %v11303_v2  ;;  %6939 = vmatprep.mubr.bf16.mxu1 %v12172_v9 }
 0x4f1   :  { %6909 = vmatprep.subr.bf16.mxu1 %v11308_v4 }
 0x4f4   :  { %6910 = vmatpush1.bf16.msra.mxu1 %v11306_v5  ;;  %v11372_v5 = vld [vmem:[#allocation9 + $0x1660] ss:$20 sps:$4 sm:$0xff]  }
 0x4f5   :  { %6911 = vmatprep.subr.bf16.mxu1 %v11311_v6 }
 0x4f8   :  { %6912 = vmatpush1.bf16.msra.mxu1 %v11309_v7  ;;  %v11375_v7 = vld [vmem:[#allocation9 + $0x1408] ss:$20 sps:$4 sm:$0xff]  }
 0x4f9   :  { %6913 = vmatprep.subr.bf16.mxu1 %v11314_v8  ;;  %v11380_v8 = vld [vmem:[#allocation9 + $0x163c] ss:$20 sps:$4 sm:$0xff]  }
 0x4fc   :  { %6914 = vmatpush1.bf16.msra.mxu1 %v11312_v11  ;;  %v11383_v11 = vld [vmem:[#allocation9 + $0x18e4] ss:$20 sps:$4 sm:$0xff]  }
 0x4fd   :  { %6915 = vmatprep.subr.bf16.mxu1 %v11317_v63  ;;  %v11378_v63 = vld [vmem:[#allocation9 + $0x1638] ss:$20 sps:$4 sm:$0xff]  }
 0x4ff   :  { %v10089_v17 = vpop.f32.mrf.mxu1 }
 0x500   :  { %6916 = vmatpush1.bf16.msra.mxu1 %v11315_v51  ;;  %v11381_v51 = vld [vmem:[#allocation9 + $0x18e0] ss:$20 sps:$4 sm:$0xff]  }
 0x501   :  { %6917 = vmatprep.subr.bf16.mxu1 %v11320_v12  ;;  %v10090_v22 = vpop.f32.mrf.mxu1  ;;  %v11386_v12 = vld [vmem:[#allocation9 + $0x1614] ss:$20 sps:$4 sm:$0xff]  }
 0x502   :  { %v10091_v37 = vadd.f32 %v10090_v22, %v10089_v17  ;;  %v11393_v17 = vld [vmem:[#allocation9 + $0x1890] ss:$20 sps:$4 sm:$0xff]   ;;  %v11396_v22 = vld [vmem:[#allocation9 + $0x15c0] ss:$20 sps:$4 sm:$0xff]  }
 0x503   :  { %v10092_v26 = vpop.f32.mrf.mxu1 }
 0x504   :  { %6918 = vmatpush1.bf16.msra.mxu1 %v11318_v14  ;;  %v5364_v29 = vadd.f32 %v10091_v37, %v4025_v36  ;;  %v11389_v14 = vld [vmem:[#allocation9 + $0x18bc] ss:$20 sps:$4 sm:$0xff]   ;;  %v11416_v37 = vld [vmem:[#allocation9 + $0x154c] ss:$20 sps:$4 sm:$0xff]  }
 0x505   :  { %6919 = vmatprep.subr.bf16.mxu1 %v11323_v15  ;;  %v10093_v35 = vpop.f32.mrf.mxu1  ;;  %v11384_v15 = vld [vmem:[#allocation9 + $0x1610] ss:$20 sps:$4 sm:$0xff]  }
 0x506   :  { %v10094_v44 = vadd.f32 %v10093_v35, %v10092_v26  ;;  %v5405_v53 = vadd.f32 %v10113_v47, %v5364_v29  ;;  %v11402_v26 = vld [vmem:[#allocation9 + $0x1598] ss:$20 sps:$4 sm:$0xff]   ;;  %v11408_v35 = vld [vmem:[#allocation9 + $0x1570] ss:$20 sps:$4 sm:$0xff]   ;;  %v11429_v47 = vld [vmem:[#allocation9 + $0x17a8] ss:$20 sps:$4 sm:$0xff]  }
 0x507   :  { %v11425_v29 = vld [vmem:[#allocation9 + $0x17cc] ss:$20 sps:$4 sm:$0xff]  }
 0x508   :  { %6920 = vmatpush1.bf16.msra.mxu1 %v11321_v16  ;;  %v5367_v48 = vadd.f32 %v10094_v44, %v4025_v36  ;;  %v11387_v16 = vld [vmem:[#allocation9 + $0x18b8] ss:$20 sps:$4 sm:$0xff]  }
 0x509   :  { %6921 = vmatprep.subr.bf16.mxu1 %v11329_v59  ;;  %v11392_v59 = vld [vmem:[#allocation9 + $0x15ec] ss:$20 sps:$4 sm:$0xff]   ;;  %v11422_v44 = vld [vmem:[#allocation9 + $0x17a4] ss:$20 sps:$4 sm:$0xff]  }
 0x50a   :  { %v5408_v56 = vadd.f32 %v10116_v50, %v5367_v48  ;;  %v11411_v36 = vld [vmem:[#allocation9 + $0x1818] ss:$20 sps:$4 sm:$0xff]   ;;  %v11433_v50 = vld [vmem:[#allocation9 + $0x1754] ss:$20 sps:$4 sm:$0xff]  }
 0x50b   :  { %v11426_v48 = vld [vmem:[#allocation9 + $0x1778] ss:$20 sps:$4 sm:$0xff]  }
 0x50c   :  { %6922 = vmatpush1.bf16.msra.mxu1 %v11327_v34  ;;  %v11395_v34 = vld [vmem:[#allocation9 + $0x1894] ss:$20 sps:$4 sm:$0xff]  }
 0x50d   :  { %6923 = vmatprep.subr.bf16.mxu1 %v11335_v57  ;;  %v11390_v57 = vld [vmem:[#allocation9 + $0x15e8] ss:$20 sps:$4 sm:$0xff]  }
 0x510   :  { %6924 = vmatpush2.bf16.msra.mxu1 %v11333_v18  ;;  %v11398_v18 = vld [vmem:[#allocation9 + $0x15c4] ss:$20 sps:$4 sm:$0xff]  }
 0x511   :  { %6925 = vmatprep.subr.bf16.mxu1 %v11341_v19  ;;  %v11401_v19 = vld [vmem:[#allocation9 + $0x186c] ss:$20 sps:$4 sm:$0xff]  }
 0x514   :  { %6926 = vmatpush2.bf16.msra.mxu1 %v11339_v25  ;;  %v11399_v25 = vld [vmem:[#allocation9 + $0x1868] ss:$20 sps:$4 sm:$0xff]  }
 0x515   :  { %6927 = vmatprep.subr.bf16.mxu1 %v11347_v23  ;;  %v11407_v23 = vld [vmem:[#allocation9 + $0x1844] ss:$20 sps:$4 sm:$0xff]  }
 0x518   :  { %6928 = vmatpush2.bf16.msra.mxu1 %v11345_v27  ;;  %v11405_v27 = vld [vmem:[#allocation9 + $0x1840] ss:$20 sps:$4 sm:$0xff]  }
 0x519   :  { %6929 = vmatprep.subr.bf16.mxu1 %v11353_v52  ;;  %v11413_v52 = vld [vmem:[#allocation9 + $0x181c] ss:$20 sps:$4 sm:$0xff]  }
 0x51c   :  { %6930 = vmatpush2.bf16.msra.mxu1 %v11351_v40  ;;  %v11419_v40 = vld [vmem:[#allocation9 + $0x17f4] ss:$20 sps:$4 sm:$0xff]  }
 0x51d   :  { %6931 = vmatprep.subr.bf16.mxu1 %v11359_v43  ;;  %v11417_v43 = vld [vmem:[#allocation9 + $0x17f0] ss:$20 sps:$4 sm:$0xff]  }
 0x51f   :  { %v5445_v21 = vpop.f32.mrf.mxu1 }
 0x520   :  { %6932 = vmatpush2.bf16.msra.mxu1 %v11357_v45  ;;  %v5446_v55 = vadd.f32 %v5445_v21, %v5405_v53  ;;  %v11420_v45 = vld [vmem:[#allocation9 + $0x17a0] ss:$20 sps:$4 sm:$0xff]   ;;  %v11430_v21 = vld [vmem:[#allocation9 + $0x1668] ss:$20 sps:$4 sm:$0xff]  }
 0x521   :  { %v10298_v10 = vpop.f32.mrf.mxu1  ;;  %6933 = vmatprep.subr.bf16.mxu1 %v11365_v46  ;;  %v11428_v46 = vld [vmem:[#allocation9 + $0x177c] ss:$20 sps:$4 sm:$0xff]   ;;  %v11434_v53 = vld [vmem:[#allocation9 + $0x1780] ss:$20 sps:$4 sm:$0xff]  }
 0x522   :  { %v5456_v2 = vmax.f32 %v5446_v55, 0.0  ;;  %v11435_v10 = vld [vmem:[#allocation9 + $0x1640] ss:$20 sps:$4 sm:$0xff]   ;;  %v11439_v55 = vld [vmem:[#allocation9 + $0x1758] ss:$20 sps:$4 sm:$0xff]  }
 0x523   :  { %v5448_v58 = vpop.f32.mrf.mxu1 }
 0x524   :  { %v5449_v60 = vadd.f32 %v5448_v58, %v5408_v56  ;;  %6934 = vmatpush2.bf16.msra.mxu1 %v11363_v42  ;;  %v11431_v42 = vld [vmem:[#allocation9 + $0x1750] ss:$20 sps:$4 sm:$0xff]   ;;  %v11436_v56 = vld [vmem:[#allocation9 + $0x1728] ss:$20 sps:$4 sm:$0xff]   ;;  %v11440_v58 = vld [vmem:[#allocation9 + $0x1618] ss:$20 sps:$4 sm:$0xff]  }
 0x525   :  { %v10299_v62 = vpop.f32.mrf.mxu1  ;;  %6935 = vmatprep.subr.bf16.mxu1 %v11371_v54  ;;  %v11438_v54 = vld [vmem:[#allocation9 + $0x172c] ss:$20 sps:$4 sm:$0xff]  }
 0x526   :  { %v5461_v4 = vmax.f32 %v5449_v60, 0.0  ;;  %v11443_v60 = vld [vmem:[#allocation9 + $0x1704] ss:$20 sps:$4 sm:$0xff]   ;;  %v11441_v62 = vld [vmem:[#allocation9 + $0x1700] ss:$20 sps:$4 sm:$0xff]  }
 0x528   :  { %v12192_v6 = vpack.c.bf16 %v5461_v4, %v5456_v2  ;;  %6936 = vmatpush2.bf16.msra.mxu1 %v11369_v61  ;;  %v11444_v61 = vld [vmem:[#allocation9 + $0x1730] ss:$20 sps:$4 sm:$0xff]   ;;  %v11446_v4 = vld [vmem:[#allocation9 + $0x16d8] ss:$20 sps:$4 sm:$0xff]  }
 0x529   :  { %6937 = vmatprep.subr.bf16.mxu1 %v11377_v1  ;;  %v11445_v1 = vld [vmem:[#allocation9 + $0x15f0] ss:$20 sps:$4 sm:$0xff]  }
 0x52a   :  { %6897 = vmatmul.mubr.bf16.vlgmr.msra.gmra.mxu0 %v12192_v6  ;;  %v11448_v2 = vld [vmem:[#allocation9 + $0x16dc] ss:$20 sps:$4 sm:$0xff]  }
 0x52b   :  { %6951 = vmatpush1.bf16.msra.mxu0 %v11372_v5  ;;  %6982 = vmatprep.mubr.bf16.mxu0 %v12183_v24  ;;  %v11450_v5 = vld [vmem:[#allocation9 + $0x15c8] ss:$20 sps:$4 sm:$0xff]  }
 0x52c   :  { %6938 = vmatpush2.bf16.msra.mxu1 %v11375_v7  ;;  %6952 = vmatprep.subr.bf16.mxu0 %v11380_v8  ;;  %v11453_v7 = vld [vmem:[#allocation9 + $0x16b4] ss:$20 sps:$4 sm:$0xff]  }
 0x52d   :  { %6993 = vmatprep.subr.bf16.mxu1 %v11383_v11  ;;  %v11454_v8 = vld [vmem:[#allocation9 + $0x16e0] ss:$20 sps:$4 sm:$0xff]   ;;  %v11451_v11 = vld [vmem:[#allocation9 + $0x16b0] ss:$20 sps:$4 sm:$0xff]  }
 0x52f   :  { %6940 = vmatmul.mubr.bf16.vlgmr.msra.gmra.mxu1 %v12174_v49  ;;  %6953 = vmatpush1.bf16.msra.mxu0 %v11378_v63  ;;  %v11455_v63 = vld [vmem:[#allocation9 + $0x15a0] ss:$20 sps:$4 sm:$0xff]  }
 0x530   :  { %6994 = vmatpush1.bf16.msra.mxu1 %v11381_v51  ;;  %6954 = vmatprep.subr.bf16.mxu0 %v11386_v12  ;;  %v11458_v51 = vld [vmem:[#allocation9 + $0x168c] ss:$20 sps:$4 sm:$0xff]  }
 0x531   :  { %6995 = vmatprep.subr.bf16.mxu1 %v11389_v14  ;;  %7025 = vmatprep.mubr.bf16.mxu1 %v11927_v0  ;;  %v11459_v12 = vld [vmem:[#allocation9 + $0x16b8] ss:$20 sps:$4 sm:$0xff]   ;;  %v11456_v14 = vld [vmem:[#allocation9 + $0x1688] ss:$20 sps:$4 sm:$0xff]  }
 0x533   :  { %6955 = vmatpush1.bf16.msra.mxu0 %v11384_v15  ;;  %v11460_v15 = vld [vmem:[#allocation9 + $0x1578] ss:$20 sps:$4 sm:$0xff]  }
 0x534   :  { %6996 = vmatpush1.bf16.msra.mxu1 %v11387_v16  ;;  %6956 = vmatprep.subr.bf16.mxu0 %v11392_v59  ;;  %v11461_v16 = vld [vmem:[#allocation9 + $0x1528] ss:$20 sps:$4 sm:$0xff]   ;;  %v11463_v59 = vld [vmem:[#allocation9 + $0x1690] ss:$20 sps:$4 sm:$0xff]  }
 0x535   :  { %6997 = vmatprep.subr.bf16.mxu1 %v11395_v34  ;;  %v11462_v34 = vld [vmem:[#allocation9 + $0x13e8] ss:$20 sps:$4 sm:$0xff]  }
 0x537   :  { %6957 = vmatpush1.bf16.msra.mxu0 %v11390_v57  ;;  %v11464_v57 = vld [vmem:[#allocation9 + $0x1550] ss:$20 sps:$4 sm:$0xff]  }
 0x538   :  { %6998 = vmatpush1.bf16.msra.mxu1 %v11393_v17  ;;  %6958 = vmatprep.subr.bf16.mxu0 %v11398_v18  ;;  %v11465_v17 = vld [vmem:[#allocation9 + $0x1500] ss:$20 sps:$4 sm:$0xff]   ;;  %v11489_v18 = vld [vmem:[#allocation9 + $0x1a1c] ss:$20 sps:$4 sm:$0xff]  }
 0x539   :  { %6999 = vmatprep.subr.bf16.mxu1 %v11401_v19  ;;  %v11466_v19 = vld [vmem:[#allocation9 + $0x13c0] ss:$20 sps:$4 sm:$0xff]  }
 0x53b   :  { %6959 = vmatpush1.bf16.msra.mxu0 %v11396_v22  ;;  %v11467_v22 = vld [vmem:[#allocation9 + $0x14d8] ss:$20 sps:$4 sm:$0xff]  }
 0x53c   :  { %7000 = vmatpush1.bf16.msra.mxu1 %v11399_v25  ;;  %6960 = vmatprep.subr.bf16.mxu0 %v11404_v13  ;;  %v11487_v25 = vld [vmem:[#allocation9 + $0x1a18] ss:$20 sps:$4 sm:$0xff]   ;;  %v11492_v13 = vld [vmem:[#allocation9 + $0x19f4] ss:$20 sps:$4 sm:$0xff]  }
 0x53d   :  { %7001 = vmatprep.subr.bf16.mxu1 %v11407_v23  ;;  %v11468_v23 = vld [vmem:[#allocation9 + $0x1398] ss:$20 sps:$4 sm:$0xff]  }
 0x53f   :  { %6961 = vmatpush1.bf16.msra.mxu0 %v11402_v26  ;;  %v11469_v26 = vld [vmem:[#allocation9 + $0x14b0] ss:$20 sps:$4 sm:$0xff]  }
 0x540   :  { %7002 = vmatpush1.bf16.msra.mxu1 %v11405_v27  ;;  %6962 = vmatprep.subr.bf16.mxu0 %v11410_v28  ;;  %v11490_v27 = vld [vmem:[#allocation9 + $0x19f0] ss:$20 sps:$4 sm:$0xff]   ;;  %v11495_v28 = vld [vmem:[#allocation9 + $0x19cc] ss:$20 sps:$4 sm:$0xff]  }
 0x541   :  { %7003 = vmatprep.subr.bf16.mxu1 %v11413_v52  ;;  %v11470_v52 = vld [vmem:[#allocation9 + $0x1370] ss:$20 sps:$4 sm:$0xff]  }
 0x543   :  { %6963 = vmatpush1.bf16.msra.mxu0 %v11408_v35  ;;  %v11493_v35 = vld [vmem:[#allocation9 + $0x19c8] ss:$20 sps:$4 sm:$0xff]  }
 0x544   :  { %7004 = vmatpush1.bf16.msra.mxu1 %v11411_v36  ;;  %6964 = vmatprep.subr.bf16.mxu0 %v11416_v37  ;;  %v11498_v36 = vld [vmem:[#allocation9 + $0x19a4] ss:$20 sps:$4 sm:$0xff]   ;;  %v11472_v37 = vld [vmem:[#allocation9 + $0x1348] ss:$20 sps:$4 sm:$0xff]  }
 0x545   :  { %7005 = vmatprep.subr.bf16.mxu1 %v11419_v40  ;;  %v11473_v40 = vld [vmem:[#allocation9 + $0x1460] ss:$20 sps:$4 sm:$0xff]  }
 0x547   :  { %6965 = vmatpush1.bf16.msra.mxu0 %v11414_v41  ;;  %v11501_v41 = vld [vmem:[#allocation9 + $0x197c] ss:$20 sps:$4 sm:$0xff]  }
 0x548   :  { %7006 = vmatpush1.bf16.msra.mxu1 %v11417_v43  ;;  %6966 = vmatprep.subr.bf16.mxu0 %v11422_v44  ;;  %v11474_v43 = vld [vmem:[#allocation9 + $0x1320] ss:$20 sps:$4 sm:$0xff]   ;;  %v11475_v44 = vld [vmem:[#allocation9 + $0x1438] ss:$20 sps:$4 sm:$0xff]  }
 0x549   :  { %7007 = vmatprep.subr.bf16.mxu1 %v11425_v29  ;;  %v11499_v29 = vld [vmem:[#allocation9 + $0x1978] ss:$20 sps:$4 sm:$0xff]  }
 0x54b   :  { %6967 = vmatpush2.bf16.msra.mxu0 %v11420_v45  ;;  %v11504_v45 = vld [vmem:[#allocation9 + $0x1954] ss:$20 sps:$4 sm:$0xff]  }
 0x54c   :  { %7008 = vmatpush1.bf16.msra.mxu1 %v11423_v33  ;;  %6968 = vmatprep.subr.bf16.mxu0 %v11428_v46  ;;  %v11476_v33 = vld [vmem:[#allocation9 + $0x12f8] ss:$20 sps:$4 sm:$0xff]   ;;  %v11477_v46 = vld [vmem:[#allocation9 + $0x1410] ss:$20 sps:$4 sm:$0xff]  }
 0x54d   :  { %10148 = vmatprep.subr.bf16.mxu1 %v11429_v47  ;;  %v11502_v47 = vld [vmem:[#allocation9 + $0x1950] ss:$20 sps:$4 sm:$0xff]  }
 0x54f   :  { %6969 = vmatpush2.bf16.msra.mxu0 %v11426_v48  ;;  %7026 = vmatmul.mubr.bf16.vlgmr.msra.gmra.mxu1 %v12192_v6  ;;  %v11507_v48 = vld [vmem:[#allocation9 + $0x192c] ss:$20 sps:$4 sm:$0xff]  }
 0x550   :  { %10149 = vmatpush3.bf16.msra.mxu1 %v11430_v21  ;;  %7109 = vmatprep.mubr.bf16.mxu1 %v12183_v24  ;;  %v11449_v24 = vld [vmem:[#allocation9 + $0x1708] ss:$20 sps:$4 sm:$0xff]   ;;  %v11478_v21 = vld [vmem:[#allocation9 + $0x12d0] ss:$20 sps:$4 sm:$0xff]  }
 0x551   :  { %6970 = vmatprep.subr.bf16.mxu0 %v11433_v50  ;;  %10150 = vmatprep.subr.bf16.mxu1 %v11434_v53  ;;  %v11505_v50 = vld [vmem:[#allocation9 + $0x1928] ss:$20 sps:$4 sm:$0xff]   ;;  %v11510_v53 = vld [vmem:[#allocation9 + $0x1904] ss:$20 sps:$4 sm:$0xff]  }
 0x553   :  { %6971 = vmatpush2.bf16.msra.mxu0 %v11431_v42  ;;  %v11479_v42 = vld [vmem:[#allocation9 + $0x18e8] ss:$20 sps:$4 sm:$0xff]  }
 0x554   :  { %10151 = vmatpush3.bf16.msra.mxu1 %v11435_v10  ;;  %6972 = vmatprep.subr.bf16.mxu0 %v11438_v54  ;;  %v11508_v10 = vld [vmem:[#allocation9 + $0x1900] ss:$20 sps:$4 sm:$0xff]   ;;  %v11513_v54 = vld [vmem:[#allocation9 + $0x1b5c] ss:$20 sps:$4 sm:$0xff]  }
 0x555   :  { %10152 = vmatprep.subr.bf16.mxu1 %v11439_v55  ;;  %v11480_v55 = vld [vmem:[#allocation9 + $0x18c0] ss:$20 sps:$4 sm:$0xff]  }
 0x557   :  { %6973 = vmatpush2.bf16.msra.mxu0 %v11436_v56  ;;  %v11511_v56 = vld [vmem:[#allocation9 + $0x1b58] ss:$20 sps:$4 sm:$0xff]  }
 0x558   :  { %10153 = vmatpush3.bf16.msra.mxu1 %v11440_v58  ;;  %6974 = vmatprep.subr.bf16.mxu0 %v11443_v60  ;;  %v11516_v58 = vld [vmem:[#allocation9 + $0x1b34] ss:$20 sps:$4 sm:$0xff]   ;;  %v11481_v60 = vld [vmem:[#allocation9 + $0x1898] ss:$20 sps:$4 sm:$0xff]  }
 0x559   :  { %10154 = vmatprep.subr.bf16.mxu1 %v11444_v61  ;;  %v11514_v61 = vld [vmem:[#allocation9 + $0x1b30] ss:$20 sps:$4 sm:$0xff]  }
 0x55b   :  { %6975 = vmatpush2.bf16.msra.mxu0 %v11441_v62  ;;  %v11519_v62 = vld [vmem:[#allocation9 + $0x1b0c] ss:$20 sps:$4 sm:$0xff]  }
 0x55c   :  { %10155 = vmatpush3.bf16.msra.mxu1 %v11445_v1  ;;  %6976 = vmatprep.subr.bf16.mxu0 %v11448_v2  ;;  %v11517_v1 = vld [vmem:[#allocation9 + $0x1b08] ss:$20 sps:$4 sm:$0xff]   ;;  %v11522_v2 = vld [vmem:[#allocation9 + $0x1ae4] ss:$20 sps:$4 sm:$0xff]  }
 0x55d   :  { %10156 = vmatprep.subr.bf16.mxu1 %v11449_v24  ;;  %v11483_v24 = vld [vmem:[#allocation9 + $0x1848] ss:$20 sps:$4 sm:$0xff]  }
 0x55f   :  { %6977 = vmatpush2.bf16.msra.mxu0 %v11446_v4  ;;  %v11520_v4 = vld [vmem:[#allocation9 + $0x1ae0] ss:$20 sps:$4 sm:$0xff]  }
 0x560   :  { %10157 = vmatpush3.bf16.msra.mxu1 %v11450_v5  ;;  %6978 = vmatprep.subr.bf16.mxu0 %v11453_v7  ;;  %v11525_v5 = vld [vmem:[#allocation9 + $0x1abc] ss:$20 sps:$4 sm:$0xff]   ;;  %v11484_v7 = vld [vmem:[#allocation9 + $0x1820] ss:$20 sps:$4 sm:$0xff]  }
 0x561   :  { %10158 = vmatprep.subr.bf16.mxu1 %v11454_v8  ;;  %v11523_v8 = vld [vmem:[#allocation9 + $0x1ab8] ss:$20 sps:$4 sm:$0xff]  }
 0x563   :  { %6979 = vmatpush2.bf16.msra.mxu0 %v11451_v11  ;;  %v11528_v11 = vld [vmem:[#allocation9 + $0x1a94] ss:$20 sps:$4 sm:$0xff]  }
 0x564   :  { %10159 = vmatpush3.bf16.msra.mxu1 %v11455_v63  ;;  %6980 = vmatprep.subr.bf16.mxu0 %v11458_v51  ;;  %v11485_v63 = vld [vmem:[#allocation9 + $0x17f8] ss:$20 sps:$4 sm:$0xff]   ;;  %v11526_v51 = vld [vmem:[#allocation9 + $0x1a90] ss:$20 sps:$4 sm:$0xff]  }
 0x565   :  { %10160 = vmatprep.subr.bf16.mxu1 %v11459_v12  ;;  %v11531_v12 = vld [vmem:[#allocation9 + $0x1a6c] ss:$20 sps:$4 sm:$0xff]  }
 0x567   :  { %6981 = vmatpush2.bf16.msra.mxu0 %v11456_v14  ;;  %v11486_v14 = vld [vmem:[#allocation9 + $0x17d0] ss:$20 sps:$4 sm:$0xff]  }
 0x568   :  { %10161 = vmatpush3.bf16.msra.mxu1 %v11460_v15  ;;  %10126 = vmatprep.subr.bf16.mxu0 %v11461_v16  ;;  %v11529_v15 = vld [vmem:[#allocation9 + $0x1a68] ss:$20 sps:$4 sm:$0xff]  }
 0x569   :  { %10162 = vmatprep.subr.bf16.mxu1 %v11463_v59  ;;  %v11537_v16 = vld [vmem:[#allocation9 + $0x1c9c] ss:$20 sps:$4 sm:$0xff]   ;;  %v11534_v59 = vld [vmem:[#allocation9 + $0x1a44] ss:$20 sps:$4 sm:$0xff]  }
 0x56a   :  { %6983 = vmatmul.mubr.bf16.vlgmr.msra.gmra.mxu0 %v12185_v3 }
 0x56b   :  { %10127 = vmatpush3.bf16.msra.mxu0 %v11462_v34  ;;  %7068 = vmatprep.mubr.bf16.mxu0 %v12172_v9  ;;  %v11471_v9 = vld [vmem:[#allocation9 + $0x1488] ss:$20 sps:$4 sm:$0xff]   ;;  %v11535_v34 = vld [vmem:[#allocation9 + $0x1c98] ss:$20 sps:$4 sm:$0xff]  }
 0x56c   :  { %10163 = vmatpush3.bf16.msra.mxu1 %v11464_v57  ;;  %10128 = vmatprep.subr.bf16.mxu0 %v11465_v17  ;;  %v11532_v57 = vld [vmem:[#allocation9 + $0x1a40] ss:$20 sps:$4 sm:$0xff]  }
 0x56d   :  { %8485 = vmatprep.subr.bf16.mxu1 %v11489_v18  ;;  %v11540_v17 = vld [vmem:[#allocation9 + $0x1c74] ss:$20 sps:$4 sm:$0xff]   ;;  %v11538_v18 = vld [vmem:[#allocation9 + $0x1c70] ss:$20 sps:$4 sm:$0xff]  }
 0x56f   :  { %10129 = vmatpush3.bf16.msra.mxu0 %v11466_v19  ;;  %7110 = vmatmul.mubr.bf16.vlgmr.msra.gmra.mxu1 %v12185_v3  ;;  %v11496_v3 = vld [vmem:[#allocation9 + $0x19a0] ss:$20 sps:$4 sm:$0xff]  }
 0x570   :  { %10130 = vmatprep.subr.bf16.mxu0 %v11467_v22  ;;  %8486 = vmatpush1.bf16.msra.mxu1 %v11487_v25  ;;  %v11543_v19 = vld [vmem:[#allocation9 + $0x1c4c] ss:$20 sps:$4 sm:$0xff]   ;;  %v11541_v22 = vld [vmem:[#allocation9 + $0x1c48] ss:$20 sps:$4 sm:$0xff]   ;;  %v11546_v25 = vld [vmem:[#allocation9 + $0x1c24] ss:$20 sps:$4 sm:$0xff]  }
 0x571   :  { %8487 = vmatprep.subr.bf16.mxu1 %v11492_v13  ;;  %v11544_v13 = vld [vmem:[#allocation9 + $0x1c20] ss:$20 sps:$4 sm:$0xff]  }
 0x573   :  { %10131 = vmatpush3.bf16.msra.mxu0 %v11468_v23  ;;  %v11549_v23 = vld [vmem:[#allocation9 + $0x1bfc] ss:$20 sps:$4 sm:$0xff]  }
 0x574   :  { %10132 = vmatprep.subr.bf16.mxu0 %v11469_v26  ;;  %8488 = vmatpush1.bf16.msra.mxu1 %v11490_v27  ;;  %v11547_v26 = vld [vmem:[#allocation9 + $0x1bf8] ss:$20 sps:$4 sm:$0xff]   ;;  %v11552_v27 = vld [vmem:[#allocation9 + $0x1bd4] ss:$20 sps:$4 sm:$0xff]  }
 0x575   :  { %8489 = vmatprep.subr.bf16.mxu1 %v11495_v28  ;;  %v11550_v28 = vld [vmem:[#allocation9 + $0x1bd0] ss:$20 sps:$4 sm:$0xff]  }
 0x577   :  { %10133 = vmatpush3.bf16.msra.mxu0 %v11470_v52  ;;  %v11553_v52 = vld [vmem:[#allocation9 + $0x1ba8] ss:$20 sps:$4 sm:$0xff]  }
 0x578   :  { %10134 = vmatprep.subr.bf16.mxu0 %v11471_v9  ;;  %8490 = vmatpush1.bf16.msra.mxu1 %v11493_v35  ;;  %v11558_v9 = vld [vmem:[#allocation9 + $0x1b84] ss:$20 sps:$4 sm:$0xff]   ;;  %v11556_v35 = vld [vmem:[#allocation9 + $0x1b80] ss:$20 sps:$4 sm:$0xff]  }
 0x579   :  { %8491 = vmatprep.subr.bf16.mxu1 %v11498_v36  ;;  %v11561_v36 = vld [vmem:[#allocation9 + $0x1ddc] ss:$20 sps:$4 sm:$0xff]  }
 0x57b   :  { %10135 = vmatpush3.bf16.msra.mxu0 %v11472_v37  ;;  %v11559_v37 = vld [vmem:[#allocation9 + $0x1dd8] ss:$20 sps:$4 sm:$0xff]  }
 0x57c   :  { %10136 = vmatprep.subr.bf16.mxu0 %v11473_v40  ;;  %8492 = vmatpush1.bf16.msra.mxu1 %v11496_v3  ;;  %v11564_v40 = vld [vmem:[#allocation9 + $0x1db4] ss:$20 sps:$4 sm:$0xff]   ;;  %v11562_v3 = vld [vmem:[#allocation9 + $0x1db0] ss:$20 sps:$4 sm:$0xff]  }
 0x57d   :  { %8493 = vmatprep.subr.bf16.mxu1 %v11501_v41  ;;  %v11567_v41 = vld [vmem:[#allocation9 + $0x1d8c] ss:$20 sps:$4 sm:$0xff]  }
 0x57f   :  { %10137 = vmatpush3.bf16.msra.mxu0 %v11474_v43  ;;  %v11565_v43 = vld [vmem:[#allocation9 + $0x1d88] ss:$20 sps:$4 sm:$0xff]  }
 0x580   :  { %10138 = vmatprep.subr.bf16.mxu0 %v11475_v44  ;;  %8494 = vmatpush1.bf16.msra.mxu1 %v11499_v29  ;;  %v11570_v44 = vld [vmem:[#allocation9 + $0x1d64] ss:$20 sps:$4 sm:$0xff]   ;;  %v11568_v29 = vld [vmem:[#allocation9 + $0x1d60] ss:$20 sps:$4 sm:$0xff]  }
 0x581   :  { %8495 = vmatprep.subr.bf16.mxu1 %v11504_v45  ;;  %v11606_v45 = vld [vmem:[#allocation9 + $0x1f1c] ss:$20 sps:$4 sm:$0xff]  }
 0x583   :  { %10139 = vmatpush3.bf16.msra.mxu0 %v11476_v33  ;;  %v11573_v33 = vld [vmem:[#allocation9 + $0x1d3c] ss:$20 sps:$4 sm:$0xff]  }
 0x584   :  { %10140 = vmatprep.subr.bf16.mxu0 %v11477_v46  ;;  %8496 = vmatpush1.bf16.msra.mxu1 %v11502_v47  ;;  %v11571_v46 = vld [vmem:[#allocation9 + $0x1d38] ss:$20 sps:$4 sm:$0xff]   ;;  %v11576_v47 = vld [vmem:[#allocation9 + $0x1d14] ss:$20 sps:$4 sm:$0xff]  }
 0x585   :  { %8497 = vmatprep.subr.bf16.mxu1 %v11507_v48  ;;  %v11574_v48 = vld [vmem:[#allocation9 + $0x1d10] ss:$20 sps:$4 sm:$0xff]  }
 0x587   :  { %10141 = vmatpush3.bf16.msra.mxu0 %v11478_v21  ;;  %v6812_v21 = vpop.f32.mrf.mxu0 }
 0x588   :  { %10300 = vmatprep.subr.bf16.mxu0 %v11929_v31  ;;  %8498 = vmatpush1.bf16.msra.mxu1 %v11505_v50  ;;  %v11579_v50 = vld [vmem:[#allocation9 + $0x1cec] ss:$20 sps:$4 sm:$0xff]  }
 0x589   :  { %8499 = vmatprep.subr.bf16.mxu1 %v11510_v53  ;;  %v11577_v53 = vld [vmem:[#allocation9 + $0x1ce8] ss:$20 sps:$4 sm:$0xff]  }
 0x58a   :  { %7069 = vmatmul.mubr.bf16.vlgmr.msra.gmra.mxu0 %v12174_v49  ;;  %v11482_v49 = vld [vmem:[#allocation9 + $0x1870] ss:$20 sps:$4 sm:$0xff]  }
 0x58b   :  { %10301 = vmatpush3.bf16.msra.mxu0 %v11479_v42  ;;  %10316 = vmatprep.mubr.msk.bf16.mxu0 %vm11930_vm3, %v11929_v31  ;;  %v6814_v42 = vpop.f32.mrf.mxu0 }
 0x58c   :  { %10302 = vmatprep.subr.bf16.mxu0 %v11929_v31  ;;  %8500 = vmatpush1.bf16.msra.mxu1 %v11508_v10 }
 0x58d   :  { %8501 = vmatprep.subr.bf16.mxu1 %v11513_v54  ;;  %v11582_v54 = vld [vmem:[#allocation9 + $0x1cc4] ss:$20 sps:$4 sm:$0xff]  }
 0x58f   :  { %10303 = vmatpush3.bf16.msra.mxu0 %v11480_v55  ;;  %v5709_v55 = vld [vmem:[#allocation11 + $0x3] ss:$8 sm:$0xf] }
 0x590   :  { %10304 = vmatprep.subr.bf16.mxu0 %v11929_v31  ;;  %8502 = vmatpush2.bf16.msra.mxu1 %v11511_v56  ;;  %v5710_v56 = vld [vmem:[#allocation11 + $0x3] ss:$8 sm:$0x10] }
 0x591   :  { %8503 = vmatprep.subr.bf16.mxu1 %v11516_v58  ;;  %v11580_v58 = vld [vmem:[#allocation9 + $0x1cc0] ss:$20 sps:$4 sm:$0xff]  }
 0x593   :  { %10305 = vmatpush3.bf16.msra.mxu0 %v11481_v60  ;;  %v12215_v60 = vor.u32 %v5710_v56, %v5709_v55 }
 0x594   :  { %10306 = vmatprep.subr.bf16.mxu0 %v11929_v31  ;;  %8504 = vmatpush2.bf16.msra.mxu1 %v11514_v61  ;;  %v6816_v61 = vpop.f32.mrf.mxu0 }
 0x595   :  { %8505 = vmatprep.subr.bf16.mxu1 %v11519_v62 }
 0x597   :  { %10307 = vmatpush3.bf16.msra.mxu0 %v11482_v49  ;;  %v11585_v49 = vld [vmem:[#allocation9 + $0x1a24] ss:$20 sps:$4 sm:$0xff]  }
 0x598   :  { %10308 = vmatprep.subr.bf16.mxu0 %v11929_v31  ;;  %8506 = vmatpush2.bf16.msra.mxu1 %v11517_v1  ;;  %v5720_v1 = vrot.slane %v12215_v60, %v12005_v30 }
 0x599   :  { %8507 = vmatprep.subr.bf16.mxu1 %v11522_v2  ;;  %v5716_v2 = vrot.slane %v12215_v60, %v12008_v32 }
 0x59b   :  { %10309 = vmatpush3.bf16.msra.mxu0 %v11483_v24  ;;  %v6818_v24 = vpop.f32.mrf.mxu0 }
 0x59c   :  { %10310 = vmatprep.subr.bf16.mxu0 %v11929_v31  ;;  %8508 = vmatpush2.bf16.msra.mxu1 %v11520_v4 }
 0x59d   :  { %8509 = vmatprep.subr.bf16.mxu1 %v11525_v5 }
 0x59f   :  { %10311 = vmatpush3.bf16.msra.mxu0 %v11484_v7  ;;  %v6815_v7 = vadd.f32 %v6814_v42, %v5720_v1 }
 0x5a0   :  { %10312 = vmatprep.subr.bf16.mxu0 %v11929_v31  ;;  %8510 = vmatpush2.bf16.msra.mxu1 %v11523_v8  ;;  %v6817_v8 = vadd.f32 %v6816_v61, %v5716_v2 }
 0x5a1   :  { %8511 = vmatprep.subr.bf16.mxu1 %v11528_v11  ;;  %v6813_v11 = vadd.f32 %v6812_v21, %v5716_v2 }
 0x5a3   :  { %10313 = vmatpush3.bf16.msra.mxu0 %v11485_v63 }
 0x5a4   :  { %10314 = vmatprep.subr.bf16.mxu0 %v11929_v31  ;;  %8512 = vmatpush2.bf16.msra.mxu1 %v11526_v51 }
 0x5a5   :  { %8513 = vmatprep.subr.bf16.mxu1 %v11531_v12  ;;  %v6819_v12 = vadd.f32 %v6818_v24, %v5720_v1 }
 0x5a7   :  { %10315 = vmatpush3.bf16.msra.mxu0 %v11486_v14 }
 0x5a8   :  { %8514 = vmatpush2.bf16.msra.mxu1 %v11529_v15  ;;  %8528 = vmatprep.subr.bf16.mxu0 %v11537_v16 }
 0x5a9   :  { %8515 = vmatprep.subr.bf16.mxu1 %v11534_v59 }
 0x5aa   :  { %10317 = vmatmul.mubr.bf16.vlgmr.msra.gmra.mxu0 %v12192_v6  ;;  %v11555_v6 = vld [vmem:[#allocation9 + $0x1bac] ss:$20 sps:$4 sm:$0xff]  }
 0x5ab   :  { %8529 = vmatpush1.bf16.msra.mxu0 %v11535_v34 }
 0x5ac   :  { %8516 = vmatpush2.bf16.msra.mxu1 %v11532_v57  ;;  %8530 = vmatprep.subr.bf16.mxu0 %v11540_v17 }
 0x5ad   :  { %8571 = vmatprep.subr.bf16.mxu1 %v11606_v45  ;;  %v11640_v45 = vld [vmem:[#allocation9 + $0x1e28] ss:$20 sps:$4 sm:$0xff]  }
 0x5af   :  { %8531 = vmatpush1.bf16.msra.mxu0 %v11538_v18  ;;  %v6855_v10 = vpop.f32.mrf.mxu1 }
 0x5b0   :  { %8532 = vmatprep.subr.bf16.mxu0 %v11543_v19  ;;  %v6856_v16 = vadd.f32 %v6855_v10, %v6813_v11  ;;  %v5728_v10 = vrot.slane %v12215_v60, %v12020_v39 }
 0x5b1   :  { %v6857_v62 = vpop.f32.mrf.mxu1 }
 0x5b2   :  { %v6858_v14 = vadd.f32 %v6857_v62, %v6815_v7 }
 0x5b3   :  { %8533 = vmatpush1.bf16.msra.mxu0 %v11541_v22  ;;  %v6859_v4 = vpop.f32.mrf.mxu1 }
 0x5b4   :  { %8534 = vmatprep.subr.bf16.mxu0 %v11546_v25  ;;  %v6860_v15 = vadd.f32 %v6859_v4, %v6817_v8 }
 0x5b5   :  { %v6861_v63 = vpop.f32.mrf.mxu1 }
 0x5b6   :  { %v6862_v34 = vadd.f32 %v6861_v63, %v6819_v12 }
 0x5b7   :  { %8535 = vmatpush1.bf16.msra.mxu0 %v11544_v13 }
 0x5b8   :  { %8536 = vmatprep.subr.bf16.mxu0 %v11549_v23 }
 0x5bb   :  { %8537 = vmatpush1.bf16.msra.mxu0 %v11547_v26 }
 0x5bc   :  { %8538 = vmatprep.subr.bf16.mxu0 %v11552_v27 }
 0x5bf   :  { %8539 = vmatpush1.bf16.msra.mxu0 %v11550_v28  ;;  %v11604_v28 = vld [vmem:[#allocation9 + $0x1f18] ss:$20 sps:$4 sm:$0xff]  }
 0x5c0   :  { %8540 = vmatprep.subr.bf16.mxu0 %v11555_v6 }
 0x5c3   :  { %8541 = vmatpush1.bf16.msra.mxu0 %v11553_v52  ;;  %v11612_v52 = vld [vmem:[#allocation9 + $0x1ef4] ss:$20 sps:$4 sm:$0xff]  }
 0x5c4   :  { %8542 = vmatprep.subr.bf16.mxu0 %v11558_v9  ;;  %v11610_v9 = vld [vmem:[#allocation9 + $0x1ef0] ss:$20 sps:$4 sm:$0xff]  }
 0x5c7   :  { %8543 = vmatpush1.bf16.msra.mxu0 %v11556_v35  ;;  %v11618_v35 = vld [vmem:[#allocation9 + $0x1ecc] ss:$20 sps:$4 sm:$0xff]  }
 0x5c8   :  { %8544 = vmatprep.subr.bf16.mxu0 %v11561_v36  ;;  %v11616_v36 = vld [vmem:[#allocation9 + $0x1ec8] ss:$20 sps:$4 sm:$0xff]  }
 0x5cb   :  { %8545 = vmatpush2.bf16.msra.mxu0 %v11559_v37  ;;  %v11624_v37 = vld [vmem:[#allocation9 + $0x1ea4] ss:$20 sps:$4 sm:$0xff]  }
 0x5cc   :  { %8546 = vmatprep.subr.bf16.mxu0 %v11564_v40  ;;  %v11622_v40 = vld [vmem:[#allocation9 + $0x1ea0] ss:$20 sps:$4 sm:$0xff]  }
 0x5cf   :  { %8547 = vmatpush2.bf16.msra.mxu0 %v11562_v3  ;;  %v11630_v3 = vld [vmem:[#allocation9 + $0x1e7c] ss:$20 sps:$4 sm:$0xff]  }
 0x5d0   :  { %8548 = vmatprep.subr.bf16.mxu0 %v11567_v41  ;;  %v11628_v41 = vld [vmem:[#allocation9 + $0x1e78] ss:$20 sps:$4 sm:$0xff]  }
 0x5d3   :  { %8549 = vmatpush2.bf16.msra.mxu0 %v11565_v43  ;;  %v11636_v43 = vld [vmem:[#allocation9 + $0x1e54] ss:$20 sps:$4 sm:$0xff]  }
 0x5d4   :  { %8550 = vmatprep.subr.bf16.mxu0 %v11570_v44  ;;  %v11634_v44 = vld [vmem:[#allocation9 + $0x1e50] ss:$20 sps:$4 sm:$0xff]  }
 0x5d7   :  { %8551 = vmatpush2.bf16.msra.mxu0 %v11568_v29  ;;  %v11642_v29 = vld [vmem:[#allocation9 + $0x1e2c] ss:$20 sps:$4 sm:$0xff]  }
 0x5d8   :  { %8552 = vmatprep.subr.bf16.mxu0 %v11573_v33  ;;  %v11648_v33 = vld [vmem:[#allocation9 + $0x1e04] ss:$20 sps:$4 sm:$0xff]  }
 0x5db   :  { %8553 = vmatpush2.bf16.msra.mxu0 %v11571_v46  ;;  %v11646_v46 = vld [vmem:[#allocation9 + $0x1e00] ss:$20 sps:$4 sm:$0xff]  }
 0x5dc   :  { %8554 = vmatprep.subr.bf16.mxu0 %v11576_v47  ;;  %v11654_v47 = vld [vmem:[#allocation9 + $0x1ca4] ss:$20 sps:$4 sm:$0xff]  }
 0x5df   :  { %8555 = vmatpush2.bf16.msra.mxu0 %v11574_v48 }
 0x5e0   :  { %8556 = vmatprep.subr.bf16.mxu0 %v11579_v50 }
 0x5e3   :  { %8557 = vmatpush2.bf16.msra.mxu0 %v11577_v53 }
 0x5e4   :  { %8558 = vmatprep.subr.bf16.mxu0 %v11582_v54  ;;  %v5724_v54 = vrot.slane %v12215_v60, %v12017_v38 }
 0x5e7   :  { %8559 = vmatpush2.bf16.msra.mxu0 %v11580_v58 }
 0x5e8   :  { %8614 = vmatprep.subr.bf16.mxu0 %v11585_v49 }
 0x5ea   :  { %v6898_v5 = vpop.f32.mrf.mxu0 }
 0x5eb   :  { %v6899_v18 = vadd.f32 %v6898_v5, %v6856_v16 }
 0x5ec   :  { %v6900_v51 = vpop.f32.mrf.mxu0 }
 0x5ed   :  { %v6901_v57 = vadd.f32 %v6900_v51, %v6858_v14  ;;  %v7159_v26 = vmax.f32 %v6899_v18, 0.0  ;;  %v11583_v18 = vld [vmem:[#allocation9 + $0x1a20] ss:$20 sps:$4 sm:$0xff]  }
 0x5ee   :  { %v6902_v59 = vpop.f32.mrf.mxu0 }
 0x5ef   :  { %v6903_v17 = vadd.f32 %v6902_v59, %v6860_v15  ;;  %v7160_v13 = vmax.f32 %v6901_v57, 0.0  ;;  %v6941_v48 = vpop.f32.mrf.mxu1 }
 0x5f0   :  { %v6904_v19 = vpop.f32.mrf.mxu0  ;;  %v6942_v61 = vadd.f32 %v6941_v48, %v5724_v54  ;;  %v11627_v48 = vld [vmem:[#allocation9 + $0x1b14] ss:$20 sps:$4 sm:$0xff]  }
 0x5f1   :  { %v6905_v22 = vadd.f32 %v6904_v19, %v6862_v34  ;;  %v7164_v25 = vmax.f32 %v6903_v17, 0.0  ;;  %v6943_v21 = vpop.f32.mrf.mxu1 }
 0x5f2   :  { %v6944_v58 = vadd.f32 %v6943_v21, %v5728_v10 }
 0x5f3   :  { %v7165_v23 = vmax.f32 %v6905_v22, 0.0  ;;  %v12223_v6 = vpack.c.bf16 %v7164_v25, %v7159_v26  ;;  %v6945_v50 = vpop.f32.mrf.mxu1  ;;  %v11588_v22 = vld [vmem:[#allocation9 + $0x19fc] ss:$20 sps:$4 sm:$0xff]   ;;  %v11586_v25 = vld [vmem:[#allocation9 + $0x19f8] ss:$20 sps:$4 sm:$0xff]  }
 0x5f4   :  { %v6946_v49 = vadd.f32 %v6945_v50, %v5724_v54  ;;  %v11594_v26 = vld [vmem:[#allocation9 + $0x19ac] ss:$20 sps:$4 sm:$0xff]   ;;  %v11625_v50 = vld [vmem:[#allocation9 + $0x1b10] ss:$20 sps:$4 sm:$0xff]   ;;  %v5732_v54 = vrot.slane %v12215_v60, %v12040_v20 }
 0x5f5   :  { %v12221_v27 = vpack.c.bf16 %v7165_v23, %v7160_v13  ;;  %v6947_v53 = vpop.f32.mrf.mxu1  ;;  %v11591_v13 = vld [vmem:[#allocation9 + $0x19d4] ss:$20 sps:$4 sm:$0xff]   ;;  %v11589_v23 = vld [vmem:[#allocation9 + $0x19d0] ss:$20 sps:$4 sm:$0xff]   ;;  %v11643_v60 = vld [vmem:[#allocation9 + $0x1a98] ss:$20 sps:$4 sm:$0xff]  }
 0x5f6   :  { %v6948_v5 = vadd.f32 %v6947_v53, %v5728_v10 }
 0x5f7   :  { %8517 = vmatprep.mubr.bf16.mxu1 %v12221_v27 }
 0x5f8   :  { %8518 = vmatmul.mubr.bf16.vlgmr.msra.gmra.mxu1 %v12223_v6 }
 0x5f9   :  { %8572 = vmatpush1.bf16.msra.mxu1 %v11604_v28  ;;  %8603 = vmatprep.mubr.bf16.mxu1 %v11927_v0  ;;  %v11592_v28 = vld [vmem:[#allocation9 + $0x19a8] ss:$20 sps:$4 sm:$0xff]  }
 0x5fa   :  { %8573 = vmatprep.subr.bf16.mxu1 %v11612_v52  ;;  %v11597_v52 = vld [vmem:[#allocation9 + $0x1984] ss:$20 sps:$4 sm:$0xff]  }
 0x5fd   :  { %8574 = vmatpush1.bf16.msra.mxu1 %v11610_v9  ;;  %v11595_v9 = vld [vmem:[#allocation9 + $0x1980] ss:$20 sps:$4 sm:$0xff]  }
 0x5fe   :  { %8575 = vmatprep.subr.bf16.mxu1 %v11618_v35  ;;  %v11600_v35 = vld [vmem:[#allocation9 + $0x195c] ss:$20 sps:$4 sm:$0xff]  }
 0x601   :  { %8576 = vmatpush1.bf16.msra.mxu1 %v11616_v36  ;;  %v11598_v36 = vld [vmem:[#allocation9 + $0x1958] ss:$20 sps:$4 sm:$0xff]  }
 0x602   :  { %8577 = vmatprep.subr.bf16.mxu1 %v11624_v37  ;;  %v11603_v37 = vld [vmem:[#allocation9 + $0x1934] ss:$20 sps:$4 sm:$0xff]  }
 0x605   :  { %8578 = vmatpush1.bf16.msra.mxu1 %v11622_v40  ;;  %v11601_v40 = vld [vmem:[#allocation9 + $0x1930] ss:$20 sps:$4 sm:$0xff]  }
 0x606   :  { %8579 = vmatprep.subr.bf16.mxu1 %v11630_v3  ;;  %v11609_v3 = vld [vmem:[#allocation9 + $0x190c] ss:$20 sps:$4 sm:$0xff]  }
 0x609   :  { %8580 = vmatpush1.bf16.msra.mxu1 %v11628_v41  ;;  %v11607_v41 = vld [vmem:[#allocation9 + $0x1908] ss:$20 sps:$4 sm:$0xff]  }
 0x60a   :  { %8581 = vmatprep.subr.bf16.mxu1 %v11636_v43  ;;  %v11615_v43 = vld [vmem:[#allocation9 + $0x1b64] ss:$20 sps:$4 sm:$0xff]  }
 0x60d   :  { %8582 = vmatpush1.bf16.msra.mxu1 %v11634_v44 }
 0x60e   :  { %8583 = vmatprep.subr.bf16.mxu1 %v11642_v29  ;;  %v11613_v29 = vld [vmem:[#allocation9 + $0x1b60] ss:$20 sps:$4 sm:$0xff]  }
 0x60f   :  { %v7027_v42 = vpop.f32.mrf.mxu1 }
 0x611   :  { %8584 = vmatpush1.bf16.msra.mxu1 %v11640_v45  ;;  %v7029_v55 = vpop.f32.mrf.mxu1  ;;  %v11621_v45 = vld [vmem:[#allocation9 + $0x1b3c] ss:$20 sps:$4 sm:$0xff]  }
 0x612   :  { %8585 = vmatprep.subr.bf16.mxu1 %v11648_v33 }
 0x613   :  { %v7031_v2 = vpop.f32.mrf.mxu1 }
 0x615   :  { %8586 = vmatpush1.bf16.msra.mxu1 %v11646_v46  ;;  %v7033_v12 = vpop.f32.mrf.mxu1  ;;  %v11619_v46 = vld [vmem:[#allocation9 + $0x1b38] ss:$20 sps:$4 sm:$0xff]  }
 0x616   :  { %8657 = vmatprep.subr.bf16.mxu1 %v11654_v47 }
 0x62a   :  { %v6984_v56 = vpop.f32.mrf.mxu0 }
 0x62b   :  { %v6985_v24 = vadd.f32 %v6984_v56, %v6942_v61  ;;  %v11631_v56 = vld [vmem:[#allocation9 + $0x1ae8] ss:$20 sps:$4 sm:$0xff]   ;;  %v11639_v61 = vld [vmem:[#allocation9 + $0x1ac4] ss:$20 sps:$4 sm:$0xff]  }
 0x62c   :  { %v6986_v62 = vpop.f32.mrf.mxu0 }
 0x62d   :  { %v6987_v1 = vadd.f32 %v6986_v62, %v6944_v58  ;;  %v7028_v14 = vadd.f32 %v7027_v42, %v6985_v24  ;;  %v11633_v42 = vld [vmem:[#allocation9 + $0x1aec] ss:$20 sps:$4 sm:$0xff]   ;;  %v11645_v24 = vld [vmem:[#allocation9 + $0x1a9c] ss:$20 sps:$4 sm:$0xff]  }
 0x62e   :  { %v6988_v4 = vpop.f32.mrf.mxu0 }
 0x62f   :  { %v6989_v7 = vadd.f32 %v6988_v4, %v6946_v49  ;;  %v7030_v11 = vadd.f32 %v7029_v55, %v6987_v1  ;;  %v7161_v57 = vmax.f32 %v7028_v14, 0.0  ;;  %v10164_v47 = vpop.f32.mrf.mxu1  ;;  %v11637_v1 = vld [vmem:[#allocation9 + $0x1ac0] ss:$20 sps:$4 sm:$0xff]  }
 0x630   :  { %v6990_v8 = vpop.f32.mrf.mxu0 }
 0x631   :  { %v7032_v63 = vadd.f32 %v7031_v2, %v6989_v7  ;;  %v6991_v51 = vadd.f32 %v6990_v8, %v6948_v5  ;;  %v7162_v59 = vmax.f32 %v7030_v11, 0.0  ;;  %v10165_v53 = vpop.f32.mrf.mxu1 }
 0x632   :  { %v10166_v4 = vadd.f32 %v10165_v53, %v10164_v47  ;;  %v11684_v47 = vld [vmem:[#allocation9 + $0x1bdc] ss:$20 sps:$4 sm:$0xff]  }
 0x633   :  { %v7034_v15 = vadd.f32 %v7033_v12, %v6991_v51  ;;  %v7166_v16 = vmax.f32 %v7032_v63, 0.0  ;;  %v10167_v58 = vpop.f32.mrf.mxu1  ;;  %v11651_v51 = vld [vmem:[#allocation9 + $0x1a74] ss:$20 sps:$4 sm:$0xff]   ;;  %v11693_v53 = vld [vmem:[#allocation9 + $0x1e5c] ss:$20 sps:$4 sm:$0xff]  }
 0x635   :  { %v7167_v34 = vmax.f32 %v7034_v15, 0.0  ;;  %v12234_v19 = vpack.c.bf16 %v7166_v16, %v7161_v57  ;;  %v10168_v2 = vpop.f32.mrf.mxu1  ;;  %v11657_v57 = vld [vmem:[#allocation9 + $0x1a4c] ss:$20 sps:$4 sm:$0xff]  }
 0x636   :  { %v10169_v8 = vadd.f32 %v10168_v2, %v10167_v58  ;;  %v11697_v58 = vld [vmem:[#allocation9 + $0x1e30] ss:$20 sps:$4 sm:$0xff]  }
 0x637   :  { %v12232_v17 = vpack.c.bf16 %v7167_v34, %v7162_v59  ;;  %v11649_v59 = vld [vmem:[#allocation9 + $0x1a70] ss:$20 sps:$4 sm:$0xff]  }
 0x638   :  { %v11708_v2 = vld [vmem:[#allocation9 + $0x1dbc] ss:$20 sps:$4 sm:$0xff]  }
 0x639   :  { %8560 = vmatprep.mubr.bf16.mxu0 %v12232_v17 }
 0x63a   :  { %8561 = vmatmul.mubr.bf16.vlgmr.msra.gmra.mxu0 %v12234_v19 }
 0x63b   :  { %8615 = vmatpush1.bf16.msra.mxu0 %v11583_v18  ;;  %8646 = vmatprep.mubr.bf16.mxu0 %v12221_v27 }
 0x63c   :  { %8616 = vmatprep.subr.bf16.mxu0 %v11588_v22 }
 0x63f   :  { %8617 = vmatpush1.bf16.msra.mxu0 %v11586_v25  ;;  %v11652_v25 = vld [vmem:[#allocation9 + $0x1ca0] ss:$20 sps:$4 sm:$0xff]  }
 0x640   :  { %8618 = vmatprep.subr.bf16.mxu0 %v11591_v13 }
 0x643   :  { %8619 = vmatpush1.bf16.msra.mxu0 %v11589_v23  ;;  %v11655_v23 = vld [vmem:[#allocation9 + $0x1a48] ss:$20 sps:$4 sm:$0xff]  }
 0x644   :  { %8620 = vmatprep.subr.bf16.mxu0 %v11594_v26  ;;  %v11660_v26 = vld [vmem:[#allocation9 + $0x1c7c] ss:$20 sps:$4 sm:$0xff]  }
 0x647   :  { %8621 = vmatpush1.bf16.msra.mxu0 %v11592_v28  ;;  %v11663_v28 = vld [vmem:[#allocation9 + $0x1f24] ss:$20 sps:$4 sm:$0xff]  }
 0x648   :  { %8622 = vmatprep.subr.bf16.mxu0 %v11597_v52  ;;  %v11658_v52 = vld [vmem:[#allocation9 + $0x1c78] ss:$20 sps:$4 sm:$0xff]  }
 0x64a   :  { %v10142_v44 = vpop.f32.mrf.mxu0 }
 0x64b   :  { %8623 = vmatpush1.bf16.msra.mxu0 %v11595_v9  ;;  %v11661_v9 = vld [vmem:[#allocation9 + $0x1f20] ss:$20 sps:$4 sm:$0xff]  }
 0x64c   :  { %8624 = vmatprep.subr.bf16.mxu0 %v11600_v35  ;;  %v10143_v33 = vpop.f32.mrf.mxu0  ;;  %v11666_v35 = vld [vmem:[#allocation9 + $0x1c54] ss:$20 sps:$4 sm:$0xff]  }
 0x64d   :  { %v10144_v55 = vadd.f32 %v10143_v33, %v10142_v44  ;;  %v11673_v44 = vld [vmem:[#allocation9 + $0x1ed0] ss:$20 sps:$4 sm:$0xff]   ;;  %v11676_v33 = vld [vmem:[#allocation9 + $0x1c00] ss:$20 sps:$4 sm:$0xff]  }
 0x64e   :  { %v10145_v21 = vpop.f32.mrf.mxu0 }
 0x64f   :  { %8625 = vmatpush1.bf16.msra.mxu0 %v11598_v36  ;;  %v7071_v49 = vadd.f32 %v10144_v55, %v5732_v54  ;;  %v11669_v36 = vld [vmem:[#allocation9 + $0x1efc] ss:$20 sps:$4 sm:$0xff]   ;;  %v11699_v55 = vld [vmem:[#allocation9 + $0x1e34] ss:$20 sps:$4 sm:$0xff]  }
 0x650   :  { %8626 = vmatprep.subr.bf16.mxu0 %v11603_v37  ;;  %v10146_v10 = vpop.f32.mrf.mxu0  ;;  %v11664_v37 = vld [vmem:[#allocation9 + $0x1c50] ss:$20 sps:$4 sm:$0xff]  }
 0x651   :  { %v10147_v62 = vadd.f32 %v10146_v10, %v10145_v21  ;;  %v7112_v11 = vadd.f32 %v10166_v4, %v7071_v49  ;;  %v11682_v21 = vld [vmem:[#allocation9 + $0x1bd8] ss:$20 sps:$4 sm:$0xff]   ;;  %v11700_v49 = vld [vmem:[#allocation9 + $0x1de0] ss:$20 sps:$4 sm:$0xff]  }
 0x652   :  { %v11691_v10 = vld [vmem:[#allocation9 + $0x1e58] ss:$20 sps:$4 sm:$0xff]  }
 0x653   :  { %8627 = vmatpush1.bf16.msra.mxu0 %v11601_v40  ;;  %v7074_v5 = vadd.f32 %v10147_v62, %v5732_v54  ;;  %v11667_v40 = vld [vmem:[#allocation9 + $0x1ef8] ss:$20 sps:$4 sm:$0xff]  }
 0x654   :  { %8628 = vmatprep.subr.bf16.mxu0 %v11609_v3  ;;  %v11672_v3 = vld [vmem:[#allocation9 + $0x1c2c] ss:$20 sps:$4 sm:$0xff]  }
 0x655   :  { %v7115_v14 = vadd.f32 %v10169_v8, %v7074_v5  ;;  %v11696_v54 = vld [vmem:[#allocation9 + $0x1b8c] ss:$20 sps:$4 sm:$0xff]   ;;  %v11710_v5 = vld [vmem:[#allocation9 + $0x1ca8] ss:$20 sps:$4 sm:$0xff]  }
 0x656   :  { %v11705_v62 = vld [vmem:[#allocation9 + $0x1e0c] ss:$20 sps:$4 sm:$0xff]  }
 0x657   :  { %8629 = vmatpush1.bf16.msra.mxu0 %v11607_v41  ;;  %v11675_v41 = vld [vmem:[#allocation9 + $0x1ed4] ss:$20 sps:$4 sm:$0xff]   ;;  %v11706_v4 = vld [vmem:[#allocation9 + $0x1db8] ss:$20 sps:$4 sm:$0xff]  }
 0x658   :  { %8630 = vmatprep.subr.bf16.mxu0 %v11615_v43  ;;  %v11670_v43 = vld [vmem:[#allocation9 + $0x1c28] ss:$20 sps:$4 sm:$0xff]   ;;  %v11714_v8 = vld [vmem:[#allocation9 + $0x1dc0] ss:$20 sps:$4 sm:$0xff]  }
 0x65b   :  { %8631 = vmatpush2.bf16.msra.mxu0 %v11613_v29  ;;  %v11678_v29 = vld [vmem:[#allocation9 + $0x1c04] ss:$20 sps:$4 sm:$0xff]  }
 0x65c   :  { %8632 = vmatprep.subr.bf16.mxu0 %v11621_v45  ;;  %v11681_v45 = vld [vmem:[#allocation9 + $0x1eac] ss:$20 sps:$4 sm:$0xff]  }
 0x65f   :  { %8633 = vmatpush2.bf16.msra.mxu0 %v11619_v46  ;;  %v11679_v46 = vld [vmem:[#allocation9 + $0x1ea8] ss:$20 sps:$4 sm:$0xff]  }
 0x660   :  { %8634 = vmatprep.subr.bf16.mxu0 %v11627_v48  ;;  %v11687_v48 = vld [vmem:[#allocation9 + $0x1e84] ss:$20 sps:$4 sm:$0xff]  }
 0x663   :  { %8635 = vmatpush2.bf16.msra.mxu0 %v11625_v50  ;;  %v11690_v50 = vld [vmem:[#allocation9 + $0x1bb4] ss:$20 sps:$4 sm:$0xff]  }
 0x664   :  { %8636 = vmatprep.subr.bf16.mxu0 %v11633_v42  ;;  %v11688_v42 = vld [vmem:[#allocation9 + $0x1bb0] ss:$20 sps:$4 sm:$0xff]  }
 0x667   :  { %8637 = vmatpush2.bf16.msra.mxu0 %v11631_v56  ;;  %v11694_v56 = vld [vmem:[#allocation9 + $0x1b88] ss:$20 sps:$4 sm:$0xff]  }
 0x668   :  { %8638 = vmatprep.subr.bf16.mxu0 %v11639_v61  ;;  %v11702_v61 = vld [vmem:[#allocation9 + $0x1de4] ss:$20 sps:$4 sm:$0xff]  }
 0x66a   :  { %v7152_v7 = vpop.f32.mrf.mxu0 }
 0x66b   :  { %8639 = vmatpush2.bf16.msra.mxu0 %v11637_v1  ;;  %v7153_v12 = vadd.f32 %v7152_v7, %v7112_v11  ;;  %v11703_v1 = vld [vmem:[#allocation9 + $0x1e08] ss:$20 sps:$4 sm:$0xff]   ;;  %v11711_v11 = vld [vmem:[#allocation9 + $0x1d90] ss:$20 sps:$4 sm:$0xff]  }
 0x66c   :  { %v10318_v63 = vpop.f32.mrf.mxu0  ;;  %8640 = vmatprep.subr.bf16.mxu0 %v11645_v24  ;;  %v11709_v24 = vld [vmem:[#allocation9 + $0x1de8] ss:$20 sps:$4 sm:$0xff]  }
 0x66d   :  { %v7163_v18 = vmax.f32 %v7153_v12, 0.0  ;;  %v11713_v7 = vld [vmem:[#allocation9 + $0x1d94] ss:$20 sps:$4 sm:$0xff]   ;;  %v11718_v63 = vld [vmem:[#allocation9 + $0x1d6c] ss:$20 sps:$4 sm:$0xff]  }
 0x66e   :  { %v7155_v15 = vpop.f32.mrf.mxu0  ;;  %v11716_v12 = vld [vmem:[#allocation9 + $0x1d68] ss:$20 sps:$4 sm:$0xff]  }
 0x66f   :  { %v7156_v16 = vadd.f32 %v7155_v15, %v7115_v14  ;;  %8641 = vmatpush2.bf16.msra.mxu0 %v11643_v60  ;;  %v11715_v60 = vld [vmem:[#allocation9 + $0x1c80] ss:$20 sps:$4 sm:$0xff]   ;;  %v11720_v14 = vld [vmem:[#allocation9 + $0x1c58] ss:$20 sps:$4 sm:$0xff]  }
 0x670   :  { %v10319_v34 = vpop.f32.mrf.mxu0  ;;  %8642 = vmatprep.subr.bf16.mxu0 %v11651_v51  ;;  %v11719_v51 = vld [vmem:[#allocation9 + $0x1d98] ss:$20 sps:$4 sm:$0xff]  }
 0x671   :  { %v7168_v22 = vmax.f32 %v7156_v16, 0.0  ;;  %v11723_v15 = vld [vmem:[#allocation9 + $0x1d44] ss:$20 sps:$4 sm:$0xff]  }
 0x672   :  { %v11724_v16 = vld [vmem:[#allocation9 + $0x1d70] ss:$20 sps:$4 sm:$0xff]  }
 0x673   :  { %v12241_v13 = vpack.c.bf16 %v7168_v22, %v7163_v18  ;;  %8643 = vmatpush2.bf16.msra.mxu0 %v11649_v59  ;;  %v11721_v59 = vld [vmem:[#allocation9 + $0x1d40] ss:$20 sps:$4 sm:$0xff]   ;;  %v11725_v34 = vld [vmem:[#allocation9 + $0x1c30] ss:$20 sps:$4 sm:$0xff]   ;;  %v11726_v18 = vld [vmem:[#allocation9 + $0x1d18] ss:$20 sps:$4 sm:$0xff]  }
 0x674   :  { %8644 = vmatprep.subr.bf16.mxu0 %v11657_v57  ;;  %v11728_v57 = vld [vmem:[#allocation9 + $0x1d1c] ss:$20 sps:$4 sm:$0xff]  }
 0x675   :  { %8604 = vmatmul.mubr.bf16.vlgmr.msra.gmra.mxu1 %v12241_v13  ;;  %v11730_v22 = vld [vmem:[#allocation9 + $0x1c08] ss:$20 sps:$4 sm:$0xff]  }
 0x676   :  { %8658 = vmatpush1.bf16.msra.mxu1 %v11652_v25  ;;  %8689 = vmatprep.mubr.bf16.mxu1 %v12232_v17  ;;  %v11733_v25 = vld [vmem:[#allocation9 + $0x1cf4] ss:$20 sps:$4 sm:$0xff]  }
 0x677   :  { %8645 = vmatpush2.bf16.msra.mxu0 %v11655_v23  ;;  %8659 = vmatprep.subr.bf16.mxu1 %v11660_v26  ;;  %v11734_v23 = vld [vmem:[#allocation9 + $0x1d20] ss:$20 sps:$4 sm:$0xff]   ;;  %v11731_v26 = vld [vmem:[#allocation9 + $0x1cf0] ss:$20 sps:$4 sm:$0xff]  }
 0x678   :  { %8700 = vmatprep.subr.bf16.mxu0 %v11663_v28  ;;  %v11735_v28 = vld [vmem:[#allocation9 + $0x1be0] ss:$20 sps:$4 sm:$0xff]  }
 0x67a   :  { %8647 = vmatmul.mubr.bf16.vlgmr.msra.gmra.mxu0 %v12223_v6  ;;  %8660 = vmatpush1.bf16.msra.mxu1 %v11658_v52  ;;  %v11738_v52 = vld [vmem:[#allocation9 + $0x1ccc] ss:$20 sps:$4 sm:$0xff]  }
 0x67b   :  { %8701 = vmatpush1.bf16.msra.mxu0 %v11661_v9  ;;  %8661 = vmatprep.subr.bf16.mxu1 %v11666_v35  ;;  %v11739_v9 = vld [vmem:[#allocation9 + $0x1cf8] ss:$20 sps:$4 sm:$0xff]   ;;  %v11736_v35 = vld [vmem:[#allocation9 + $0x1cc8] ss:$20 sps:$4 sm:$0xff]  }
 0x67c   :  { %8702 = vmatprep.subr.bf16.mxu0 %v11669_v36  ;;  %8732 = vmatprep.mubr.bf16.mxu0 %v11927_v0  ;;  %v11685_v0 = vld [vmem:[#allocation9 + $0x1e80] ss:$20 sps:$4 sm:$0xff]   ;;  %v11740_v36 = vld [vmem:[#allocation9 + $0x1bb8] ss:$20 sps:$4 sm:$0xff]  }
 0x67e   :  { %8662 = vmatpush1.bf16.msra.mxu1 %v11664_v37  ;;  %v11741_v37 = vld [vmem:[#allocation9 + $0x1b68] ss:$20 sps:$4 sm:$0xff]  }
 0x67f   :  { %8703 = vmatpush1.bf16.msra.mxu0 %v11667_v40  ;;  %8663 = vmatprep.subr.bf16.mxu1 %v11672_v3  ;;  %v11743_v40 = vld [vmem:[#allocation9 + $0x1cd0] ss:$20 sps:$4 sm:$0xff]   ;;  %v11742_v3 = vld [vmem:[#allocation9 + $0x1a28] ss:$20 sps:$4 sm:$0xff]  }
 0x680   :  { %8704 = vmatprep.subr.bf16.mxu0 %v11675_v41  ;;  %v11744_v41 = vld [vmem:[#allocation9 + $0x1b90] ss:$20 sps:$4 sm:$0xff]  }
 0x682   :  { %8664 = vmatpush1.bf16.msra.mxu1 %v11670_v43  ;;  %v11745_v43 = vld [vmem:[#allocation9 + $0x1b40] ss:$20 sps:$4 sm:$0xff]  }
 0x683   :  { %8705 = vmatpush1.bf16.msra.mxu0 %v11673_v44  ;;  %8665 = vmatprep.subr.bf16.mxu1 %v11678_v29  ;;  %v11746_v44 = vld [vmem:[#allocation9 + $0x1a00] ss:$20 sps:$4 sm:$0xff]   ;;  %v11747_v29 = vld [vmem:[#allocation9 + $0x1b18] ss:$20 sps:$4 sm:$0xff]  }
 0x684   :  { %8706 = vmatprep.subr.bf16.mxu0 %v11681_v45  ;;  %v11748_v45 = vld [vmem:[#allocation9 + $0x19d8] ss:$20 sps:$4 sm:$0xff]  }
 0x686   :  { %8666 = vmatpush1.bf16.msra.mxu1 %v11676_v33  ;;  %v11749_v33 = vld [vmem:[#allocation9 + $0x1af0] ss:$20 sps:$4 sm:$0xff]  }
 0x687   :  { %8707 = vmatpush1.bf16.msra.mxu0 %v11679_v46  ;;  %8667 = vmatprep.subr.bf16.mxu1 %v11684_v47  ;;  %v11750_v46 = vld [vmem:[#allocation9 + $0x19b0] ss:$20 sps:$4 sm:$0xff]   ;;  %v11751_v47 = vld [vmem:[#allocation9 + $0x1ac8] ss:$20 sps:$4 sm:$0xff]  }
 0x688   :  { %8708 = vmatprep.subr.bf16.mxu0 %v11687_v48  ;;  %v11752_v48 = vld [vmem:[#allocation9 + $0x1988] ss:$20 sps:$4 sm:$0xff]  }
 0x68a   :  { %8668 = vmatpush1.bf16.msra.mxu1 %v11682_v21  ;;  %v11753_v21 = vld [vmem:[#allocation9 + $0x1aa0] ss:$20 sps:$4 sm:$0xff]  }
 0x68b   :  { %8709 = vmatpush1.bf16.msra.mxu0 %v11685_v0  ;;  %8669 = vmatprep.subr.bf16.mxu1 %v11690_v50  ;;  %v11755_v0 = vld [vmem:[#allocation9 + $0x1a78] ss:$20 sps:$4 sm:$0xff]  }
 0x68c   :  { %8710 = vmatprep.subr.bf16.mxu0 %v11693_v53  ;;  %v11756_v50 = vld [vmem:[#allocation9 + $0x1938] ss:$20 sps:$4 sm:$0xff]   ;;  %v11757_v53 = vld [vmem:[#allocation9 + $0x1a50] ss:$20 sps:$4 sm:$0xff]  }
 0x68e   :  { %8670 = vmatpush1.bf16.msra.mxu1 %v11688_v42  ;;  %v11759_v42 = vld [vmem:[#allocation9 + $0x1f28] ss:$20 sps:$4 sm:$0xff]  }
 0x68f   :  { %8711 = vmatpush1.bf16.msra.mxu0 %v11691_v10  ;;  %8671 = vmatprep.subr.bf16.mxu1 %v11696_v54  ;;  %v11760_v10 = vld [vmem:[#allocation9 + $0x1f00] ss:$20 sps:$4 sm:$0xff]   ;;  %v11761_v54 = vld [vmem:[#allocation9 + $0x1ed8] ss:$20 sps:$4 sm:$0xff]  }
 0x690   :  { %8712 = vmatprep.subr.bf16.mxu0 %v11699_v55  ;;  %v11762_v55 = vld [vmem:[#allocation9 + $0x1eb0] ss:$20 sps:$4 sm:$0xff]  }
 0x692   :  { %8672 = vmatpush1.bf16.msra.mxu1 %v11694_v56  ;;  %v11763_v56 = vld [vmem:[#allocation9 + $0x1e88] ss:$20 sps:$4 sm:$0xff]  }
 0x693   :  { %8713 = vmatpush1.bf16.msra.mxu0 %v11697_v58  ;;  %8673 = vmatprep.subr.bf16.mxu1 %v11702_v61  ;;  %v11765_v58 = vld [vmem:[#allocation9 + $0x1e38] ss:$20 sps:$4 sm:$0xff]   ;;  %v11766_v61 = vld [vmem:[#allocation9 + $0x1e10] ss:$20 sps:$4 sm:$0xff]  }
 0x694   :  { %8714 = vmatprep.subr.bf16.mxu0 %v11705_v62 }
 0x696   :  { %8674 = vmatpush2.bf16.msra.mxu1 %v11700_v49 }
 0x697   :  { %8715 = vmatpush1.bf16.msra.mxu0 %v11703_v1  ;;  %8675 = vmatprep.subr.bf16.mxu1 %v11708_v2 }
 0x698   :  { %10201 = vmatprep.subr.bf16.mxu0 %v11709_v24 }
 0x69a   :  { %8676 = vmatpush2.bf16.msra.mxu1 %v11706_v4  ;;  %8733 = vmatmul.mubr.bf16.vlgmr.msra.gmra.mxu0 %v12241_v13 }
 0x69b   :  { %10202 = vmatpush3.bf16.msra.mxu0 %v11710_v5  ;;  %8816 = vmatprep.mubr.bf16.mxu0 %v12232_v17  ;;  %v11729_v17 = vld [vmem:[#allocation9 + $0x1d48] ss:$20 sps:$4 sm:$0xff]  }
 0x69c   :  { %8677 = vmatprep.subr.bf16.mxu1 %v11713_v7  ;;  %10203 = vmatprep.subr.bf16.mxu0 %v11714_v8 }
 0x69e   :  { %8678 = vmatpush2.bf16.msra.mxu1 %v11711_v11 }
 0x69f   :  { %10204 = vmatpush3.bf16.msra.mxu0 %v11715_v60  ;;  %8679 = vmatprep.subr.bf16.mxu1 %v11718_v63 }
 0x6a0   :  { %10205 = vmatprep.subr.bf16.mxu0 %v11719_v51 }
 0x6a2   :  { %8680 = vmatpush2.bf16.msra.mxu1 %v11716_v12 }
 0x6a3   :  { %10206 = vmatpush3.bf16.msra.mxu0 %v11720_v14  ;;  %8681 = vmatprep.subr.bf16.mxu1 %v11723_v15 }
 0x6a4   :  { %10207 = vmatprep.subr.bf16.mxu0 %v11724_v16 }
 0x6a6   :  { %8682 = vmatpush2.bf16.msra.mxu1 %v11721_v59 }
 0x6a7   :  { %10208 = vmatpush3.bf16.msra.mxu0 %v11725_v34  ;;  %8683 = vmatprep.subr.bf16.mxu1 %v11728_v57  ;;  %v7417_v34 = vld [vmem:[#allocation11 + $0x4] ss:$8 sm:$0x10] }
 0x6a8   :  { %10209 = vmatprep.subr.bf16.mxu0 %v11729_v17 }
 0x6aa   :  { %8684 = vmatpush2.bf16.msra.mxu1 %v11726_v18 }
 0x6ab   :  { %10210 = vmatpush3.bf16.msra.mxu0 %v11730_v22  ;;  %8685 = vmatprep.subr.bf16.mxu1 %v11733_v25 }
 0x6ac   :  { %10211 = vmatprep.subr.bf16.mxu0 %v11734_v23 }
 0x6ae   :  { %8686 = vmatpush2.bf16.msra.mxu1 %v11731_v26 }
 0x6af   :  { %10212 = vmatpush3.bf16.msra.mxu0 %v11735_v28  ;;  %8687 = vmatprep.subr.bf16.mxu1 %v11738_v52 }
 0x6b0   :  { %10213 = vmatprep.subr.bf16.mxu0 %v11739_v9 }
 0x6b2   :  { %8688 = vmatpush2.bf16.msra.mxu1 %v11736_v35 }
 0x6b3   :  { %10214 = vmatpush3.bf16.msra.mxu0 %v11740_v36  ;;  %10179 = vmatprep.subr.bf16.mxu1 %v11741_v37 }
 0x6b4   :  { %10215 = vmatprep.subr.bf16.mxu0 %v11743_v40 }
 0x6b5   :  { %8690 = vmatmul.mubr.bf16.vlgmr.msra.gmra.mxu1 %v12234_v19 }
 0x6b6   :  { %10180 = vmatpush3.bf16.msra.mxu1 %v11742_v3  ;;  %8775 = vmatprep.mubr.bf16.mxu1 %v12221_v27  ;;  %v11754_v27 = vld [vmem:[#allocation9 + $0x1960] ss:$20 sps:$4 sm:$0xff]  }
 0x6b7   :  { %10216 = vmatpush3.bf16.msra.mxu0 %v11744_v41  ;;  %10181 = vmatprep.subr.bf16.mxu1 %v11745_v43 }
 0x6b8   :  { %v8519_v62 = vpop.f32.mrf.mxu1 }
 0x6ba   :  { %10182 = vmatpush3.bf16.msra.mxu1 %v11746_v44  ;;  %8817 = vmatmul.mubr.bf16.vlgmr.msra.gmra.mxu0 %v12234_v19  ;;  %v11758_v19 = vld [vmem:[#allocation9 + $0x1910] ss:$20 sps:$4 sm:$0xff]   ;;  %v8521_v49 = vpop.f32.mrf.mxu1 }
 0x6bb   :  { %10183 = vmatprep.subr.bf16.mxu1 %v11747_v29  ;;  %v8876_v29 = vld [vmem:[#allocation12] sm:$0x1f] }
 0x6bc   :  { %v8523_v2 = vpop.f32.mrf.mxu1 }
 0x6be   :  { %10184 = vmatpush3.bf16.msra.mxu1 %v11748_v45  ;;  %v8525_v4 = vpop.f32.mrf.mxu1 }
 0x6bf   :  { %10185 = vmatprep.subr.bf16.mxu1 %v11749_v33 }
 0x6c2   :  { %10186 = vmatpush3.bf16.msra.mxu1 %v11750_v46 }
 0x6c3   :  { %10187 = vmatprep.subr.bf16.mxu1 %v11751_v47 }
 0x6c6   :  { %10188 = vmatpush3.bf16.msra.mxu1 %v11752_v48 }
 0x6c7   :  { %10189 = vmatprep.subr.bf16.mxu1 %v11753_v21 }
 0x6ca   :  { %10190 = vmatpush3.bf16.msra.mxu1 %v11754_v27 }
 0x6cb   :  { %10191 = vmatprep.subr.bf16.mxu1 %v11755_v0 }
 0x6ce   :  { %10192 = vmatpush3.bf16.msra.mxu1 %v11756_v50 }
 0x6cf   :  { %10193 = vmatprep.subr.bf16.mxu1 %v11757_v53 }
 0x6d2   :  { %10194 = vmatpush3.bf16.msra.mxu1 %v11758_v19 }
 0x6d3   :  { %10320 = vmatprep.subr.bf16.mxu1 %v11929_v31 }
 0x6d5   :  { %8776 = vmatmul.mubr.bf16.vlgmr.msra.gmra.mxu1 %v12223_v6  ;;  %v11764_v6 = vld [vmem:[#allocation9 + $0x1e60] ss:$20 sps:$4 sm:$0xff]  }
 0x6d6   :  { %10321 = vmatpush3.bf16.msra.mxu1 %v11759_v42  ;;  %10336 = vmatprep.mubr.msk.bf16.mxu1 %vm11930_vm3, %v11929_v31  ;;  %v8881_v42 = vrot.slane %v8876_v29, %v12008_v32 }
 0x6d7   :  { %10322 = vmatprep.subr.bf16.mxu1 %v11929_v31 }
 0x6da   :  { %10323 = vmatpush3.bf16.msra.mxu1 %v11760_v10 }
 0x6db   :  { %10324 = vmatprep.subr.bf16.mxu1 %v11929_v31 }
 0x6de   :  { %10325 = vmatpush3.bf16.msra.mxu1 %v11761_v54 }
 0x6df   :  { %10326 = vmatprep.subr.bf16.mxu1 %v11929_v31 }
 0x6e2   :  { %10327 = vmatpush3.bf16.msra.mxu1 %v11762_v55 }
 0x6e3   :  { %10328 = vmatprep.subr.bf16.mxu1 %v11929_v31 }
 0x6e6   :  { %10329 = vmatpush3.bf16.msra.mxu1 %v11763_v56  ;;  %v8885_v56 = vrot.slane %v8876_v29, %v12005_v30 }
 0x6e7   :  { %10330 = vmatprep.subr.bf16.mxu1 %v11929_v31 }
 0x6ea   :  { %10331 = vmatpush3.bf16.msra.mxu1 %v11764_v6  ;;  %v8889_v6 = vrot.slane %v8876_v29, %v12017_v38 }
 0x6eb   :  { %10332 = vmatprep.subr.bf16.mxu1 %v11929_v31 }
 0x6ee   :  { %10333 = vmatpush3.bf16.msra.mxu1 %v11765_v58 }
 0x6ef   :  { %10334 = vmatprep.subr.bf16.mxu1 %v11929_v31 }
 0x6f2   :  { %10335 = vmatpush3.bf16.msra.mxu1 %v11766_v61 }
 0x6f5   :  { %10337 = vmatmul.mubr.bf16.vlgmr.msra.gmra.mxu1 %v12241_v13  ;;  %v7416_v13 = vld [vmem:[#allocation11 + $0x4] ss:$8 sm:$0xf] }
 0x6f6   :  { %v7418_v17 = vor.u32 %v7417_v34, %v7416_v13 }
 0x6f8   :  { %v7427_v22 = vrot.slane %v7418_v17, %v12005_v30  ;;  %v7431_v25 = vrot.slane %v7418_v17, %v12017_v38  ;;  %v7423_v26 = vrot.slane %v7418_v17, %v12008_v32  ;;  %v7435_v36 = vrot.slane %v7418_v17, %v12020_v39 }
 0x6f9   :  { %v8893_v30 = vrot.slane %v8876_v29, %v12020_v39 }
 0x6fa   :  { %v8562_v1 = vpop.f32.mrf.mxu0  ;;  %v8522_v9 = vadd.f32 %v8521_v49, %v7427_v22  ;;  %v8520_v37 = vadd.f32 %v8519_v62, %v7423_v26  ;;  %v8526_v47 = vadd.f32 %v8525_v4, %v7427_v22  ;;  %v8524_v21 = vadd.f32 %v8523_v2, %v7423_v26 }
 0x6fb   :  { %v7439_v49 = vrot.slane %v7418_v17, %v12040_v20  ;;  %v8897_v26 = vrot.slane %v8876_v29, %v12040_v20 }
 0x6fc   :  { %v8564_v24 = vpop.f32.mrf.mxu0  ;;  %v8563_v44 = vadd.f32 %v8562_v1, %v8520_v37 }
 0x6fd   :  { %v8565_v40 = vadd.f32 %v8564_v24, %v8522_v9 }
 0x6fe   :  { %v8566_v5 = vpop.f32.mrf.mxu0 }
 0x6ff   :  { %v8567_v54 = vadd.f32 %v8566_v5, %v8524_v21 }
 0x700   :  { %v8568_v8 = vpop.f32.mrf.mxu0 }
 0x701   :  { %v8569_v19 = vadd.f32 %v8568_v8, %v8526_v47 }
 0x735   :  { %v8605_v7 = vpop.f32.mrf.mxu1 }
 0x736   :  { %v8606_v27 = vadd.f32 %v8605_v7, %v8563_v44 }
 0x737   :  { %v8607_v11 = vpop.f32.mrf.mxu1 }
 0x738   :  { %v8608_v45 = vadd.f32 %v8607_v11, %v8565_v40  ;;  %v8866_v2 = vmax.f32 %v8606_v27, 0.0 }
 0x739   :  { %v8609_v63 = vpop.f32.mrf.mxu1 }
 0x73a   :  { %v8648_v60 = vpop.f32.mrf.mxu0  ;;  %v8867_v55 = vmax.f32 %v8608_v45, 0.0  ;;  %v8610_v24 = vadd.f32 %v8609_v63, %v8567_v54 }
 0x73b   :  { %v8611_v12 = vpop.f32.mrf.mxu1  ;;  %v8649_v35 = vadd.f32 %v8648_v60, %v7431_v25 }
 0x73c   :  { %v8650_v51 = vpop.f32.mrf.mxu0  ;;  %v8612_v61 = vadd.f32 %v8611_v12, %v8569_v19  ;;  %v8904_v60 = vmul.f32 %v8885_v56, %v8867_v55  ;;  %v8871_v12 = vmax.f32 %v8610_v24, 0.0 }
 0x73d   :  { %v8651_v33 = vadd.f32 %v8650_v51, %v7435_v36 }
 0x73e   :  { %v8652_v14 = vpop.f32.mrf.mxu0  ;;  %v8872_v51 = vmax.f32 %v8612_v61, 0.0 }
 0x73f   :  { %v8653_v48 = vadd.f32 %v8652_v14, %v7431_v25  ;;  %v8908_v25 = vmul.f32 %v8881_v42, %v8871_v12 }
 0x740   :  { %v8654_v31 = vpop.f32.mrf.mxu0  ;;  %v8909_v17 = vmul.f32 %v8885_v56, %v8872_v51 }
 0x741   :  { %v8655_v62 = vadd.f32 %v8654_v31, %v7435_v36 }
 0x742   :  { %v8919_v40 = vadd.f32 %v8909_v17, %v8908_v25 }
 0x75a   :  { %v8734_v59 = vpop.f32.mrf.mxu0 }
 0x75c   :  { %v8736_v18 = vpop.f32.mrf.mxu0 }
 0x75e   :  { %v8738_v28 = vpop.f32.mrf.mxu0 }
 0x760   :  { %v8740_v3 = vpop.f32.mrf.mxu0 }
 0x775   :  { %v8691_v15 = vpop.f32.mrf.mxu1 }
 0x776   :  { %v8692_v41 = vadd.f32 %v8691_v15, %v8649_v35  ;;  %v8903_v15 = vmul.f32 %v8881_v42, %v8866_v2 }
 0x777   :  { %v8693_v16 = vpop.f32.mrf.mxu1 }
 0x778   :  { %v8735_v0 = vadd.f32 %v8734_v59, %v8692_v41  ;;  %v8694_v50 = vadd.f32 %v8693_v16, %v8651_v33  ;;  %v8913_v63 = vadd.f32 %v8904_v60, %v8903_v15 }
 0x779   :  { %v8695_v57 = vpop.f32.mrf.mxu1 }
 0x77a   :  { %v10217_v46 = vpop.f32.mrf.mxu0  ;;  %v8696_v10 = vadd.f32 %v8695_v57, %v8653_v48  ;;  %v8868_v4 = vmax.f32 %v8735_v0, 0.0  ;;  %v8737_v7 = vadd.f32 %v8736_v18, %v8694_v50  ;;  %v8926_v50 = vstv %s12289_s6 }
 0x77b   :  { %v8697_v23 = vpop.f32.mrf.mxu1 }
 0x77c   :  { %v10218_v58 = vpop.f32.mrf.mxu0  ;;  %v8739_v11 = vadd.f32 %v8738_v28, %v8696_v10  ;;  %v8698_v32 = vadd.f32 %v8697_v23, %v8655_v62  ;;  %v8905_v31 = vmul.f32 %v8889_v6, %v8868_v4  ;;  %v8869_v16 = vmax.f32 %v8737_v7, 0.0 }
 0x77d   :  { %v10219_v34 = vadd.f32 %v10218_v58, %v10217_v46 }
 0x77e   :  { %v10220_v5 = vpop.f32.mrf.mxu0  ;;  %v8873_v59 = vmax.f32 %v8739_v11, 0.0  ;;  %v8741_v13 = vadd.f32 %v8740_v3, %v8698_v32  ;;  %v8906_v28 = vmul.f32 %v8893_v30, %v8869_v16  ;;  %v8914_v39 = vadd.f32 %v8913_v63, %v8905_v31 }
 0x780   :  { %v10221_v57 = vpop.f32.mrf.mxu0  ;;  %v8874_v9 = vmax.f32 %v8741_v13, 0.0  ;;  %v8915_v44 = vadd.f32 %v8914_v39, %v8906_v28 }
 0x781   :  { %v10222_v35 = vadd.f32 %v10221_v57, %v10220_v5 }
 0x782   :  { %v8911_v45 = vmul.f32 %v8893_v30, %v8874_v9 }
 0x795   :  { %v10195_v52 = vpop.f32.mrf.mxu1 }
 0x797   :  { %v10196_v43 = vpop.f32.mrf.mxu1 }
 0x798   :  { %v10197_v1 = vadd.f32 %v10196_v43, %v10195_v52  ;;  %v8910_v52 = vmul.f32 %v8889_v6, %v8873_v59 }
 0x799   :  { %v10198_v53 = vpop.f32.mrf.mxu1 }
 0x79a   :  { %v8778_v14 = vadd.f32 %v10197_v1, %v7439_v49  ;;  %v8920_v47 = vadd.f32 %v8919_v40, %v8910_v52 }
 0x79b   :  { %v10199_v8 = vpop.f32.mrf.mxu1 }
 0x79c   :  { %v10200_v38 = vadd.f32 %v10199_v8, %v10198_v53  ;;  %v8819_v22 = vadd.f32 %v10219_v34, %v8778_v14  ;;  %v8921_v29 = vadd.f32 %v8920_v47, %v8911_v45 }
 0x79e   :  { %v8781_v18 = vadd.f32 %v10200_v38, %v7439_v49 }
 0x7a0   :  { %v8822_v3 = vadd.f32 %v10222_v35, %v8781_v18 }
 0x7b5   :  { %v8859_v23 = vpop.f32.mrf.mxu1 }
 0x7b6   :  { %v8860_v36 = vadd.f32 %v8859_v23, %v8819_v22 }
 0x7b7   :  { %v10338_v37 = vpop.f32.mrf.mxu1 }
 0x7b8   :  { %v8870_v41 = vmax.f32 %v8860_v36, 0.0 }
 0x7b9   :  { %v8862_v43 = vpop.f32.mrf.mxu1 }
 0x7ba   :  { %v8863_v33 = vadd.f32 %v8862_v43, %v8822_v3  ;;  %v8907_v46 = vmul.f32 %v8897_v26, %v8870_v41 }
 0x7bb   :  { %v10339_v48 = vpop.f32.mrf.mxu1 }
 0x7bc   :  { %v8875_v21 = vmax.f32 %v8863_v33, 0.0  ;;  %v8916_v27 = vadd.f32 %v8915_v44, %v8907_v46 }
 0x7be   :  { %v8912_v20 = vmul.f32 %v8897_v26, %v8875_v21  ;;  %8917 = vadd.xlane.f32.xlu0 %v8916_v27 }
 0x7c0   :  { %v8922_v0 = vadd.f32 %v8921_v29, %v8912_v20 }
 0x7c2   :  { %8923 = vadd.xlane.f32.xlu0 %v8922_v0 }
 0x847   :  { %v8918_v53 = vpop.xlane.xlu0 %8917 }
 0x848   :  { %v8927_v19 = vadd.f32 %v8926_v50, %v8918_v53 }
 0x84a   :  { %8929 = vst [vmem:[#allocation14] sm:$0xff] %v8927_v19 }
 0x84b   :  { %v8924_v42 = vpop.xlane.xlu0 %8923 }
 0x84c   :  { %v8928_v10 = vadd.f32 %v8926_v50, %v8924_v42 }
 0x84e   :  { %8930 = vst [vmem:[#allocation14 + $0x8] sm:$0xff] %v8928_v10 }
 0x84f   :  { %11898 = shalt.err (!%p11895_p6)
}
 0x850   :  { %8942 = dma.vmem_to_hbm [thread:$0]  %s8937_s11, 256, %s12290_s7, [#allocation5], %s11922_s1, %s11922_s1, %s11923_s16  }
 0x851   :  { %11915 = dma.done.wait [#allocation5], 256  }
 0x852   :  { %11916 = vsyncadd [#allocation5], 4294967040 }
 0x853   :  { %8946 = vsyncpa [#allocation4], 1 }
 0x854   :  { %8947 = vsyncpa [#allocation7], 1 }
 0x855   :  { %8948 = vsyncpa [#allocation10], 1 }
 0x856   :  { %8949 = vsyncpa [#allocation13], 1 }
 0x857   :  { %8950 = vsyncpa [#allocation5], 1 }

// kernel: tpu_custom_call.1
= control target key start
LH: loop header
LB: loop body
LE: loop exit
PB: predicated region body
PF: predicated region fallthrough
CT: control target
= control target key end

     0   :  { %13 = vsyncpa [#allocation4], 0  ;;  %s12283_s0 = inlined_call_operand.hbm [shape: f32[16,23], index: 0, kind: input, shape index: {}]   ;;  %s12284_s1 = inlined_call_operand.hbm [shape: bf16[23,640], index: 1, kind: input, shape index: {}]   ;;  %s12285_s2 = inlined_call_operand.hbm [shape: f32[1,640], index: 2, kind: input, shape index: {}]   ;;  %s12286_s3 = inlined_call_operand.hbm [shape: bf16[5,640,640], index: 3, kind: input, shape index: {}]   ;;  %s12287_s4 = inlined_call_operand.hbm [shape: f32[5,640], index: 4, kind: input, shape index: {}]   ;;  %s12288_s5 = inlined_call_operand.hbm [shape: f32[1,640], index: 5, kind: input, shape index: {}]   ;;  %s12289_s6 = inlined_call_operand.<no memory space> [shape: f32[1,1], index: 6, kind: input, shape index: {}]   ;;  %s12290_s7 = inlined_call_operand.hbm [shape: f32[16,128], index: 7, kind: output, shape index: {}]  }
   0x1   :  { %14 = vsyncpa [#allocation7], 0 }
   0x2   :  { %15 = vsyncpa [#allocation10], 0 }
   0x3   :  { %16 = vsyncpa [#allocation13], 0 }
   0x4   :  { %17 = vsyncpa [#allocation5], 0  ;;  %s11917_s24 = smov [#allocation6]  }
   0x5   :  { %s35_s25 = sshll.u32 %s11917_s24, 4  ;;  %s36_s25 = int_to_ptr.vmem [resolvable:$true] %s35_s25 }
   0x6   :  { %s11775_s26 = scalar_lea.vmem %s36_s25, 960  ;;  %p11780_p1 = scmp.lt.s32.totalorder %s36_s25, %s36_s25 }
   0x7   :  { %p11776_p0 = scmp.ne.s32.totalorder %s36_s25, %s11775_s26  ;;  %p11781_p2 = scmp.lt.s32.totalorder %s11775_s26, %s11775_s26 }
   0x9   :  { %p11782_p3 = por %p11781_p2, %p11780_p1 }
   0xb   :  { %p11783_p4 = pnand %p11782_p3, %p11776_p0 }
   0xd   :  { %11786 = shalt.err (!%p11783_p4)
}
   0xe   :  { %s11918_s27 = smov 320   ;;  %s11919_s28 = smov 20  }
   0xf   :  { %41 = dma.hbm_to_vmem [thread:$0]  %s12284_s1, 960, %s36_s25, [#allocation7], %s11918_s27, %s11918_s27, %s11919_s28  }
  0x10   :  { %s11920_s8 = smov [#allocation9]   ;;  %s11921_s10 = smov [#allocation3]  }
  0x11   :  { %s57_s9 = sshll.u32 %s11920_s8, 4  ;;  %s23_s11 = sshll.u32 %s11921_s10, 4  ;;  %s58_s9 = int_to_ptr.vmem [resolvable:$true] %s57_s9  ;;  %s24_s11 = int_to_ptr.vmem [resolvable:$true] %s23_s11 }
  0x12   :  { %s11795_s12 = scalar_lea.vmem %s58_s9, 128000  ;;  %p11800_p6 = scmp.lt.s32.totalorder %s58_s9, %s58_s9 }
  0x13   :  { %p11796_p5 = scmp.ne.s32.totalorder %s58_s9, %s11795_s12  ;;  %p11801_p7 = scmp.lt.s32.totalorder %s11795_s12, %s11795_s12 }
  0x15   :  { %p11802_p8 = por %p11801_p7, %p11800_p6 }
  0x17   :  { %p11803_p9 = pnand %p11802_p8, %p11796_p5 }
  0x19   :  { %11806 = shalt.err (!%p11803_p9)
}
  0x1a   :  { %63 = dma.hbm_to_vmem [thread:$0]  %s12286_s3, 128000, %s58_s9, [#allocation10], %s11918_s27, %s11918_s27, %s11919_s28  }
  0x1b   :  { %s11815_s15 = scalar_lea.vmem %s24_s11, 256  ;;  %p11820_p11 = scmp.lt.s32.totalorder %s24_s11, %s24_s11 }
  0x1c   :  { %p11816_p10 = scmp.ne.s32.totalorder %s24_s11, %s11815_s15  ;;  %p11821_p12 = scmp.lt.s32.totalorder %s11815_s15, %s11815_s15 }
  0x1e   :  { %p11822_p13 = por %p11821_p12, %p11820_p11 }
  0x20   :  { %p11823_p0 = pnand %p11822_p13, %p11816_p10 }
  0x22   :  { %11826 = shalt.err (!%p11823_p0)
}
  0x23   :  { %s11922_s1 = smov 128   ;;  %s11923_s16 = smov 8  }
  0x24   :  { %29 = dma.hbm_to_vmem [thread:$0]  %s12283_s0, 256, %s24_s11, [#allocation4], %s11922_s1, %s11922_s1, %s11923_s16  }
  0x25   :  { %s11924_s19 = smov [#allocation8]   ;;  %s11925_s3 = smov [#allocation11]  }
  0x26   :  { %s48_s20 = sshll.u32 %s11924_s19, 4  ;;  %s70_s21 = sshll.u32 %s11925_s3, 4  ;;  %s49_s20 = int_to_ptr.vmem [resolvable:$true] %s48_s20  ;;  %s71_s21 = int_to_ptr.vmem [resolvable:$true] %s70_s21 }
  0x27   :  { %s11835_s22 = scalar_lea.vmem %s49_s20, 80  ;;  %s11839_s23 = scalar_lea.vmem %s49_s20, 96 }
  0x28   :  { %p11836_p1 = scmp.ne.s32.totalorder %s49_s20, %s11835_s22  ;;  %p11840_p2 = scmp.lt.s32.totalorder %s49_s20, %s49_s20 }
  0x29   :  { %p11841_p3 = scmp.lt.s32.totalorder %s11839_s23, %s11835_s22 }
  0x2b   :  { %p11842_p4 = por %p11841_p3, %p11840_p2 }
  0x2d   :  { %p11843_p5 = pnand %p11842_p4, %p11836_p1 }
  0x2f   :  { %11846 = shalt.err (!%p11843_p5)
}
  0x30   :  { %51 = dma.hbm_to_vmem [thread:$0]  %s12285_s2, 80, %s49_s20, [#allocation7]  }
  0x31   :  { %s11855_s26 = scalar_lea.vmem %s71_s21, 640  ;;  %p11860_p7 = scmp.lt.s32.totalorder %s71_s21, %s71_s21 }
  0x32   :  { %p11856_p6 = scmp.ne.s32.totalorder %s71_s21, %s11855_s26  ;;  %p11861_p8 = scmp.lt.s32.totalorder %s11855_s26, %s11855_s26 }
  0x34   :  { %p11862_p9 = por %p11861_p8, %p11860_p7 }
  0x36   :  { %p11863_p10 = pnand %p11862_p9, %p11856_p6 }
  0x38   :  { %11866 = shalt.err (!%p11863_p10)
}
  0x39   :  { %73 = dma.hbm_to_vmem [thread:$0]  %s12287_s4, 640, %s71_s21, [#allocation10]  }
  0x3a   :  { %s11926_s28 = smov [#allocation12]  }
  0x3b   :  { %s80_s29 = sshll.u32 %s11926_s28, 4  ;;  %s81_s29 = int_to_ptr.vmem [resolvable:$true] %s80_s29 }
  0x3c   :  { %s11875_s30 = scalar_lea.vmem %s81_s29, 80  ;;  %s11879_s8 = scalar_lea.vmem %s81_s29, 96 }
  0x3d   :  { %p11876_p11 = scmp.ne.s32.totalorder %s81_s29, %s11875_s30  ;;  %p11880_p12 = scmp.lt.s32.totalorder %s81_s29, %s81_s29 }
  0x3e   :  { %p11881_p13 = scmp.lt.s32.totalorder %s11879_s8, %s11875_s30 }
  0x40   :  { %p11882_p0 = por %p11881_p13, %p11880_p12 }
  0x42   :  { %p11883_p1 = pnand %p11882_p0, %p11876_p11 }
  0x44   :  { %11886 = shalt.err (!%p11883_p1)
}
  0x45   :  { %83 = dma.hbm_to_vmem [thread:$0]  %s12288_s5, 80, %s81_s29, [#allocation13]  }
  0x46   :  { %11907 = dma.done.wait [#allocation4], 256  }
  0x47   :  { %11908 = vsyncadd [#allocation4], 4294967040 }
  0x48   :  { %11909 = dma.done.wait [#allocation7], 1040  }
  0x49   :  { %11910 = vsyncadd [#allocation7], 4294966256 }
  0x4a   :  { %11911 = dma.done.wait [#allocation10], 128640  }
  0x4b   :  { %11912 = vsyncadd [#allocation10], 4294838656 }
  0x4c   :  { %11913 = dma.done.wait [#allocation13], 80  }
  0x4d   :  { %11914 = vsyncadd [#allocation13], 4294967216  ;;  %vm187_vm0 = vcmask 1042432   ;;  %v11927_v0 = vmov 0   ;;  %vm188_vm1 = vcmask 1043456   ;;  %v11928_v1 = vmov 65535  }
  0x4e   :  { %238 = vmatprep.mubr.bf16.mxu0 %v11927_v0  ;;  %v189_v2 = vsel %vm187_vm0, 4294967295, %v11928_v1  ;;  %v114_v3 = vld [vmem:[#allocation6 + $0x28] sm:$0xff]  ;;  %v115_v7 = vld [vmem:[#allocation6 + $0x30] sm:$0xff]  ;;  %v10357_v10 = vld [vmem:[#allocation6 + $0x4] ss:$20 sps:$4 sm:$0xff]   ;;  %vm183_vm2 = vcmask 187392  }
  0x4f   :  { %v190_v4 = vsel %vm188_vm1, %v189_v2, 0  ;;  %v8957_v5 = vcombine.high %v114_v3, %v114_v3  ;;  %v8956_v6 = vcombine.low %v114_v3, %v114_v3  ;;  %v10359_v11 = vld [vmem:[#allocation6] ss:$20 sps:$4 sm:$0xff]   ;;  %v8959_v13 = vcombine.high %v115_v7, %v115_v7  ;;  %v106_v14 = vld [vmem:[#allocation3 + $0x8] sm:$0xff]  ;;  %v10366_v33 = vld [vmem:[#allocation6 + $0x10] ss:$20 sps:$4 sm:$0xff]  }
  0x50   :  { %v105_v12 = vld [vmem:[#allocation3] sm:$0xff]  ;;  %v8958_v15 = vcombine.low %v115_v7, %v115_v7  ;;  %v10364_v23 = vld [vmem:[#allocation6 + $0xc] ss:$20 sps:$4 sm:$0xff]   ;;  %v10362_v25 = vld [vmem:[#allocation6 + $0x8] ss:$20 sps:$4 sm:$0xff]   ;;  %v11929_v31 = vmov 0.0  }
  0x51   :  { %v195_v8 = vand.u32 %v8957_v5, %v190_v4  ;;  %v192_v9 = vand.u32 %v8956_v6, %v190_v4  ;;  %v10367_v16 = vld [vmem:[#allocation9 + $0x11c] ss:$20 sps:$4 sm:$0xff]   ;;  %v10369_v17 = vld [vmem:[#allocation9 + $0x118] ss:$20 sps:$4 sm:$0xff]   ;;  %v201_v18 = vand.u32 %v8959_v13, %v190_v4  ;;  %v10370_v19 = vld [vmem:[#allocation9 + $0xf4] ss:$20 sps:$4 sm:$0xff]   ;;  %v107_v20 = vpack.c.bf16 %v106_v14, %v105_v12 }
  0x52   :  { %1657 = vmatprep.subr.bf16.mxu1 %v10367_v16  ;;  %v10372_v21 = vld [vmem:[#allocation9 + $0xf0] ss:$20 sps:$4 sm:$0xff]   ;;  %v198_v22 = vand.u32 %v8958_v15, %v190_v4  ;;  %v10373_v24 = vld [vmem:[#allocation9 + $0xcc] ss:$20 sps:$4 sm:$0xff]   ;;  %v10365_v26 = vld [vmem:[#allocation6 + $0x38] ss:$0 sps:$4 sm:$0xff]  }
  0x53   :  { %218 = vmatprep.subr.bf16.mxu0 %v195_v8  ;;  %1658 = vmatpush1.bf16.msra.mxu1 %v10369_v17  ;;  %v10378_v27 = vld [vmem:[#allocation9 + $0xc8] ss:$20 sps:$4 sm:$0xff]   ;;  %v10379_v28 = vld [vmem:[#allocation9 + $0xa4] ss:$20 sps:$4 sm:$0xff]   ;;  %v10384_v29 = vld [vmem:[#allocation9 + $0xa0] ss:$20 sps:$4 sm:$0xff]   ;;  %v204_v30 = vand.u32 %v10365_v26, %v190_v4 }
  0x54   :  { %219 = vmatpush1.bf16.msra.mxu0 %v192_v9  ;;  %1659 = vmatprep.subr.bf16.mxu1 %v10370_v19  ;;  %v10385_v32 = vld [vmem:[#allocation9 + $0x7c] ss:$20 sps:$4 sm:$0xff]   ;;  %v10390_v34 = vld [vmem:[#allocation9 + $0x78] ss:$20 sps:$4 sm:$0xff]   ;;  %vm11930_vm3 = vmmov 0   ;;  %s11931_s10 = smov [#allocation14]  }
  0x55   :  { %220 = vmatprep.subr.bf16.mxu0 %v10357_v10  ;;  %v10391_v35 = vld [vmem:[#allocation9 + $0x54] ss:$20 sps:$4 sm:$0xff]   ;;  %v10377_v36 = vld [vmem:[#allocation9 + $0x39c] ss:$20 sps:$4 sm:$0xff]   ;;  %v10375_v38 = vld [vmem:[#allocation9 + $0x398] ss:$20 sps:$4 sm:$0xff]  }
  0x56   :  { %v10396_v37 = vld [vmem:[#allocation9 + $0x50] ss:$20 sps:$4 sm:$0xff]   ;;  %v10397_v39 = vld [vmem:[#allocation9 + $0x2c] ss:$20 sps:$4 sm:$0xff]   ;;  %v10383_v40 = vld [vmem:[#allocation9 + $0x374] ss:$20 sps:$4 sm:$0xff]  }
  0x57   :  { %1660 = vmatpush1.bf16.msra.mxu1 %v10372_v21  ;;  %v10381_v41 = vld [vmem:[#allocation9 + $0x370] ss:$20 sps:$4 sm:$0xff]   ;;  %v10402_v42 = vld [vmem:[#allocation9 + $0x28] ss:$20 sps:$4 sm:$0xff]   ;;  %v10389_v44 = vld [vmem:[#allocation9 + $0x34c] ss:$20 sps:$4 sm:$0xff]  }
  0x58   :  { %221 = vmatpush1.bf16.msra.mxu0 %v10359_v11  ;;  %1661 = vmatprep.subr.bf16.mxu1 %v10373_v24  ;;  %v10403_v43 = vld [vmem:[#allocation9 + $0x4] ss:$20 sps:$4 sm:$0xff]   ;;  %v10408_v45 = vld [vmem:[#allocation9] ss:$20 sps:$4 sm:$0xff]   ;;  %v10387_v46 = vld [vmem:[#allocation9 + $0x348] ss:$20 sps:$4 sm:$0xff]  }
  0x59   :  { %261 = vmatprep.subr.bf16.mxu0 %v201_v18  ;;  %v10409_v47 = vld [vmem:[#allocation9 + $0x25c] ss:$20 sps:$4 sm:$0xff]   ;;  %v10395_v48 = vld [vmem:[#allocation9 + $0x324] ss:$20 sps:$4 sm:$0xff]   ;;  %v10393_v49 = vld [vmem:[#allocation9 + $0x320] ss:$20 sps:$4 sm:$0xff]  }
  0x5a   :  { %v10401_v50 = vld [vmem:[#allocation9 + $0x2fc] ss:$20 sps:$4 sm:$0xff]   ;;  %v10414_v51 = vld [vmem:[#allocation9 + $0x258] ss:$20 sps:$4 sm:$0xff]   ;;  %v10415_v52 = vld [vmem:[#allocation9 + $0x234] ss:$20 sps:$4 sm:$0xff]  }
  0x5b   :  { %8961 = vmatmul.mubr.msk.bf16.vlgmr.msra.gmra.mxu0 %vm183_vm2, %v107_v20  ;;  %1662 = vmatpush1.bf16.msra.mxu1 %v10378_v27  ;;  %v10420_v53 = vld [vmem:[#allocation9 + $0x230] ss:$20 sps:$4 sm:$0xff]   ;;  %v10399_v54 = vld [vmem:[#allocation9 + $0x2f8] ss:$20 sps:$4 sm:$0xff]   ;;  %v10407_v56 = vld [vmem:[#allocation9 + $0x2d4] ss:$20 sps:$4 sm:$0xff]  }
  0x5c   :  { %262 = vmatpush1.bf16.msra.mxu0 %v198_v22  ;;  %281 = vmatprep.mubr.bf16.mxu0 %v11927_v0  ;;  %v10421_v55 = vld [vmem:[#allocation9 + $0x20c] ss:$20 sps:$4 sm:$0xff]   ;;  %v10426_v57 = vld [vmem:[#allocation9 + $0x208] ss:$20 sps:$4 sm:$0xff]   ;;  %v10405_v58 = vld [vmem:[#allocation9 + $0x2d0] ss:$20 sps:$4 sm:$0xff]  }
  0x5d   :  { %263 = vmatprep.subr.bf16.mxu0 %v10364_v23  ;;  %1663 = vmatprep.subr.bf16.mxu1 %v10379_v28  ;;  %v10427_v59 = vld [vmem:[#allocation9 + $0x1e4] ss:$20 sps:$4 sm:$0xff]   ;;  %v10413_v60 = vld [vmem:[#allocation9 + $0x2ac] ss:$20 sps:$4 sm:$0xff]   ;;  %v10411_v62 = vld [vmem:[#allocation9 + $0x2a8] ss:$20 sps:$4 sm:$0xff]   ;;  %v119_v28 = vlaneseq }
  0x5e   :  { %v10432_v61 = vld [vmem:[#allocation9 + $0x1e0] ss:$20 sps:$4 sm:$0xff]   ;;  %v10433_v63 = vld [vmem:[#allocation9 + $0x1bc] ss:$20 sps:$4 sm:$0xff]   ;;  %v10419_v1 = vld [vmem:[#allocation9 + $0x284] ss:$20 sps:$4 sm:$0xff]  }
  0x5f   :  { %1664 = vmatpush1.bf16.msra.mxu1 %v10384_v29  ;;  %v10438_v2 = vld [vmem:[#allocation9 + $0x1b8] ss:$20 sps:$4 sm:$0xff]   ;;  %v10417_v3 = vld [vmem:[#allocation9 + $0x280] ss:$20 sps:$4 sm:$0xff]   ;;  %v10425_v4 = vld [vmem:[#allocation9 + $0x4dc] ss:$20 sps:$4 sm:$0xff]  }
  0x60   :  { %264 = vmatpush1.bf16.msra.mxu0 %v10362_v25  ;;  %1665 = vmatprep.subr.bf16.mxu1 %v10385_v32  ;;  %v10423_v5 = vld [vmem:[#allocation9 + $0x4d8] ss:$20 sps:$4 sm:$0xff]   ;;  %v10431_v6 = vld [vmem:[#allocation9 + $0x4b4] ss:$20 sps:$4 sm:$0xff]   ;;  %v10429_v7 = vld [vmem:[#allocation9 + $0x4b0] ss:$20 sps:$4 sm:$0xff]  }
  0x61   :  { %10232 = vmatprep.subr.bf16.mxu0 %v11929_v31  ;;  %v10437_v8 = vld [vmem:[#allocation9 + $0x48c] ss:$20 sps:$4 sm:$0xff]   ;;  %v10435_v9 = vld [vmem:[#allocation9 + $0x488] ss:$20 sps:$4 sm:$0xff]   ;;  %v10443_v11 = vld [vmem:[#allocation9 + $0x464] ss:$20 sps:$4 sm:$0xff]  }
  0x62   :  { %v10439_v10 = vld [vmem:[#allocation9 + $0x194] ss:$20 sps:$4 sm:$0xff]   ;;  %v10444_v13 = vld [vmem:[#allocation9 + $0x190] ss:$20 sps:$4 sm:$0xff]   ;;  %v10445_v14 = vld [vmem:[#allocation9 + $0x16c] ss:$20 sps:$4 sm:$0xff]  }
  0x63   :  { %8962 = vmatmul.mubr.msk.bf16.vlgmr.msra.gmra.mxu0 %vm183_vm2, %v107_v20  ;;  %1666 = vmatpush1.bf16.msra.mxu1 %v10390_v34  ;;  %v10441_v12 = vld [vmem:[#allocation9 + $0x460] ss:$20 sps:$4 sm:$0xff]   ;;  %v10449_v15 = vld [vmem:[#allocation9 + $0x43c] ss:$20 sps:$4 sm:$0xff]   ;;  %v10447_v16 = vld [vmem:[#allocation9 + $0x438] ss:$20 sps:$4 sm:$0xff]  }
  0x64   :  { %10233 = vmatpush3.bf16.msra.mxu0 %v204_v30  ;;  %10236 = vmatprep.mubr.msk.bf16.mxu0 %vm11930_vm3, %v11929_v31  ;;  %v10450_v17 = vld [vmem:[#allocation9 + $0x168] ss:$20 sps:$4 sm:$0xff]   ;;  %v10451_v18 = vld [vmem:[#allocation9 + $0x144] ss:$20 sps:$4 sm:$0xff]   ;;  %v10456_v21 = vld [vmem:[#allocation9 + $0x140] ss:$20 sps:$4 sm:$0xff]  }
  0x65   :  { %10234 = vmatprep.subr.bf16.mxu0 %v11929_v31  ;;  %1667 = vmatprep.subr.bf16.mxu1 %v10391_v35  ;;  %v10455_v19 = vld [vmem:[#allocation9 + $0x414] ss:$20 sps:$4 sm:$0xff]   ;;  %v10459_v22 = vld [vmem:[#allocation9 + $0x3ec] ss:$20 sps:$4 sm:$0xff]   ;;  %v10462_v23 = vld [vmem:[#allocation9 + $0x61c] ss:$20 sps:$4 sm:$0xff]  }
  0x66   :  { %v10457_v24 = vld [vmem:[#allocation9 + $0x3e8] ss:$20 sps:$4 sm:$0xff]   ;;  %v10465_v25 = vld [vmem:[#allocation9 + $0x3c4] ss:$20 sps:$4 sm:$0xff]   ;;  %v10463_v26 = vld [vmem:[#allocation9 + $0x3c0] ss:$20 sps:$4 sm:$0xff]  }
  0x67   :  { %1668 = vmatpush1.bf16.msra.mxu1 %v10396_v37  ;;  %v10474_v27 = vld [vmem:[#allocation9 + $0x124] ss:$20 sps:$4 sm:$0xff]   ;;  %v12002_v29 = vshrl.u32 %v119_v28, 7  ;;  %v10495_v28 = vld [vmem:[#allocation9 + $0x52c] ss:$20 sps:$4 sm:$0xff]   ;;  %s8936_s11 = sshll.u32 %s11931_s10, 4  ;;  %s8937_s11 = int_to_ptr.vmem [resolvable:$true] %s8936_s11 }
  0x68   :  { %10235 = vmatpush3.bf16.msra.mxu0 %v10366_v33  ;;  %1669 = vmatprep.subr.bf16.mxu1 %v10397_v39  ;;  %v12010_v33 = vld [vmem:[#allocation8] sm:$0x1f]  ;;  %s11887_s12 = scalar_lea.vmem %s8937_s11, 256  ;;  %p11892_p3 = scmp.lt.s32.totalorder %s8937_s11, %s8937_s11 }
  0x69   :  { %1700 = vmatprep.subr.bf16.mxu0 %v10377_v36  ;;  %v12005_v30 = vsub.s32 1, %v12002_v29  ;;  %v12008_v32 = vsub.s32 0, %v12002_v29  ;;  %v12020_v39 = vsub.s32 3, %v12002_v29  ;;  %p11888_p2 = scmp.ne.s32.totalorder %s8937_s11, %s11887_s12  ;;  %p11893_p4 = scmp.lt.s32.totalorder %s11887_s12, %s11887_s12 }
  0x6b   :  { %10237 = vmatmul.mubr.msk.bf16.vlgmr.msra.gmra.mxu0 %vm183_vm2, %v107_v20  ;;  %1670 = vmatpush1.bf16.msra.mxu1 %v10402_v42  ;;  %v10453_v20 = vld [vmem:[#allocation9 + $0x410] ss:$20 sps:$4 sm:$0xff]   ;;  %v126_v35 = vrot.slane %v12010_v33, %v12005_v30  ;;  %v122_v36 = vrot.slane %v12010_v33, %v12008_v32  ;;  %p11894_p5 = por %p11893_p4, %p11892_p3 }
  0x6c   :  { %1701 = vmatpush1.bf16.msra.mxu0 %v10375_v38  ;;  %1671 = vmatprep.subr.bf16.mxu1 %v10403_v43  ;;  %v12017_v38 = vsub.s32 2, %v12002_v29 }
  0x6d   :  { %1702 = vmatprep.subr.bf16.mxu0 %v10383_v40  ;;  %p11895_p6 = pnand %p11894_p5, %p11888_p2 }
  0x6f   :  { %1672 = vmatpush1.bf16.msra.mxu1 %v10408_v45  ;;  %v130_v45 = vrot.slane %v12010_v33, %v12017_v38 }
  0x70   :  { %1703 = vmatpush1.bf16.msra.mxu0 %v10381_v41  ;;  %1673 = vmatprep.subr.bf16.mxu1 %v10409_v47  ;;  %v134_v47 = vrot.slane %v12010_v33, %v12020_v39 }
  0x71   :  { %1704 = vmatprep.subr.bf16.mxu0 %v10389_v44 }
  0x73   :  { %1674 = vmatpush2.bf16.msra.mxu1 %v10414_v51 }
  0x74   :  { %1705 = vmatpush1.bf16.msra.mxu0 %v10387_v46  ;;  %1675 = vmatprep.subr.bf16.mxu1 %v10415_v52  ;;  %v10460_v52 = vld [vmem:[#allocation9 + $0x618] ss:$20 sps:$4 sm:$0xff]  }
  0x75   :  { %1706 = vmatprep.subr.bf16.mxu0 %v10395_v48 }
  0x77   :  { %1676 = vmatpush2.bf16.msra.mxu1 %v10420_v53 }
  0x78   :  { %1707 = vmatpush1.bf16.msra.mxu0 %v10393_v49  ;;  %1677 = vmatprep.subr.bf16.mxu1 %v10421_v55 }
  0x79   :  { %1708 = vmatprep.subr.bf16.mxu0 %v10401_v50 }
  0x7b   :  { %1678 = vmatpush2.bf16.msra.mxu1 %v10426_v57 }
  0x7c   :  { %1709 = vmatpush1.bf16.msra.mxu0 %v10399_v54  ;;  %1679 = vmatprep.subr.bf16.mxu1 %v10427_v59 }
  0x7d   :  { %1710 = vmatprep.subr.bf16.mxu0 %v10407_v56  ;;  %v10468_v56 = vld [vmem:[#allocation9 + $0x5f4] ss:$20 sps:$4 sm:$0xff]  }
  0x7f   :  { %1680 = vmatpush2.bf16.msra.mxu1 %v10432_v61 }
  0x80   :  { %1711 = vmatpush1.bf16.msra.mxu0 %v10405_v58  ;;  %1681 = vmatprep.subr.bf16.mxu1 %v10433_v63 }
  0x81   :  { %1712 = vmatprep.subr.bf16.mxu0 %v10413_v60 }
  0x83   :  { %1682 = vmatpush2.bf16.msra.mxu1 %v10438_v2 }
  0x84   :  { %1713 = vmatpush1.bf16.msra.mxu0 %v10411_v62  ;;  %1683 = vmatprep.subr.bf16.mxu1 %v10439_v10 }
  0x85   :  { %1714 = vmatprep.subr.bf16.mxu0 %v10419_v1  ;;  %v10466_v1 = vld [vmem:[#allocation9 + $0x5f0] ss:$20 sps:$4 sm:$0xff]  }
  0x87   :  { %1684 = vmatpush2.bf16.msra.mxu1 %v10444_v13 }
  0x88   :  { %1715 = vmatpush1.bf16.msra.mxu0 %v10417_v3  ;;  %1685 = vmatprep.subr.bf16.mxu1 %v10445_v14  ;;  %v10480_v14 = vld [vmem:[#allocation9 + $0xfc] ss:$20 sps:$4 sm:$0xff]  }
  0x89   :  { %1716 = vmatprep.subr.bf16.mxu0 %v10425_v4 }
  0x8b   :  { %1686 = vmatpush2.bf16.msra.mxu1 %v10450_v17  ;;  %v10478_v17 = vld [vmem:[#allocation9 + $0xf8] ss:$20 sps:$4 sm:$0xff]  }
  0x8c   :  { %1717 = vmatpush2.bf16.msra.mxu0 %v10423_v5  ;;  %1687 = vmatprep.subr.bf16.mxu1 %v10451_v18  ;;  %v10471_v5 = vld [vmem:[#allocation9 + $0x5cc] ss:$20 sps:$4 sm:$0xff]   ;;  %v10483_v18 = vld [vmem:[#allocation9 + $0x57c] ss:$20 sps:$4 sm:$0xff]  }
  0x8d   :  { %1718 = vmatprep.subr.bf16.mxu0 %v10431_v6 }
  0x8f   :  { %1688 = vmatpush2.bf16.msra.mxu1 %v10456_v21  ;;  %v10486_v21 = vld [vmem:[#allocation9 + $0xd4] ss:$20 sps:$4 sm:$0xff]  }
  0x90   :  { %1719 = vmatpush2.bf16.msra.mxu0 %v10429_v7  ;;  %1743 = vmatprep.subr.bf16.mxu1 %v10462_v23  ;;  %v10484_v23 = vld [vmem:[#allocation9 + $0xd0] ss:$20 sps:$4 sm:$0xff]  }
  0x91   :  { %1720 = vmatprep.subr.bf16.mxu0 %v10437_v8  ;;  %v10469_v8 = vld [vmem:[#allocation9 + $0x5c8] ss:$20 sps:$4 sm:$0xff]  }
  0x94   :  { %1721 = vmatpush2.bf16.msra.mxu0 %v10435_v9  ;;  %v10472_v9 = vld [vmem:[#allocation9 + $0x120] ss:$20 sps:$4 sm:$0xff]  }
  0x95   :  { %1722 = vmatprep.subr.bf16.mxu0 %v10443_v11  ;;  %v10477_v11 = vld [vmem:[#allocation9 + $0x5a4] ss:$20 sps:$4 sm:$0xff]  }
  0x98   :  { %1723 = vmatpush2.bf16.msra.mxu0 %v10441_v12 }
  0x99   :  { %1724 = vmatprep.subr.bf16.mxu0 %v10449_v15 }
  0x9c   :  { %1725 = vmatpush2.bf16.msra.mxu0 %v10447_v16  ;;  %v10475_v16 = vld [vmem:[#allocation9 + $0x5a0] ss:$20 sps:$4 sm:$0xff]  }
  0x9d   :  { %1726 = vmatprep.subr.bf16.mxu0 %v10455_v19 }
  0xa0   :  { %1727 = vmatpush2.bf16.msra.mxu0 %v10453_v20  ;;  %v12040_v20 = vsub.s32 4, %v12002_v29 }
  0xa1   :  { %1728 = vmatprep.subr.bf16.mxu0 %v10459_v22  ;;  %v10481_v22 = vld [vmem:[#allocation9 + $0x578] ss:$20 sps:$4 sm:$0xff]  }
  0xa2   :  { %v138_v29 = vrot.slane %v12010_v33, %v12040_v20 }
  0xa4   :  { %1729 = vmatpush2.bf16.msra.mxu0 %v10457_v24  ;;  %v10489_v24 = vld [vmem:[#allocation9 + $0x554] ss:$20 sps:$4 sm:$0xff]  }
  0xa5   :  { %1730 = vmatprep.subr.bf16.mxu0 %v10465_v25  ;;  %v10492_v25 = vld [vmem:[#allocation9 + $0xac] ss:$20 sps:$4 sm:$0xff]  }
  0xa8   :  { %1731 = vmatpush2.bf16.msra.mxu0 %v10463_v26  ;;  %v10487_v26 = vld [vmem:[#allocation9 + $0x550] ss:$20 sps:$4 sm:$0xff]  }
  0xa9   :  { %1786 = vmatprep.subr.bf16.mxu0 %v10474_v27  ;;  %v10490_v27 = vld [vmem:[#allocation9 + $0xa8] ss:$20 sps:$4 sm:$0xff]  }
 0x11b   :  { %v240_v34 = vpop.f32.mrf.mxu0 }
 0x11c   :  { %v241_v43 = vadd.f32 %v240_v34, %v122_v36  ;;  %v10498_v34 = vld [vmem:[#allocation9 + $0x84] ss:$20 sps:$4 sm:$0xff]  }
 0x11d   :  { %v242_v37 = vpop.f32.mrf.mxu0 }
 0x11e   :  { %v243_v40 = vadd.f32 %v242_v37, %v126_v35  ;;  %v333_v53 = vmax.f32 %v241_v43, 0.0  ;;  %v10501_v37 = vld [vmem:[#allocation9 + $0x504] ss:$20 sps:$4 sm:$0xff]   ;;  %v10499_v43 = vld [vmem:[#allocation9 + $0x500] ss:$20 sps:$4 sm:$0xff]  }
 0x11f   :  { %v244_v41 = vpop.f32.mrf.mxu0 }
 0x120   :  { %v245_v42 = vadd.f32 %v244_v41, %v122_v36  ;;  %v334_v48 = vmax.f32 %v243_v40, 0.0  ;;  %v10496_v36 = vld [vmem:[#allocation9 + $0x80] ss:$20 sps:$4 sm:$0xff]  }
 0x121   :  { %v246_v44 = vpop.f32.mrf.mxu0 }
 0x122   :  { %v247_v46 = vadd.f32 %v246_v44, %v126_v35  ;;  %v338_v49 = vmax.f32 %v245_v42, 0.0  ;;  %v10493_v35 = vld [vmem:[#allocation9 + $0x528] ss:$20 sps:$4 sm:$0xff]   ;;  %v10502_v44 = vld [vmem:[#allocation9 + $0x58] ss:$20 sps:$4 sm:$0xff]  }
 0x123   :  { %v283_v50 = vpop.f32.mrf.mxu0  ;;  %v10504_v42 = vld [vmem:[#allocation9 + $0x5c] ss:$20 sps:$4 sm:$0xff]  }
 0x124   :  { %v339_v51 = vmax.f32 %v247_v46, 0.0  ;;  %v284_v54 = vadd.f32 %v283_v50, %v130_v45  ;;  %v12028_v59 = vpack.c.bf16 %v338_v49, %v333_v53  ;;  %v10508_v49 = vld [vmem:[#allocation9 + $0x3a0] ss:$20 sps:$4 sm:$0xff]   ;;  %v10511_v53 = vld [vmem:[#allocation9 + $0x8] ss:$20 sps:$4 sm:$0xff]  }
 0x125   :  { %v285_v55 = vpop.f32.mrf.mxu0  ;;  %v10513_v50 = vld [vmem:[#allocation9 + $0xc] ss:$20 sps:$4 sm:$0xff]  }
 0x126   :  { %v12026_v57 = vpack.c.bf16 %v339_v51, %v334_v48  ;;  %v286_v58 = vadd.f32 %v285_v55, %v134_v47  ;;  %v335_v62 = vmax.f32 %v284_v54, 0.0  ;;  %v10505_v48 = vld [vmem:[#allocation9 + $0x30] ss:$20 sps:$4 sm:$0xff]   ;;  %v10514_v54 = vld [vmem:[#allocation9 + $0x378] ss:$20 sps:$4 sm:$0xff]  }
 0x127   :  { %v287_v60 = vpop.f32.mrf.mxu0  ;;  %v10516_v51 = vld [vmem:[#allocation9 + $0x37c] ss:$20 sps:$4 sm:$0xff]   ;;  %v10519_v55 = vld [vmem:[#allocation9 + $0x264] ss:$20 sps:$4 sm:$0xff]  }
 0x128   :  { %v288_v61 = vadd.f32 %v287_v60, %v130_v45  ;;  %1689 = vmatprep.mubr.bf16.mxu1 %v12026_v57  ;;  %v336_v2 = vmax.f32 %v286_v58, 0.0  ;;  %v10507_v45 = vld [vmem:[#allocation9 + $0x34] ss:$20 sps:$4 sm:$0xff]   ;;  %v10520_v60 = vld [vmem:[#allocation9 + $0x350] ss:$20 sps:$4 sm:$0xff]  }
 0x129   :  { %v289_v63 = vpop.f32.mrf.mxu0  ;;  %1690 = vmatmul.mubr.bf16.vlgmr.msra.gmra.mxu1 %v12028_v59  ;;  %v10517_v58 = vld [vmem:[#allocation9 + $0x260] ss:$20 sps:$4 sm:$0xff]  }
 0x12a   :  { %v340_v3 = vmax.f32 %v288_v61, 0.0  ;;  %v290_v4 = vadd.f32 %v289_v63, %v134_v47  ;;  %1744 = vmatpush1.bf16.msra.mxu1 %v10460_v52  ;;  %1775 = vmatprep.mubr.bf16.mxu1 %v11927_v0  ;;  %v10510_v47 = vld [vmem:[#allocation9 + $0x3a4] ss:$20 sps:$4 sm:$0xff]   ;;  %v10525_v61 = vld [vmem:[#allocation9 + $0x23c] ss:$20 sps:$4 sm:$0xff]  }
 0x12b   :  { %1745 = vmatprep.subr.bf16.mxu1 %v10468_v56  ;;  %v326_v6 = vpop.f32.mrf.mxu0  ;;  %v10522_v56 = vld [vmem:[#allocation9 + $0x354] ss:$20 sps:$4 sm:$0xff]   ;;  %v10523_v63 = vld [vmem:[#allocation9 + $0x238] ss:$20 sps:$4 sm:$0xff]  }
 0x12c   :  { %v341_v7 = vmax.f32 %v290_v4, 0.0  ;;  %v12033_v10 = vpack.c.bf16 %v340_v3, %v335_v62  ;;  %v327_v40 = vadd.f32 %v326_v6, %v138_v29  ;;  %v10528_v62 = vld [vmem:[#allocation9 + $0x32c] ss:$20 sps:$4 sm:$0xff]   ;;  %v10534_v3 = vld [vmem:[#allocation9 + $0x304] ss:$20 sps:$4 sm:$0xff]  }
 0x12d   :  { %v10238_v12 = vpop.f32.mrf.mxu0  ;;  %v10529_v4 = vld [vmem:[#allocation9 + $0x210] ss:$20 sps:$4 sm:$0xff]   ;;  %v10537_v6 = vld [vmem:[#allocation9 + $0x1ec] ss:$20 sps:$4 sm:$0xff]  }
 0x12e   :  { %v12035_v13 = vpack.c.bf16 %v341_v7, %v336_v2  ;;  %1746 = vmatpush1.bf16.msra.mxu1 %v10466_v1  ;;  %v337_v46 = vmax.f32 %v327_v40, 0.0  ;;  %v10526_v1 = vld [vmem:[#allocation9 + $0x328] ss:$20 sps:$4 sm:$0xff]  }
 0x12f   :  { %1747 = vmatprep.subr.bf16.mxu1 %v10471_v5  ;;  %v329_v15 = vpop.f32.mrf.mxu0  ;;  %v10531_v2 = vld [vmem:[#allocation9 + $0x214] ss:$20 sps:$4 sm:$0xff]   ;;  %v10540_v7 = vld [vmem:[#allocation9 + $0x2dc] ss:$20 sps:$4 sm:$0xff]  }
 0x130   :  { %1732 = vmatprep.mubr.bf16.mxu0 %v12035_v13  ;;  %v330_v41 = vadd.f32 %v329_v15, %v138_v29  ;;  %v10532_v5 = vld [vmem:[#allocation9 + $0x300] ss:$20 sps:$4 sm:$0xff]   ;;  %v10544_v15 = vld [vmem:[#allocation9 + $0x2b0] ss:$20 sps:$4 sm:$0xff]  }
 0x131   :  { %1733 = vmatmul.mubr.bf16.vlgmr.msra.gmra.mxu0 %v12033_v10  ;;  %v10239_v19 = vpop.f32.mrf.mxu0  ;;  %v10546_v12 = vld [vmem:[#allocation9 + $0x2b4] ss:$20 sps:$4 sm:$0xff]   ;;  %v10576_v40 = vld [vmem:[#allocation9 + $0x5fc] ss:$20 sps:$4 sm:$0xff]  }
 0x132   :  { %1748 = vmatpush1.bf16.msra.mxu1 %v10469_v8  ;;  %1787 = vmatpush1.bf16.msra.mxu0 %v10472_v9  ;;  %v342_v33 = vmax.f32 %v330_v41, 0.0  ;;  %v10535_v8 = vld [vmem:[#allocation9 + $0x1e8] ss:$20 sps:$4 sm:$0xff]   ;;  %v10538_v9 = vld [vmem:[#allocation9 + $0x2d8] ss:$20 sps:$4 sm:$0xff]  }
 0x133   :  { %1818 = vmatprep.mubr.bf16.mxu0 %v12026_v57  ;;  %1749 = vmatprep.subr.bf16.mxu1 %v10477_v11  ;;  %v10543_v11 = vld [vmem:[#allocation9 + $0x1c4] ss:$20 sps:$4 sm:$0xff]   ;;  %v10550_v19 = vld [vmem:[#allocation9 + $0x288] ss:$20 sps:$4 sm:$0xff]  }
 0x134   :  { %1788 = vmatprep.subr.bf16.mxu0 %v10480_v14  ;;  %v12045_v52 = vpack.c.bf16 %v342_v33, %v337_v46  ;;  %v10541_v14 = vld [vmem:[#allocation9 + $0x1c0] ss:$20 sps:$4 sm:$0xff]   ;;  %v10571_v41 = vld [vmem:[#allocation9 + $0x468] ss:$20 sps:$4 sm:$0xff]   ;;  %v10580_v46 = vld [vmem:[#allocation9 + $0x5d0] ss:$20 sps:$4 sm:$0xff]  }
 0x135   :  { %v10567_v29 = vld [vmem:[#allocation9 + $0x494] ss:$20 sps:$4 sm:$0xff]   ;;  %v10585_v33 = vld [vmem:[#allocation9 + $0x41c] ss:$20 sps:$4 sm:$0xff]  }
 0x136   :  { %1750 = vmatpush1.bf16.msra.mxu1 %v10475_v16  ;;  %1789 = vmatpush1.bf16.msra.mxu0 %v10478_v17  ;;  %v10549_v16 = vld [vmem:[#allocation9 + $0x19c] ss:$20 sps:$4 sm:$0xff]   ;;  %v10552_v17 = vld [vmem:[#allocation9 + $0x28c] ss:$20 sps:$4 sm:$0xff]  }
 0x137   :  { %1751 = vmatprep.subr.bf16.mxu1 %v10483_v18  ;;  %1790 = vmatprep.subr.bf16.mxu0 %v10486_v21  ;;  %v10547_v18 = vld [vmem:[#allocation9 + $0x198] ss:$20 sps:$4 sm:$0xff]   ;;  %v10555_v21 = vld [vmem:[#allocation9 + $0x174] ss:$20 sps:$4 sm:$0xff]  }
 0x13a   :  { %1752 = vmatpush1.bf16.msra.mxu1 %v10481_v22  ;;  %1791 = vmatpush1.bf16.msra.mxu0 %v10484_v23  ;;  %v10558_v22 = vld [vmem:[#allocation9 + $0x4e4] ss:$20 sps:$4 sm:$0xff]  }
 0x13b   :  { %1753 = vmatprep.subr.bf16.mxu1 %v10489_v24  ;;  %1792 = vmatprep.subr.bf16.mxu0 %v10492_v25  ;;  %v10553_v23 = vld [vmem:[#allocation9 + $0x170] ss:$20 sps:$4 sm:$0xff]   ;;  %v10556_v24 = vld [vmem:[#allocation9 + $0x4e0] ss:$20 sps:$4 sm:$0xff]  }
 0x13c   :  { %v10561_v25 = vld [vmem:[#allocation9 + $0x14c] ss:$20 sps:$4 sm:$0xff]  }
 0x13e   :  { %1754 = vmatpush1.bf16.msra.mxu1 %v10487_v26  ;;  %1793 = vmatpush1.bf16.msra.mxu0 %v10490_v27  ;;  %v10564_v26 = vld [vmem:[#allocation9 + $0x4bc] ss:$20 sps:$4 sm:$0xff]  }
 0x13f   :  { %1755 = vmatprep.subr.bf16.mxu1 %v10495_v28  ;;  %1794 = vmatprep.subr.bf16.mxu0 %v10498_v34  ;;  %v10559_v27 = vld [vmem:[#allocation9 + $0x148] ss:$20 sps:$4 sm:$0xff]   ;;  %v10562_v28 = vld [vmem:[#allocation9 + $0x4b8] ss:$20 sps:$4 sm:$0xff]  }
 0x140   :  { %v10570_v34 = vld [vmem:[#allocation9 + $0x624] ss:$20 sps:$4 sm:$0xff]  }
 0x142   :  { %1756 = vmatpush1.bf16.msra.mxu1 %v10493_v35  ;;  %1795 = vmatpush1.bf16.msra.mxu0 %v10496_v36  ;;  %v10565_v35 = vld [vmem:[#allocation9 + $0x490] ss:$20 sps:$4 sm:$0xff]   ;;  %v10568_v36 = vld [vmem:[#allocation9 + $0x620] ss:$20 sps:$4 sm:$0xff]  }
 0x143   :  { %1757 = vmatprep.subr.bf16.mxu1 %v10501_v37  ;;  %1796 = vmatprep.subr.bf16.mxu0 %v10504_v42  ;;  %v10573_v37 = vld [vmem:[#allocation9 + $0x46c] ss:$20 sps:$4 sm:$0xff]  }
 0x144   :  { %v10574_v42 = vld [vmem:[#allocation9 + $0x5f8] ss:$20 sps:$4 sm:$0xff]  }
 0x146   :  { %1758 = vmatpush1.bf16.msra.mxu1 %v10499_v43  ;;  %1797 = vmatpush1.bf16.msra.mxu0 %v10502_v44  ;;  %v10579_v43 = vld [vmem:[#allocation9 + $0x444] ss:$20 sps:$4 sm:$0xff]   ;;  %v10582_v44 = vld [vmem:[#allocation9 + $0x5d4] ss:$20 sps:$4 sm:$0xff]  }
 0x147   :  { %1798 = vmatprep.subr.bf16.mxu0 %v10507_v45  ;;  %1829 = vmatprep.subr.bf16.mxu1 %v10510_v47  ;;  %v10577_v45 = vld [vmem:[#allocation9 + $0x440] ss:$20 sps:$4 sm:$0xff]  }
 0x148   :  { %v10588_v47 = vld [vmem:[#allocation9 + $0x5ac] ss:$20 sps:$4 sm:$0xff]  }
 0x149   :  { %1776 = vmatmul.mubr.bf16.vlgmr.msra.gmra.mxu1 %v12045_v52 }
 0x14a   :  { %1799 = vmatpush1.bf16.msra.mxu0 %v10505_v48  ;;  %1830 = vmatpush1.bf16.msra.mxu1 %v10508_v49  ;;  %v10583_v48 = vld [vmem:[#allocation9 + $0x418] ss:$20 sps:$4 sm:$0xff]   ;;  %v10586_v49 = vld [vmem:[#allocation9 + $0x5a8] ss:$20 sps:$4 sm:$0xff]  }
 0x14b   :  { %1861 = vmatprep.mubr.bf16.mxu1 %v12035_v13  ;;  %1800 = vmatprep.subr.bf16.mxu0 %v10513_v50  ;;  %v10591_v50 = vld [vmem:[#allocation9 + $0x3f4] ss:$20 sps:$4 sm:$0xff]  }
 0x14c   :  { %1831 = vmatprep.subr.bf16.mxu1 %v10516_v51  ;;  %v10594_v51 = vld [vmem:[#allocation9 + $0x584] ss:$20 sps:$4 sm:$0xff]  }
 0x14e   :  { %1801 = vmatpush1.bf16.msra.mxu0 %v10511_v53  ;;  %1832 = vmatpush1.bf16.msra.mxu1 %v10514_v54  ;;  %v10589_v53 = vld [vmem:[#allocation9 + $0x3f0] ss:$20 sps:$4 sm:$0xff]   ;;  %v10592_v54 = vld [vmem:[#allocation9 + $0x580] ss:$20 sps:$4 sm:$0xff]  }
 0x14f   :  { %1802 = vmatprep.subr.bf16.mxu0 %v10519_v55  ;;  %1833 = vmatprep.subr.bf16.mxu1 %v10522_v56  ;;  %v10597_v55 = vld [vmem:[#allocation9 + $0x3cc] ss:$20 sps:$4 sm:$0xff]   ;;  %v10600_v56 = vld [vmem:[#allocation9 + $0x55c] ss:$20 sps:$4 sm:$0xff]  }
 0x152   :  { %1803 = vmatpush2.bf16.msra.mxu0 %v10517_v58  ;;  %1834 = vmatpush1.bf16.msra.mxu1 %v10520_v60  ;;  %v10595_v58 = vld [vmem:[#allocation9 + $0x3c8] ss:$20 sps:$4 sm:$0xff]   ;;  %v10598_v60 = vld [vmem:[#allocation9 + $0x558] ss:$20 sps:$4 sm:$0xff]  }
 0x153   :  { %1804 = vmatprep.subr.bf16.mxu0 %v10525_v61  ;;  %1835 = vmatprep.subr.bf16.mxu1 %v10528_v62  ;;  %v10603_v61 = vld [vmem:[#allocation9 + $0x534] ss:$20 sps:$4 sm:$0xff]  }
 0x154   :  { %v10604_v62 = vld [vmem:[#allocation9 + $0x268] ss:$20 sps:$4 sm:$0xff]  }
 0x156   :  { %1805 = vmatpush2.bf16.msra.mxu0 %v10523_v63  ;;  %1836 = vmatpush1.bf16.msra.mxu1 %v10526_v1  ;;  %v10601_v63 = vld [vmem:[#allocation9 + $0x530] ss:$20 sps:$4 sm:$0xff]   ;;  %v10605_v1 = vld [vmem:[#allocation9 + $0x128] ss:$20 sps:$4 sm:$0xff]  }
 0x157   :  { %1806 = vmatprep.subr.bf16.mxu0 %v10531_v2  ;;  %1837 = vmatprep.subr.bf16.mxu1 %v10534_v3  ;;  %v10608_v2 = vld [vmem:[#allocation9 + $0x50c] ss:$20 sps:$4 sm:$0xff]  }
 0x158   :  { %v10609_v3 = vld [vmem:[#allocation9 + $0x240] ss:$20 sps:$4 sm:$0xff]  }
 0x15a   :  { %1807 = vmatpush2.bf16.msra.mxu0 %v10529_v4  ;;  %1838 = vmatpush1.bf16.msra.mxu1 %v10532_v5  ;;  %v10606_v4 = vld [vmem:[#allocation9 + $0x508] ss:$20 sps:$4 sm:$0xff]   ;;  %v10610_v5 = vld [vmem:[#allocation9 + $0x100] ss:$20 sps:$4 sm:$0xff]  }
 0x15b   :  { %1808 = vmatprep.subr.bf16.mxu0 %v10537_v6  ;;  %1839 = vmatprep.subr.bf16.mxu1 %v10540_v7  ;;  %v10611_v6 = vld [vmem:[#allocation9 + $0x218] ss:$20 sps:$4 sm:$0xff]   ;;  %v10612_v7 = vld [vmem:[#allocation9 + $0x4e8] ss:$20 sps:$4 sm:$0xff]  }
 0x15e   :  { %1809 = vmatpush2.bf16.msra.mxu0 %v10535_v8  ;;  %1840 = vmatpush1.bf16.msra.mxu1 %v10538_v9  ;;  %v10613_v8 = vld [vmem:[#allocation9 + $0xd8] ss:$20 sps:$4 sm:$0xff]   ;;  %v10614_v9 = vld [vmem:[#allocation9 + $0x3a8] ss:$20 sps:$4 sm:$0xff]  }
 0x15f   :  { %1810 = vmatprep.subr.bf16.mxu0 %v10543_v11  ;;  %1841 = vmatprep.subr.bf16.mxu1 %v10546_v12  ;;  %v10615_v11 = vld [vmem:[#allocation9 + $0x1f0] ss:$20 sps:$4 sm:$0xff]   ;;  %v10616_v12 = vld [vmem:[#allocation9 + $0x4c0] ss:$20 sps:$4 sm:$0xff]  }
 0x162   :  { %1811 = vmatpush2.bf16.msra.mxu0 %v10541_v14  ;;  %1842 = vmatpush1.bf16.msra.mxu1 %v10544_v15  ;;  %v10617_v14 = vld [vmem:[#allocation9 + $0xb0] ss:$20 sps:$4 sm:$0xff]   ;;  %v10618_v15 = vld [vmem:[#allocation9 + $0x380] ss:$20 sps:$4 sm:$0xff]  }
 0x163   :  { %1812 = vmatprep.subr.bf16.mxu0 %v10549_v16  ;;  %1843 = vmatprep.subr.bf16.mxu1 %v10552_v17  ;;  %v10619_v16 = vld [vmem:[#allocation9 + $0x1c8] ss:$20 sps:$4 sm:$0xff]  }
 0x164   :  { %v10621_v17 = vld [vmem:[#allocation9 + $0x88] ss:$20 sps:$4 sm:$0xff]  }
 0x166   :  { %1813 = vmatpush2.bf16.msra.mxu0 %v10547_v18  ;;  %1844 = vmatpush1.bf16.msra.mxu1 %v10550_v19  ;;  %v10622_v18 = vld [vmem:[#allocation9 + $0x358] ss:$20 sps:$4 sm:$0xff]   ;;  %v10623_v19 = vld [vmem:[#allocation9 + $0x1a0] ss:$20 sps:$4 sm:$0xff]  }
 0x167   :  { %1814 = vmatprep.subr.bf16.mxu0 %v10555_v21  ;;  %1845 = vmatprep.subr.bf16.mxu1 %v10558_v22  ;;  %v10624_v21 = vld [vmem:[#allocation9 + $0x470] ss:$20 sps:$4 sm:$0xff]   ;;  %v10625_v22 = vld [vmem:[#allocation9 + $0x60] ss:$20 sps:$4 sm:$0xff]  }
 0x16a   :  { %1815 = vmatpush2.bf16.msra.mxu0 %v10553_v23  ;;  %1846 = vmatpush2.bf16.msra.mxu1 %v10556_v24  ;;  %v10626_v23 = vld [vmem:[#allocation9 + $0x330] ss:$20 sps:$4 sm:$0xff]   ;;  %v10627_v24 = vld [vmem:[#allocation9 + $0x178] ss:$20 sps:$4 sm:$0xff]  }
 0x16b   :  { %1816 = vmatprep.subr.bf16.mxu0 %v10561_v25  ;;  %1847 = vmatprep.subr.bf16.mxu1 %v10564_v26  ;;  %v10628_v25 = vld [vmem:[#allocation9 + $0x448] ss:$20 sps:$4 sm:$0xff]  }
 0x16c   :  { %v10630_v26 = vld [vmem:[#allocation9 + $0x308] ss:$20 sps:$4 sm:$0xff]  }
 0x16e   :  { %1817 = vmatpush2.bf16.msra.mxu0 %v10559_v27  ;;  %1848 = vmatpush2.bf16.msra.mxu1 %v10562_v28  ;;  %v10631_v27 = vld [vmem:[#allocation9 + $0x150] ss:$20 sps:$4 sm:$0xff]   ;;  %v10632_v28 = vld [vmem:[#allocation9 + $0x420] ss:$20 sps:$4 sm:$0xff]  }
 0x16f   :  { %1849 = vmatprep.subr.bf16.mxu1 %v10567_v29  ;;  %1872 = vmatprep.subr.bf16.mxu0 %v10570_v34  ;;  %v10633_v29 = vld [vmem:[#allocation9 + $0x10] ss:$20 sps:$4 sm:$0xff]   ;;  %v10634_v34 = vld [vmem:[#allocation9 + $0x2e0] ss:$20 sps:$4 sm:$0xff]  }
 0x171   :  { %1819 = vmatmul.mubr.bf16.vlgmr.msra.gmra.mxu0 %v12028_v59 }
 0x172   :  { %1850 = vmatpush2.bf16.msra.mxu1 %v10565_v35  ;;  %1873 = vmatpush1.bf16.msra.mxu0 %v10568_v36  ;;  %v10635_v35 = vld [vmem:[#allocation9 + $0x3f8] ss:$20 sps:$4 sm:$0xff]  }
 0x173   :  { %1851 = vmatprep.subr.bf16.mxu1 %v10573_v37  ;;  %1874 = vmatprep.subr.bf16.mxu0 %v10576_v40  ;;  %v10636_v36 = vld [vmem:[#allocation9 + $0x2b8] ss:$20 sps:$4 sm:$0xff]   ;;  %v10637_v37 = vld [vmem:[#allocation9 + $0x628] ss:$20 sps:$4 sm:$0xff]   ;;  %v10638_v40 = vld [vmem:[#allocation9 + $0x3d0] ss:$20 sps:$4 sm:$0xff]  }
 0x174   :  { %1904 = vmatprep.mubr.bf16.mxu0 %v11927_v0 }
 0x176   :  { %1852 = vmatpush2.bf16.msra.mxu1 %v10571_v41  ;;  %1875 = vmatpush1.bf16.msra.mxu0 %v10574_v42  ;;  %v10639_v41 = vld [vmem:[#allocation9 + $0x290] ss:$20 sps:$4 sm:$0xff]   ;;  %v10640_v42 = vld [vmem:[#allocation9 + $0x600] ss:$20 sps:$4 sm:$0xff]  }
 0x177   :  { %1853 = vmatprep.subr.bf16.mxu1 %v10579_v43  ;;  %1876 = vmatprep.subr.bf16.mxu0 %v10582_v44  ;;  %v10649_v43 = vld [vmem:[#allocation9 + $0x75c] ss:$20 sps:$4 sm:$0xff]   ;;  %v10641_v44 = vld [vmem:[#allocation9 + $0x5d8] ss:$20 sps:$4 sm:$0xff]  }
 0x17a   :  { %1854 = vmatpush2.bf16.msra.mxu1 %v10577_v45  ;;  %1877 = vmatpush1.bf16.msra.mxu0 %v10580_v46  ;;  %v10647_v45 = vld [vmem:[#allocation9 + $0x758] ss:$20 sps:$4 sm:$0xff]   ;;  %v10652_v46 = vld [vmem:[#allocation9 + $0x734] ss:$20 sps:$4 sm:$0xff]  }
 0x17b   :  { %1855 = vmatprep.subr.bf16.mxu1 %v10585_v33  ;;  %1878 = vmatprep.subr.bf16.mxu0 %v10588_v47  ;;  %v10642_v33 = vld [vmem:[#allocation9 + $0x5b0] ss:$20 sps:$4 sm:$0xff]   ;;  %v10655_v47 = vld [vmem:[#allocation9 + $0x70c] ss:$20 sps:$4 sm:$0xff]  }
 0x17e   :  { %1856 = vmatpush2.bf16.msra.mxu1 %v10583_v48  ;;  %1879 = vmatpush1.bf16.msra.mxu0 %v10586_v49  ;;  %v10643_v48 = vld [vmem:[#allocation9 + $0x588] ss:$20 sps:$4 sm:$0xff]  }
 0x17f   :  { %1857 = vmatprep.subr.bf16.mxu1 %v10591_v50  ;;  %1880 = vmatprep.subr.bf16.mxu0 %v10594_v51  ;;  %v10653_v49 = vld [vmem:[#allocation9 + $0x708] ss:$20 sps:$4 sm:$0xff]   ;;  %v10658_v50 = vld [vmem:[#allocation9 + $0x6e4] ss:$20 sps:$4 sm:$0xff]   ;;  %v10644_v51 = vld [vmem:[#allocation9 + $0x560] ss:$20 sps:$4 sm:$0xff]  }
 0x182   :  { %1858 = vmatpush2.bf16.msra.mxu1 %v10589_v53  ;;  %1881 = vmatpush1.bf16.msra.mxu0 %v10592_v54  ;;  %v10656_v53 = vld [vmem:[#allocation9 + $0x6e0] ss:$20 sps:$4 sm:$0xff]   ;;  %v10645_v54 = vld [vmem:[#allocation9 + $0x538] ss:$20 sps:$4 sm:$0xff]  }
 0x183   :  { %1859 = vmatprep.subr.bf16.mxu1 %v10597_v55  ;;  %1882 = vmatprep.subr.bf16.mxu0 %v10600_v56  ;;  %v10659_v55 = vld [vmem:[#allocation9 + $0x6b8] ss:$20 sps:$4 sm:$0xff]   ;;  %v10664_v56 = vld [vmem:[#allocation9 + $0x694] ss:$20 sps:$4 sm:$0xff]  }
 0x186   :  { %1860 = vmatpush2.bf16.msra.mxu1 %v10595_v58  ;;  %1883 = vmatpush1.bf16.msra.mxu0 %v10598_v60  ;;  %v10646_v58 = vld [vmem:[#allocation9 + $0x510] ss:$20 sps:$4 sm:$0xff]  }
 0x187   :  { %1884 = vmatprep.subr.bf16.mxu0 %v10603_v61  ;;  %9967 = vmatprep.subr.bf16.mxu1 %v10604_v62  ;;  %v10662_v60 = vld [vmem:[#allocation9 + $0x690] ss:$20 sps:$4 sm:$0xff]   ;;  %v10667_v61 = vld [vmem:[#allocation9 + $0x66c] ss:$20 sps:$4 sm:$0xff]  }
 0x188   :  { %v10697_v62 = vld [vmem:[#allocation9 + $0x9dc] ss:$20 sps:$4 sm:$0xff]  }
 0x189   :  { %1862 = vmatmul.mubr.bf16.vlgmr.msra.gmra.mxu1 %v12033_v10 }
 0x18a   :  { %1885 = vmatpush1.bf16.msra.mxu0 %v10601_v63  ;;  %9968 = vmatpush3.bf16.msra.mxu1 %v10605_v1  ;;  %v10665_v63 = vld [vmem:[#allocation9 + $0x668] ss:$20 sps:$4 sm:$0xff]   ;;  %v10695_v1 = vld [vmem:[#allocation9 + $0x9d8] ss:$20 sps:$4 sm:$0xff]  }
 0x18b   :  { %1947 = vmatprep.mubr.bf16.mxu1 %v12026_v57  ;;  %1886 = vmatprep.subr.bf16.mxu0 %v10608_v2  ;;  %v10620_v57 = vld [vmem:[#allocation9 + $0x498] ss:$20 sps:$4 sm:$0xff]  }
 0x18c   :  { %9969 = vmatprep.subr.bf16.mxu1 %v10609_v3  ;;  %v10670_v2 = vld [vmem:[#allocation9 + $0x644] ss:$20 sps:$4 sm:$0xff]   ;;  %v10700_v3 = vld [vmem:[#allocation9 + $0x9b4] ss:$20 sps:$4 sm:$0xff]  }
 0x18e   :  { %1887 = vmatpush1.bf16.msra.mxu0 %v10606_v4  ;;  %9970 = vmatpush3.bf16.msra.mxu1 %v10610_v5  ;;  %v10668_v4 = vld [vmem:[#allocation9 + $0x640] ss:$20 sps:$4 sm:$0xff]   ;;  %v10673_v5 = vld [vmem:[#allocation9 + $0x89c] ss:$20 sps:$4 sm:$0xff]  }
 0x18f   :  { %9971 = vmatprep.subr.bf16.mxu1 %v10611_v6  ;;  %9989 = vmatprep.subr.bf16.mxu0 %v10612_v7  ;;  %v10698_v6 = vld [vmem:[#allocation9 + $0x9b0] ss:$20 sps:$4 sm:$0xff]   ;;  %v10703_v7 = vld [vmem:[#allocation9 + $0x98c] ss:$20 sps:$4 sm:$0xff]  }
 0x191   :  { %1905 = vmatmul.mubr.bf16.vlgmr.msra.gmra.mxu0 %v12045_v52 }
 0x192   :  { %9972 = vmatpush3.bf16.msra.mxu1 %v10613_v8  ;;  %9990 = vmatpush3.bf16.msra.mxu0 %v10614_v9  ;;  %v10671_v8 = vld [vmem:[#allocation9 + $0x898] ss:$20 sps:$4 sm:$0xff]   ;;  %v10676_v9 = vld [vmem:[#allocation9 + $0x874] ss:$20 sps:$4 sm:$0xff]  }
 0x193   :  { %1988 = vmatprep.mubr.bf16.mxu0 %v12035_v13  ;;  %9973 = vmatprep.subr.bf16.mxu1 %v10615_v11  ;;  %v10629_v13 = vld [vmem:[#allocation9 + $0x38] ss:$20 sps:$4 sm:$0xff]   ;;  %v10701_v11 = vld [vmem:[#allocation9 + $0x988] ss:$20 sps:$4 sm:$0xff]  }
 0x194   :  { %9991 = vmatprep.subr.bf16.mxu0 %v10616_v12  ;;  %v10706_v12 = vld [vmem:[#allocation9 + $0x964] ss:$20 sps:$4 sm:$0xff]  }
 0x196   :  { %9974 = vmatpush3.bf16.msra.mxu1 %v10617_v14  ;;  %9992 = vmatpush3.bf16.msra.mxu0 %v10618_v15  ;;  %v10674_v14 = vld [vmem:[#allocation9 + $0x870] ss:$20 sps:$4 sm:$0xff]   ;;  %v10679_v15 = vld [vmem:[#allocation9 + $0x84c] ss:$20 sps:$4 sm:$0xff]  }
 0x197   :  { %9975 = vmatprep.subr.bf16.mxu1 %v10619_v16  ;;  %9993 = vmatprep.subr.bf16.mxu0 %v10620_v57  ;;  %v10704_v16 = vld [vmem:[#allocation9 + $0x960] ss:$20 sps:$4 sm:$0xff]   ;;  %v10677_v57 = vld [vmem:[#allocation9 + $0x848] ss:$20 sps:$4 sm:$0xff]  }
 0x19a   :  { %9976 = vmatpush3.bf16.msra.mxu1 %v10621_v17  ;;  %9994 = vmatpush3.bf16.msra.mxu0 %v10622_v18  ;;  %v10682_v17 = vld [vmem:[#allocation9 + $0x824] ss:$20 sps:$4 sm:$0xff]  }
 0x19b   :  { %9977 = vmatprep.subr.bf16.mxu1 %v10623_v19  ;;  %9995 = vmatprep.subr.bf16.mxu0 %v10624_v21  ;;  %v10707_v18 = vld [vmem:[#allocation9 + $0x938] ss:$20 sps:$4 sm:$0xff]   ;;  %v10712_v19 = vld [vmem:[#allocation9 + $0x914] ss:$20 sps:$4 sm:$0xff]  }
 0x19c   :  { %v10680_v21 = vld [vmem:[#allocation9 + $0x820] ss:$20 sps:$4 sm:$0xff]  }
 0x19e   :  { %9978 = vmatpush3.bf16.msra.mxu1 %v10625_v22  ;;  %9996 = vmatpush3.bf16.msra.mxu0 %v10626_v23  ;;  %v10685_v22 = vld [vmem:[#allocation9 + $0x7fc] ss:$20 sps:$4 sm:$0xff]  }
 0x19f   :  { %9979 = vmatprep.subr.bf16.mxu1 %v10627_v24  ;;  %9997 = vmatprep.subr.bf16.mxu0 %v10628_v25  ;;  %v10710_v23 = vld [vmem:[#allocation9 + $0x910] ss:$20 sps:$4 sm:$0xff]   ;;  %v10715_v24 = vld [vmem:[#allocation9 + $0x8ec] ss:$20 sps:$4 sm:$0xff]  }
 0x1a0   :  { %v10683_v25 = vld [vmem:[#allocation9 + $0x7f8] ss:$20 sps:$4 sm:$0xff]  }
 0x1a2   :  { %9980 = vmatpush3.bf16.msra.mxu1 %v10629_v13  ;;  %9998 = vmatpush3.bf16.msra.mxu0 %v10630_v26  ;;  %v10688_v13 = vld [vmem:[#allocation9 + $0x7d4] ss:$20 sps:$4 sm:$0xff]  }
 0x1a3   :  { %9981 = vmatprep.subr.bf16.mxu1 %v10631_v27  ;;  %9999 = vmatprep.subr.bf16.mxu0 %v10632_v28  ;;  %v10713_v26 = vld [vmem:[#allocation9 + $0x8e8] ss:$20 sps:$4 sm:$0xff]   ;;  %v10718_v27 = vld [vmem:[#allocation9 + $0x8c4] ss:$20 sps:$4 sm:$0xff]  }
 0x1a4   :  { %v10686_v28 = vld [vmem:[#allocation9 + $0x7d0] ss:$20 sps:$4 sm:$0xff]  }
 0x1a6   :  { %9982 = vmatpush3.bf16.msra.mxu1 %v10633_v29  ;;  %10000 = vmatpush3.bf16.msra.mxu0 %v10634_v34  ;;  %v10716_v29 = vld [vmem:[#allocation9 + $0x8c0] ss:$20 sps:$4 sm:$0xff]  }
 0x1a7   :  { %10001 = vmatprep.subr.bf16.mxu0 %v10635_v35  ;;  %10240 = vmatprep.subr.bf16.mxu1 %v11929_v31  ;;  %v10691_v34 = vld [vmem:[#allocation9 + $0x7ac] ss:$20 sps:$4 sm:$0xff]   ;;  %v10721_v35 = vld [vmem:[#allocation9 + $0xb1c] ss:$20 sps:$4 sm:$0xff]  }
 0x1a9   :  { %1948 = vmatmul.mubr.bf16.vlgmr.msra.gmra.mxu1 %v12028_v59  ;;  %v10650_v59 = vld [vmem:[#allocation9 + $0x730] ss:$20 sps:$4 sm:$0xff]  }
 0x1aa   :  { %10002 = vmatpush3.bf16.msra.mxu0 %v10636_v36  ;;  %10241 = vmatpush3.bf16.msra.mxu1 %v10637_v37  ;;  %v10689_v36 = vld [vmem:[#allocation9 + $0x7a8] ss:$20 sps:$4 sm:$0xff]   ;;  %v10719_v37 = vld [vmem:[#allocation9 + $0xb18] ss:$20 sps:$4 sm:$0xff]  }
 0x1ab   :  { %10003 = vmatprep.subr.bf16.mxu0 %v10638_v40  ;;  %10242 = vmatprep.subr.bf16.mxu1 %v11929_v31  ;;  %v10694_v40 = vld [vmem:[#allocation9 + $0x784] ss:$20 sps:$4 sm:$0xff]  }
 0x1ac   :  { %10256 = vmatprep.mubr.msk.bf16.mxu1 %vm11930_vm3, %v11929_v31 }
 0x1ae   :  { %10004 = vmatpush3.bf16.msra.mxu0 %v10639_v41  ;;  %10243 = vmatpush3.bf16.msra.mxu1 %v10640_v42  ;;  %v10724_v41 = vld [vmem:[#allocation9 + $0xaf4] ss:$20 sps:$4 sm:$0xff]  }
 0x1af   :  { %10244 = vmatprep.subr.bf16.mxu1 %v11929_v31  ;;  %3364 = vmatprep.subr.bf16.mxu0 %v10649_v43  ;;  %v10692_v42 = vld [vmem:[#allocation9 + $0x780] ss:$20 sps:$4 sm:$0xff]   ;;  %v10722_v43 = vld [vmem:[#allocation9 + $0xaf0] ss:$20 sps:$4 sm:$0xff]  }
 0x1b1   :  { %1989 = vmatmul.mubr.bf16.vlgmr.msra.gmra.mxu0 %v12033_v10  ;;  %v10661_v10 = vld [vmem:[#allocation9 + $0x6bc] ss:$20 sps:$4 sm:$0xff]  }
 0x1b2   :  { %10245 = vmatpush3.bf16.msra.mxu1 %v10641_v44  ;;  %3365 = vmatpush1.bf16.msra.mxu0 %v10647_v45  ;;  %v10727_v44 = vld [vmem:[#allocation9 + $0xacc] ss:$20 sps:$4 sm:$0xff]   ;;  %v10725_v45 = vld [vmem:[#allocation9 + $0xac8] ss:$20 sps:$4 sm:$0xff]  }
 0x1b3   :  { %10246 = vmatprep.subr.bf16.mxu1 %v11929_v31  ;;  %3366 = vmatprep.subr.bf16.mxu0 %v10652_v46  ;;  %v10730_v46 = vld [vmem:[#allocation9 + $0xaa4] ss:$20 sps:$4 sm:$0xff]  }
 0x1b6   :  { %10247 = vmatpush3.bf16.msra.mxu1 %v10642_v33  ;;  %3367 = vmatpush1.bf16.msra.mxu0 %v10650_v59  ;;  %v10728_v33 = vld [vmem:[#allocation9 + $0xaa0] ss:$20 sps:$4 sm:$0xff]   ;;  %v10763_v59 = vld [vmem:[#allocation9 + $0xc5c] ss:$20 sps:$4 sm:$0xff]  }
 0x1b7   :  { %10248 = vmatprep.subr.bf16.mxu1 %v11929_v31  ;;  %3368 = vmatprep.subr.bf16.mxu0 %v10655_v47  ;;  %v10733_v47 = vld [vmem:[#allocation9 + $0xa7c] ss:$20 sps:$4 sm:$0xff]  }
 0x1ba   :  { %10249 = vmatpush3.bf16.msra.mxu1 %v10643_v48  ;;  %3369 = vmatpush1.bf16.msra.mxu0 %v10653_v49  ;;  %v10731_v48 = vld [vmem:[#allocation9 + $0xa78] ss:$20 sps:$4 sm:$0xff]   ;;  %v10736_v49 = vld [vmem:[#allocation9 + $0xa54] ss:$20 sps:$4 sm:$0xff]  }
 0x1bb   :  { %10250 = vmatprep.subr.bf16.mxu1 %v11929_v31  ;;  %3370 = vmatprep.subr.bf16.mxu0 %v10658_v50  ;;  %v10734_v50 = vld [vmem:[#allocation9 + $0xa50] ss:$20 sps:$4 sm:$0xff]  }
 0x1be   :  { %10251 = vmatpush3.bf16.msra.mxu1 %v10644_v51  ;;  %3371 = vmatpush1.bf16.msra.mxu0 %v10656_v53  ;;  %v10739_v51 = vld [vmem:[#allocation9 + $0xa2c] ss:$20 sps:$4 sm:$0xff]  }
 0x1bf   :  { %10252 = vmatprep.subr.bf16.mxu1 %v11929_v31  ;;  %3372 = vmatprep.subr.bf16.mxu0 %v10661_v10  ;;  %v10737_v10 = vld [vmem:[#allocation9 + $0xa28] ss:$20 sps:$4 sm:$0xff]  }
 0x1c2   :  { %10253 = vmatpush3.bf16.msra.mxu1 %v10645_v54  ;;  %3373 = vmatpush1.bf16.msra.mxu0 %v10659_v55  ;;  %v10742_v54 = vld [vmem:[#allocation9 + $0xa04] ss:$20 sps:$4 sm:$0xff]  }
 0x1c3   :  { %10254 = vmatprep.subr.bf16.mxu1 %v11929_v31  ;;  %3374 = vmatprep.subr.bf16.mxu0 %v10664_v56  ;;  %v588_v55 = vld [vmem:[#allocation11] ss:$8 sm:$0xf] }
 0x1c6   :  { %10255 = vmatpush3.bf16.msra.mxu1 %v10646_v58  ;;  %3375 = vmatpush1.bf16.msra.mxu0 %v10662_v60  ;;  %v589_v60 = vld [vmem:[#allocation11] ss:$8 sm:$0x10] }
 0x1c7   :  { %3376 = vmatprep.subr.bf16.mxu0 %v10667_v61  ;;  %3407 = vmatprep.subr.bf16.mxu1 %v10697_v62  ;;  %v10740_v61 = vld [vmem:[#allocation9 + $0xa00] ss:$20 sps:$4 sm:$0xff]   ;;  %v10745_v62 = vld [vmem:[#allocation9 + $0x764] ss:$20 sps:$4 sm:$0xff]  }
 0x1c9   :  { %10257 = vmatmul.mubr.bf16.vlgmr.msra.gmra.mxu1 %v12045_v52  ;;  %v10709_v52 = vld [vmem:[#allocation9 + $0x93c] ss:$20 sps:$4 sm:$0xff]  }
 0x1ca   :  { %3377 = vmatpush1.bf16.msra.mxu0 %v10665_v63  ;;  %3408 = vmatpush1.bf16.msra.mxu1 %v10695_v1  ;;  %v12068_v63 = vor.u32 %v589_v60, %v588_v55 }
 0x1cb   :  { %3378 = vmatprep.subr.bf16.mxu0 %v10670_v2  ;;  %3409 = vmatprep.subr.bf16.mxu1 %v10700_v3 }
 0x1cc   :  { %v599_v3 = vrot.slane %v12068_v63, %v12005_v30  ;;  %v607_v55 = vrot.slane %v12068_v63, %v12020_v39 }
 0x1ce   :  { %3379 = vmatpush1.bf16.msra.mxu0 %v10668_v4  ;;  %3410 = vmatpush1.bf16.msra.mxu1 %v10698_v6  ;;  %v595_v4 = vrot.slane %v12068_v63, %v12008_v32 }
 0x1cf   :  { %3380 = vmatprep.subr.bf16.mxu0 %v10673_v5  ;;  %3411 = vmatprep.subr.bf16.mxu1 %v10703_v7 }
 0x1d2   :  { %3381 = vmatpush2.bf16.msra.mxu0 %v10671_v8  ;;  %3412 = vmatpush1.bf16.msra.mxu1 %v10701_v11 }
 0x1d3   :  { %3382 = vmatprep.subr.bf16.mxu0 %v10676_v9  ;;  %3413 = vmatprep.subr.bf16.mxu1 %v10706_v12 }
 0x1d6   :  { %3383 = vmatpush2.bf16.msra.mxu0 %v10674_v14  ;;  %3414 = vmatpush1.bf16.msra.mxu1 %v10704_v16 }
 0x1d7   :  { %3384 = vmatprep.subr.bf16.mxu0 %v10679_v15  ;;  %3415 = vmatprep.subr.bf16.mxu1 %v10709_v52 }
 0x1da   :  { %3385 = vmatpush2.bf16.msra.mxu0 %v10677_v57  ;;  %3416 = vmatpush1.bf16.msra.mxu1 %v10707_v18 }
 0x1db   :  { %3386 = vmatprep.subr.bf16.mxu0 %v10682_v17  ;;  %3417 = vmatprep.subr.bf16.mxu1 %v10712_v19 }
 0x1de   :  { %3387 = vmatpush2.bf16.msra.mxu0 %v10680_v21  ;;  %3418 = vmatpush1.bf16.msra.mxu1 %v10710_v23 }
 0x1df   :  { %3388 = vmatprep.subr.bf16.mxu0 %v10685_v22  ;;  %3419 = vmatprep.subr.bf16.mxu1 %v10715_v24 }
 0x1e2   :  { %3389 = vmatpush2.bf16.msra.mxu0 %v10683_v25  ;;  %3420 = vmatpush1.bf16.msra.mxu1 %v10713_v26 }
 0x1e3   :  { %3390 = vmatprep.subr.bf16.mxu0 %v10688_v13  ;;  %3421 = vmatprep.subr.bf16.mxu1 %v10718_v27 }
 0x1e6   :  { %3391 = vmatpush2.bf16.msra.mxu0 %v10686_v28  ;;  %3422 = vmatpush1.bf16.msra.mxu1 %v10716_v29  ;;  %v10761_v28 = vld [vmem:[#allocation9 + $0xc58] ss:$20 sps:$4 sm:$0xff]  }
 0x1e7   :  { %3392 = vmatprep.subr.bf16.mxu0 %v10691_v34  ;;  %3423 = vmatprep.subr.bf16.mxu1 %v10721_v35  ;;  %v10769_v35 = vld [vmem:[#allocation9 + $0xc34] ss:$20 sps:$4 sm:$0xff]  }
 0x1e9   :  { %v1691_v53 = vpop.f32.mrf.mxu1 }
 0x1ea   :  { %3393 = vmatpush2.bf16.msra.mxu0 %v10689_v36  ;;  %3424 = vmatpush2.bf16.msra.mxu1 %v10719_v37  ;;  %v1692_v11 = vadd.f32 %v1691_v53, %v595_v4  ;;  %v10767_v36 = vld [vmem:[#allocation9 + $0xc30] ss:$20 sps:$4 sm:$0xff]   ;;  %v10775_v37 = vld [vmem:[#allocation9 + $0xc0c] ss:$20 sps:$4 sm:$0xff]  }
 0x1eb   :  { %3394 = vmatprep.subr.bf16.mxu0 %v10694_v40  ;;  %3425 = vmatprep.subr.bf16.mxu1 %v10724_v41  ;;  %v1693_v56 = vpop.f32.mrf.mxu1  ;;  %v10773_v40 = vld [vmem:[#allocation9 + $0xc08] ss:$20 sps:$4 sm:$0xff]   ;;  %v10781_v41 = vld [vmem:[#allocation9 + $0xbe4] ss:$20 sps:$4 sm:$0xff]  }
 0x1ec   :  { %v1694_v8 = vadd.f32 %v1693_v56, %v599_v3  ;;  %v603_v56 = vrot.slane %v12068_v63, %v12017_v38 }
 0x1ed   :  { %v1695_v1 = vpop.f32.mrf.mxu1 }
 0x1ee   :  { %3395 = vmatpush2.bf16.msra.mxu0 %v10692_v42  ;;  %3426 = vmatpush2.bf16.msra.mxu1 %v10722_v43  ;;  %v1696_v9 = vadd.f32 %v1695_v1, %v595_v4  ;;  %v10779_v42 = vld [vmem:[#allocation9 + $0xbe0] ss:$20 sps:$4 sm:$0xff]   ;;  %v10787_v43 = vld [vmem:[#allocation9 + $0xbbc] ss:$20 sps:$4 sm:$0xff]  }
 0x1ef   :  { %3427 = vmatprep.subr.bf16.mxu1 %v10727_v44  ;;  %3450 = vmatprep.subr.bf16.mxu0 %v10763_v59  ;;  %v1697_v5 = vpop.f32.mrf.mxu1  ;;  %v10785_v44 = vld [vmem:[#allocation9 + $0xbb8] ss:$20 sps:$4 sm:$0xff]   ;;  %v10797_v59 = vld [vmem:[#allocation9 + $0xb68] ss:$20 sps:$4 sm:$0xff]  }
 0x1f0   :  { %v1698_v15 = vadd.f32 %v1697_v5, %v599_v3 }
 0x1f1   :  { %v1734_v58 = vpop.f32.mrf.mxu0 }
 0x1f2   :  { %3428 = vmatpush2.bf16.msra.mxu1 %v10725_v45  ;;  %v1735_v57 = vadd.f32 %v1734_v58, %v1692_v11  ;;  %v10793_v45 = vld [vmem:[#allocation9 + $0xb94] ss:$20 sps:$4 sm:$0xff]  }
 0x1f3   :  { %3429 = vmatprep.subr.bf16.mxu1 %v10730_v46  ;;  %v1736_v2 = vpop.f32.mrf.mxu0  ;;  %v10791_v46 = vld [vmem:[#allocation9 + $0xb90] ss:$20 sps:$4 sm:$0xff]  }
 0x1f4   :  { %v1737_v16 = vadd.f32 %v1736_v2, %v1694_v8 }
 0x1f5   :  { %v1738_v6 = vpop.f32.mrf.mxu0 }
 0x1f6   :  { %3430 = vmatpush2.bf16.msra.mxu1 %v10728_v33  ;;  %v1739_v52 = vadd.f32 %v1738_v6, %v1696_v9  ;;  %v10799_v33 = vld [vmem:[#allocation9 + $0xb6c] ss:$20 sps:$4 sm:$0xff]  }
 0x1f7   :  { %3431 = vmatprep.subr.bf16.mxu1 %v10733_v47  ;;  %v1740_v12 = vpop.f32.mrf.mxu0  ;;  %v10805_v47 = vld [vmem:[#allocation9 + $0xb44] ss:$20 sps:$4 sm:$0xff]  }
 0x1f8   :  { %v1741_v18 = vadd.f32 %v1740_v12, %v1698_v15 }
 0x1fa   :  { %3432 = vmatpush2.bf16.msra.mxu1 %v10731_v48  ;;  %v10803_v48 = vld [vmem:[#allocation9 + $0xb40] ss:$20 sps:$4 sm:$0xff]  }
 0x1fb   :  { %3433 = vmatprep.subr.bf16.mxu1 %v10736_v49  ;;  %v10811_v49 = vld [vmem:[#allocation9 + $0x9e4] ss:$20 sps:$4 sm:$0xff]  }
 0x1fe   :  { %3434 = vmatpush2.bf16.msra.mxu1 %v10734_v50 }
 0x1ff   :  { %3435 = vmatprep.subr.bf16.mxu1 %v10739_v51 }
 0x202   :  { %3436 = vmatpush2.bf16.msra.mxu1 %v10737_v10 }
 0x203   :  { %3437 = vmatprep.subr.bf16.mxu1 %v10742_v54 }
 0x206   :  { %3438 = vmatpush2.bf16.msra.mxu1 %v10740_v61 }
 0x207   :  { %3493 = vmatprep.subr.bf16.mxu1 %v10745_v62 }
 0x209   :  { %v1777_v7 = vpop.f32.mrf.mxu1 }
 0x20a   :  { %v1778_v22 = vadd.f32 %v1777_v7, %v1735_v57 }
 0x20b   :  { %v1779_v14 = vpop.f32.mrf.mxu1 }
 0x20c   :  { %v1780_v19 = vadd.f32 %v1779_v14, %v1737_v16  ;;  %v2038_v27 = vmax.f32 %v1778_v22, 0.0  ;;  %v10748_v22 = vld [vmem:[#allocation9 + $0x73c] ss:$20 sps:$4 sm:$0xff]  }
 0x20d   :  { %v1781_v17 = vpop.f32.mrf.mxu1 }
 0x20e   :  { %v1782_v21 = vadd.f32 %v1781_v17, %v1739_v52  ;;  %v2039_v13 = vmax.f32 %v1780_v19, 0.0  ;;  %v10743_v19 = vld [vmem:[#allocation9 + $0x760] ss:$20 sps:$4 sm:$0xff]  }
 0x20f   :  { %v1783_v23 = vpop.f32.mrf.mxu1 }
 0x210   :  { %v1784_v24 = vadd.f32 %v1783_v23, %v1741_v18  ;;  %v2043_v25 = vmax.f32 %v1782_v21, 0.0 }
 0x212   :  { %v2044_v26 = vmax.f32 %v1784_v24, 0.0  ;;  %v12076_v34 = vpack.c.bf16 %v2043_v25, %v2038_v27  ;;  %v10746_v25 = vld [vmem:[#allocation9 + $0x738] ss:$20 sps:$4 sm:$0xff]  }
 0x213   :  { %v10754_v27 = vld [vmem:[#allocation9 + $0x6ec] ss:$20 sps:$4 sm:$0xff]  }
 0x214   :  { %v12074_v29 = vpack.c.bf16 %v2044_v26, %v2039_v13  ;;  %v10751_v13 = vld [vmem:[#allocation9 + $0x714] ss:$20 sps:$4 sm:$0xff]   ;;  %v10749_v26 = vld [vmem:[#allocation9 + $0x710] ss:$20 sps:$4 sm:$0xff]  }
 0x216   :  { %3396 = vmatprep.mubr.bf16.mxu0 %v12074_v29 }
 0x217   :  { %3397 = vmatmul.mubr.bf16.vlgmr.msra.gmra.mxu0 %v12076_v34 }
 0x218   :  { %3451 = vmatpush1.bf16.msra.mxu0 %v10761_v28  ;;  %3482 = vmatprep.mubr.bf16.mxu0 %v11927_v0  ;;  %v10752_v28 = vld [vmem:[#allocation9 + $0x6e8] ss:$20 sps:$4 sm:$0xff]  }
 0x219   :  { %3452 = vmatprep.subr.bf16.mxu0 %v10769_v35  ;;  %v10757_v35 = vld [vmem:[#allocation9 + $0x6c4] ss:$20 sps:$4 sm:$0xff]  }
 0x21c   :  { %3453 = vmatpush1.bf16.msra.mxu0 %v10767_v36  ;;  %v10755_v36 = vld [vmem:[#allocation9 + $0x6c0] ss:$20 sps:$4 sm:$0xff]  }
 0x21d   :  { %3454 = vmatprep.subr.bf16.mxu0 %v10775_v37  ;;  %v10760_v37 = vld [vmem:[#allocation9 + $0x69c] ss:$20 sps:$4 sm:$0xff]  }
 0x220   :  { %3455 = vmatpush1.bf16.msra.mxu0 %v10773_v40  ;;  %v10758_v40 = vld [vmem:[#allocation9 + $0x698] ss:$20 sps:$4 sm:$0xff]  }
 0x221   :  { %3456 = vmatprep.subr.bf16.mxu0 %v10781_v41  ;;  %v10766_v41 = vld [vmem:[#allocation9 + $0x674] ss:$20 sps:$4 sm:$0xff]  }
 0x224   :  { %3457 = vmatpush1.bf16.msra.mxu0 %v10779_v42  ;;  %v10764_v42 = vld [vmem:[#allocation9 + $0x670] ss:$20 sps:$4 sm:$0xff]  }
 0x225   :  { %3458 = vmatprep.subr.bf16.mxu0 %v10787_v43  ;;  %v10772_v43 = vld [vmem:[#allocation9 + $0x64c] ss:$20 sps:$4 sm:$0xff]  }
 0x228   :  { %3459 = vmatpush1.bf16.msra.mxu0 %v10785_v44 }
 0x229   :  { %3460 = vmatprep.subr.bf16.mxu0 %v10793_v45  ;;  %v10770_v45 = vld [vmem:[#allocation9 + $0x648] ss:$20 sps:$4 sm:$0xff]  }
 0x22c   :  { %3461 = vmatpush1.bf16.msra.mxu0 %v10791_v46 }
 0x22d   :  { %3462 = vmatprep.subr.bf16.mxu0 %v10799_v33  ;;  %v10778_v33 = vld [vmem:[#allocation9 + $0x8a4] ss:$20 sps:$4 sm:$0xff]  }
 0x230   :  { %3463 = vmatpush1.bf16.msra.mxu0 %v10797_v59 }
 0x231   :  { %3464 = vmatprep.subr.bf16.mxu0 %v10805_v47  ;;  %v1820_v50 = vpop.f32.mrf.mxu0  ;;  %v10776_v47 = vld [vmem:[#allocation9 + $0x8a0] ss:$20 sps:$4 sm:$0xff]  }
 0x232   :  { %v1821_v2 = vadd.f32 %v1820_v50, %v603_v56 }
 0x233   :  { %v1822_v51 = vpop.f32.mrf.mxu0 }
 0x234   :  { %3465 = vmatpush1.bf16.msra.mxu0 %v10803_v48  ;;  %v1823_v62 = vadd.f32 %v1822_v51, %v607_v55  ;;  %v10782_v51 = vld [vmem:[#allocation9 + $0x878] ss:$20 sps:$4 sm:$0xff]  }
 0x235   :  { %3536 = vmatprep.subr.bf16.mxu0 %v10811_v49  ;;  %v1824_v10 = vpop.f32.mrf.mxu0  ;;  %v10784_v49 = vld [vmem:[#allocation9 + $0x87c] ss:$20 sps:$4 sm:$0xff]  }
 0x236   :  { %v1825_v1 = vadd.f32 %v1824_v10, %v603_v56  ;;  %v10790_v10 = vld [vmem:[#allocation9 + $0x854] ss:$20 sps:$4 sm:$0xff]  }
 0x237   :  { %v1826_v58 = vpop.f32.mrf.mxu0 }
 0x238   :  { %v1827_v5 = vadd.f32 %v1826_v58, %v607_v55  ;;  %v611_v55 = vrot.slane %v12068_v63, %v12040_v20  ;;  %v10788_v58 = vld [vmem:[#allocation9 + $0x850] ss:$20 sps:$4 sm:$0xff]  }
 0x249   :  { %v1863_v53 = vpop.f32.mrf.mxu1 }
 0x24a   :  { %v1864_v8 = vadd.f32 %v1863_v53, %v1821_v2 }
 0x24b   :  { %v1865_v54 = vpop.f32.mrf.mxu1 }
 0x24c   :  { %v1866_v6 = vadd.f32 %v1865_v54, %v1823_v62 }
 0x24d   :  { %v1867_v60 = vpop.f32.mrf.mxu1 }
 0x24e   :  { %v1868_v7 = vadd.f32 %v1867_v60, %v1825_v1 }
 0x24f   :  { %v1869_v3 = vpop.f32.mrf.mxu1 }
 0x250   :  { %v1870_v11 = vadd.f32 %v1869_v3, %v1827_v5 }
 0x251   :  { %v1906_v61 = vpop.f32.mrf.mxu0 }
 0x252   :  { %v1907_v15 = vadd.f32 %v1906_v61, %v1864_v8  ;;  %v10796_v61 = vld [vmem:[#allocation9 + $0x82c] ss:$20 sps:$4 sm:$0xff]  }
 0x253   :  { %v1908_v4 = vpop.f32.mrf.mxu0 }
 0x254   :  { %v1909_v12 = vadd.f32 %v1908_v4, %v1866_v6  ;;  %v2040_v21 = vmax.f32 %v1907_v15, 0.0  ;;  %v10794_v4 = vld [vmem:[#allocation9 + $0x828] ss:$20 sps:$4 sm:$0xff]   ;;  %v10802_v6 = vld [vmem:[#allocation9 + $0x804] ss:$20 sps:$4 sm:$0xff]  }
 0x255   :  { %v1910_v9 = vpop.f32.mrf.mxu0  ;;  %v10808_v15 = vld [vmem:[#allocation9 + $0x7dc] ss:$20 sps:$4 sm:$0xff]  }
 0x256   :  { %v1911_v14 = vadd.f32 %v1910_v9, %v1868_v7  ;;  %v2041_v17 = vmax.f32 %v1909_v12, 0.0  ;;  %v10800_v12 = vld [vmem:[#allocation9 + $0x800] ss:$20 sps:$4 sm:$0xff]  }
 0x257   :  { %v1912_v16 = vpop.f32.mrf.mxu0 }
 0x258   :  { %v1913_v52 = vadd.f32 %v1912_v16, %v1870_v11  ;;  %v2045_v57 = vmax.f32 %v1911_v14, 0.0 }
 0x25a   :  { %v2046_v18 = vmax.f32 %v1913_v52, 0.0  ;;  %v12087_v24 = vpack.c.bf16 %v2045_v57, %v2040_v21 }
 0x25c   :  { %v12085_v23 = vpack.c.bf16 %v2046_v18, %v2041_v17  ;;  %v10806_v18 = vld [vmem:[#allocation9 + $0x7d8] ss:$20 sps:$4 sm:$0xff]  }
 0x25e   :  { %3439 = vmatprep.mubr.bf16.mxu1 %v12085_v23 }
 0x25f   :  { %3440 = vmatmul.mubr.bf16.vlgmr.msra.gmra.mxu1 %v12087_v24 }
 0x260   :  { %3494 = vmatpush1.bf16.msra.mxu1 %v10743_v19  ;;  %3525 = vmatprep.mubr.bf16.mxu1 %v12074_v29  ;;  %v10809_v19 = vld [vmem:[#allocation9 + $0x9e0] ss:$20 sps:$4 sm:$0xff]  }
 0x261   :  { %3495 = vmatprep.subr.bf16.mxu1 %v10748_v22  ;;  %v10814_v22 = vld [vmem:[#allocation9 + $0x7b4] ss:$20 sps:$4 sm:$0xff]  }
 0x264   :  { %3496 = vmatpush1.bf16.msra.mxu1 %v10746_v25  ;;  %v10817_v25 = vld [vmem:[#allocation9 + $0x9bc] ss:$20 sps:$4 sm:$0xff]  }
 0x265   :  { %3497 = vmatprep.subr.bf16.mxu1 %v10751_v13  ;;  %v10812_v13 = vld [vmem:[#allocation9 + $0x7b0] ss:$20 sps:$4 sm:$0xff]  }
 0x268   :  { %3498 = vmatpush1.bf16.msra.mxu1 %v10749_v26  ;;  %v10815_v26 = vld [vmem:[#allocation9 + $0x9b8] ss:$20 sps:$4 sm:$0xff]  }
 0x269   :  { %3499 = vmatprep.subr.bf16.mxu1 %v10754_v27  ;;  %v9983_v44 = vpop.f32.mrf.mxu1  ;;  %v10820_v27 = vld [vmem:[#allocation9 + $0x78c] ss:$20 sps:$4 sm:$0xff]  }
 0x26b   :  { %v9984_v59 = vpop.f32.mrf.mxu1 }
 0x26c   :  { %3500 = vmatpush1.bf16.msra.mxu1 %v10752_v28  ;;  %v9985_v56 = vadd.f32 %v9984_v59, %v9983_v44  ;;  %v10823_v28 = vld [vmem:[#allocation9 + $0x994] ss:$20 sps:$4 sm:$0xff]   ;;  %v10835_v44 = vld [vmem:[#allocation9 + $0x944] ss:$20 sps:$4 sm:$0xff]   ;;  %v10841_v59 = vld [vmem:[#allocation9 + $0x91c] ss:$20 sps:$4 sm:$0xff]  }
 0x26d   :  { %3501 = vmatprep.subr.bf16.mxu1 %v10757_v35  ;;  %v9986_v50 = vpop.f32.mrf.mxu1  ;;  %v10818_v35 = vld [vmem:[#allocation9 + $0x788] ss:$20 sps:$4 sm:$0xff]  }
 0x26e   :  { %v1950_v2 = vadd.f32 %v9985_v56, %v611_v55  ;;  %v10851_v56 = vld [vmem:[#allocation9 + $0x8c8] ss:$20 sps:$4 sm:$0xff]  }
 0x26f   :  { %v9987_v54 = vpop.f32.mrf.mxu1 }
 0x270   :  { %3502 = vmatpush1.bf16.msra.mxu1 %v10755_v36  ;;  %v9988_v62 = vadd.f32 %v9987_v54, %v9986_v50  ;;  %v10821_v36 = vld [vmem:[#allocation9 + $0x990] ss:$20 sps:$4 sm:$0xff]   ;;  %v10847_v50 = vld [vmem:[#allocation9 + $0x8f4] ss:$20 sps:$4 sm:$0xff]   ;;  %v10853_v54 = vld [vmem:[#allocation9 + $0x8cc] ss:$20 sps:$4 sm:$0xff]  }
 0x271   :  { %3503 = vmatprep.subr.bf16.mxu1 %v10760_v37  ;;  %v10005_v46 = vpop.f32.mrf.mxu0  ;;  %v10826_v37 = vld [vmem:[#allocation9 + $0xc64] ss:$20 sps:$4 sm:$0xff]  }
 0x272   :  { %v1953_v7 = vadd.f32 %v9988_v62, %v611_v55  ;;  %v10848_v55 = vld [vmem:[#allocation9 + $0xbc0] ss:$20 sps:$4 sm:$0xff]  }
 0x273   :  { %v10006_v48 = vpop.f32.mrf.mxu0  ;;  %v10857_v62 = vld [vmem:[#allocation9 + $0xb20] ss:$20 sps:$4 sm:$0xff]  }
 0x274   :  { %3504 = vmatpush1.bf16.msra.mxu1 %v10758_v40  ;;  %v10007_v1 = vadd.f32 %v10006_v48, %v10005_v46  ;;  %v10829_v40 = vld [vmem:[#allocation9 + $0x96c] ss:$20 sps:$4 sm:$0xff]  }
 0x275   :  { %3505 = vmatprep.subr.bf16.mxu1 %v10766_v41  ;;  %v10008_v53 = vpop.f32.mrf.mxu0  ;;  %v10824_v41 = vld [vmem:[#allocation9 + $0xc60] ss:$20 sps:$4 sm:$0xff]   ;;  %v10839_v48 = vld [vmem:[#allocation9 + $0x918] ss:$20 sps:$4 sm:$0xff]  }
 0x276   :  { %v1991_v8 = vadd.f32 %v10007_v1, %v1950_v2  ;;  %v10833_v46 = vld [vmem:[#allocation9 + $0x940] ss:$20 sps:$4 sm:$0xff]   ;;  %v10865_v2 = vld [vmem:[#allocation9 + $0xafc] ss:$20 sps:$4 sm:$0xff]  }
 0x277   :  { %v10009_v60 = vpop.f32.mrf.mxu0  ;;  %v10862_v1 = vld [vmem:[#allocation9 + $0xb74] ss:$20 sps:$4 sm:$0xff]  }
 0x278   :  { %3506 = vmatpush1.bf16.msra.mxu1 %v10764_v42  ;;  %v10010_v3 = vadd.f32 %v10009_v60, %v10008_v53  ;;  %v10827_v42 = vld [vmem:[#allocation9 + $0x968] ss:$20 sps:$4 sm:$0xff]   ;;  %v10845_v53 = vld [vmem:[#allocation9 + $0x8f0] ss:$20 sps:$4 sm:$0xff]  }
 0x279   :  { %3507 = vmatprep.subr.bf16.mxu1 %v10772_v43  ;;  %v10832_v43 = vld [vmem:[#allocation9 + $0xc3c] ss:$20 sps:$4 sm:$0xff]   ;;  %v10859_v60 = vld [vmem:[#allocation9 + $0xb24] ss:$20 sps:$4 sm:$0xff]  }
 0x27a   :  { %v1994_v63 = vadd.f32 %v10010_v3, %v1953_v7  ;;  %v10860_v3 = vld [vmem:[#allocation9 + $0xb70] ss:$20 sps:$4 sm:$0xff]   ;;  %v10866_v7 = vld [vmem:[#allocation9 + $0xb48] ss:$20 sps:$4 sm:$0xff]  }
 0x27c   :  { %3508 = vmatpush1.bf16.msra.mxu1 %v10770_v45  ;;  %v10830_v45 = vld [vmem:[#allocation9 + $0xc38] ss:$20 sps:$4 sm:$0xff]  }
 0x27d   :  { %3509 = vmatprep.subr.bf16.mxu1 %v10778_v33  ;;  %v10838_v33 = vld [vmem:[#allocation9 + $0xc14] ss:$20 sps:$4 sm:$0xff]  }
 0x280   :  { %3510 = vmatpush2.bf16.msra.mxu1 %v10776_v47  ;;  %v10836_v47 = vld [vmem:[#allocation9 + $0xc10] ss:$20 sps:$4 sm:$0xff]  }
 0x281   :  { %3511 = vmatprep.subr.bf16.mxu1 %v10784_v49  ;;  %v10844_v49 = vld [vmem:[#allocation9 + $0xbec] ss:$20 sps:$4 sm:$0xff]  }
 0x284   :  { %3512 = vmatpush2.bf16.msra.mxu1 %v10782_v51  ;;  %v10842_v51 = vld [vmem:[#allocation9 + $0xbe8] ss:$20 sps:$4 sm:$0xff]  }
 0x285   :  { %3513 = vmatprep.subr.bf16.mxu1 %v10790_v10  ;;  %v10850_v10 = vld [vmem:[#allocation9 + $0xbc4] ss:$20 sps:$4 sm:$0xff]  }
 0x288   :  { %3514 = vmatpush2.bf16.msra.mxu1 %v10788_v58  ;;  %v10856_v58 = vld [vmem:[#allocation9 + $0xb9c] ss:$20 sps:$4 sm:$0xff]  }
 0x289   :  { %v2031_v5 = vpop.f32.mrf.mxu1  ;;  %3515 = vmatprep.subr.bf16.mxu1 %v10796_v61  ;;  %v10854_v61 = vld [vmem:[#allocation9 + $0xb98] ss:$20 sps:$4 sm:$0xff]  }
 0x28a   :  { %v2032_v11 = vadd.f32 %v2031_v5, %v1991_v8  ;;  %v10868_v5 = vld [vmem:[#allocation9 + $0xb4c] ss:$20 sps:$4 sm:$0xff]   ;;  %v10869_v8 = vld [vmem:[#allocation9 + $0xad0] ss:$20 sps:$4 sm:$0xff]  }
 0x28b   :  { %v10258_v9 = vpop.f32.mrf.mxu1 }
 0x28c   :  { %3516 = vmatpush2.bf16.msra.mxu1 %v10794_v4  ;;  %v2042_v57 = vmax.f32 %v2032_v11, 0.0  ;;  %v10863_v4 = vld [vmem:[#allocation9 + $0xaf8] ss:$20 sps:$4 sm:$0xff]   ;;  %v10872_v9 = vld [vmem:[#allocation9 + $0xb28] ss:$20 sps:$4 sm:$0xff]  }
 0x28d   :  { %v2034_v14 = vpop.f32.mrf.mxu1  ;;  %3517 = vmatprep.subr.bf16.mxu1 %v10802_v6  ;;  %v10871_v6 = vld [vmem:[#allocation9 + $0xad4] ss:$20 sps:$4 sm:$0xff]   ;;  %v10875_v11 = vld [vmem:[#allocation9 + $0xaac] ss:$20 sps:$4 sm:$0xff]  }
 0x28e   :  { %v2035_v16 = vadd.f32 %v2034_v14, %v1994_v63  ;;  %v10876_v63 = vld [vmem:[#allocation9 + $0x9e8] ss:$20 sps:$4 sm:$0xff]   ;;  %v10877_v14 = vld [vmem:[#allocation9 + $0xb00] ss:$20 sps:$4 sm:$0xff]  }
 0x28f   :  { %v10259_v52 = vpop.f32.mrf.mxu1 }
 0x290   :  { %v2047_v17 = vmax.f32 %v2035_v16, 0.0  ;;  %3518 = vmatpush2.bf16.msra.mxu1 %v10800_v12  ;;  %v10873_v12 = vld [vmem:[#allocation9 + $0xaa8] ss:$20 sps:$4 sm:$0xff]   ;;  %v10881_v16 = vld [vmem:[#allocation9 + $0x9c0] ss:$20 sps:$4 sm:$0xff]  }
 0x291   :  { %3519 = vmatprep.subr.bf16.mxu1 %v10808_v15  ;;  %v10880_v15 = vld [vmem:[#allocation9 + $0xa84] ss:$20 sps:$4 sm:$0xff]   ;;  %v10878_v52 = vld [vmem:[#allocation9 + $0xa80] ss:$20 sps:$4 sm:$0xff]  }
 0x292   :  { %v12094_v21 = vpack.c.bf16 %v2047_v17, %v2042_v57  ;;  %v10882_v57 = vld [vmem:[#allocation9 + $0xad8] ss:$20 sps:$4 sm:$0xff]   ;;  %v10885_v17 = vld [vmem:[#allocation9 + $0xa5c] ss:$20 sps:$4 sm:$0xff]  }
 0x294   :  { %3520 = vmatpush2.bf16.msra.mxu1 %v10806_v18  ;;  %3483 = vmatmul.mubr.bf16.vlgmr.msra.gmra.mxu0 %v12094_v21  ;;  %v10886_v18 = vld [vmem:[#allocation9 + $0x998] ss:$20 sps:$4 sm:$0xff]  }
 0x295   :  { %3537 = vmatpush1.bf16.msra.mxu0 %v10809_v19  ;;  %3568 = vmatprep.mubr.bf16.mxu0 %v12085_v23  ;;  %v10883_v19 = vld [vmem:[#allocation9 + $0xa58] ss:$20 sps:$4 sm:$0xff]  }
 0x296   :  { %3521 = vmatprep.subr.bf16.mxu1 %v10814_v22  ;;  %3538 = vmatprep.subr.bf16.mxu0 %v10817_v25  ;;  %v10887_v22 = vld [vmem:[#allocation9 + $0xab0] ss:$20 sps:$4 sm:$0xff]   ;;  %v10890_v25 = vld [vmem:[#allocation9 + $0xa34] ss:$20 sps:$4 sm:$0xff]  }
 0x298   :  { %3522 = vmatpush2.bf16.msra.mxu1 %v10812_v13  ;;  %v10891_v13 = vld [vmem:[#allocation9 + $0x970] ss:$20 sps:$4 sm:$0xff]  }
 0x299   :  { %3539 = vmatpush1.bf16.msra.mxu0 %v10815_v26  ;;  %3523 = vmatprep.subr.bf16.mxu1 %v10820_v27  ;;  %v10892_v26 = vld [vmem:[#allocation9 + $0xa88] ss:$20 sps:$4 sm:$0xff]   ;;  %v10895_v27 = vld [vmem:[#allocation9 + $0xa0c] ss:$20 sps:$4 sm:$0xff]  }
 0x29a   :  { %3540 = vmatprep.subr.bf16.mxu0 %v10823_v28  ;;  %v10896_v28 = vld [vmem:[#allocation9 + $0x948] ss:$20 sps:$4 sm:$0xff]  }
 0x29c   :  { %3524 = vmatpush2.bf16.msra.mxu1 %v10818_v35  ;;  %v10893_v35 = vld [vmem:[#allocation9 + $0xa08] ss:$20 sps:$4 sm:$0xff]  }
 0x29d   :  { %3541 = vmatpush1.bf16.msra.mxu0 %v10821_v36  ;;  %3579 = vmatprep.subr.bf16.mxu1 %v10826_v37  ;;  %v10897_v36 = vld [vmem:[#allocation9 + $0xa60] ss:$20 sps:$4 sm:$0xff]   ;;  %v10898_v37 = vld [vmem:[#allocation9 + $0x8a8] ss:$20 sps:$4 sm:$0xff]  }
 0x29e   :  { %3542 = vmatprep.subr.bf16.mxu0 %v10829_v40  ;;  %v10899_v40 = vld [vmem:[#allocation9 + $0x920] ss:$20 sps:$4 sm:$0xff]  }
 0x29f   :  { %3526 = vmatmul.mubr.bf16.vlgmr.msra.gmra.mxu1 %v12076_v34 }
 0x2a0   :  { %3580 = vmatpush1.bf16.msra.mxu1 %v10824_v41  ;;  %3611 = vmatprep.mubr.bf16.mxu1 %v11927_v0  ;;  %v10900_v41 = vld [vmem:[#allocation9 + $0x768] ss:$20 sps:$4 sm:$0xff]  }
 0x2a1   :  { %3543 = vmatpush1.bf16.msra.mxu0 %v10827_v42  ;;  %3581 = vmatprep.subr.bf16.mxu1 %v10832_v43  ;;  %v10901_v42 = vld [vmem:[#allocation9 + $0xa38] ss:$20 sps:$4 sm:$0xff]   ;;  %v10902_v43 = vld [vmem:[#allocation9 + $0x880] ss:$20 sps:$4 sm:$0xff]  }
 0x2a2   :  { %3544 = vmatprep.subr.bf16.mxu0 %v10835_v44  ;;  %v10903_v44 = vld [vmem:[#allocation9 + $0x8f8] ss:$20 sps:$4 sm:$0xff]  }
 0x2a4   :  { %3582 = vmatpush1.bf16.msra.mxu1 %v10830_v45  ;;  %v10904_v45 = vld [vmem:[#allocation9 + $0x740] ss:$20 sps:$4 sm:$0xff]  }
 0x2a5   :  { %3545 = vmatpush1.bf16.msra.mxu0 %v10833_v46  ;;  %3583 = vmatprep.subr.bf16.mxu1 %v10838_v33  ;;  %v10905_v46 = vld [vmem:[#allocation9 + $0xa10] ss:$20 sps:$4 sm:$0xff]   ;;  %v10906_v33 = vld [vmem:[#allocation9 + $0x858] ss:$20 sps:$4 sm:$0xff]  }
 0x2a6   :  { %3546 = vmatprep.subr.bf16.mxu0 %v10841_v59  ;;  %v10907_v59 = vld [vmem:[#allocation9 + $0x8d0] ss:$20 sps:$4 sm:$0xff]  }
 0x2a8   :  { %3584 = vmatpush1.bf16.msra.mxu1 %v10836_v47  ;;  %v10908_v47 = vld [vmem:[#allocation9 + $0x718] ss:$20 sps:$4 sm:$0xff]  }
 0x2a9   :  { %3547 = vmatpush1.bf16.msra.mxu0 %v10839_v48  ;;  %3585 = vmatprep.subr.bf16.mxu1 %v10844_v49  ;;  %v10929_v48 = vld [vmem:[#allocation9 + $0xd9c] ss:$20 sps:$4 sm:$0xff]  }
 0x2aa   :  { %3548 = vmatprep.subr.bf16.mxu0 %v10847_v50  ;;  %v10909_v49 = vld [vmem:[#allocation9 + $0x830] ss:$20 sps:$4 sm:$0xff]   ;;  %v10927_v50 = vld [vmem:[#allocation9 + $0xd98] ss:$20 sps:$4 sm:$0xff]  }
 0x2ac   :  { %3586 = vmatpush1.bf16.msra.mxu1 %v10842_v51  ;;  %v10910_v51 = vld [vmem:[#allocation9 + $0x6f0] ss:$20 sps:$4 sm:$0xff]  }
 0x2ad   :  { %3549 = vmatpush1.bf16.msra.mxu0 %v10845_v53  ;;  %3587 = vmatprep.subr.bf16.mxu1 %v10850_v10  ;;  %v10932_v53 = vld [vmem:[#allocation9 + $0xd74] ss:$20 sps:$4 sm:$0xff]   ;;  %v10930_v10 = vld [vmem:[#allocation9 + $0xd70] ss:$20 sps:$4 sm:$0xff]  }
 0x2ae   :  { %3550 = vmatprep.subr.bf16.mxu0 %v10853_v54  ;;  %v10912_v54 = vld [vmem:[#allocation9 + $0x6c8] ss:$20 sps:$4 sm:$0xff]  }
 0x2b0   :  { %3588 = vmatpush1.bf16.msra.mxu1 %v10848_v55  ;;  %v10935_v55 = vld [vmem:[#allocation9 + $0xd4c] ss:$20 sps:$4 sm:$0xff]  }
 0x2b1   :  { %3551 = vmatpush1.bf16.msra.mxu0 %v10851_v56  ;;  %3589 = vmatprep.subr.bf16.mxu1 %v10856_v58  ;;  %v10913_v56 = vld [vmem:[#allocation9 + $0x7e0] ss:$20 sps:$4 sm:$0xff]   ;;  %v10933_v58 = vld [vmem:[#allocation9 + $0xd48] ss:$20 sps:$4 sm:$0xff]  }
 0x2b2   :  { %3552 = vmatprep.subr.bf16.mxu0 %v10859_v60  ;;  %v10914_v60 = vld [vmem:[#allocation9 + $0x6a0] ss:$20 sps:$4 sm:$0xff]  }
 0x2b4   :  { %3590 = vmatpush1.bf16.msra.mxu1 %v10854_v61  ;;  %v10938_v61 = vld [vmem:[#allocation9 + $0xd24] ss:$20 sps:$4 sm:$0xff]  }
 0x2b5   :  { %3553 = vmatpush2.bf16.msra.mxu0 %v10857_v62  ;;  %3591 = vmatprep.subr.bf16.mxu1 %v10862_v1  ;;  %v10915_v62 = vld [vmem:[#allocation9 + $0x7b8] ss:$20 sps:$4 sm:$0xff]   ;;  %v10936_v1 = vld [vmem:[#allocation9 + $0xd20] ss:$20 sps:$4 sm:$0xff]  }
 0x2b6   :  { %3554 = vmatprep.subr.bf16.mxu0 %v10865_v2  ;;  %v10941_v2 = vld [vmem:[#allocation9 + $0xcfc] ss:$20 sps:$4 sm:$0xff]  }
 0x2b8   :  { %3592 = vmatpush1.bf16.msra.mxu1 %v10860_v3  ;;  %v10917_v3 = vld [vmem:[#allocation9 + $0x790] ss:$20 sps:$4 sm:$0xff]  }
 0x2b9   :  { %3555 = vmatpush2.bf16.msra.mxu0 %v10863_v4  ;;  %3593 = vmatprep.subr.bf16.mxu1 %v10868_v5  ;;  %v10939_v4 = vld [vmem:[#allocation9 + $0xcf8] ss:$20 sps:$4 sm:$0xff]   ;;  %v10918_v5 = vld [vmem:[#allocation9 + $0x650] ss:$20 sps:$4 sm:$0xff]  }
 0x2ba   :  { %3556 = vmatprep.subr.bf16.mxu0 %v10871_v6  ;;  %v10944_v6 = vld [vmem:[#allocation9 + $0xcd4] ss:$20 sps:$4 sm:$0xff]  }
 0x2bc   :  { %3594 = vmatpush1.bf16.msra.mxu1 %v10866_v7  ;;  %v10942_v7 = vld [vmem:[#allocation9 + $0xcd0] ss:$20 sps:$4 sm:$0xff]  }
 0x2bd   :  { %3557 = vmatpush2.bf16.msra.mxu0 %v10869_v8  ;;  %10042 = vmatprep.subr.bf16.mxu1 %v10872_v9  ;;  %v10919_v8 = vld [vmem:[#allocation9 + $0xc68] ss:$20 sps:$4 sm:$0xff]   ;;  %v10947_v9 = vld [vmem:[#allocation9 + $0xcac] ss:$20 sps:$4 sm:$0xff]  }
 0x2be   :  { %3558 = vmatprep.subr.bf16.mxu0 %v10875_v11  ;;  %v10945_v11 = vld [vmem:[#allocation9 + $0xca8] ss:$20 sps:$4 sm:$0xff]  }
 0x2bf   :  { %3612 = vmatmul.mubr.bf16.vlgmr.msra.gmra.mxu1 %v12094_v21 }
 0x2c0   :  { %10043 = vmatpush3.bf16.msra.mxu1 %v10876_v63  ;;  %3695 = vmatprep.mubr.bf16.mxu1 %v12085_v23  ;;  %v10888_v23 = vld [vmem:[#allocation9 + $0xa30] ss:$20 sps:$4 sm:$0xff]   ;;  %v10920_v63 = vld [vmem:[#allocation9 + $0xc40] ss:$20 sps:$4 sm:$0xff]  }
 0x2c1   :  { %3559 = vmatpush2.bf16.msra.mxu0 %v10873_v12  ;;  %10044 = vmatprep.subr.bf16.mxu1 %v10877_v14  ;;  %v10950_v12 = vld [vmem:[#allocation9 + $0xc84] ss:$20 sps:$4 sm:$0xff]   ;;  %v10948_v14 = vld [vmem:[#allocation9 + $0xc80] ss:$20 sps:$4 sm:$0xff]  }
 0x2c2   :  { %3560 = vmatprep.subr.bf16.mxu0 %v10880_v15  ;;  %v10921_v15 = vld [vmem:[#allocation9 + $0xc18] ss:$20 sps:$4 sm:$0xff]  }
 0x2c4   :  { %10045 = vmatpush3.bf16.msra.mxu1 %v10881_v16  ;;  %v10953_v16 = vld [vmem:[#allocation9 + $0xedc] ss:$20 sps:$4 sm:$0xff]  }
 0x2c5   :  { %3561 = vmatpush2.bf16.msra.mxu0 %v10878_v52  ;;  %10046 = vmatprep.subr.bf16.mxu1 %v10882_v57  ;;  %v10922_v52 = vld [vmem:[#allocation9 + $0xbf0] ss:$20 sps:$4 sm:$0xff]   ;;  %v10956_v57 = vld [vmem:[#allocation9 + $0xeb4] ss:$20 sps:$4 sm:$0xff]  }
 0x2c6   :  { %3562 = vmatprep.subr.bf16.mxu0 %v10885_v17  ;;  %v10954_v17 = vld [vmem:[#allocation9 + $0xeb0] ss:$20 sps:$4 sm:$0xff]  }
 0x2c8   :  { %10047 = vmatpush3.bf16.msra.mxu1 %v10886_v18  ;;  %v10923_v18 = vld [vmem:[#allocation9 + $0xbc8] ss:$20 sps:$4 sm:$0xff]  }
 0x2c9   :  { %3563 = vmatpush2.bf16.msra.mxu0 %v10883_v19  ;;  %10048 = vmatprep.subr.bf16.mxu1 %v10887_v22  ;;  %v10959_v19 = vld [vmem:[#allocation9 + $0xe8c] ss:$20 sps:$4 sm:$0xff]   ;;  %v10957_v22 = vld [vmem:[#allocation9 + $0xe88] ss:$20 sps:$4 sm:$0xff]  }
 0x2ca   :  { %3564 = vmatprep.subr.bf16.mxu0 %v10890_v25  ;;  %v10924_v25 = vld [vmem:[#allocation9 + $0xba0] ss:$20 sps:$4 sm:$0xff]  }
 0x2cc   :  { %10049 = vmatpush3.bf16.msra.mxu1 %v10891_v13  ;;  %v10962_v13 = vld [vmem:[#allocation9 + $0xe64] ss:$20 sps:$4 sm:$0xff]  }
 0x2cd   :  { %3565 = vmatpush2.bf16.msra.mxu0 %v10888_v23  ;;  %10050 = vmatprep.subr.bf16.mxu1 %v10892_v26  ;;  %v10960_v23 = vld [vmem:[#allocation9 + $0xe60] ss:$20 sps:$4 sm:$0xff]   ;;  %v10925_v26 = vld [vmem:[#allocation9 + $0xb78] ss:$20 sps:$4 sm:$0xff]  }
 0x2ce   :  { %3566 = vmatprep.subr.bf16.mxu0 %v10895_v27  ;;  %v10965_v27 = vld [vmem:[#allocation9 + $0xe3c] ss:$20 sps:$4 sm:$0xff]  }
 0x2d0   :  { %10051 = vmatpush3.bf16.msra.mxu1 %v10896_v28  ;;  %v10963_v28 = vld [vmem:[#allocation9 + $0xe38] ss:$20 sps:$4 sm:$0xff]  }
 0x2d1   :  { %3567 = vmatpush2.bf16.msra.mxu0 %v10893_v35  ;;  %10052 = vmatprep.subr.bf16.mxu1 %v10897_v36  ;;  %v10926_v35 = vld [vmem:[#allocation9 + $0xb50] ss:$20 sps:$4 sm:$0xff]   ;;  %v10968_v36 = vld [vmem:[#allocation9 + $0xe14] ss:$20 sps:$4 sm:$0xff]  }
 0x2d2   :  { %10020 = vmatprep.subr.bf16.mxu0 %v10898_v37  ;;  %v10977_v37 = vld [vmem:[#allocation9 + $0x101c] ss:$20 sps:$4 sm:$0xff]  }
 0x2d4   :  { %3569 = vmatmul.mubr.bf16.vlgmr.msra.gmra.mxu0 %v12087_v24  ;;  %10053 = vmatpush3.bf16.msra.mxu1 %v10899_v40  ;;  %v10966_v40 = vld [vmem:[#allocation9 + $0xe10] ss:$20 sps:$4 sm:$0xff]  }
 0x2d5   :  { %10021 = vmatpush3.bf16.msra.mxu0 %v10900_v41  ;;  %3654 = vmatprep.mubr.bf16.mxu0 %v12074_v29  ;;  %v10911_v29 = vld [vmem:[#allocation9 + $0x808] ss:$20 sps:$4 sm:$0xff]   ;;  %v10971_v41 = vld [vmem:[#allocation9 + $0xdec] ss:$20 sps:$4 sm:$0xff]  }
 0x2d6   :  { %10054 = vmatprep.subr.bf16.mxu1 %v10901_v42  ;;  %10022 = vmatprep.subr.bf16.mxu0 %v10902_v43  ;;  %v10975_v42 = vld [vmem:[#allocation9 + $0x1018] ss:$20 sps:$4 sm:$0xff]   ;;  %v10980_v43 = vld [vmem:[#allocation9 + $0xff4] ss:$20 sps:$4 sm:$0xff]  }
 0x2d8   :  { %10055 = vmatpush3.bf16.msra.mxu1 %v10903_v44  ;;  %v10969_v44 = vld [vmem:[#allocation9 + $0xde8] ss:$20 sps:$4 sm:$0xff]  }
 0x2d9   :  { %10023 = vmatpush3.bf16.msra.mxu0 %v10904_v45  ;;  %10056 = vmatprep.subr.bf16.mxu1 %v10905_v46  ;;  %v10974_v45 = vld [vmem:[#allocation9 + $0xdc4] ss:$20 sps:$4 sm:$0xff]  }
 0x2da   :  { %10024 = vmatprep.subr.bf16.mxu0 %v10906_v33  ;;  %v10978_v46 = vld [vmem:[#allocation9 + $0xff0] ss:$20 sps:$4 sm:$0xff]   ;;  %v10983_v33 = vld [vmem:[#allocation9 + $0xfcc] ss:$20 sps:$4 sm:$0xff]  }
 0x2dc   :  { %10057 = vmatpush3.bf16.msra.mxu1 %v10907_v59  ;;  %v10972_v59 = vld [vmem:[#allocation9 + $0xdc0] ss:$20 sps:$4 sm:$0xff]  }
 0x2dd   :  { %10025 = vmatpush3.bf16.msra.mxu0 %v10908_v47  ;;  %5071 = vmatprep.subr.bf16.mxu1 %v10929_v48  ;;  %v10981_v47 = vld [vmem:[#allocation9 + $0xfc8] ss:$20 sps:$4 sm:$0xff]   ;;  %v10986_v48 = vld [vmem:[#allocation9 + $0xfa4] ss:$20 sps:$4 sm:$0xff]  }
 0x2de   :  { %10026 = vmatprep.subr.bf16.mxu0 %v10909_v49  ;;  %v10984_v49 = vld [vmem:[#allocation9 + $0xfa0] ss:$20 sps:$4 sm:$0xff]  }
 0x2df   :  { %3696 = vmatmul.mubr.bf16.vlgmr.msra.gmra.mxu1 %v12087_v24  ;;  %v10916_v24 = vld [vmem:[#allocation9 + $0x678] ss:$20 sps:$4 sm:$0xff]  }
 0x2e0   :  { %5072 = vmatpush1.bf16.msra.mxu1 %v10927_v50  ;;  %v10987_v50 = vld [vmem:[#allocation9 + $0xf78] ss:$20 sps:$4 sm:$0xff]  }
 0x2e1   :  { %10027 = vmatpush3.bf16.msra.mxu0 %v10910_v51  ;;  %5073 = vmatprep.subr.bf16.mxu1 %v10932_v53  ;;  %v10992_v51 = vld [vmem:[#allocation9 + $0xf54] ss:$20 sps:$4 sm:$0xff]   ;;  %v10990_v53 = vld [vmem:[#allocation9 + $0xf50] ss:$20 sps:$4 sm:$0xff]  }
 0x2e2   :  { %10028 = vmatprep.subr.bf16.mxu0 %v10911_v29  ;;  %v10995_v29 = vld [vmem:[#allocation9 + $0xf2c] ss:$20 sps:$4 sm:$0xff]  }
 0x2e4   :  { %5074 = vmatpush1.bf16.msra.mxu1 %v10930_v10  ;;  %v10993_v10 = vld [vmem:[#allocation9 + $0xf28] ss:$20 sps:$4 sm:$0xff]  }
 0x2e5   :  { %10029 = vmatpush3.bf16.msra.mxu0 %v10912_v54  ;;  %5075 = vmatprep.subr.bf16.mxu1 %v10935_v55  ;;  %v10998_v54 = vld [vmem:[#allocation9 + $0xf04] ss:$20 sps:$4 sm:$0xff]   ;;  %v10996_v55 = vld [vmem:[#allocation9 + $0xf00] ss:$20 sps:$4 sm:$0xff]  }
 0x2e6   :  { %10030 = vmatprep.subr.bf16.mxu0 %v10913_v56  ;;  %v11001_v56 = vld [vmem:[#allocation9 + $0x115c] ss:$20 sps:$4 sm:$0xff]  }
 0x2e8   :  { %5076 = vmatpush1.bf16.msra.mxu1 %v10933_v58  ;;  %v10999_v58 = vld [vmem:[#allocation9 + $0x1158] ss:$20 sps:$4 sm:$0xff]  }
 0x2e9   :  { %10031 = vmatpush3.bf16.msra.mxu0 %v10914_v60  ;;  %5077 = vmatprep.subr.bf16.mxu1 %v10938_v61  ;;  %v11004_v60 = vld [vmem:[#allocation9 + $0x1134] ss:$20 sps:$4 sm:$0xff]   ;;  %v11002_v61 = vld [vmem:[#allocation9 + $0x1130] ss:$20 sps:$4 sm:$0xff]  }
 0x2ea   :  { %10032 = vmatprep.subr.bf16.mxu0 %v10915_v62  ;;  %v11007_v62 = vld [vmem:[#allocation9 + $0x110c] ss:$20 sps:$4 sm:$0xff]  }
 0x2ec   :  { %5078 = vmatpush1.bf16.msra.mxu1 %v10936_v1  ;;  %v11005_v1 = vld [vmem:[#allocation9 + $0x1108] ss:$20 sps:$4 sm:$0xff]  }
 0x2ed   :  { %10033 = vmatpush3.bf16.msra.mxu0 %v10916_v24  ;;  %5079 = vmatprep.subr.bf16.mxu1 %v10941_v2  ;;  %v11010_v24 = vld [vmem:[#allocation9 + $0x10e4] ss:$20 sps:$4 sm:$0xff]   ;;  %v11008_v2 = vld [vmem:[#allocation9 + $0x10e0] ss:$20 sps:$4 sm:$0xff]  }
 0x2ee   :  { %10034 = vmatprep.subr.bf16.mxu0 %v10917_v3  ;;  %v11046_v3 = vld [vmem:[#allocation9 + $0x129c] ss:$20 sps:$4 sm:$0xff]  }
 0x2f0   :  { %5080 = vmatpush1.bf16.msra.mxu1 %v10939_v4  ;;  %v11013_v4 = vld [vmem:[#allocation9 + $0x10bc] ss:$20 sps:$4 sm:$0xff]  }
 0x2f1   :  { %10035 = vmatpush3.bf16.msra.mxu0 %v10918_v5  ;;  %5081 = vmatprep.subr.bf16.mxu1 %v10944_v6  ;;  %v11011_v5 = vld [vmem:[#allocation9 + $0x10b8] ss:$20 sps:$4 sm:$0xff]   ;;  %v11016_v6 = vld [vmem:[#allocation9 + $0x1094] ss:$20 sps:$4 sm:$0xff]  }
 0x2f2   :  { %10260 = vmatprep.subr.bf16.mxu0 %v11929_v31 }
 0x2f4   :  { %3655 = vmatmul.mubr.bf16.vlgmr.msra.gmra.mxu0 %v12076_v34  ;;  %5082 = vmatpush1.bf16.msra.mxu1 %v10942_v7  ;;  %v10951_v34 = vld [vmem:[#allocation9 + $0xed8] ss:$20 sps:$4 sm:$0xff]   ;;  %v11014_v7 = vld [vmem:[#allocation9 + $0x1090] ss:$20 sps:$4 sm:$0xff]  }
 0x2f5   :  { %10261 = vmatpush3.bf16.msra.mxu0 %v10919_v8  ;;  %10276 = vmatprep.mubr.msk.bf16.mxu0 %vm11930_vm3, %v11929_v31  ;;  %v3398_v8 = vpop.f32.mrf.mxu0 }
 0x2f6   :  { %10262 = vmatprep.subr.bf16.mxu0 %v11929_v31  ;;  %5083 = vmatprep.subr.bf16.mxu1 %v10947_v9  ;;  %v11019_v9 = vld [vmem:[#allocation9 + $0x106c] ss:$20 sps:$4 sm:$0xff]  }
 0x2f8   :  { %5084 = vmatpush1.bf16.msra.mxu1 %v10945_v11  ;;  %v11017_v11 = vld [vmem:[#allocation9 + $0x1068] ss:$20 sps:$4 sm:$0xff]  }
 0x2f9   :  { %10263 = vmatpush3.bf16.msra.mxu0 %v10920_v63  ;;  %5085 = vmatprep.subr.bf16.mxu1 %v10950_v12  ;;  %v3400_v63 = vpop.f32.mrf.mxu0 }
 0x2fa   :  { %10264 = vmatprep.subr.bf16.mxu0 %v11929_v31 }
 0x2fc   :  { %5086 = vmatpush1.bf16.msra.mxu1 %v10948_v14  ;;  %v11022_v14 = vld [vmem:[#allocation9 + $0x1044] ss:$20 sps:$4 sm:$0xff]  }
 0x2fd   :  { %10265 = vmatpush3.bf16.msra.mxu0 %v10921_v15  ;;  %5087 = vmatprep.subr.bf16.mxu1 %v10953_v16  ;;  %v2295_v15 = vld [vmem:[#allocation11 + $0x1] ss:$8 sm:$0xf] }
 0x2fe   :  { %10266 = vmatprep.subr.bf16.mxu0 %v11929_v31  ;;  %v2296_v16 = vld [vmem:[#allocation11 + $0x1] ss:$8 sm:$0x10] }
 0x300   :  { %5088 = vmatpush2.bf16.msra.mxu1 %v10951_v34  ;;  %v11020_v34 = vld [vmem:[#allocation9 + $0x1040] ss:$20 sps:$4 sm:$0xff]  }
 0x301   :  { %10267 = vmatpush3.bf16.msra.mxu0 %v10922_v52  ;;  %5089 = vmatprep.subr.bf16.mxu1 %v10956_v57  ;;  %v12117_v52 = vor.u32 %v2296_v16, %v2295_v15  ;;  %v3402_v57 = vpop.f32.mrf.mxu0 }
 0x302   :  { %10268 = vmatprep.subr.bf16.mxu0 %v11929_v31 }
 0x304   :  { %5090 = vmatpush2.bf16.msra.mxu1 %v10954_v17 }
 0x305   :  { %10269 = vmatpush3.bf16.msra.mxu0 %v10923_v18  ;;  %5091 = vmatprep.subr.bf16.mxu1 %v10959_v19  ;;  %v11025_v18 = vld [vmem:[#allocation9 + $0xda4] ss:$20 sps:$4 sm:$0xff]   ;;  %v2306_v19 = vrot.slane %v12117_v52, %v12005_v30 }
 0x306   :  { %10270 = vmatprep.subr.bf16.mxu0 %v11929_v31 }
 0x308   :  { %5092 = vmatpush2.bf16.msra.mxu1 %v10957_v22  ;;  %v2302_v22 = vrot.slane %v12117_v52, %v12008_v32 }
 0x309   :  { %10271 = vmatpush3.bf16.msra.mxu0 %v10924_v25  ;;  %5093 = vmatprep.subr.bf16.mxu1 %v10962_v13  ;;  %v3404_v25 = vpop.f32.mrf.mxu0 }
 0x30a   :  { %10272 = vmatprep.subr.bf16.mxu0 %v11929_v31 }
 0x30c   :  { %5094 = vmatpush2.bf16.msra.mxu1 %v10960_v23 }
 0x30d   :  { %10273 = vmatpush3.bf16.msra.mxu0 %v10925_v26  ;;  %5095 = vmatprep.subr.bf16.mxu1 %v10965_v27  ;;  %v3401_v26 = vadd.f32 %v3400_v63, %v2306_v19  ;;  %v3403_v27 = vadd.f32 %v3402_v57, %v2302_v22 }
 0x30e   :  { %10274 = vmatprep.subr.bf16.mxu0 %v11929_v31 }
 0x310   :  { %5096 = vmatpush2.bf16.msra.mxu1 %v10963_v28  ;;  %v3399_v28 = vadd.f32 %v3398_v8, %v2302_v22 }
 0x311   :  { %10275 = vmatpush3.bf16.msra.mxu0 %v10926_v35  ;;  %5097 = vmatprep.subr.bf16.mxu1 %v10968_v36 }
 0x312   :  { %5114 = vmatprep.subr.bf16.mxu0 %v10977_v37  ;;  %v3405_v37 = vadd.f32 %v3404_v25, %v2306_v19 }
 0x314   :  { %10277 = vmatmul.mubr.bf16.vlgmr.msra.gmra.mxu0 %v12094_v21  ;;  %5098 = vmatpush2.bf16.msra.mxu1 %v10966_v40  ;;  %v10989_v21 = vld [vmem:[#allocation9 + $0xf7c] ss:$20 sps:$4 sm:$0xff]  }
 0x315   :  { %5099 = vmatprep.subr.bf16.mxu1 %v10971_v41  ;;  %5115 = vmatpush1.bf16.msra.mxu0 %v10975_v42 }
 0x316   :  { %5116 = vmatprep.subr.bf16.mxu0 %v10980_v43 }
 0x318   :  { %5100 = vmatpush2.bf16.msra.mxu1 %v10969_v44 }
 0x319   :  { %5101 = vmatprep.subr.bf16.mxu1 %v10974_v45  ;;  %5117 = vmatpush1.bf16.msra.mxu0 %v10978_v46 }
 0x31a   :  { %5118 = vmatprep.subr.bf16.mxu0 %v10983_v33 }
 0x31c   :  { %5102 = vmatpush2.bf16.msra.mxu1 %v10972_v59 }
 0x31d   :  { %5119 = vmatpush1.bf16.msra.mxu0 %v10981_v47  ;;  %5157 = vmatprep.subr.bf16.mxu1 %v11046_v3  ;;  %v11080_v3 = vld [vmem:[#allocation9 + $0x11a8] ss:$20 sps:$4 sm:$0xff]  }
 0x31e   :  { %5120 = vmatprep.subr.bf16.mxu0 %v10986_v48 }
 0x31f   :  { %v3441_v12 = vpop.f32.mrf.mxu1 }
 0x320   :  { %v3442_v42 = vadd.f32 %v3441_v12, %v3399_v28  ;;  %v2314_v12 = vrot.slane %v12117_v52, %v12020_v39 }
 0x321   :  { %5121 = vmatpush1.bf16.msra.mxu0 %v10984_v49  ;;  %v3443_v17 = vpop.f32.mrf.mxu1 }
 0x322   :  { %5122 = vmatprep.subr.bf16.mxu0 %v10989_v21  ;;  %v3444_v40 = vadd.f32 %v3443_v17, %v3401_v26 }
 0x323   :  { %v3445_v13 = vpop.f32.mrf.mxu1 }
 0x324   :  { %v3446_v41 = vadd.f32 %v3445_v13, %v3403_v27 }
 0x325   :  { %5123 = vmatpush1.bf16.msra.mxu0 %v10987_v50  ;;  %v3447_v35 = vpop.f32.mrf.mxu1 }
 0x326   :  { %5124 = vmatprep.subr.bf16.mxu0 %v10992_v51  ;;  %v3448_v44 = vadd.f32 %v3447_v35, %v3405_v37 }
 0x329   :  { %5125 = vmatpush1.bf16.msra.mxu0 %v10990_v53  ;;  %v11044_v53 = vld [vmem:[#allocation9 + $0x1298] ss:$20 sps:$4 sm:$0xff]  }
 0x32a   :  { %5126 = vmatprep.subr.bf16.mxu0 %v10995_v29 }
 0x32d   :  { %5127 = vmatpush1.bf16.msra.mxu0 %v10993_v10  ;;  %v11052_v10 = vld [vmem:[#allocation9 + $0x1274] ss:$20 sps:$4 sm:$0xff]  }
 0x32e   :  { %5128 = vmatprep.subr.bf16.mxu0 %v10998_v54  ;;  %v11050_v54 = vld [vmem:[#allocation9 + $0x1270] ss:$20 sps:$4 sm:$0xff]  }
 0x331   :  { %5129 = vmatpush1.bf16.msra.mxu0 %v10996_v55  ;;  %v11058_v55 = vld [vmem:[#allocation9 + $0x124c] ss:$20 sps:$4 sm:$0xff]  }
 0x332   :  { %5130 = vmatprep.subr.bf16.mxu0 %v11001_v56  ;;  %v11056_v56 = vld [vmem:[#allocation9 + $0x1248] ss:$20 sps:$4 sm:$0xff]  }
 0x335   :  { %5131 = vmatpush2.bf16.msra.mxu0 %v10999_v58  ;;  %v11064_v58 = vld [vmem:[#allocation9 + $0x1224] ss:$20 sps:$4 sm:$0xff]  }
 0x336   :  { %5132 = vmatprep.subr.bf16.mxu0 %v11004_v60  ;;  %v11062_v60 = vld [vmem:[#allocation9 + $0x1220] ss:$20 sps:$4 sm:$0xff]  }
 0x339   :  { %5133 = vmatpush2.bf16.msra.mxu0 %v11002_v61  ;;  %v11070_v61 = vld [vmem:[#allocation9 + $0x11fc] ss:$20 sps:$4 sm:$0xff]  }
 0x33a   :  { %5134 = vmatprep.subr.bf16.mxu0 %v11007_v62  ;;  %v11068_v62 = vld [vmem:[#allocation9 + $0x11f8] ss:$20 sps:$4 sm:$0xff]  }
 0x33d   :  { %5135 = vmatpush2.bf16.msra.mxu0 %v11005_v1  ;;  %v11076_v1 = vld [vmem:[#allocation9 + $0x11d4] ss:$20 sps:$4 sm:$0xff]  }
 0x33e   :  { %5136 = vmatprep.subr.bf16.mxu0 %v11010_v24  ;;  %v11074_v24 = vld [vmem:[#allocation9 + $0x11d0] ss:$20 sps:$4 sm:$0xff]  }
 0x341   :  { %5137 = vmatpush2.bf16.msra.mxu0 %v11008_v2  ;;  %v11082_v2 = vld [vmem:[#allocation9 + $0x11ac] ss:$20 sps:$4 sm:$0xff]  }
 0x342   :  { %5138 = vmatprep.subr.bf16.mxu0 %v11013_v4  ;;  %v11088_v4 = vld [vmem:[#allocation9 + $0x1184] ss:$20 sps:$4 sm:$0xff]  }
 0x345   :  { %5139 = vmatpush2.bf16.msra.mxu0 %v11011_v5  ;;  %v11086_v5 = vld [vmem:[#allocation9 + $0x1180] ss:$20 sps:$4 sm:$0xff]  }
 0x346   :  { %5140 = vmatprep.subr.bf16.mxu0 %v11016_v6  ;;  %v11094_v6 = vld [vmem:[#allocation9 + $0x1024] ss:$20 sps:$4 sm:$0xff]  }
 0x349   :  { %5141 = vmatpush2.bf16.msra.mxu0 %v11014_v7 }
 0x34a   :  { %5142 = vmatprep.subr.bf16.mxu0 %v11019_v9 }
 0x34d   :  { %5143 = vmatpush2.bf16.msra.mxu0 %v11017_v11 }
 0x34e   :  { %5144 = vmatprep.subr.bf16.mxu0 %v11022_v14  ;;  %v2310_v14 = vrot.slane %v12117_v52, %v12017_v38 }
 0x351   :  { %5145 = vmatpush2.bf16.msra.mxu0 %v11020_v34 }
 0x352   :  { %5200 = vmatprep.subr.bf16.mxu0 %v11025_v18 }
 0x354   :  { %v3484_v23 = vpop.f32.mrf.mxu0 }
 0x355   :  { %v3485_v33 = vadd.f32 %v3484_v23, %v3442_v42 }
 0x356   :  { %v3486_v36 = vpop.f32.mrf.mxu0 }
 0x357   :  { %v3487_v45 = vadd.f32 %v3486_v36, %v3444_v40  ;;  %v3745_v50 = vmax.f32 %v3485_v33, 0.0  ;;  %v11023_v33 = vld [vmem:[#allocation9 + $0xda0] ss:$20 sps:$4 sm:$0xff]  }
 0x358   :  { %v3488_v43 = vpop.f32.mrf.mxu0 }
 0x359   :  { %v3489_v46 = vadd.f32 %v3488_v43, %v3446_v41  ;;  %v3746_v49 = vmax.f32 %v3487_v45, 0.0 }
 0x35a   :  { %v3490_v59 = vpop.f32.mrf.mxu0 }
 0x35b   :  { %v3491_v47 = vadd.f32 %v3490_v59, %v3448_v44  ;;  %v3750_v48 = vmax.f32 %v3489_v46, 0.0 }
 0x35d   :  { %v3751_v21 = vmax.f32 %v3491_v47, 0.0  ;;  %v12125_v29 = vpack.c.bf16 %v3750_v48, %v3745_v50  ;;  %v11028_v47 = vld [vmem:[#allocation9 + $0xd7c] ss:$20 sps:$4 sm:$0xff]   ;;  %v11026_v48 = vld [vmem:[#allocation9 + $0xd78] ss:$20 sps:$4 sm:$0xff]  }
 0x35e   :  { %v11034_v50 = vld [vmem:[#allocation9 + $0xd2c] ss:$20 sps:$4 sm:$0xff]  }
 0x35f   :  { %v12123_v51 = vpack.c.bf16 %v3751_v21, %v3746_v49  ;;  %v3527_v7 = vpop.f32.mrf.mxu1  ;;  %v11031_v49 = vld [vmem:[#allocation9 + $0xd54] ss:$20 sps:$4 sm:$0xff]   ;;  %v11029_v21 = vld [vmem:[#allocation9 + $0xd50] ss:$20 sps:$4 sm:$0xff]  }
 0x360   :  { %v3528_v57 = vadd.f32 %v3527_v7, %v2310_v14  ;;  %v11067_v7 = vld [vmem:[#allocation9 + $0xe94] ss:$20 sps:$4 sm:$0xff]  }
 0x361   :  { %5103 = vmatprep.mubr.bf16.mxu1 %v12123_v51  ;;  %v3529_v8 = vpop.f32.mrf.mxu1 }
 0x362   :  { %5104 = vmatmul.mubr.bf16.vlgmr.msra.gmra.mxu1 %v12125_v29  ;;  %v3530_v34 = vadd.f32 %v3529_v8, %v2314_v12 }
 0x363   :  { %5158 = vmatpush1.bf16.msra.mxu1 %v11044_v53  ;;  %5189 = vmatprep.mubr.bf16.mxu1 %v11927_v0  ;;  %v3531_v9 = vpop.f32.mrf.mxu1  ;;  %v11032_v53 = vld [vmem:[#allocation9 + $0xd28] ss:$20 sps:$4 sm:$0xff]  }
 0x364   :  { %5159 = vmatprep.subr.bf16.mxu1 %v11052_v10  ;;  %v3532_v18 = vadd.f32 %v3531_v9, %v2310_v14  ;;  %v11037_v10 = vld [vmem:[#allocation9 + $0xd04] ss:$20 sps:$4 sm:$0xff]   ;;  %v2318_v14 = vrot.slane %v12117_v52, %v12040_v20 }
 0x365   :  { %v3533_v11 = vpop.f32.mrf.mxu1  ;;  %v11065_v9 = vld [vmem:[#allocation9 + $0xe90] ss:$20 sps:$4 sm:$0xff]   ;;  %v11083_v52 = vld [vmem:[#allocation9 + $0xe18] ss:$20 sps:$4 sm:$0xff]  }
 0x366   :  { %v3534_v23 = vadd.f32 %v3533_v11, %v2314_v12 }
 0x367   :  { %5160 = vmatpush1.bf16.msra.mxu1 %v11050_v54  ;;  %v11035_v54 = vld [vmem:[#allocation9 + $0xd00] ss:$20 sps:$4 sm:$0xff]  }
 0x368   :  { %5161 = vmatprep.subr.bf16.mxu1 %v11058_v55  ;;  %v11040_v55 = vld [vmem:[#allocation9 + $0xcdc] ss:$20 sps:$4 sm:$0xff]  }
 0x36b   :  { %5162 = vmatpush1.bf16.msra.mxu1 %v11056_v56  ;;  %v11038_v56 = vld [vmem:[#allocation9 + $0xcd8] ss:$20 sps:$4 sm:$0xff]  }
 0x36c   :  { %5163 = vmatprep.subr.bf16.mxu1 %v11064_v58  ;;  %v11043_v58 = vld [vmem:[#allocation9 + $0xcb4] ss:$20 sps:$4 sm:$0xff]  }
 0x36f   :  { %5164 = vmatpush1.bf16.msra.mxu1 %v11062_v60  ;;  %v11041_v60 = vld [vmem:[#allocation9 + $0xcb0] ss:$20 sps:$4 sm:$0xff]  }
 0x370   :  { %5165 = vmatprep.subr.bf16.mxu1 %v11070_v61  ;;  %v11049_v61 = vld [vmem:[#allocation9 + $0xc8c] ss:$20 sps:$4 sm:$0xff]  }
 0x373   :  { %5166 = vmatpush1.bf16.msra.mxu1 %v11068_v62  ;;  %v11047_v62 = vld [vmem:[#allocation9 + $0xc88] ss:$20 sps:$4 sm:$0xff]  }
 0x374   :  { %5167 = vmatprep.subr.bf16.mxu1 %v11076_v1  ;;  %v11055_v1 = vld [vmem:[#allocation9 + $0xee4] ss:$20 sps:$4 sm:$0xff]  }
 0x377   :  { %5168 = vmatpush1.bf16.msra.mxu1 %v11074_v24 }
 0x378   :  { %5169 = vmatprep.subr.bf16.mxu1 %v11082_v2  ;;  %v11053_v2 = vld [vmem:[#allocation9 + $0xee0] ss:$20 sps:$4 sm:$0xff]  }
 0x37b   :  { %5170 = vmatpush1.bf16.msra.mxu1 %v11080_v3  ;;  %v11061_v3 = vld [vmem:[#allocation9 + $0xebc] ss:$20 sps:$4 sm:$0xff]  }
 0x37c   :  { %5171 = vmatprep.subr.bf16.mxu1 %v11088_v4 }
 0x37f   :  { %5172 = vmatpush1.bf16.msra.mxu1 %v11086_v5  ;;  %v3613_v63 = vpop.f32.mrf.mxu1  ;;  %v11059_v5 = vld [vmem:[#allocation9 + $0xeb8] ss:$20 sps:$4 sm:$0xff]  }
 0x380   :  { %5243 = vmatprep.subr.bf16.mxu1 %v11094_v6 }
 0x381   :  { %v3615_v15 = vpop.f32.mrf.mxu1 }
 0x383   :  { %v3617_v22 = vpop.f32.mrf.mxu1 }
 0x385   :  { %v3619_v37 = vpop.f32.mrf.mxu1 }
 0x394   :  { %v3570_v16 = vpop.f32.mrf.mxu0 }
 0x395   :  { %v3571_v25 = vadd.f32 %v3570_v16, %v3528_v57  ;;  %v11071_v16 = vld [vmem:[#allocation9 + $0xe68] ss:$20 sps:$4 sm:$0xff]   ;;  %v11079_v57 = vld [vmem:[#allocation9 + $0xe44] ss:$20 sps:$4 sm:$0xff]  }
 0x396   :  { %v3572_v17 = vpop.f32.mrf.mxu0 }
 0x397   :  { %v3573_v19 = vadd.f32 %v3572_v17, %v3530_v34  ;;  %v3614_v40 = vadd.f32 %v3613_v63, %v3571_v25  ;;  %v11073_v63 = vld [vmem:[#allocation9 + $0xe6c] ss:$20 sps:$4 sm:$0xff]   ;;  %v11085_v25 = vld [vmem:[#allocation9 + $0xe1c] ss:$20 sps:$4 sm:$0xff]  }
 0x398   :  { %v3574_v13 = vpop.f32.mrf.mxu0 }
 0x399   :  { %v3575_v26 = vadd.f32 %v3574_v13, %v3532_v18  ;;  %v3616_v28 = vadd.f32 %v3615_v15, %v3573_v19  ;;  %v3747_v45 = vmax.f32 %v3614_v40, 0.0  ;;  %v11077_v19 = vld [vmem:[#allocation9 + $0xe40] ss:$20 sps:$4 sm:$0xff]  }
 0x39a   :  { %v3576_v27 = vpop.f32.mrf.mxu0 }
 0x39b   :  { %v3618_v35 = vadd.f32 %v3617_v22, %v3575_v26  ;;  %v3577_v36 = vadd.f32 %v3576_v27, %v3534_v23  ;;  %v3748_v43 = vmax.f32 %v3616_v28, 0.0 }
 0x39d   :  { %v3620_v41 = vadd.f32 %v3619_v37, %v3577_v36  ;;  %v3752_v42 = vmax.f32 %v3618_v35, 0.0  ;;  %v11091_v36 = vld [vmem:[#allocation9 + $0xdf4] ss:$20 sps:$4 sm:$0xff]  }
 0x39f   :  { %v3753_v44 = vmax.f32 %v3620_v41, 0.0  ;;  %v12136_v59 = vpack.c.bf16 %v3752_v42, %v3747_v45  ;;  %v10058_v6 = vpop.f32.mrf.mxu1  ;;  %v11097_v45 = vld [vmem:[#allocation9 + $0xdcc] ss:$20 sps:$4 sm:$0xff]  }
 0x3a1   :  { %v12134_v46 = vpack.c.bf16 %v3753_v44, %v3748_v43  ;;  %v10059_v11 = vpop.f32.mrf.mxu1  ;;  %v11089_v43 = vld [vmem:[#allocation9 + $0xdf0] ss:$20 sps:$4 sm:$0xff]  }
 0x3a2   :  { %v10060_v13 = vadd.f32 %v10059_v11, %v10058_v6  ;;  %v11124_v6 = vld [vmem:[#allocation9 + $0xf5c] ss:$20 sps:$4 sm:$0xff]   ;;  %v11130_v11 = vld [vmem:[#allocation9 + $0xf34] ss:$20 sps:$4 sm:$0xff]  }
 0x3a3   :  { %5146 = vmatprep.mubr.bf16.mxu0 %v12134_v46  ;;  %v10061_v34 = vpop.f32.mrf.mxu1 }
 0x3a4   :  { %5147 = vmatmul.mubr.bf16.vlgmr.msra.gmra.mxu0 %v12136_v59 }
 0x3a5   :  { %5201 = vmatpush1.bf16.msra.mxu0 %v11023_v33  ;;  %5232 = vmatprep.mubr.bf16.mxu0 %v12123_v51  ;;  %v10062_v22 = vpop.f32.mrf.mxu1 }
 0x3a6   :  { %5202 = vmatprep.subr.bf16.mxu0 %v11028_v47  ;;  %v10063_v27 = vadd.f32 %v10062_v22, %v10061_v34  ;;  %v11134_v34 = vld [vmem:[#allocation9 + $0xf08] ss:$20 sps:$4 sm:$0xff]  }
 0x3a7   :  { %v11143_v22 = vld [vmem:[#allocation9 + $0x1188] ss:$20 sps:$4 sm:$0xff]  }
 0x3a9   :  { %5203 = vmatpush1.bf16.msra.mxu0 %v11026_v48  ;;  %v11092_v48 = vld [vmem:[#allocation9 + $0x1020] ss:$20 sps:$4 sm:$0xff]  }
 0x3aa   :  { %5204 = vmatprep.subr.bf16.mxu0 %v11031_v49 }
 0x3ad   :  { %5205 = vmatpush1.bf16.msra.mxu0 %v11029_v21  ;;  %v11095_v21 = vld [vmem:[#allocation9 + $0xdc8] ss:$20 sps:$4 sm:$0xff]  }
 0x3ae   :  { %5206 = vmatprep.subr.bf16.mxu0 %v11034_v50  ;;  %v11100_v50 = vld [vmem:[#allocation9 + $0xffc] ss:$20 sps:$4 sm:$0xff]  }
 0x3b1   :  { %5207 = vmatpush1.bf16.msra.mxu0 %v11032_v53  ;;  %v11103_v53 = vld [vmem:[#allocation9 + $0x12a4] ss:$20 sps:$4 sm:$0xff]  }
 0x3b2   :  { %5208 = vmatprep.subr.bf16.mxu0 %v11037_v10  ;;  %v11098_v10 = vld [vmem:[#allocation9 + $0xff8] ss:$20 sps:$4 sm:$0xff]  }
 0x3b4   :  { %v10036_v24 = vpop.f32.mrf.mxu0 }
 0x3b5   :  { %5209 = vmatpush1.bf16.msra.mxu0 %v11035_v54  ;;  %v11101_v54 = vld [vmem:[#allocation9 + $0x12a0] ss:$20 sps:$4 sm:$0xff]  }
 0x3b6   :  { %5210 = vmatprep.subr.bf16.mxu0 %v11040_v55  ;;  %v10037_v4 = vpop.f32.mrf.mxu0  ;;  %v11106_v55 = vld [vmem:[#allocation9 + $0xfd4] ss:$20 sps:$4 sm:$0xff]  }
 0x3b7   :  { %v10038_v15 = vadd.f32 %v10037_v4, %v10036_v24  ;;  %v11113_v24 = vld [vmem:[#allocation9 + $0x1250] ss:$20 sps:$4 sm:$0xff]   ;;  %v11116_v4 = vld [vmem:[#allocation9 + $0xf80] ss:$20 sps:$4 sm:$0xff]  }
 0x3b8   :  { %v10039_v8 = vpop.f32.mrf.mxu0 }
 0x3b9   :  { %5211 = vmatpush1.bf16.msra.mxu0 %v11038_v56  ;;  %v3657_v18 = vadd.f32 %v10038_v15, %v2318_v14  ;;  %v11109_v56 = vld [vmem:[#allocation9 + $0x127c] ss:$20 sps:$4 sm:$0xff]   ;;  %v11136_v15 = vld [vmem:[#allocation9 + $0xf0c] ss:$20 sps:$4 sm:$0xff]  }
 0x3ba   :  { %5212 = vmatprep.subr.bf16.mxu0 %v11043_v58  ;;  %v10040_v12 = vpop.f32.mrf.mxu0  ;;  %v11104_v58 = vld [vmem:[#allocation9 + $0xfd0] ss:$20 sps:$4 sm:$0xff]  }
 0x3bb   :  { %v10041_v17 = vadd.f32 %v10040_v12, %v10039_v8  ;;  %v3698_v28 = vadd.f32 %v10060_v13, %v3657_v18  ;;  %v11122_v8 = vld [vmem:[#allocation9 + $0xf58] ss:$20 sps:$4 sm:$0xff]   ;;  %v11128_v12 = vld [vmem:[#allocation9 + $0xf30] ss:$20 sps:$4 sm:$0xff]   ;;  %v11149_v13 = vld [vmem:[#allocation9 + $0x1168] ss:$20 sps:$4 sm:$0xff]  }
 0x3bc   :  { %v11145_v18 = vld [vmem:[#allocation9 + $0x118c] ss:$20 sps:$4 sm:$0xff]  }
 0x3bd   :  { %5213 = vmatpush1.bf16.msra.mxu0 %v11041_v60  ;;  %v3660_v23 = vadd.f32 %v10041_v17, %v2318_v14  ;;  %v11107_v60 = vld [vmem:[#allocation9 + $0x1278] ss:$20 sps:$4 sm:$0xff]  }
 0x3be   :  { %5214 = vmatprep.subr.bf16.mxu0 %v11049_v61  ;;  %v11112_v61 = vld [vmem:[#allocation9 + $0xfac] ss:$20 sps:$4 sm:$0xff]   ;;  %v11142_v17 = vld [vmem:[#allocation9 + $0x1164] ss:$20 sps:$4 sm:$0xff]  }
 0x3bf   :  { %v3701_v40 = vadd.f32 %v10063_v27, %v3660_v23  ;;  %v11131_v14 = vld [vmem:[#allocation9 + $0x11d8] ss:$20 sps:$4 sm:$0xff]   ;;  %v11153_v27 = vld [vmem:[#allocation9 + $0x1114] ss:$20 sps:$4 sm:$0xff]  }
 0x3c0   :  { %v11146_v23 = vld [vmem:[#allocation9 + $0x1138] ss:$20 sps:$4 sm:$0xff]  }
 0x3c1   :  { %5215 = vmatpush1.bf16.msra.mxu0 %v11047_v62  ;;  %v11115_v62 = vld [vmem:[#allocation9 + $0x1254] ss:$20 sps:$4 sm:$0xff]  }
 0x3c2   :  { %5216 = vmatprep.subr.bf16.mxu0 %v11055_v1  ;;  %v11110_v1 = vld [vmem:[#allocation9 + $0xfa8] ss:$20 sps:$4 sm:$0xff]  }
 0x3c5   :  { %5217 = vmatpush2.bf16.msra.mxu0 %v11053_v2  ;;  %v11118_v2 = vld [vmem:[#allocation9 + $0xf84] ss:$20 sps:$4 sm:$0xff]  }
 0x3c6   :  { %5218 = vmatprep.subr.bf16.mxu0 %v11061_v3  ;;  %v11121_v3 = vld [vmem:[#allocation9 + $0x122c] ss:$20 sps:$4 sm:$0xff]  }
 0x3c9   :  { %5219 = vmatpush2.bf16.msra.mxu0 %v11059_v5  ;;  %v11119_v5 = vld [vmem:[#allocation9 + $0x1228] ss:$20 sps:$4 sm:$0xff]  }
 0x3ca   :  { %5220 = vmatprep.subr.bf16.mxu0 %v11067_v7  ;;  %v11127_v7 = vld [vmem:[#allocation9 + $0x1204] ss:$20 sps:$4 sm:$0xff]  }
 0x3cd   :  { %5221 = vmatpush2.bf16.msra.mxu0 %v11065_v9  ;;  %v11125_v9 = vld [vmem:[#allocation9 + $0x1200] ss:$20 sps:$4 sm:$0xff]  }
 0x3ce   :  { %5222 = vmatprep.subr.bf16.mxu0 %v11073_v63  ;;  %v11133_v63 = vld [vmem:[#allocation9 + $0x11dc] ss:$20 sps:$4 sm:$0xff]  }
 0x3d1   :  { %5223 = vmatpush2.bf16.msra.mxu0 %v11071_v16  ;;  %v11139_v16 = vld [vmem:[#allocation9 + $0x11b4] ss:$20 sps:$4 sm:$0xff]  }
 0x3d2   :  { %5224 = vmatprep.subr.bf16.mxu0 %v11079_v57  ;;  %v11137_v57 = vld [vmem:[#allocation9 + $0x11b0] ss:$20 sps:$4 sm:$0xff]  }
 0x3d4   :  { %v3738_v26 = vpop.f32.mrf.mxu0 }
 0x3d5   :  { %5225 = vmatpush2.bf16.msra.mxu0 %v11077_v19  ;;  %v3739_v37 = vadd.f32 %v3738_v26, %v3698_v28  ;;  %v11140_v19 = vld [vmem:[#allocation9 + $0x1160] ss:$20 sps:$4 sm:$0xff]   ;;  %v11150_v26 = vld [vmem:[#allocation9 + $0x1028] ss:$20 sps:$4 sm:$0xff]  }
 0x3d6   :  { %v10278_v35 = vpop.f32.mrf.mxu0  ;;  %5226 = vmatprep.subr.bf16.mxu0 %v11085_v25  ;;  %v11148_v25 = vld [vmem:[#allocation9 + $0x113c] ss:$20 sps:$4 sm:$0xff]   ;;  %v11154_v28 = vld [vmem:[#allocation9 + $0x1140] ss:$20 sps:$4 sm:$0xff]  }
 0x3d7   :  { %v3749_v33 = vmax.f32 %v3739_v37, 0.0  ;;  %v11155_v35 = vld [vmem:[#allocation9 + $0x1000] ss:$20 sps:$4 sm:$0xff]   ;;  %v11159_v37 = vld [vmem:[#allocation9 + $0x1118] ss:$20 sps:$4 sm:$0xff]  }
 0x3d8   :  { %v3741_v41 = vpop.f32.mrf.mxu0 }
 0x3d9   :  { %v3742_v42 = vadd.f32 %v3741_v41, %v3701_v40  ;;  %5227 = vmatpush2.bf16.msra.mxu0 %v11083_v52  ;;  %v11151_v52 = vld [vmem:[#allocation9 + $0x1110] ss:$20 sps:$4 sm:$0xff]   ;;  %v11156_v40 = vld [vmem:[#allocation9 + $0x10e8] ss:$20 sps:$4 sm:$0xff]   ;;  %v11160_v41 = vld [vmem:[#allocation9 + $0xfd8] ss:$20 sps:$4 sm:$0xff]  }
 0x3da   :  { %v10279_v44 = vpop.f32.mrf.mxu0  ;;  %5228 = vmatprep.subr.bf16.mxu0 %v11091_v36  ;;  %v11158_v36 = vld [vmem:[#allocation9 + $0x10ec] ss:$20 sps:$4 sm:$0xff]  }
 0x3db   :  { %v3754_v47 = vmax.f32 %v3742_v42, 0.0  ;;  %v11163_v42 = vld [vmem:[#allocation9 + $0x10c4] ss:$20 sps:$4 sm:$0xff]   ;;  %v11161_v44 = vld [vmem:[#allocation9 + $0x10c0] ss:$20 sps:$4 sm:$0xff]  }
 0x3dd   :  { %v12143_v49 = vpack.c.bf16 %v3754_v47, %v3749_v33  ;;  %5229 = vmatpush2.bf16.msra.mxu0 %v11089_v43  ;;  %v11164_v43 = vld [vmem:[#allocation9 + $0x10f0] ss:$20 sps:$4 sm:$0xff]   ;;  %v11166_v47 = vld [vmem:[#allocation9 + $0x1098] ss:$20 sps:$4 sm:$0xff]  }
 0x3de   :  { %5230 = vmatprep.subr.bf16.mxu0 %v11097_v45  ;;  %v11165_v45 = vld [vmem:[#allocation9 + $0xfb0] ss:$20 sps:$4 sm:$0xff]  }
 0x3df   :  { %5190 = vmatmul.mubr.bf16.vlgmr.msra.gmra.mxu1 %v12143_v49  ;;  %v11168_v33 = vld [vmem:[#allocation9 + $0x109c] ss:$20 sps:$4 sm:$0xff]  }
 0x3e0   :  { %5244 = vmatpush1.bf16.msra.mxu1 %v11092_v48  ;;  %5275 = vmatprep.mubr.bf16.mxu1 %v12134_v46  ;;  %v11170_v48 = vld [vmem:[#allocation9 + $0xf88] ss:$20 sps:$4 sm:$0xff]  }
 0x3e1   :  { %5231 = vmatpush2.bf16.msra.mxu0 %v11095_v21  ;;  %5245 = vmatprep.subr.bf16.mxu1 %v11100_v50  ;;  %v11173_v21 = vld [vmem:[#allocation9 + $0x1074] ss:$20 sps:$4 sm:$0xff]  }
 0x3e2   :  { %5286 = vmatprep.subr.bf16.mxu0 %v11103_v53  ;;  %v11174_v50 = vld [vmem:[#allocation9 + $0x10a0] ss:$20 sps:$4 sm:$0xff]   ;;  %v11171_v53 = vld [vmem:[#allocation9 + $0x1070] ss:$20 sps:$4 sm:$0xff]  }
 0x3e4   :  { %5233 = vmatmul.mubr.bf16.vlgmr.msra.gmra.mxu0 %v12125_v29  ;;  %5246 = vmatpush1.bf16.msra.mxu1 %v11098_v10  ;;  %v11175_v10 = vld [vmem:[#allocation9 + $0xf60] ss:$20 sps:$4 sm:$0xff]  }
 0x3e5   :  { %5287 = vmatpush1.bf16.msra.mxu0 %v11101_v54  ;;  %5247 = vmatprep.subr.bf16.mxu1 %v11106_v55  ;;  %v11178_v54 = vld [vmem:[#allocation9 + $0x104c] ss:$20 sps:$4 sm:$0xff]  }
 0x3e6   :  { %5288 = vmatprep.subr.bf16.mxu0 %v11109_v56  ;;  %5318 = vmatprep.mubr.bf16.mxu0 %v11927_v0  ;;  %v11179_v55 = vld [vmem:[#allocation9 + $0x1078] ss:$20 sps:$4 sm:$0xff]   ;;  %v11176_v56 = vld [vmem:[#allocation9 + $0x1048] ss:$20 sps:$4 sm:$0xff]  }
 0x3e8   :  { %5248 = vmatpush1.bf16.msra.mxu1 %v11104_v58  ;;  %v11180_v58 = vld [vmem:[#allocation9 + $0xf38] ss:$20 sps:$4 sm:$0xff]  }
 0x3e9   :  { %5289 = vmatpush1.bf16.msra.mxu0 %v11107_v60  ;;  %5249 = vmatprep.subr.bf16.mxu1 %v11112_v61  ;;  %v11181_v60 = vld [vmem:[#allocation9 + $0xee8] ss:$20 sps:$4 sm:$0xff]   ;;  %v11183_v61 = vld [vmem:[#allocation9 + $0x1050] ss:$20 sps:$4 sm:$0xff]  }
 0x3ea   :  { %5290 = vmatprep.subr.bf16.mxu0 %v11115_v62  ;;  %v11182_v62 = vld [vmem:[#allocation9 + $0xda8] ss:$20 sps:$4 sm:$0xff]  }
 0x3ec   :  { %5250 = vmatpush1.bf16.msra.mxu1 %v11110_v1  ;;  %v11184_v1 = vld [vmem:[#allocation9 + $0xf10] ss:$20 sps:$4 sm:$0xff]  }
 0x3ed   :  { %5291 = vmatpush1.bf16.msra.mxu0 %v11113_v24  ;;  %5251 = vmatprep.subr.bf16.mxu1 %v11118_v2  ;;  %v11185_v24 = vld [vmem:[#allocation9 + $0xec0] ss:$20 sps:$4 sm:$0xff]   ;;  %v11209_v2 = vld [vmem:[#allocation9 + $0x13dc] ss:$20 sps:$4 sm:$0xff]  }
 0x3ee   :  { %5292 = vmatprep.subr.bf16.mxu0 %v11121_v3  ;;  %v11186_v3 = vld [vmem:[#allocation9 + $0xd80] ss:$20 sps:$4 sm:$0xff]  }
 0x3f0   :  { %5252 = vmatpush1.bf16.msra.mxu1 %v11116_v4  ;;  %v11187_v4 = vld [vmem:[#allocation9 + $0xe98] ss:$20 sps:$4 sm:$0xff]  }
 0x3f1   :  { %5293 = vmatpush1.bf16.msra.mxu0 %v11119_v5  ;;  %5253 = vmatprep.subr.bf16.mxu1 %v11124_v6  ;;  %v11207_v5 = vld [vmem:[#allocation9 + $0x13d8] ss:$20 sps:$4 sm:$0xff]   ;;  %v11212_v6 = vld [vmem:[#allocation9 + $0x13b4] ss:$20 sps:$4 sm:$0xff]  }
 0x3f2   :  { %5294 = vmatprep.subr.bf16.mxu0 %v11127_v7  ;;  %v11188_v7 = vld [vmem:[#allocation9 + $0xd58] ss:$20 sps:$4 sm:$0xff]  }
 0x3f4   :  { %5254 = vmatpush1.bf16.msra.mxu1 %v11122_v8  ;;  %v11189_v8 = vld [vmem:[#allocation9 + $0xe70] ss:$20 sps:$4 sm:$0xff]  }
 0x3f5   :  { %5295 = vmatpush1.bf16.msra.mxu0 %v11125_v9  ;;  %5255 = vmatprep.subr.bf16.mxu1 %v11130_v11  ;;  %v11210_v9 = vld [vmem:[#allocation9 + $0x13b0] ss:$20 sps:$4 sm:$0xff]   ;;  %v11215_v11 = vld [vmem:[#allocation9 + $0x138c] ss:$20 sps:$4 sm:$0xff]  }
 0x3f6   :  { %5296 = vmatprep.subr.bf16.mxu0 %v11133_v63  ;;  %v11190_v63 = vld [vmem:[#allocation9 + $0xd30] ss:$20 sps:$4 sm:$0xff]  }
 0x3f8   :  { %5256 = vmatpush1.bf16.msra.mxu1 %v11128_v12  ;;  %v11213_v12 = vld [vmem:[#allocation9 + $0x1388] ss:$20 sps:$4 sm:$0xff]  }
 0x3f9   :  { %5297 = vmatpush1.bf16.msra.mxu0 %v11131_v14  ;;  %5257 = vmatprep.subr.bf16.mxu1 %v11136_v15  ;;  %v11218_v14 = vld [vmem:[#allocation9 + $0x1364] ss:$20 sps:$4 sm:$0xff]   ;;  %v11192_v15 = vld [vmem:[#allocation9 + $0xd08] ss:$20 sps:$4 sm:$0xff]  }
 0x3fa   :  { %5298 = vmatprep.subr.bf16.mxu0 %v11139_v16  ;;  %v11193_v16 = vld [vmem:[#allocation9 + $0xe20] ss:$20 sps:$4 sm:$0xff]  }
 0x3fc   :  { %5258 = vmatpush1.bf16.msra.mxu1 %v11134_v34  ;;  %v11221_v34 = vld [vmem:[#allocation9 + $0x133c] ss:$20 sps:$4 sm:$0xff]  }
 0x3fd   :  { %5299 = vmatpush1.bf16.msra.mxu0 %v11137_v57  ;;  %5259 = vmatprep.subr.bf16.mxu1 %v11142_v17  ;;  %v11194_v57 = vld [vmem:[#allocation9 + $0xce0] ss:$20 sps:$4 sm:$0xff]   ;;  %v11195_v17 = vld [vmem:[#allocation9 + $0xdf8] ss:$20 sps:$4 sm:$0xff]  }
 0x3fe   :  { %5300 = vmatprep.subr.bf16.mxu0 %v11145_v18  ;;  %v11219_v18 = vld [vmem:[#allocation9 + $0x1338] ss:$20 sps:$4 sm:$0xff]  }
 0x400   :  { %5260 = vmatpush2.bf16.msra.mxu1 %v11140_v19  ;;  %v11224_v19 = vld [vmem:[#allocation9 + $0x1314] ss:$20 sps:$4 sm:$0xff]  }
 0x401   :  { %5301 = vmatpush1.bf16.msra.mxu0 %v11143_v22  ;;  %5261 = vmatprep.subr.bf16.mxu1 %v11148_v25  ;;  %v11196_v22 = vld [vmem:[#allocation9 + $0xcb8] ss:$20 sps:$4 sm:$0xff]   ;;  %v11197_v25 = vld [vmem:[#allocation9 + $0xdd0] ss:$20 sps:$4 sm:$0xff]  }
 0x402   :  { %10095 = vmatprep.subr.bf16.mxu0 %v11149_v13  ;;  %v11222_v13 = vld [vmem:[#allocation9 + $0x1310] ss:$20 sps:$4 sm:$0xff]  }
 0x404   :  { %5262 = vmatpush2.bf16.msra.mxu1 %v11146_v23  ;;  %5319 = vmatmul.mubr.bf16.vlgmr.msra.gmra.mxu0 %v12143_v49  ;;  %v11227_v23 = vld [vmem:[#allocation9 + $0x12ec] ss:$20 sps:$4 sm:$0xff]  }
 0x405   :  { %10096 = vmatpush3.bf16.msra.mxu0 %v11150_v26  ;;  %5402 = vmatprep.mubr.bf16.mxu0 %v12134_v46  ;;  %v11169_v46 = vld [vmem:[#allocation9 + $0x10c8] ss:$20 sps:$4 sm:$0xff]   ;;  %v11198_v26 = vld [vmem:[#allocation9 + $0xc90] ss:$20 sps:$4 sm:$0xff]  }
 0x406   :  { %5263 = vmatprep.subr.bf16.mxu1 %v11153_v27  ;;  %10097 = vmatprep.subr.bf16.mxu0 %v11154_v28  ;;  %v11225_v27 = vld [vmem:[#allocation9 + $0x12e8] ss:$20 sps:$4 sm:$0xff]   ;;  %v11230_v28 = vld [vmem:[#allocation9 + $0x12c4] ss:$20 sps:$4 sm:$0xff]  }
 0x408   :  { %5264 = vmatpush2.bf16.msra.mxu1 %v11151_v52  ;;  %v11199_v52 = vld [vmem:[#allocation9 + $0x12a8] ss:$20 sps:$4 sm:$0xff]  }
 0x409   :  { %10098 = vmatpush3.bf16.msra.mxu0 %v11155_v35  ;;  %5265 = vmatprep.subr.bf16.mxu1 %v11158_v36  ;;  %v11228_v35 = vld [vmem:[#allocation9 + $0x12c0] ss:$20 sps:$4 sm:$0xff]   ;;  %v11233_v36 = vld [vmem:[#allocation9 + $0x151c] ss:$20 sps:$4 sm:$0xff]  }
 0x40a   :  { %10099 = vmatprep.subr.bf16.mxu0 %v11159_v37  ;;  %v11200_v37 = vld [vmem:[#allocation9 + $0x1280] ss:$20 sps:$4 sm:$0xff]  }
 0x40c   :  { %5266 = vmatpush2.bf16.msra.mxu1 %v11156_v40  ;;  %v11231_v40 = vld [vmem:[#allocation9 + $0x1518] ss:$20 sps:$4 sm:$0xff]  }
 0x40d   :  { %10100 = vmatpush3.bf16.msra.mxu0 %v11160_v41  ;;  %5267 = vmatprep.subr.bf16.mxu1 %v11163_v42  ;;  %v11236_v41 = vld [vmem:[#allocation9 + $0x14f4] ss:$20 sps:$4 sm:$0xff]   ;;  %v11201_v42 = vld [vmem:[#allocation9 + $0x1258] ss:$20 sps:$4 sm:$0xff]  }
 0x40e   :  { %10101 = vmatprep.subr.bf16.mxu0 %v11164_v43  ;;  %v11234_v43 = vld [vmem:[#allocation9 + $0x14f0] ss:$20 sps:$4 sm:$0xff]  }
 0x410   :  { %5268 = vmatpush2.bf16.msra.mxu1 %v11161_v44  ;;  %v11239_v44 = vld [vmem:[#allocation9 + $0x14cc] ss:$20 sps:$4 sm:$0xff]  }
 0x411   :  { %10102 = vmatpush3.bf16.msra.mxu0 %v11165_v45  ;;  %5269 = vmatprep.subr.bf16.mxu1 %v11168_v33  ;;  %v11237_v45 = vld [vmem:[#allocation9 + $0x14c8] ss:$20 sps:$4 sm:$0xff]   ;;  %v11242_v33 = vld [vmem:[#allocation9 + $0x14a4] ss:$20 sps:$4 sm:$0xff]  }
 0x412   :  { %10103 = vmatprep.subr.bf16.mxu0 %v11169_v46  ;;  %v11203_v46 = vld [vmem:[#allocation9 + $0x1208] ss:$20 sps:$4 sm:$0xff]  }
 0x414   :  { %5270 = vmatpush2.bf16.msra.mxu1 %v11166_v47  ;;  %v11240_v47 = vld [vmem:[#allocation9 + $0x14a0] ss:$20 sps:$4 sm:$0xff]  }
 0x415   :  { %10104 = vmatpush3.bf16.msra.mxu0 %v11170_v48  ;;  %5271 = vmatprep.subr.bf16.mxu1 %v11173_v21  ;;  %v11245_v48 = vld [vmem:[#allocation9 + $0x147c] ss:$20 sps:$4 sm:$0xff]   ;;  %v11204_v21 = vld [vmem:[#allocation9 + $0x11e0] ss:$20 sps:$4 sm:$0xff]  }
 0x416   :  { %10105 = vmatprep.subr.bf16.mxu0 %v11174_v50  ;;  %v11243_v50 = vld [vmem:[#allocation9 + $0x1478] ss:$20 sps:$4 sm:$0xff]  }
 0x418   :  { %5272 = vmatpush2.bf16.msra.mxu1 %v11171_v53  ;;  %v11248_v53 = vld [vmem:[#allocation9 + $0x1454] ss:$20 sps:$4 sm:$0xff]  }
 0x419   :  { %10106 = vmatpush3.bf16.msra.mxu0 %v11175_v10  ;;  %5273 = vmatprep.subr.bf16.mxu1 %v11178_v54  ;;  %v11205_v10 = vld [vmem:[#allocation9 + $0x11b8] ss:$20 sps:$4 sm:$0xff]   ;;  %v11246_v54 = vld [vmem:[#allocation9 + $0x1450] ss:$20 sps:$4 sm:$0xff]  }
 0x41a   :  { %10107 = vmatprep.subr.bf16.mxu0 %v11179_v55  ;;  %v11251_v55 = vld [vmem:[#allocation9 + $0x142c] ss:$20 sps:$4 sm:$0xff]  }
 0x41c   :  { %5274 = vmatpush2.bf16.msra.mxu1 %v11176_v56  ;;  %v11206_v56 = vld [vmem:[#allocation9 + $0x1190] ss:$20 sps:$4 sm:$0xff]  }
 0x41d   :  { %10108 = vmatpush3.bf16.msra.mxu0 %v11180_v58  ;;  %10073 = vmatprep.subr.bf16.mxu1 %v11181_v60  ;;  %v11249_v58 = vld [vmem:[#allocation9 + $0x1428] ss:$20 sps:$4 sm:$0xff]  }
 0x41e   :  { %10109 = vmatprep.subr.bf16.mxu0 %v11183_v61  ;;  %v11257_v60 = vld [vmem:[#allocation9 + $0x165c] ss:$20 sps:$4 sm:$0xff]   ;;  %v11254_v61 = vld [vmem:[#allocation9 + $0x1404] ss:$20 sps:$4 sm:$0xff]  }
 0x41f   :  { %5276 = vmatmul.mubr.bf16.vlgmr.msra.gmra.mxu1 %v12136_v59 }
 0x420   :  { %10074 = vmatpush3.bf16.msra.mxu1 %v11182_v62  ;;  %5361 = vmatprep.mubr.bf16.mxu1 %v12123_v51  ;;  %v11191_v51 = vld [vmem:[#allocation9 + $0xe48] ss:$20 sps:$4 sm:$0xff]   ;;  %v11255_v62 = vld [vmem:[#allocation9 + $0x1658] ss:$20 sps:$4 sm:$0xff]  }
 0x421   :  { %10110 = vmatpush3.bf16.msra.mxu0 %v11184_v1  ;;  %10075 = vmatprep.subr.bf16.mxu1 %v11185_v24  ;;  %v11252_v1 = vld [vmem:[#allocation9 + $0x1400] ss:$20 sps:$4 sm:$0xff]  }
 0x422   :  { %6778 = vmatprep.subr.bf16.mxu0 %v11209_v2  ;;  %v11260_v24 = vld [vmem:[#allocation9 + $0x1634] ss:$20 sps:$4 sm:$0xff]   ;;  %v11258_v2 = vld [vmem:[#allocation9 + $0x1630] ss:$20 sps:$4 sm:$0xff]  }
 0x424   :  { %10076 = vmatpush3.bf16.msra.mxu1 %v11186_v3  ;;  %5403 = vmatmul.mubr.bf16.vlgmr.msra.gmra.mxu0 %v12136_v59  ;;  %v11216_v59 = vld [vmem:[#allocation9 + $0x1360] ss:$20 sps:$4 sm:$0xff]  }
 0x425   :  { %10077 = vmatprep.subr.bf16.mxu1 %v11187_v4  ;;  %6779 = vmatpush1.bf16.msra.mxu0 %v11207_v5  ;;  %v11263_v3 = vld [vmem:[#allocation9 + $0x160c] ss:$20 sps:$4 sm:$0xff]   ;;  %v11261_v4 = vld [vmem:[#allocation9 + $0x1608] ss:$20 sps:$4 sm:$0xff]   ;;  %v11266_v5 = vld [vmem:[#allocation9 + $0x15e4] ss:$20 sps:$4 sm:$0xff]  }
 0x426   :  { %6780 = vmatprep.subr.bf16.mxu0 %v11212_v6  ;;  %v11264_v6 = vld [vmem:[#allocation9 + $0x15e0] ss:$20 sps:$4 sm:$0xff]  }
 0x428   :  { %10078 = vmatpush3.bf16.msra.mxu1 %v11188_v7  ;;  %v11269_v7 = vld [vmem:[#allocation9 + $0x15bc] ss:$20 sps:$4 sm:$0xff]  }
 0x429   :  { %10079 = vmatprep.subr.bf16.mxu1 %v11189_v8  ;;  %6781 = vmatpush1.bf16.msra.mxu0 %v11210_v9  ;;  %v11267_v8 = vld [vmem:[#allocation9 + $0x15b8] ss:$20 sps:$4 sm:$0xff]   ;;  %v11272_v9 = vld [vmem:[#allocation9 + $0x1594] ss:$20 sps:$4 sm:$0xff]  }
 0x42a   :  { %6782 = vmatprep.subr.bf16.mxu0 %v11215_v11  ;;  %v11270_v11 = vld [vmem:[#allocation9 + $0x1590] ss:$20 sps:$4 sm:$0xff]  }
 0x42c   :  { %10080 = vmatpush3.bf16.msra.mxu1 %v11190_v63  ;;  %v11273_v63 = vld [vmem:[#allocation9 + $0x1568] ss:$20 sps:$4 sm:$0xff]  }
 0x42d   :  { %10081 = vmatprep.subr.bf16.mxu1 %v11191_v51  ;;  %6783 = vmatpush1.bf16.msra.mxu0 %v11213_v12  ;;  %v11278_v51 = vld [vmem:[#allocation9 + $0x1544] ss:$20 sps:$4 sm:$0xff]   ;;  %v11276_v12 = vld [vmem:[#allocation9 + $0x1540] ss:$20 sps:$4 sm:$0xff]  }
 0x42e   :  { %6784 = vmatprep.subr.bf16.mxu0 %v11218_v14  ;;  %v11281_v14 = vld [vmem:[#allocation9 + $0x179c] ss:$20 sps:$4 sm:$0xff]  }
 0x430   :  { %10082 = vmatpush3.bf16.msra.mxu1 %v11192_v15  ;;  %v11279_v15 = vld [vmem:[#allocation9 + $0x1798] ss:$20 sps:$4 sm:$0xff]  }
 0x431   :  { %10083 = vmatprep.subr.bf16.mxu1 %v11193_v16  ;;  %6785 = vmatpush1.bf16.msra.mxu0 %v11216_v59  ;;  %v11284_v16 = vld [vmem:[#allocation9 + $0x1774] ss:$20 sps:$4 sm:$0xff]   ;;  %v11282_v59 = vld [vmem:[#allocation9 + $0x1770] ss:$20 sps:$4 sm:$0xff]  }
 0x432   :  { %6786 = vmatprep.subr.bf16.mxu0 %v11221_v34  ;;  %v11287_v34 = vld [vmem:[#allocation9 + $0x174c] ss:$20 sps:$4 sm:$0xff]  }
 0x434   :  { %10084 = vmatpush3.bf16.msra.mxu1 %v11194_v57  ;;  %v11285_v57 = vld [vmem:[#allocation9 + $0x1748] ss:$20 sps:$4 sm:$0xff]  }
 0x435   :  { %10085 = vmatprep.subr.bf16.mxu1 %v11195_v17  ;;  %6787 = vmatpush1.bf16.msra.mxu0 %v11219_v18  ;;  %v11290_v17 = vld [vmem:[#allocation9 + $0x1724] ss:$20 sps:$4 sm:$0xff]   ;;  %v11288_v18 = vld [vmem:[#allocation9 + $0x1720] ss:$20 sps:$4 sm:$0xff]  }
 0x436   :  { %6788 = vmatprep.subr.bf16.mxu0 %v11224_v19  ;;  %v11326_v19 = vld [vmem:[#allocation9 + $0x18dc] ss:$20 sps:$4 sm:$0xff]  }
 0x438   :  { %10086 = vmatpush3.bf16.msra.mxu1 %v11196_v22  ;;  %v11293_v22 = vld [vmem:[#allocation9 + $0x16fc] ss:$20 sps:$4 sm:$0xff]  }
 0x439   :  { %10087 = vmatprep.subr.bf16.mxu1 %v11197_v25  ;;  %6789 = vmatpush1.bf16.msra.mxu0 %v11222_v13  ;;  %v11291_v25 = vld [vmem:[#allocation9 + $0x16f8] ss:$20 sps:$4 sm:$0xff]   ;;  %v11296_v13 = vld [vmem:[#allocation9 + $0x16d4] ss:$20 sps:$4 sm:$0xff]  }
 0x43a   :  { %6790 = vmatprep.subr.bf16.mxu0 %v11227_v23  ;;  %v11294_v23 = vld [vmem:[#allocation9 + $0x16d0] ss:$20 sps:$4 sm:$0xff]  }
 0x43c   :  { %10088 = vmatpush3.bf16.msra.mxu1 %v11198_v26  ;;  %v5105_v26 = vpop.f32.mrf.mxu1 }
 0x43d   :  { %10280 = vmatprep.subr.bf16.mxu1 %v11929_v31  ;;  %6791 = vmatpush1.bf16.msra.mxu0 %v11225_v27  ;;  %v11299_v27 = vld [vmem:[#allocation9 + $0x16ac] ss:$20 sps:$4 sm:$0xff]  }
 0x43e   :  { %6792 = vmatprep.subr.bf16.mxu0 %v11230_v28  ;;  %v11297_v28 = vld [vmem:[#allocation9 + $0x16a8] ss:$20 sps:$4 sm:$0xff]  }
 0x43f   :  { %5362 = vmatmul.mubr.bf16.vlgmr.msra.gmra.mxu1 %v12125_v29  ;;  %v11202_v29 = vld [vmem:[#allocation9 + $0x1230] ss:$20 sps:$4 sm:$0xff]  }
 0x440   :  { %10281 = vmatpush3.bf16.msra.mxu1 %v11199_v52  ;;  %10296 = vmatprep.mubr.msk.bf16.mxu1 %vm11930_vm3, %v11929_v31  ;;  %v5107_v52 = vpop.f32.mrf.mxu1 }
 0x441   :  { %10282 = vmatprep.subr.bf16.mxu1 %v11929_v31  ;;  %6793 = vmatpush1.bf16.msra.mxu0 %v11228_v35 }
 0x442   :  { %6794 = vmatprep.subr.bf16.mxu0 %v11233_v36  ;;  %v11302_v36 = vld [vmem:[#allocation9 + $0x1684] ss:$20 sps:$4 sm:$0xff]  }
 0x444   :  { %10283 = vmatpush3.bf16.msra.mxu1 %v11200_v37  ;;  %v4002_v37 = vld [vmem:[#allocation11 + $0x2] ss:$8 sm:$0xf] }
 0x445   :  { %10284 = vmatprep.subr.bf16.mxu1 %v11929_v31  ;;  %6795 = vmatpush2.bf16.msra.mxu0 %v11231_v40  ;;  %v4003_v40 = vld [vmem:[#allocation11 + $0x2] ss:$8 sm:$0x10] }
 0x446   :  { %6796 = vmatprep.subr.bf16.mxu0 %v11236_v41  ;;  %v11300_v41 = vld [vmem:[#allocation9 + $0x1680] ss:$20 sps:$4 sm:$0xff]  }
 0x448   :  { %10285 = vmatpush3.bf16.msra.mxu1 %v11201_v42  ;;  %v12166_v42 = vor.u32 %v4003_v40, %v4002_v37 }
 0x449   :  { %10286 = vmatprep.subr.bf16.mxu1 %v11929_v31  ;;  %6797 = vmatpush2.bf16.msra.mxu0 %v11234_v43  ;;  %v5109_v43 = vpop.f32.mrf.mxu1 }
 0x44a   :  { %6798 = vmatprep.subr.bf16.mxu0 %v11239_v44 }
 0x44c   :  { %10287 = vmatpush3.bf16.msra.mxu1 %v11202_v29  ;;  %v11305_v29 = vld [vmem:[#allocation9 + $0x13e4] ss:$20 sps:$4 sm:$0xff]  }
 0x44d   :  { %10288 = vmatprep.subr.bf16.mxu1 %v11929_v31  ;;  %6799 = vmatpush2.bf16.msra.mxu0 %v11237_v45  ;;  %v4013_v45 = vrot.slane %v12166_v42, %v12005_v30 }
 0x44e   :  { %6800 = vmatprep.subr.bf16.mxu0 %v11242_v33  ;;  %v4009_v33 = vrot.slane %v12166_v42, %v12008_v32 }
 0x450   :  { %10289 = vmatpush3.bf16.msra.mxu1 %v11203_v46  ;;  %v5111_v46 = vpop.f32.mrf.mxu1 }
 0x451   :  { %10290 = vmatprep.subr.bf16.mxu1 %v11929_v31  ;;  %6801 = vmatpush2.bf16.msra.mxu0 %v11240_v47 }
 0x452   :  { %6802 = vmatprep.subr.bf16.mxu0 %v11245_v48 }
 0x454   :  { %10291 = vmatpush3.bf16.msra.mxu1 %v11204_v21  ;;  %v5108_v21 = vadd.f32 %v5107_v52, %v4013_v45 }
 0x455   :  { %10292 = vmatprep.subr.bf16.mxu1 %v11929_v31  ;;  %6803 = vmatpush2.bf16.msra.mxu0 %v11243_v50  ;;  %v5110_v50 = vadd.f32 %v5109_v43, %v4009_v33 }
 0x456   :  { %6804 = vmatprep.subr.bf16.mxu0 %v11248_v53  ;;  %v5106_v53 = vadd.f32 %v5105_v26, %v4009_v33 }
 0x458   :  { %10293 = vmatpush3.bf16.msra.mxu1 %v11205_v10 }
 0x459   :  { %10294 = vmatprep.subr.bf16.mxu1 %v11929_v31  ;;  %6805 = vmatpush2.bf16.msra.mxu0 %v11246_v54 }
 0x45a   :  { %6806 = vmatprep.subr.bf16.mxu0 %v11251_v55  ;;  %v5112_v55 = vadd.f32 %v5111_v46, %v4013_v45 }
 0x45c   :  { %10295 = vmatpush3.bf16.msra.mxu1 %v11206_v56 }
 0x45d   :  { %6807 = vmatpush2.bf16.msra.mxu0 %v11249_v58  ;;  %6821 = vmatprep.subr.bf16.mxu1 %v11257_v60 }
 0x45e   :  { %6808 = vmatprep.subr.bf16.mxu0 %v11254_v61 }
 0x45f   :  { %10297 = vmatmul.mubr.bf16.vlgmr.msra.gmra.mxu1 %v12143_v49  ;;  %v11275_v49 = vld [vmem:[#allocation9 + $0x156c] ss:$20 sps:$4 sm:$0xff]  }
 0x460   :  { %6822 = vmatpush1.bf16.msra.mxu1 %v11255_v62 }
 0x461   :  { %6809 = vmatpush2.bf16.msra.mxu0 %v11252_v1  ;;  %6823 = vmatprep.subr.bf16.mxu1 %v11260_v24 }
 0x462   :  { %6864 = vmatprep.subr.bf16.mxu0 %v11326_v19  ;;  %v11360_v19 = vld [vmem:[#allocation9 + $0x17e8] ss:$20 sps:$4 sm:$0xff]  }
 0x464   :  { %6824 = vmatpush1.bf16.msra.mxu1 %v11258_v2  ;;  %v5148_v35 = vpop.f32.mrf.mxu0 }
 0x465   :  { %6825 = vmatprep.subr.bf16.mxu1 %v11263_v3  ;;  %v5149_v60 = vadd.f32 %v5148_v35, %v5106_v53  ;;  %v4021_v35 = vrot.slane %v12166_v42, %v12020_v39 }
 0x466   :  { %v5150_v44 = vpop.f32.mrf.mxu0 }
 0x467   :  { %v5151_v56 = vadd.f32 %v5150_v44, %v5108_v21 }
 0x468   :  { %6826 = vmatpush1.bf16.msra.mxu1 %v11261_v4  ;;  %v5152_v47 = vpop.f32.mrf.mxu0 }
 0x469   :  { %6827 = vmatprep.subr.bf16.mxu1 %v11266_v5  ;;  %v5153_v58 = vadd.f32 %v5152_v47, %v5110_v50 }
 0x46a   :  { %v5154_v10 = vpop.f32.mrf.mxu0 }
 0x46b   :  { %v5155_v62 = vadd.f32 %v5154_v10, %v5112_v55 }
 0x46c   :  { %6828 = vmatpush1.bf16.msra.mxu1 %v11264_v6 }
 0x46d   :  { %6829 = vmatprep.subr.bf16.mxu1 %v11269_v7 }
 0x470   :  { %6830 = vmatpush1.bf16.msra.mxu1 %v11267_v8 }
 0x471   :  { %6831 = vmatprep.subr.bf16.mxu1 %v11272_v9 }
 0x474   :  { %6832 = vmatpush1.bf16.msra.mxu1 %v11270_v11  ;;  %v11324_v11 = vld [vmem:[#allocation9 + $0x18d8] ss:$20 sps:$4 sm:$0xff]  }
 0x475   :  { %6833 = vmatprep.subr.bf16.mxu1 %v11275_v49 }
 0x478   :  { %6834 = vmatpush1.bf16.msra.mxu1 %v11273_v63  ;;  %v11332_v63 = vld [vmem:[#allocation9 + $0x18b4] ss:$20 sps:$4 sm:$0xff]  }
 0x479   :  { %6835 = vmatprep.subr.bf16.mxu1 %v11278_v51  ;;  %v11330_v51 = vld [vmem:[#allocation9 + $0x18b0] ss:$20 sps:$4 sm:$0xff]  }
 0x47c   :  { %6836 = vmatpush1.bf16.msra.mxu1 %v11276_v12  ;;  %v11338_v12 = vld [vmem:[#allocation9 + $0x188c] ss:$20 sps:$4 sm:$0xff]  }
 0x47d   :  { %6837 = vmatprep.subr.bf16.mxu1 %v11281_v14  ;;  %v11336_v14 = vld [vmem:[#allocation9 + $0x1888] ss:$20 sps:$4 sm:$0xff]  }
 0x480   :  { %6838 = vmatpush2.bf16.msra.mxu1 %v11279_v15  ;;  %v11344_v15 = vld [vmem:[#allocation9 + $0x1864] ss:$20 sps:$4 sm:$0xff]  }
 0x481   :  { %6839 = vmatprep.subr.bf16.mxu1 %v11284_v16  ;;  %v11342_v16 = vld [vmem:[#allocation9 + $0x1860] ss:$20 sps:$4 sm:$0xff]  }
 0x484   :  { %6840 = vmatpush2.bf16.msra.mxu1 %v11282_v59  ;;  %v11350_v59 = vld [vmem:[#allocation9 + $0x183c] ss:$20 sps:$4 sm:$0xff]  }
 0x485   :  { %6841 = vmatprep.subr.bf16.mxu1 %v11287_v34  ;;  %v11348_v34 = vld [vmem:[#allocation9 + $0x1838] ss:$20 sps:$4 sm:$0xff]  }
 0x488   :  { %6842 = vmatpush2.bf16.msra.mxu1 %v11285_v57  ;;  %v11356_v57 = vld [vmem:[#allocation9 + $0x1814] ss:$20 sps:$4 sm:$0xff]  }
 0x489   :  { %6843 = vmatprep.subr.bf16.mxu1 %v11290_v17  ;;  %v11354_v17 = vld [vmem:[#allocation9 + $0x1810] ss:$20 sps:$4 sm:$0xff]  }
 0x48c   :  { %6844 = vmatpush2.bf16.msra.mxu1 %v11288_v18  ;;  %v11362_v18 = vld [vmem:[#allocation9 + $0x17ec] ss:$20 sps:$4 sm:$0xff]  }
 0x48d   :  { %6845 = vmatprep.subr.bf16.mxu1 %v11293_v22  ;;  %v11368_v22 = vld [vmem:[#allocation9 + $0x17c4] ss:$20 sps:$4 sm:$0xff]  }
 0x490   :  { %6846 = vmatpush2.bf16.msra.mxu1 %v11291_v25  ;;  %v11366_v25 = vld [vmem:[#allocation9 + $0x17c0] ss:$20 sps:$4 sm:$0xff]  }
 0x491   :  { %6847 = vmatprep.subr.bf16.mxu1 %v11296_v13  ;;  %v11374_v13 = vld [vmem:[#allocation9 + $0x1664] ss:$20 sps:$4 sm:$0xff]  }
 0x494   :  { %6848 = vmatpush2.bf16.msra.mxu1 %v11294_v23 }
 0x495   :  { %6849 = vmatprep.subr.bf16.mxu1 %v11299_v27 }
 0x498   :  { %6850 = vmatpush2.bf16.msra.mxu1 %v11297_v28 }
 0x499   :  { %6851 = vmatprep.subr.bf16.mxu1 %v11302_v36  ;;  %v4017_v36 = vrot.slane %v12166_v42, %v12017_v38 }
 0x49c   :  { %6852 = vmatpush2.bf16.msra.mxu1 %v11300_v41 }
 0x49d   :  { %6907 = vmatprep.subr.bf16.mxu1 %v11305_v29 }
 0x49f   :  { %v5191_v48 = vpop.f32.mrf.mxu1 }
 0x4a0   :  { %v5192_v2 = vadd.f32 %v5191_v48, %v5149_v60 }
 0x4a1   :  { %v5193_v54 = vpop.f32.mrf.mxu1 }
 0x4a2   :  { %v5194_v1 = vadd.f32 %v5193_v54, %v5151_v56  ;;  %v5452_v8 = vmax.f32 %v5192_v2, 0.0  ;;  %v11303_v2 = vld [vmem:[#allocation9 + $0x13e0] ss:$20 sps:$4 sm:$0xff]  }
 0x4a3   :  { %v5195_v61 = vpop.f32.mrf.mxu1 }
 0x4a4   :  { %v5196_v24 = vadd.f32 %v5195_v61, %v5153_v58  ;;  %v5453_v6 = vmax.f32 %v5194_v1, 0.0  ;;  %v5234_v23 = vpop.f32.mrf.mxu0 }
 0x4a5   :  { %v5197_v3 = vpop.f32.mrf.mxu1  ;;  %v5235_v43 = vadd.f32 %v5234_v23, %v4017_v36  ;;  %v11347_v23 = vld [vmem:[#allocation9 + $0x14d4] ss:$20 sps:$4 sm:$0xff]  }
 0x4a6   :  { %v5198_v4 = vadd.f32 %v5197_v3, %v5155_v62  ;;  %v5457_v5 = vmax.f32 %v5196_v24, 0.0  ;;  %v5236_v26 = vpop.f32.mrf.mxu0 }
 0x4a7   :  { %v5237_v41 = vadd.f32 %v5236_v26, %v4021_v35 }
 0x4a8   :  { %v5458_v7 = vmax.f32 %v5198_v4, 0.0  ;;  %v12174_v49 = vpack.c.bf16 %v5457_v5, %v5452_v8  ;;  %v5238_v27 = vpop.f32.mrf.mxu0  ;;  %v11308_v4 = vld [vmem:[#allocation9 + $0x13bc] ss:$20 sps:$4 sm:$0xff]   ;;  %v11306_v5 = vld [vmem:[#allocation9 + $0x13b8] ss:$20 sps:$4 sm:$0xff]  }
 0x4a9   :  { %v5239_v29 = vadd.f32 %v5238_v27, %v4017_v36  ;;  %v11314_v8 = vld [vmem:[#allocation9 + $0x136c] ss:$20 sps:$4 sm:$0xff]   ;;  %v11345_v27 = vld [vmem:[#allocation9 + $0x14d0] ss:$20 sps:$4 sm:$0xff]   ;;  %v4025_v36 = vrot.slane %v12166_v42, %v12040_v20 }
 0x4aa   :  { %v12172_v9 = vpack.c.bf16 %v5458_v7, %v5453_v6  ;;  %v5240_v28 = vpop.f32.mrf.mxu0  ;;  %v11311_v6 = vld [vmem:[#allocation9 + $0x1394] ss:$20 sps:$4 sm:$0xff]   ;;  %v11309_v7 = vld [vmem:[#allocation9 + $0x1390] ss:$20 sps:$4 sm:$0xff]   ;;  %v11363_v42 = vld [vmem:[#allocation9 + $0x1458] ss:$20 sps:$4 sm:$0xff]  }
 0x4ab   :  { %v5241_v48 = vadd.f32 %v5240_v28, %v4021_v35 }
 0x4ac   :  { %6810 = vmatprep.mubr.bf16.mxu0 %v12172_v9 }
 0x4ad   :  { %6811 = vmatmul.mubr.bf16.vlgmr.msra.gmra.mxu0 %v12174_v49 }
 0x4ae   :  { %6865 = vmatpush1.bf16.msra.mxu0 %v11324_v11  ;;  %6896 = vmatprep.mubr.bf16.mxu0 %v11927_v0  ;;  %v11312_v11 = vld [vmem:[#allocation9 + $0x1368] ss:$20 sps:$4 sm:$0xff]  }
 0x4af   :  { %6866 = vmatprep.subr.bf16.mxu0 %v11332_v63  ;;  %v11317_v63 = vld [vmem:[#allocation9 + $0x1344] ss:$20 sps:$4 sm:$0xff]  }
 0x4b2   :  { %6867 = vmatpush1.bf16.msra.mxu0 %v11330_v51  ;;  %v11315_v51 = vld [vmem:[#allocation9 + $0x1340] ss:$20 sps:$4 sm:$0xff]  }
 0x4b3   :  { %6868 = vmatprep.subr.bf16.mxu0 %v11338_v12  ;;  %v11320_v12 = vld [vmem:[#allocation9 + $0x131c] ss:$20 sps:$4 sm:$0xff]  }
 0x4b6   :  { %6869 = vmatpush1.bf16.msra.mxu0 %v11336_v14  ;;  %v11318_v14 = vld [vmem:[#allocation9 + $0x1318] ss:$20 sps:$4 sm:$0xff]  }
 0x4b7   :  { %6870 = vmatprep.subr.bf16.mxu0 %v11344_v15  ;;  %v11323_v15 = vld [vmem:[#allocation9 + $0x12f4] ss:$20 sps:$4 sm:$0xff]  }
 0x4ba   :  { %6871 = vmatpush1.bf16.msra.mxu0 %v11342_v16  ;;  %v11321_v16 = vld [vmem:[#allocation9 + $0x12f0] ss:$20 sps:$4 sm:$0xff]  }
 0x4bb   :  { %6872 = vmatprep.subr.bf16.mxu0 %v11350_v59  ;;  %v11329_v59 = vld [vmem:[#allocation9 + $0x12cc] ss:$20 sps:$4 sm:$0xff]  }
 0x4be   :  { %6873 = vmatpush1.bf16.msra.mxu0 %v11348_v34  ;;  %v11327_v34 = vld [vmem:[#allocation9 + $0x12c8] ss:$20 sps:$4 sm:$0xff]  }
 0x4bf   :  { %6874 = vmatprep.subr.bf16.mxu0 %v11356_v57  ;;  %v11335_v57 = vld [vmem:[#allocation9 + $0x1524] ss:$20 sps:$4 sm:$0xff]  }
 0x4c2   :  { %6875 = vmatpush1.bf16.msra.mxu0 %v11354_v17 }
 0x4c3   :  { %6876 = vmatprep.subr.bf16.mxu0 %v11362_v18  ;;  %v11333_v18 = vld [vmem:[#allocation9 + $0x1520] ss:$20 sps:$4 sm:$0xff]  }
 0x4c4   :  { %v5320_v52 = vpop.f32.mrf.mxu0 }
 0x4c6   :  { %6877 = vmatpush1.bf16.msra.mxu0 %v11360_v19  ;;  %v5322_v37 = vpop.f32.mrf.mxu0  ;;  %v11341_v19 = vld [vmem:[#allocation9 + $0x14fc] ss:$20 sps:$4 sm:$0xff]  }
 0x4c7   :  { %6878 = vmatprep.subr.bf16.mxu0 %v11368_v22 }
 0x4c8   :  { %v5324_v33 = vpop.f32.mrf.mxu0 }
 0x4ca   :  { %6879 = vmatpush1.bf16.msra.mxu0 %v11366_v25  ;;  %v5326_v55 = vpop.f32.mrf.mxu0  ;;  %v11339_v25 = vld [vmem:[#allocation9 + $0x14f8] ss:$20 sps:$4 sm:$0xff]  }
 0x4cb   :  { %6950 = vmatprep.subr.bf16.mxu0 %v11374_v13 }
 0x4df   :  { %v5277_v40 = vpop.f32.mrf.mxu1 }
 0x4e0   :  { %v5278_v46 = vadd.f32 %v5277_v40, %v5235_v43  ;;  %v11351_v40 = vld [vmem:[#allocation9 + $0x14a8] ss:$20 sps:$4 sm:$0xff]   ;;  %v11359_v43 = vld [vmem:[#allocation9 + $0x1484] ss:$20 sps:$4 sm:$0xff]  }
 0x4e1   :  { %v5279_v44 = vpop.f32.mrf.mxu1 }
 0x4e2   :  { %v5280_v45 = vadd.f32 %v5279_v44, %v5237_v41  ;;  %v5321_v56 = vadd.f32 %v5320_v52, %v5278_v46  ;;  %v11353_v52 = vld [vmem:[#allocation9 + $0x14ac] ss:$20 sps:$4 sm:$0xff]   ;;  %v11365_v46 = vld [vmem:[#allocation9 + $0x145c] ss:$20 sps:$4 sm:$0xff]  }
 0x4e3   :  { %v5281_v47 = vpop.f32.mrf.mxu1 }
 0x4e4   :  { %v5282_v21 = vadd.f32 %v5281_v47, %v5239_v29  ;;  %v5323_v53 = vadd.f32 %v5322_v37, %v5280_v45  ;;  %v5454_v1 = vmax.f32 %v5321_v56, 0.0  ;;  %v10111_v13 = vpop.f32.mrf.mxu0  ;;  %v11357_v45 = vld [vmem:[#allocation9 + $0x1480] ss:$20 sps:$4 sm:$0xff]  }
 0x4e5   :  { %v5283_v50 = vpop.f32.mrf.mxu1 }
 0x4e6   :  { %v5325_v10 = vadd.f32 %v5324_v33, %v5282_v21  ;;  %v5284_v54 = vadd.f32 %v5283_v50, %v5241_v48  ;;  %v5455_v61 = vmax.f32 %v5323_v53, 0.0  ;;  %v10112_v28 = vpop.f32.mrf.mxu0 }
 0x4e7   :  { %v10113_v47 = vadd.f32 %v10112_v28, %v10111_v13  ;;  %v11404_v13 = vld [vmem:[#allocation9 + $0x159c] ss:$20 sps:$4 sm:$0xff]   ;;  %v11410_v28 = vld [vmem:[#allocation9 + $0x1574] ss:$20 sps:$4 sm:$0xff]  }
 0x4e8   :  { %v5327_v58 = vadd.f32 %v5326_v55, %v5284_v54  ;;  %v5459_v60 = vmax.f32 %v5325_v10, 0.0  ;;  %v10114_v41 = vpop.f32.mrf.mxu0  ;;  %v11371_v54 = vld [vmem:[#allocation9 + $0x1434] ss:$20 sps:$4 sm:$0xff]  }
 0x4ea   :  { %v5460_v62 = vmax.f32 %v5327_v58, 0.0  ;;  %v12185_v3 = vpack.c.bf16 %v5459_v60, %v5454_v1  ;;  %v10115_v33 = vpop.f32.mrf.mxu0  ;;  %v11377_v1 = vld [vmem:[#allocation9 + $0x140c] ss:$20 sps:$4 sm:$0xff]  }
 0x4eb   :  { %v10116_v50 = vadd.f32 %v10115_v33, %v10114_v41  ;;  %v11414_v41 = vld [vmem:[#allocation9 + $0x1548] ss:$20 sps:$4 sm:$0xff]  }
 0x4ec   :  { %v12183_v24 = vpack.c.bf16 %v5460_v62, %v5455_v61  ;;  %v11369_v61 = vld [vmem:[#allocation9 + $0x1430] ss:$20 sps:$4 sm:$0xff]   ;;  %v11423_v33 = vld [vmem:[#allocation9 + $0x17c8] ss:$20 sps:$4 sm:$0xff]  }
 0x4ee   :  { %6853 = vmatprep.mubr.bf16.mxu1 %v12183_v24 }
 0x4ef   :  { %6854 = vmatmul.mubr.bf16.vlgmr.msra.gmra.mxu1 %v12185_v3 }
 0x4f0   :  { %6908 = vmatpush1.bf16.msra.mxu1 %v11303_v2  ;;  %6939 = vmatprep.mubr.bf16.mxu1 %v12172_v9 }
 0x4f1   :  { %6909 = vmatprep.subr.bf16.mxu1 %v11308_v4 }
 0x4f4   :  { %6910 = vmatpush1.bf16.msra.mxu1 %v11306_v5  ;;  %v11372_v5 = vld [vmem:[#allocation9 + $0x1660] ss:$20 sps:$4 sm:$0xff]  }
 0x4f5   :  { %6911 = vmatprep.subr.bf16.mxu1 %v11311_v6 }
 0x4f8   :  { %6912 = vmatpush1.bf16.msra.mxu1 %v11309_v7  ;;  %v11375_v7 = vld [vmem:[#allocation9 + $0x1408] ss:$20 sps:$4 sm:$0xff]  }
 0x4f9   :  { %6913 = vmatprep.subr.bf16.mxu1 %v11314_v8  ;;  %v11380_v8 = vld [vmem:[#allocation9 + $0x163c] ss:$20 sps:$4 sm:$0xff]  }
 0x4fc   :  { %6914 = vmatpush1.bf16.msra.mxu1 %v11312_v11  ;;  %v11383_v11 = vld [vmem:[#allocation9 + $0x18e4] ss:$20 sps:$4 sm:$0xff]  }
 0x4fd   :  { %6915 = vmatprep.subr.bf16.mxu1 %v11317_v63  ;;  %v11378_v63 = vld [vmem:[#allocation9 + $0x1638] ss:$20 sps:$4 sm:$0xff]  }
 0x4ff   :  { %v10089_v17 = vpop.f32.mrf.mxu1 }
 0x500   :  { %6916 = vmatpush1.bf16.msra.mxu1 %v11315_v51  ;;  %v11381_v51 = vld [vmem:[#allocation9 + $0x18e0] ss:$20 sps:$4 sm:$0xff]  }
 0x501   :  { %6917 = vmatprep.subr.bf16.mxu1 %v11320_v12  ;;  %v10090_v22 = vpop.f32.mrf.mxu1  ;;  %v11386_v12 = vld [vmem:[#allocation9 + $0x1614] ss:$20 sps:$4 sm:$0xff]  }
 0x502   :  { %v10091_v37 = vadd.f32 %v10090_v22, %v10089_v17  ;;  %v11393_v17 = vld [vmem:[#allocation9 + $0x1890] ss:$20 sps:$4 sm:$0xff]   ;;  %v11396_v22 = vld [vmem:[#allocation9 + $0x15c0] ss:$20 sps:$4 sm:$0xff]  }
 0x503   :  { %v10092_v26 = vpop.f32.mrf.mxu1 }
 0x504   :  { %6918 = vmatpush1.bf16.msra.mxu1 %v11318_v14  ;;  %v5364_v29 = vadd.f32 %v10091_v37, %v4025_v36  ;;  %v11389_v14 = vld [vmem:[#allocation9 + $0x18bc] ss:$20 sps:$4 sm:$0xff]   ;;  %v11416_v37 = vld [vmem:[#allocation9 + $0x154c] ss:$20 sps:$4 sm:$0xff]  }
 0x505   :  { %6919 = vmatprep.subr.bf16.mxu1 %v11323_v15  ;;  %v10093_v35 = vpop.f32.mrf.mxu1  ;;  %v11384_v15 = vld [vmem:[#allocation9 + $0x1610] ss:$20 sps:$4 sm:$0xff]  }
 0x506   :  { %v10094_v44 = vadd.f32 %v10093_v35, %v10092_v26  ;;  %v5405_v53 = vadd.f32 %v10113_v47, %v5364_v29  ;;  %v11402_v26 = vld [vmem:[#allocation9 + $0x1598] ss:$20 sps:$4 sm:$0xff]   ;;  %v11408_v35 = vld [vmem:[#allocation9 + $0x1570] ss:$20 sps:$4 sm:$0xff]   ;;  %v11429_v47 = vld [vmem:[#allocation9 + $0x17a8] ss:$20 sps:$4 sm:$0xff]  }
 0x507   :  { %v11425_v29 = vld [vmem:[#allocation9 + $0x17cc] ss:$20 sps:$4 sm:$0xff]  }
 0x508   :  { %6920 = vmatpush1.bf16.msra.mxu1 %v11321_v16  ;;  %v5367_v48 = vadd.f32 %v10094_v44, %v4025_v36  ;;  %v11387_v16 = vld [vmem:[#allocation9 + $0x18b8] ss:$20 sps:$4 sm:$0xff]  }
 0x509   :  { %6921 = vmatprep.subr.bf16.mxu1 %v11329_v59  ;;  %v11392_v59 = vld [vmem:[#allocation9 + $0x15ec] ss:$20 sps:$4 sm:$0xff]   ;;  %v11422_v44 = vld [vmem:[#allocation9 + $0x17a4] ss:$20 sps:$4 sm:$0xff]  }
 0x50a   :  { %v5408_v56 = vadd.f32 %v10116_v50, %v5367_v48  ;;  %v11411_v36 = vld [vmem:[#allocation9 + $0x1818] ss:$20 sps:$4 sm:$0xff]   ;;  %v11433_v50 = vld [vmem:[#allocation9 + $0x1754] ss:$20 sps:$4 sm:$0xff]  }
 0x50b   :  { %v11426_v48 = vld [vmem:[#allocation9 + $0x1778] ss:$20 sps:$4 sm:$0xff]  }
 0x50c   :  { %6922 = vmatpush1.bf16.msra.mxu1 %v11327_v34  ;;  %v11395_v34 = vld [vmem:[#allocation9 + $0x1894] ss:$20 sps:$4 sm:$0xff]  }
 0x50d   :  { %6923 = vmatprep.subr.bf16.mxu1 %v11335_v57  ;;  %v11390_v57 = vld [vmem:[#allocation9 + $0x15e8] ss:$20 sps:$4 sm:$0xff]  }
 0x510   :  { %6924 = vmatpush2.bf16.msra.mxu1 %v11333_v18  ;;  %v11398_v18 = vld [vmem:[#allocation9 + $0x15c4] ss:$20 sps:$4 sm:$0xff]  }
 0x511   :  { %6925 = vmatprep.subr.bf16.mxu1 %v11341_v19  ;;  %v11401_v19 = vld [vmem:[#allocation9 + $0x186c] ss:$20 sps:$4 sm:$0xff]  }
 0x514   :  { %6926 = vmatpush2.bf16.msra.mxu1 %v11339_v25  ;;  %v11399_v25 = vld [vmem:[#allocation9 + $0x1868] ss:$20 sps:$4 sm:$0xff]  }
 0x515   :  { %6927 = vmatprep.subr.bf16.mxu1 %v11347_v23  ;;  %v11407_v23 = vld [vmem:[#allocation9 + $0x1844] ss:$20 sps:$4 sm:$0xff]  }
 0x518   :  { %6928 = vmatpush2.bf16.msra.mxu1 %v11345_v27  ;;  %v11405_v27 = vld [vmem:[#allocation9 + $0x1840] ss:$20 sps:$4 sm:$0xff]  }
 0x519   :  { %6929 = vmatprep.subr.bf16.mxu1 %v11353_v52  ;;  %v11413_v52 = vld [vmem:[#allocation9 + $0x181c] ss:$20 sps:$4 sm:$0xff]  }
 0x51c   :  { %6930 = vmatpush2.bf16.msra.mxu1 %v11351_v40  ;;  %v11419_v40 = vld [vmem:[#allocation9 + $0x17f4] ss:$20 sps:$4 sm:$0xff]  }
 0x51d   :  { %6931 = vmatprep.subr.bf16.mxu1 %v11359_v43  ;;  %v11417_v43 = vld [vmem:[#allocation9 + $0x17f0] ss:$20 sps:$4 sm:$0xff]  }
 0x51f   :  { %v5445_v21 = vpop.f32.mrf.mxu1 }
 0x520   :  { %6932 = vmatpush2.bf16.msra.mxu1 %v11357_v45  ;;  %v5446_v55 = vadd.f32 %v5445_v21, %v5405_v53  ;;  %v11420_v45 = vld [vmem:[#allocation9 + $0x17a0] ss:$20 sps:$4 sm:$0xff]   ;;  %v11430_v21 = vld [vmem:[#allocation9 + $0x1668] ss:$20 sps:$4 sm:$0xff]  }
 0x521   :  { %v10298_v10 = vpop.f32.mrf.mxu1  ;;  %6933 = vmatprep.subr.bf16.mxu1 %v11365_v46  ;;  %v11428_v46 = vld [vmem:[#allocation9 + $0x177c] ss:$20 sps:$4 sm:$0xff]   ;;  %v11434_v53 = vld [vmem:[#allocation9 + $0x1780] ss:$20 sps:$4 sm:$0xff]  }
 0x522   :  { %v5456_v2 = vmax.f32 %v5446_v55, 0.0  ;;  %v11435_v10 = vld [vmem:[#allocation9 + $0x1640] ss:$20 sps:$4 sm:$0xff]   ;;  %v11439_v55 = vld [vmem:[#allocation9 + $0x1758] ss:$20 sps:$4 sm:$0xff]  }
 0x523   :  { %v5448_v58 = vpop.f32.mrf.mxu1 }
 0x524   :  { %v5449_v60 = vadd.f32 %v5448_v58, %v5408_v56  ;;  %6934 = vmatpush2.bf16.msra.mxu1 %v11363_v42  ;;  %v11431_v42 = vld [vmem:[#allocation9 + $0x1750] ss:$20 sps:$4 sm:$0xff]   ;;  %v11436_v56 = vld [vmem:[#allocation9 + $0x1728] ss:$20 sps:$4 sm:$0xff]   ;;  %v11440_v58 = vld [vmem:[#allocation9 + $0x1618] ss:$20 sps:$4 sm:$0xff]  }
 0x525   :  { %v10299_v62 = vpop.f32.mrf.mxu1  ;;  %6935 = vmatprep.subr.bf16.mxu1 %v11371_v54  ;;  %v11438_v54 = vld [vmem:[#allocation9 + $0x172c] ss:$20 sps:$4 sm:$0xff]  }
 0x526   :  { %v5461_v4 = vmax.f32 %v5449_v60, 0.0  ;;  %v11443_v60 = vld [vmem:[#allocation9 + $0x1704] ss:$20 sps:$4 sm:$0xff]   ;;  %v11441_v62 = vld [vmem:[#allocation9 + $0x1700] ss:$20 sps:$4 sm:$0xff]  }
 0x528   :  { %v12192_v6 = vpack.c.bf16 %v5461_v4, %v5456_v2  ;;  %6936 = vmatpush2.bf16.msra.mxu1 %v11369_v61  ;;  %v11444_v61 = vld [vmem:[#allocation9 + $0x1730] ss:$20 sps:$4 sm:$0xff]   ;;  %v11446_v4 = vld [vmem:[#allocation9 + $0x16d8] ss:$20 sps:$4 sm:$0xff]  }
 0x529   :  { %6937 = vmatprep.subr.bf16.mxu1 %v11377_v1  ;;  %v11445_v1 = vld [vmem:[#allocation9 + $0x15f0] ss:$20 sps:$4 sm:$0xff]  }
 0x52a   :  { %6897 = vmatmul.mubr.bf16.vlgmr.msra.gmra.mxu0 %v12192_v6  ;;  %v11448_v2 = vld [vmem:[#allocation9 + $0x16dc] ss:$20 sps:$4 sm:$0xff]  }
 0x52b   :  { %6951 = vmatpush1.bf16.msra.mxu0 %v11372_v5  ;;  %6982 = vmatprep.mubr.bf16.mxu0 %v12183_v24  ;;  %v11450_v5 = vld [vmem:[#allocation9 + $0x15c8] ss:$20 sps:$4 sm:$0xff]  }
 0x52c   :  { %6938 = vmatpush2.bf16.msra.mxu1 %v11375_v7  ;;  %6952 = vmatprep.subr.bf16.mxu0 %v11380_v8  ;;  %v11453_v7 = vld [vmem:[#allocation9 + $0x16b4] ss:$20 sps:$4 sm:$0xff]  }
 0x52d   :  { %6993 = vmatprep.subr.bf16.mxu1 %v11383_v11  ;;  %v11454_v8 = vld [vmem:[#allocation9 + $0x16e0] ss:$20 sps:$4 sm:$0xff]   ;;  %v11451_v11 = vld [vmem:[#allocation9 + $0x16b0] ss:$20 sps:$4 sm:$0xff]  }
 0x52f   :  { %6940 = vmatmul.mubr.bf16.vlgmr.msra.gmra.mxu1 %v12174_v49  ;;  %6953 = vmatpush1.bf16.msra.mxu0 %v11378_v63  ;;  %v11455_v63 = vld [vmem:[#allocation9 + $0x15a0] ss:$20 sps:$4 sm:$0xff]  }
 0x530   :  { %6994 = vmatpush1.bf16.msra.mxu1 %v11381_v51  ;;  %6954 = vmatprep.subr.bf16.mxu0 %v11386_v12  ;;  %v11458_v51 = vld [vmem:[#allocation9 + $0x168c] ss:$20 sps:$4 sm:$0xff]  }
 0x531   :  { %6995 = vmatprep.subr.bf16.mxu1 %v11389_v14  ;;  %7025 = vmatprep.mubr.bf16.mxu1 %v11927_v0  ;;  %v11459_v12 = vld [vmem:[#allocation9 + $0x16b8] ss:$20 sps:$4 sm:$0xff]   ;;  %v11456_v14 = vld [vmem:[#allocation9 + $0x1688] ss:$20 sps:$4 sm:$0xff]  }
 0x533   :  { %6955 = vmatpush1.bf16.msra.mxu0 %v11384_v15  ;;  %v11460_v15 = vld [vmem:[#allocation9 + $0x1578] ss:$20 sps:$4 sm:$0xff]  }
 0x534   :  { %6996 = vmatpush1.bf16.msra.mxu1 %v11387_v16  ;;  %6956 = vmatprep.subr.bf16.mxu0 %v11392_v59  ;;  %v11461_v16 = vld [vmem:[#allocation9 + $0x1528] ss:$20 sps:$4 sm:$0xff]   ;;  %v11463_v59 = vld [vmem:[#allocation9 + $0x1690] ss:$20 sps:$4 sm:$0xff]  }
 0x535   :  { %6997 = vmatprep.subr.bf16.mxu1 %v11395_v34  ;;  %v11462_v34 = vld [vmem:[#allocation9 + $0x13e8] ss:$20 sps:$4 sm:$0xff]  }
 0x537   :  { %6957 = vmatpush1.bf16.msra.mxu0 %v11390_v57  ;;  %v11464_v57 = vld [vmem:[#allocation9 + $0x1550] ss:$20 sps:$4 sm:$0xff]  }
 0x538   :  { %6998 = vmatpush1.bf16.msra.mxu1 %v11393_v17  ;;  %6958 = vmatprep.subr.bf16.mxu0 %v11398_v18  ;;  %v11465_v17 = vld [vmem:[#allocation9 + $0x1500] ss:$20 sps:$4 sm:$0xff]   ;;  %v11489_v18 = vld [vmem:[#allocation9 + $0x1a1c] ss:$20 sps:$4 sm:$0xff]  }
 0x539   :  { %6999 = vmatprep.subr.bf16.mxu1 %v11401_v19  ;;  %v11466_v19 = vld [vmem:[#allocation9 + $0x13c0] ss:$20 sps:$4 sm:$0xff]  }
 0x53b   :  { %6959 = vmatpush1.bf16.msra.mxu0 %v11396_v22  ;;  %v11467_v22 = vld [vmem:[#allocation9 + $0x14d8] ss:$20 sps:$4 sm:$0xff]  }
 0x53c   :  { %7000 = vmatpush1.bf16.msra.mxu1 %v11399_v25  ;;  %6960 = vmatprep.subr.bf16.mxu0 %v11404_v13  ;;  %v11487_v25 = vld [vmem:[#allocation9 + $0x1a18] ss:$20 sps:$4 sm:$0xff]   ;;  %v11492_v13 = vld [vmem:[#allocation9 + $0x19f4] ss:$20 sps:$4 sm:$0xff]  }
 0x53d   :  { %7001 = vmatprep.subr.bf16.mxu1 %v11407_v23  ;;  %v11468_v23 = vld [vmem:[#allocation9 + $0x1398] ss:$20 sps:$4 sm:$0xff]  }
 0x53f   :  { %6961 = vmatpush1.bf16.msra.mxu0 %v11402_v26  ;;  %v11469_v26 = vld [vmem:[#allocation9 + $0x14b0] ss:$20 sps:$4 sm:$0xff]  }
 0x540   :  { %7002 = vmatpush1.bf16.msra.mxu1 %v11405_v27  ;;  %6962 = vmatprep.subr.bf16.mxu0 %v11410_v28  ;;  %v11490_v27 = vld [vmem:[#allocation9 + $0x19f0] ss:$20 sps:$4 sm:$0xff]   ;;  %v11495_v28 = vld [vmem:[#allocation9 + $0x19cc] ss:$20 sps:$4 sm:$0xff]  }
 0x541   :  { %7003 = vmatprep.subr.bf16.mxu1 %v11413_v52  ;;  %v11470_v52 = vld [vmem:[#allocation9 + $0x1370] ss:$20 sps:$4 sm:$0xff]  }
 0x543   :  { %6963 = vmatpush1.bf16.msra.mxu0 %v11408_v35  ;;  %v11493_v35 = vld [vmem:[#allocation9 + $0x19c8] ss:$20 sps:$4 sm:$0xff]  }
 0x544   :  { %7004 = vmatpush1.bf16.msra.mxu1 %v11411_v36  ;;  %6964 = vmatprep.subr.bf16.mxu0 %v11416_v37  ;;  %v11498_v36 = vld [vmem:[#allocation9 + $0x19a4] ss:$20 sps:$4 sm:$0xff]   ;;  %v11472_v37 = vld [vmem:[#allocation9 + $0x1348] ss:$20 sps:$4 sm:$0xff]  }
 0x545   :  { %7005 = vmatprep.subr.bf16.mxu1 %v11419_v40  ;;  %v11473_v40 = vld [vmem:[#allocation9 + $0x1460] ss:$20 sps:$4 sm:$0xff]  }
 0x547   :  { %6965 = vmatpush1.bf16.msra.mxu0 %v11414_v41  ;;  %v11501_v41 = vld [vmem:[#allocation9 + $0x197c] ss:$20 sps:$4 sm:$0xff]  }
 0x548   :  { %7006 = vmatpush1.bf16.msra.mxu1 %v11417_v43  ;;  %6966 = vmatprep.subr.bf16.mxu0 %v11422_v44  ;;  %v11474_v43 = vld [vmem:[#allocation9 + $0x1320] ss:$20 sps:$4 sm:$0xff]   ;;  %v11475_v44 = vld [vmem:[#allocation9 + $0x1438] ss:$20 sps:$4 sm:$0xff]  }
 0x549   :  { %7007 = vmatprep.subr.bf16.mxu1 %v11425_v29  ;;  %v11499_v29 = vld [vmem:[#allocation9 + $0x1978] ss:$20 sps:$4 sm:$0xff]  }
 0x54b   :  { %6967 = vmatpush2.bf16.msra.mxu0 %v11420_v45  ;;  %v11504_v45 = vld [vmem:[#allocation9 + $0x1954] ss:$20 sps:$4 sm:$0xff]  }
 0x54c   :  { %7008 = vmatpush1.bf16.msra.mxu1 %v11423_v33  ;;  %6968 = vmatprep.subr.bf16.mxu0 %v11428_v46  ;;  %v11476_v33 = vld [vmem:[#allocation9 + $0x12f8] ss:$20 sps:$4 sm:$0xff]   ;;  %v11477_v46 = vld [vmem:[#allocation9 + $0x1410] ss:$20 sps:$4 sm:$0xff]  }
 0x54d   :  { %10148 = vmatprep.subr.bf16.mxu1 %v11429_v47  ;;  %v11502_v47 = vld [vmem:[#allocation9 + $0x1950] ss:$20 sps:$4 sm:$0xff]  }
 0x54f   :  { %6969 = vmatpush2.bf16.msra.mxu0 %v11426_v48  ;;  %7026 = vmatmul.mubr.bf16.vlgmr.msra.gmra.mxu1 %v12192_v6  ;;  %v11507_v48 = vld [vmem:[#allocation9 + $0x192c] ss:$20 sps:$4 sm:$0xff]  }
 0x550   :  { %10149 = vmatpush3.bf16.msra.mxu1 %v11430_v21  ;;  %7109 = vmatprep.mubr.bf16.mxu1 %v12183_v24  ;;  %v11449_v24 = vld [vmem:[#allocation9 + $0x1708] ss:$20 sps:$4 sm:$0xff]   ;;  %v11478_v21 = vld [vmem:[#allocation9 + $0x12d0] ss:$20 sps:$4 sm:$0xff]  }
 0x551   :  { %6970 = vmatprep.subr.bf16.mxu0 %v11433_v50  ;;  %10150 = vmatprep.subr.bf16.mxu1 %v11434_v53  ;;  %v11505_v50 = vld [vmem:[#allocation9 + $0x1928] ss:$20 sps:$4 sm:$0xff]   ;;  %v11510_v53 = vld [vmem:[#allocation9 + $0x1904] ss:$20 sps:$4 sm:$0xff]  }
 0x553   :  { %6971 = vmatpush2.bf16.msra.mxu0 %v11431_v42  ;;  %v11479_v42 = vld [vmem:[#allocation9 + $0x18e8] ss:$20 sps:$4 sm:$0xff]  }
 0x554   :  { %10151 = vmatpush3.bf16.msra.mxu1 %v11435_v10  ;;  %6972 = vmatprep.subr.bf16.mxu0 %v11438_v54  ;;  %v11508_v10 = vld [vmem:[#allocation9 + $0x1900] ss:$20 sps:$4 sm:$0xff]   ;;  %v11513_v54 = vld [vmem:[#allocation9 + $0x1b5c] ss:$20 sps:$4 sm:$0xff]  }
 0x555   :  { %10152 = vmatprep.subr.bf16.mxu1 %v11439_v55  ;;  %v11480_v55 = vld [vmem:[#allocation9 + $0x18c0] ss:$20 sps:$4 sm:$0xff]  }
 0x557   :  { %6973 = vmatpush2.bf16.msra.mxu0 %v11436_v56  ;;  %v11511_v56 = vld [vmem:[#allocation9 + $0x1b58] ss:$20 sps:$4 sm:$0xff]  }
 0x558   :  { %10153 = vmatpush3.bf16.msra.mxu1 %v11440_v58  ;;  %6974 = vmatprep.subr.bf16.mxu0 %v11443_v60  ;;  %v11516_v58 = vld [vmem:[#allocation9 + $0x1b34] ss:$20 sps:$4 sm:$0xff]   ;;  %v11481_v60 = vld [vmem:[#allocation9 + $0x1898] ss:$20 sps:$4 sm:$0xff]  }
 0x559   :  { %10154 = vmatprep.subr.bf16.mxu1 %v11444_v61  ;;  %v11514_v61 = vld [vmem:[#allocation9 + $0x1b30] ss:$20 sps:$4 sm:$0xff]  }
 0x55b   :  { %6975 = vmatpush2.bf16.msra.mxu0 %v11441_v62  ;;  %v11519_v62 = vld [vmem:[#allocation9 + $0x1b0c] ss:$20 sps:$4 sm:$0xff]  }
 0x55c   :  { %10155 = vmatpush3.bf16.msra.mxu1 %v11445_v1  ;;  %6976 = vmatprep.subr.bf16.mxu0 %v11448_v2  ;;  %v11517_v1 = vld [vmem:[#allocation9 + $0x1b08] ss:$20 sps:$4 sm:$0xff]   ;;  %v11522_v2 = vld [vmem:[#allocation9 + $0x1ae4] ss:$20 sps:$4 sm:$0xff]  }
 0x55d   :  { %10156 = vmatprep.subr.bf16.mxu1 %v11449_v24  ;;  %v11483_v24 = vld [vmem:[#allocation9 + $0x1848] ss:$20 sps:$4 sm:$0xff]  }
 0x55f   :  { %6977 = vmatpush2.bf16.msra.mxu0 %v11446_v4  ;;  %v11520_v4 = vld [vmem:[#allocation9 + $0x1ae0] ss:$20 sps:$4 sm:$0xff]  }
 0x560   :  { %10157 = vmatpush3.bf16.msra.mxu1 %v11450_v5  ;;  %6978 = vmatprep.subr.bf16.mxu0 %v11453_v7  ;;  %v11525_v5 = vld [vmem:[#allocation9 + $0x1abc] ss:$20 sps:$4 sm:$0xff]   ;;  %v11484_v7 = vld [vmem:[#allocation9 + $0x1820] ss:$20 sps:$4 sm:$0xff]  }
 0x561   :  { %10158 = vmatprep.subr.bf16.mxu1 %v11454_v8  ;;  %v11523_v8 = vld [vmem:[#allocation9 + $0x1ab8] ss:$20 sps:$4 sm:$0xff]  }
 0x563   :  { %6979 = vmatpush2.bf16.msra.mxu0 %v11451_v11  ;;  %v11528_v11 = vld [vmem:[#allocation9 + $0x1a94] ss:$20 sps:$4 sm:$0xff]  }
 0x564   :  { %10159 = vmatpush3.bf16.msra.mxu1 %v11455_v63  ;;  %6980 = vmatprep.subr.bf16.mxu0 %v11458_v51  ;;  %v11485_v63 = vld [vmem:[#allocation9 + $0x17f8] ss:$20 sps:$4 sm:$0xff]   ;;  %v11526_v51 = vld [vmem:[#allocation9 + $0x1a90] ss:$20 sps:$4 sm:$0xff]  }
 0x565   :  { %10160 = vmatprep.subr.bf16.mxu1 %v11459_v12  ;;  %v11531_v12 = vld [vmem:[#allocation9 + $0x1a6c] ss:$20 sps:$4 sm:$0xff]  }
 0x567   :  { %6981 = vmatpush2.bf16.msra.mxu0 %v11456_v14  ;;  %v11486_v14 = vld [vmem:[#allocation9 + $0x17d0] ss:$20 sps:$4 sm:$0xff]  }
 0x568   :  { %10161 = vmatpush3.bf16.msra.mxu1 %v11460_v15  ;;  %10126 = vmatprep.subr.bf16.mxu0 %v11461_v16  ;;  %v11529_v15 = vld [vmem:[#allocation9 + $0x1a68] ss:$20 sps:$4 sm:$0xff]  }
 0x569   :  { %10162 = vmatprep.subr.bf16.mxu1 %v11463_v59  ;;  %v11537_v16 = vld [vmem:[#allocation9 + $0x1c9c] ss:$20 sps:$4 sm:$0xff]   ;;  %v11534_v59 = vld [vmem:[#allocation9 + $0x1a44] ss:$20 sps:$4 sm:$0xff]  }
 0x56a   :  { %6983 = vmatmul.mubr.bf16.vlgmr.msra.gmra.mxu0 %v12185_v3 }
 0x56b   :  { %10127 = vmatpush3.bf16.msra.mxu0 %v11462_v34  ;;  %7068 = vmatprep.mubr.bf16.mxu0 %v12172_v9  ;;  %v11471_v9 = vld [vmem:[#allocation9 + $0x1488] ss:$20 sps:$4 sm:$0xff]   ;;  %v11535_v34 = vld [vmem:[#allocation9 + $0x1c98] ss:$20 sps:$4 sm:$0xff]  }
 0x56c   :  { %10163 = vmatpush3.bf16.msra.mxu1 %v11464_v57  ;;  %10128 = vmatprep.subr.bf16.mxu0 %v11465_v17  ;;  %v11532_v57 = vld [vmem:[#allocation9 + $0x1a40] ss:$20 sps:$4 sm:$0xff]  }
 0x56d   :  { %8485 = vmatprep.subr.bf16.mxu1 %v11489_v18  ;;  %v11540_v17 = vld [vmem:[#allocation9 + $0x1c74] ss:$20 sps:$4 sm:$0xff]   ;;  %v11538_v18 = vld [vmem:[#allocation9 + $0x1c70] ss:$20 sps:$4 sm:$0xff]  }
 0x56f   :  { %10129 = vmatpush3.bf16.msra.mxu0 %v11466_v19  ;;  %7110 = vmatmul.mubr.bf16.vlgmr.msra.gmra.mxu1 %v12185_v3  ;;  %v11496_v3 = vld [vmem:[#allocation9 + $0x19a0] ss:$20 sps:$4 sm:$0xff]  }
 0x570   :  { %10130 = vmatprep.subr.bf16.mxu0 %v11467_v22  ;;  %8486 = vmatpush1.bf16.msra.mxu1 %v11487_v25  ;;  %v11543_v19 = vld [vmem:[#allocation9 + $0x1c4c] ss:$20 sps:$4 sm:$0xff]   ;;  %v11541_v22 = vld [vmem:[#allocation9 + $0x1c48] ss:$20 sps:$4 sm:$0xff]   ;;  %v11546_v25 = vld [vmem:[#allocation9 + $0x1c24] ss:$20 sps:$4 sm:$0xff]  }
 0x571   :  { %8487 = vmatprep.subr.bf16.mxu1 %v11492_v13  ;;  %v11544_v13 = vld [vmem:[#allocation9 + $0x1c20] ss:$20 sps:$4 sm:$0xff]  }
 0x573   :  { %10131 = vmatpush3.bf16.msra.mxu0 %v11468_v23  ;;  %v11549_v23 = vld [vmem:[#allocation9 + $0x1bfc] ss:$20 sps:$4 sm:$0xff]  }
 0x574   :  { %10132 = vmatprep.subr.bf16.mxu0 %v11469_v26  ;;  %8488 = vmatpush1.bf16.msra.mxu1 %v11490_v27  ;;  %v11547_v26 = vld [vmem:[#allocation9 + $0x1bf8] ss:$20 sps:$4 sm:$0xff]   ;;  %v11552_v27 = vld [vmem:[#allocation9 + $0x1bd4] ss:$20 sps:$4 sm:$0xff]  }
 0x575   :  { %8489 = vmatprep.subr.bf16.mxu1 %v11495_v28  ;;  %v11550_v28 = vld [vmem:[#allocation9 + $0x1bd0] ss:$20 sps:$4 sm:$0xff]  }
 0x577   :  { %10133 = vmatpush3.bf16.msra.mxu0 %v11470_v52  ;;  %v11553_v52 = vld [vmem:[#allocation9 + $0x1ba8] ss:$20 sps:$4 sm:$0xff]  }
 0x578   :  { %10134 = vmatprep.subr.bf16.mxu0 %v11471_v9  ;;  %8490 = vmatpush1.bf16.msra.mxu1 %v11493_v35  ;;  %v11558_v9 = vld [vmem:[#allocation9 + $0x1b84] ss:$20 sps:$4 sm:$0xff]   ;;  %v11556_v35 = vld [vmem:[#allocation9 + $0x1b80] ss:$20 sps:$4 sm:$0xff]  }
 0x579   :  { %8491 = vmatprep.subr.bf16.mxu1 %v11498_v36  ;;  %v11561_v36 = vld [vmem:[#allocation9 + $0x1ddc] ss:$20 sps:$4 sm:$0xff]  }
 0x57b   :  { %10135 = vmatpush3.bf16.msra.mxu0 %v11472_v37  ;;  %v11559_v37 = vld [vmem:[#allocation9 + $0x1dd8] ss:$20 sps:$4 sm:$0xff]  }
 0x57c   :  { %10136 = vmatprep.subr.bf16.mxu0 %v11473_v40  ;;  %8492 = vmatpush1.bf16.msra.mxu1 %v11496_v3  ;;  %v11564_v40 = vld [vmem:[#allocation9 + $0x1db4] ss:$20 sps:$4 sm:$0xff]   ;;  %v11562_v3 = vld [vmem:[#allocation9 + $0x1db0] ss:$20 sps:$4 sm:$0xff]  }
 0x57d   :  { %8493 = vmatprep.subr.bf16.mxu1 %v11501_v41  ;;  %v11567_v41 = vld [vmem:[#allocation9 + $0x1d8c] ss:$20 sps:$4 sm:$0xff]  }
 0x57f   :  { %10137 = vmatpush3.bf16.msra.mxu0 %v11474_v43  ;;  %v11565_v43 = vld [vmem:[#allocation9 + $0x1d88] ss:$20 sps:$4 sm:$0xff]  }
 0x580   :  { %10138 = vmatprep.subr.bf16.mxu0 %v11475_v44  ;;  %8494 = vmatpush1.bf16.msra.mxu1 %v11499_v29  ;;  %v11570_v44 = vld [vmem:[#allocation9 + $0x1d64] ss:$20 sps:$4 sm:$0xff]   ;;  %v11568_v29 = vld [vmem:[#allocation9 + $0x1d60] ss:$20 sps:$4 sm:$0xff]  }
 0x581   :  { %8495 = vmatprep.subr.bf16.mxu1 %v11504_v45  ;;  %v11606_v45 = vld [vmem:[#allocation9 + $0x1f1c] ss:$20 sps:$4 sm:$0xff]  }
 0x583   :  { %10139 = vmatpush3.bf16.msra.mxu0 %v11476_v33  ;;  %v11573_v33 = vld [vmem:[#allocation9 + $0x1d3c] ss:$20 sps:$4 sm:$0xff]  }
 0x584   :  { %10140 = vmatprep.subr.bf16.mxu0 %v11477_v46  ;;  %8496 = vmatpush1.bf16.msra.mxu1 %v11502_v47  ;;  %v11571_v46 = vld [vmem:[#allocation9 + $0x1d38] ss:$20 sps:$4 sm:$0xff]   ;;  %v11576_v47 = vld [vmem:[#allocation9 + $0x1d14] ss:$20 sps:$4 sm:$0xff]  }
 0x585   :  { %8497 = vmatprep.subr.bf16.mxu1 %v11507_v48  ;;  %v11574_v48 = vld [vmem:[#allocation9 + $0x1d10] ss:$20 sps:$4 sm:$0xff]  }
 0x587   :  { %10141 = vmatpush3.bf16.msra.mxu0 %v11478_v21  ;;  %v6812_v21 = vpop.f32.mrf.mxu0 }
 0x588   :  { %10300 = vmatprep.subr.bf16.mxu0 %v11929_v31  ;;  %8498 = vmatpush1.bf16.msra.mxu1 %v11505_v50  ;;  %v11579_v50 = vld [vmem:[#allocation9 + $0x1cec] ss:$20 sps:$4 sm:$0xff]  }
 0x589   :  { %8499 = vmatprep.subr.bf16.mxu1 %v11510_v53  ;;  %v11577_v53 = vld [vmem:[#allocation9 + $0x1ce8] ss:$20 sps:$4 sm:$0xff]  }
 0x58a   :  { %7069 = vmatmul.mubr.bf16.vlgmr.msra.gmra.mxu0 %v12174_v49  ;;  %v11482_v49 = vld [vmem:[#allocation9 + $0x1870] ss:$20 sps:$4 sm:$0xff]  }
 0x58b   :  { %10301 = vmatpush3.bf16.msra.mxu0 %v11479_v42  ;;  %10316 = vmatprep.mubr.msk.bf16.mxu0 %vm11930_vm3, %v11929_v31  ;;  %v6814_v42 = vpop.f32.mrf.mxu0 }
 0x58c   :  { %10302 = vmatprep.subr.bf16.mxu0 %v11929_v31  ;;  %8500 = vmatpush1.bf16.msra.mxu1 %v11508_v10 }
 0x58d   :  { %8501 = vmatprep.subr.bf16.mxu1 %v11513_v54  ;;  %v11582_v54 = vld [vmem:[#allocation9 + $0x1cc4] ss:$20 sps:$4 sm:$0xff]  }
 0x58f   :  { %10303 = vmatpush3.bf16.msra.mxu0 %v11480_v55  ;;  %v5709_v55 = vld [vmem:[#allocation11 + $0x3] ss:$8 sm:$0xf] }
 0x590   :  { %10304 = vmatprep.subr.bf16.mxu0 %v11929_v31  ;;  %8502 = vmatpush2.bf16.msra.mxu1 %v11511_v56  ;;  %v5710_v56 = vld [vmem:[#allocation11 + $0x3] ss:$8 sm:$0x10] }
 0x591   :  { %8503 = vmatprep.subr.bf16.mxu1 %v11516_v58  ;;  %v11580_v58 = vld [vmem:[#allocation9 + $0x1cc0] ss:$20 sps:$4 sm:$0xff]  }
 0x593   :  { %10305 = vmatpush3.bf16.msra.mxu0 %v11481_v60  ;;  %v12215_v60 = vor.u32 %v5710_v56, %v5709_v55 }
 0x594   :  { %10306 = vmatprep.subr.bf16.mxu0 %v11929_v31  ;;  %8504 = vmatpush2.bf16.msra.mxu1 %v11514_v61  ;;  %v6816_v61 = vpop.f32.mrf.mxu0 }
 0x595   :  { %8505 = vmatprep.subr.bf16.mxu1 %v11519_v62 }
 0x597   :  { %10307 = vmatpush3.bf16.msra.mxu0 %v11482_v49  ;;  %v11585_v49 = vld [vmem:[#allocation9 + $0x1a24] ss:$20 sps:$4 sm:$0xff]  }
 0x598   :  { %10308 = vmatprep.subr.bf16.mxu0 %v11929_v31  ;;  %8506 = vmatpush2.bf16.msra.mxu1 %v11517_v1  ;;  %v5720_v1 = vrot.slane %v12215_v60, %v12005_v30 }
 0x599   :  { %8507 = vmatprep.subr.bf16.mxu1 %v11522_v2  ;;  %v5716_v2 = vrot.slane %v12215_v60, %v12008_v32 }
 0x59b   :  { %10309 = vmatpush3.bf16.msra.mxu0 %v11483_v24  ;;  %v6818_v24 = vpop.f32.mrf.mxu0 }
 0x59c   :  { %10310 = vmatprep.subr.bf16.mxu0 %v11929_v31  ;;  %8508 = vmatpush2.bf16.msra.mxu1 %v11520_v4 }
 0x59d   :  { %8509 = vmatprep.subr.bf16.mxu1 %v11525_v5 }
 0x59f   :  { %10311 = vmatpush3.bf16.msra.mxu0 %v11484_v7  ;;  %v6815_v7 = vadd.f32 %v6814_v42, %v5720_v1 }
 0x5a0   :  { %10312 = vmatprep.subr.bf16.mxu0 %v11929_v31  ;;  %8510 = vmatpush2.bf16.msra.mxu1 %v11523_v8  ;;  %v6817_v8 = vadd.f32 %v6816_v61, %v5716_v2 }
 0x5a1   :  { %8511 = vmatprep.subr.bf16.mxu1 %v11528_v11  ;;  %v6813_v11 = vadd.f32 %v6812_v21, %v5716_v2 }
 0x5a3   :  { %10313 = vmatpush3.bf16.msra.mxu0 %v11485_v63 }
 0x5a4   :  { %10314 = vmatprep.subr.bf16.mxu0 %v11929_v31  ;;  %8512 = vmatpush2.bf16.msra.mxu1 %v11526_v51 }
 0x5a5   :  { %8513 = vmatprep.subr.bf16.mxu1 %v11531_v12  ;;  %v6819_v12 = vadd.f32 %v6818_v24, %v5720_v1 }
 0x5a7   :  { %10315 = vmatpush3.bf16.msra.mxu0 %v11486_v14 }
 0x5a8   :  { %8514 = vmatpush2.bf16.msra.mxu1 %v11529_v15  ;;  %8528 = vmatprep.subr.bf16.mxu0 %v11537_v16 }
 0x5a9   :  { %8515 = vmatprep.subr.bf16.mxu1 %v11534_v59 }
 0x5aa   :  { %10317 = vmatmul.mubr.bf16.vlgmr.msra.gmra.mxu0 %v12192_v6  ;;  %v11555_v6 = vld [vmem:[#allocation9 + $0x1bac] ss:$20 sps:$4 sm:$0xff]  }
 0x5ab   :  { %8529 = vmatpush1.bf16.msra.mxu0 %v11535_v34 }
 0x5ac   :  { %8516 = vmatpush2.bf16.msra.mxu1 %v11532_v57  ;;  %8530 = vmatprep.subr.bf16.mxu0 %v11540_v17 }
 0x5ad   :  { %8571 = vmatprep.subr.bf16.mxu1 %v11606_v45  ;;  %v11640_v45 = vld [vmem:[#allocation9 + $0x1e28] ss:$20 sps:$4 sm:$0xff]  }
 0x5af   :  { %8531 = vmatpush1.bf16.msra.mxu0 %v11538_v18  ;;  %v6855_v10 = vpop.f32.mrf.mxu1 }
 0x5b0   :  { %8532 = vmatprep.subr.bf16.mxu0 %v11543_v19  ;;  %v6856_v16 = vadd.f32 %v6855_v10, %v6813_v11  ;;  %v5728_v10 = vrot.slane %v12215_v60, %v12020_v39 }
 0x5b1   :  { %v6857_v62 = vpop.f32.mrf.mxu1 }
 0x5b2   :  { %v6858_v14 = vadd.f32 %v6857_v62, %v6815_v7 }
 0x5b3   :  { %8533 = vmatpush1.bf16.msra.mxu0 %v11541_v22  ;;  %v6859_v4 = vpop.f32.mrf.mxu1 }
 0x5b4   :  { %8534 = vmatprep.subr.bf16.mxu0 %v11546_v25  ;;  %v6860_v15 = vadd.f32 %v6859_v4, %v6817_v8 }
 0x5b5   :  { %v6861_v63 = vpop.f32.mrf.mxu1 }
 0x5b6   :  { %v6862_v34 = vadd.f32 %v6861_v63, %v6819_v12 }
 0x5b7   :  { %8535 = vmatpush1.bf16.msra.mxu0 %v11544_v13 }
 0x5b8   :  { %8536 = vmatprep.subr.bf16.mxu0 %v11549_v23 }
 0x5bb   :  { %8537 = vmatpush1.bf16.msra.mxu0 %v11547_v26 }
 0x5bc   :  { %8538 = vmatprep.subr.bf16.mxu0 %v11552_v27 }
 0x5bf   :  { %8539 = vmatpush1.bf16.msra.mxu0 %v11550_v28  ;;  %v11604_v28 = vld [vmem:[#allocation9 + $0x1f18] ss:$20 sps:$4 sm:$0xff]  }
 0x5c0   :  { %8540 = vmatprep.subr.bf16.mxu0 %v11555_v6 }
 0x5c3   :  { %8541 = vmatpush1.bf16.msra.mxu0 %v11553_v52  ;;  %v11612_v52 = vld [vmem:[#allocation9 + $0x1ef4] ss:$20 sps:$4 sm:$0xff]  }
 0x5c4   :  { %8542 = vmatprep.subr.bf16.mxu0 %v11558_v9  ;;  %v11610_v9 = vld [vmem:[#allocation9 + $0x1ef0] ss:$20 sps:$4 sm:$0xff]  }
 0x5c7   :  { %8543 = vmatpush1.bf16.msra.mxu0 %v11556_v35  ;;  %v11618_v35 = vld [vmem:[#allocation9 + $0x1ecc] ss:$20 sps:$4 sm:$0xff]  }
 0x5c8   :  { %8544 = vmatprep.subr.bf16.mxu0 %v11561_v36  ;;  %v11616_v36 = vld [vmem:[#allocation9 + $0x1ec8] ss:$20 sps:$4 sm:$0xff]  }
 0x5cb   :  { %8545 = vmatpush2.bf16.msra.mxu0 %v11559_v37  ;;  %v11624_v37 = vld [vmem:[#allocation9 + $0x1ea4] ss:$20 sps:$4 sm:$0xff]  }
 0x5cc   :  { %8546 = vmatprep.subr.bf16.mxu0 %v11564_v40  ;;  %v11622_v40 = vld [vmem:[#allocation9 + $0x1ea0] ss:$20 sps:$4 sm:$0xff]  }
 0x5cf   :  { %8547 = vmatpush2.bf16.msra.mxu0 %v11562_v3  ;;  %v11630_v3 = vld [vmem:[#allocation9 + $0x1e7c] ss:$20 sps:$4 sm:$0xff]  }
 0x5d0   :  { %8548 = vmatprep.subr.bf16.mxu0 %v11567_v41  ;;  %v11628_v41 = vld [vmem:[#allocation9 + $0x1e78] ss:$20 sps:$4 sm:$0xff]  }
 0x5d3   :  { %8549 = vmatpush2.bf16.msra.mxu0 %v11565_v43  ;;  %v11636_v43 = vld [vmem:[#allocation9 + $0x1e54] ss:$20 sps:$4 sm:$0xff]  }
 0x5d4   :  { %8550 = vmatprep.subr.bf16.mxu0 %v11570_v44  ;;  %v11634_v44 = vld [vmem:[#allocation9 + $0x1e50] ss:$20 sps:$4 sm:$0xff]  }
 0x5d7   :  { %8551 = vmatpush2.bf16.msra.mxu0 %v11568_v29  ;;  %v11642_v29 = vld [vmem:[#allocation9 + $0x1e2c] ss:$20 sps:$4 sm:$0xff]  }
 0x5d8   :  { %8552 = vmatprep.subr.bf16.mxu0 %v11573_v33  ;;  %v11648_v33 = vld [vmem:[#allocation9 + $0x1e04] ss:$20 sps:$4 sm:$0xff]  }
 0x5db   :  { %8553 = vmatpush2.bf16.msra.mxu0 %v11571_v46  ;;  %v11646_v46 = vld [vmem:[#allocation9 + $0x1e00] ss:$20 sps:$4 sm:$0xff]  }
 0x5dc   :  { %8554 = vmatprep.subr.bf16.mxu0 %v11576_v47  ;;  %v11654_v47 = vld [vmem:[#allocation9 + $0x1ca4] ss:$20 sps:$4 sm:$0xff]  }
 0x5df   :  { %8555 = vmatpush2.bf16.msra.mxu0 %v11574_v48 }
 0x5e0   :  { %8556 = vmatprep.subr.bf16.mxu0 %v11579_v50 }
 0x5e3   :  { %8557 = vmatpush2.bf16.msra.mxu0 %v11577_v53 }
 0x5e4   :  { %8558 = vmatprep.subr.bf16.mxu0 %v11582_v54  ;;  %v5724_v54 = vrot.slane %v12215_v60, %v12017_v38 }
 0x5e7   :  { %8559 = vmatpush2.bf16.msra.mxu0 %v11580_v58 }
 0x5e8   :  { %8614 = vmatprep.subr.bf16.mxu0 %v11585_v49 }
 0x5ea   :  { %v6898_v5 = vpop.f32.mrf.mxu0 }
 0x5eb   :  { %v6899_v18 = vadd.f32 %v6898_v5, %v6856_v16 }
 0x5ec   :  { %v6900_v51 = vpop.f32.mrf.mxu0 }
 0x5ed   :  { %v6901_v57 = vadd.f32 %v6900_v51, %v6858_v14  ;;  %v7159_v26 = vmax.f32 %v6899_v18, 0.0  ;;  %v11583_v18 = vld [vmem:[#allocation9 + $0x1a20] ss:$20 sps:$4 sm:$0xff]  }
 0x5ee   :  { %v6902_v59 = vpop.f32.mrf.mxu0 }
 0x5ef   :  { %v6903_v17 = vadd.f32 %v6902_v59, %v6860_v15  ;;  %v7160_v13 = vmax.f32 %v6901_v57, 0.0  ;;  %v6941_v48 = vpop.f32.mrf.mxu1 }
 0x5f0   :  { %v6904_v19 = vpop.f32.mrf.mxu0  ;;  %v6942_v61 = vadd.f32 %v6941_v48, %v5724_v54  ;;  %v11627_v48 = vld [vmem:[#allocation9 + $0x1b14] ss:$20 sps:$4 sm:$0xff]  }
 0x5f1   :  { %v6905_v22 = vadd.f32 %v6904_v19, %v6862_v34  ;;  %v7164_v25 = vmax.f32 %v6903_v17, 0.0  ;;  %v6943_v21 = vpop.f32.mrf.mxu1 }
 0x5f2   :  { %v6944_v58 = vadd.f32 %v6943_v21, %v5728_v10 }
 0x5f3   :  { %v7165_v23 = vmax.f32 %v6905_v22, 0.0  ;;  %v12223_v6 = vpack.c.bf16 %v7164_v25, %v7159_v26  ;;  %v6945_v50 = vpop.f32.mrf.mxu1  ;;  %v11588_v22 = vld [vmem:[#allocation9 + $0x19fc] ss:$20 sps:$4 sm:$0xff]   ;;  %v11586_v25 = vld [vmem:[#allocation9 + $0x19f8] ss:$20 sps:$4 sm:$0xff]  }
 0x5f4   :  { %v6946_v49 = vadd.f32 %v6945_v50, %v5724_v54  ;;  %v11594_v26 = vld [vmem:[#allocation9 + $0x19ac] ss:$20 sps:$4 sm:$0xff]   ;;  %v11625_v50 = vld [vmem:[#allocation9 + $0x1b10] ss:$20 sps:$4 sm:$0xff]   ;;  %v5732_v54 = vrot.slane %v12215_v60, %v12040_v20 }
 0x5f5   :  { %v12221_v27 = vpack.c.bf16 %v7165_v23, %v7160_v13  ;;  %v6947_v53 = vpop.f32.mrf.mxu1  ;;  %v11591_v13 = vld [vmem:[#allocation9 + $0x19d4] ss:$20 sps:$4 sm:$0xff]   ;;  %v11589_v23 = vld [vmem:[#allocation9 + $0x19d0] ss:$20 sps:$4 sm:$0xff]   ;;  %v11643_v60 = vld [vmem:[#allocation9 + $0x1a98] ss:$20 sps:$4 sm:$0xff]  }
 0x5f6   :  { %v6948_v5 = vadd.f32 %v6947_v53, %v5728_v10 }
 0x5f7   :  { %8517 = vmatprep.mubr.bf16.mxu1 %v12221_v27 }
 0x5f8   :  { %8518 = vmatmul.mubr.bf16.vlgmr.msra.gmra.mxu1 %v12223_v6 }
 0x5f9   :  { %8572 = vmatpush1.bf16.msra.mxu1 %v11604_v28  ;;  %8603 = vmatprep.mubr.bf16.mxu1 %v11927_v0  ;;  %v11592_v28 = vld [vmem:[#allocation9 + $0x19a8] ss:$20 sps:$4 sm:$0xff]  }
 0x5fa   :  { %8573 = vmatprep.subr.bf16.mxu1 %v11612_v52  ;;  %v11597_v52 = vld [vmem:[#allocation9 + $0x1984] ss:$20 sps:$4 sm:$0xff]  }
 0x5fd   :  { %8574 = vmatpush1.bf16.msra.mxu1 %v11610_v9  ;;  %v11595_v9 = vld [vmem:[#allocation9 + $0x1980] ss:$20 sps:$4 sm:$0xff]  }
 0x5fe   :  { %8575 = vmatprep.subr.bf16.mxu1 %v11618_v35  ;;  %v11600_v35 = vld [vmem:[#allocation9 + $0x195c] ss:$20 sps:$4 sm:$0xff]  }
 0x601   :  { %8576 = vmatpush1.bf16.msra.mxu1 %v11616_v36  ;;  %v11598_v36 = vld [vmem:[#allocation9 + $0x1958] ss:$20 sps:$4 sm:$0xff]  }
 0x602   :  { %8577 = vmatprep.subr.bf16.mxu1 %v11624_v37  ;;  %v11603_v37 = vld [vmem:[#allocation9 + $0x1934] ss:$20 sps:$4 sm:$0xff]  }
 0x605   :  { %8578 = vmatpush1.bf16.msra.mxu1 %v11622_v40  ;;  %v11601_v40 = vld [vmem:[#allocation9 + $0x1930] ss:$20 sps:$4 sm:$0xff]  }
 0x606   :  { %8579 = vmatprep.subr.bf16.mxu1 %v11630_v3  ;;  %v11609_v3 = vld [vmem:[#allocation9 + $0x190c] ss:$20 sps:$4 sm:$0xff]  }
 0x609   :  { %8580 = vmatpush1.bf16.msra.mxu1 %v11628_v41  ;;  %v11607_v41 = vld [vmem:[#allocation9 + $0x1908] ss:$20 sps:$4 sm:$0xff]  }
 0x60a   :  { %8581 = vmatprep.subr.bf16.mxu1 %v11636_v43  ;;  %v11615_v43 = vld [vmem:[#allocation9 + $0x1b64] ss:$20 sps:$4 sm:$0xff]  }
 0x60d   :  { %8582 = vmatpush1.bf16.msra.mxu1 %v11634_v44 }
 0x60e   :  { %8583 = vmatprep.subr.bf16.mxu1 %v11642_v29  ;;  %v11613_v29 = vld [vmem:[#allocation9 + $0x1b60] ss:$20 sps:$4 sm:$0xff]  }
 0x60f   :  { %v7027_v42 = vpop.f32.mrf.mxu1 }
 0x611   :  { %8584 = vmatpush1.bf16.msra.mxu1 %v11640_v45  ;;  %v7029_v55 = vpop.f32.mrf.mxu1  ;;  %v11621_v45 = vld [vmem:[#allocation9 + $0x1b3c] ss:$20 sps:$4 sm:$0xff]  }
 0x612   :  { %8585 = vmatprep.subr.bf16.mxu1 %v11648_v33 }
 0x613   :  { %v7031_v2 = vpop.f32.mrf.mxu1 }
 0x615   :  { %8586 = vmatpush1.bf16.msra.mxu1 %v11646_v46  ;;  %v7033_v12 = vpop.f32.mrf.mxu1  ;;  %v11619_v46 = vld [vmem:[#allocation9 + $0x1b38] ss:$20 sps:$4 sm:$0xff]  }
 0x616   :  { %8657 = vmatprep.subr.bf16.mxu1 %v11654_v47 }
 0x62a   :  { %v6984_v56 = vpop.f32.mrf.mxu0 }
 0x62b   :  { %v6985_v24 = vadd.f32 %v6984_v56, %v6942_v61  ;;  %v11631_v56 = vld [vmem:[#allocation9 + $0x1ae8] ss:$20 sps:$4 sm:$0xff]   ;;  %v11639_v61 = vld [vmem:[#allocation9 + $0x1ac4] ss:$20 sps:$4 sm:$0xff]  }
 0x62c   :  { %v6986_v62 = vpop.f32.mrf.mxu0 }
 0x62d   :  { %v6987_v1 = vadd.f32 %v6986_v62, %v6944_v58  ;;  %v7028_v14 = vadd.f32 %v7027_v42, %v6985_v24  ;;  %v11633_v42 = vld [vmem:[#allocation9 + $0x1aec] ss:$20 sps:$4 sm:$0xff]   ;;  %v11645_v24 = vld [vmem:[#allocation9 + $0x1a9c] ss:$20 sps:$4 sm:$0xff]  }
 0x62e   :  { %v6988_v4 = vpop.f32.mrf.mxu0 }
 0x62f   :  { %v6989_v7 = vadd.f32 %v6988_v4, %v6946_v49  ;;  %v7030_v11 = vadd.f32 %v7029_v55, %v6987_v1  ;;  %v7161_v57 = vmax.f32 %v7028_v14, 0.0  ;;  %v10164_v47 = vpop.f32.mrf.mxu1  ;;  %v11637_v1 = vld [vmem:[#allocation9 + $0x1ac0] ss:$20 sps:$4 sm:$0xff]  }
 0x630   :  { %v6990_v8 = vpop.f32.mrf.mxu0 }
 0x631   :  { %v7032_v63 = vadd.f32 %v7031_v2, %v6989_v7  ;;  %v6991_v51 = vadd.f32 %v6990_v8, %v6948_v5  ;;  %v7162_v59 = vmax.f32 %v7030_v11, 0.0  ;;  %v10165_v53 = vpop.f32.mrf.mxu1 }
 0x632   :  { %v10166_v4 = vadd.f32 %v10165_v53, %v10164_v47  ;;  %v11684_v47 = vld [vmem:[#allocation9 + $0x1bdc] ss:$20 sps:$4 sm:$0xff]  }
 0x633   :  { %v7034_v15 = vadd.f32 %v7033_v12, %v6991_v51  ;;  %v7166_v16 = vmax.f32 %v7032_v63, 0.0  ;;  %v10167_v58 = vpop.f32.mrf.mxu1  ;;  %v11651_v51 = vld [vmem:[#allocation9 + $0x1a74] ss:$20 sps:$4 sm:$0xff]   ;;  %v11693_v53 = vld [vmem:[#allocation9 + $0x1e5c] ss:$20 sps:$4 sm:$0xff]  }
 0x635   :  { %v7167_v34 = vmax.f32 %v7034_v15, 0.0  ;;  %v12234_v19 = vpack.c.bf16 %v7166_v16, %v7161_v57  ;;  %v10168_v2 = vpop.f32.mrf.mxu1  ;;  %v11657_v57 = vld [vmem:[#allocation9 + $0x1a4c] ss:$20 sps:$4 sm:$0xff]  }
 0x636   :  { %v10169_v8 = vadd.f32 %v10168_v2, %v10167_v58  ;;  %v11697_v58 = vld [vmem:[#allocation9 + $0x1e30] ss:$20 sps:$4 sm:$0xff]  }
 0x637   :  { %v12232_v17 = vpack.c.bf16 %v7167_v34, %v7162_v59  ;;  %v11649_v59 = vld [vmem:[#allocation9 + $0x1a70] ss:$20 sps:$4 sm:$0xff]  }
 0x638   :  { %v11708_v2 = vld [vmem:[#allocation9 + $0x1dbc] ss:$20 sps:$4 sm:$0xff]  }
 0x639   :  { %8560 = vmatprep.mubr.bf16.mxu0 %v12232_v17 }
 0x63a   :  { %8561 = vmatmul.mubr.bf16.vlgmr.msra.gmra.mxu0 %v12234_v19 }
 0x63b   :  { %8615 = vmatpush1.bf16.msra.mxu0 %v11583_v18  ;;  %8646 = vmatprep.mubr.bf16.mxu0 %v12221_v27 }
 0x63c   :  { %8616 = vmatprep.subr.bf16.mxu0 %v11588_v22 }
 0x63f   :  { %8617 = vmatpush1.bf16.msra.mxu0 %v11586_v25  ;;  %v11652_v25 = vld [vmem:[#allocation9 + $0x1ca0] ss:$20 sps:$4 sm:$0xff]  }
 0x640   :  { %8618 = vmatprep.subr.bf16.mxu0 %v11591_v13 }
 0x643   :  { %8619 = vmatpush1.bf16.msra.mxu0 %v11589_v23  ;;  %v11655_v23 = vld [vmem:[#allocation9 + $0x1a48] ss:$20 sps:$4 sm:$0xff]  }
 0x644   :  { %8620 = vmatprep.subr.bf16.mxu0 %v11594_v26  ;;  %v11660_v26 = vld [vmem:[#allocation9 + $0x1c7c] ss:$20 sps:$4 sm:$0xff]  }
 0x647   :  { %8621 = vmatpush1.bf16.msra.mxu0 %v11592_v28  ;;  %v11663_v28 = vld [vmem:[#allocation9 + $0x1f24] ss:$20 sps:$4 sm:$0xff]  }
 0x648   :  { %8622 = vmatprep.subr.bf16.mxu0 %v11597_v52  ;;  %v11658_v52 = vld [vmem:[#allocation9 + $0x1c78] ss:$20 sps:$4 sm:$0xff]  }
 0x64a   :  { %v10142_v44 = vpop.f32.mrf.mxu0 }
 0x64b   :  { %8623 = vmatpush1.bf16.msra.mxu0 %v11595_v9  ;;  %v11661_v9 = vld [vmem:[#allocation9 + $0x1f20] ss:$20 sps:$4 sm:$0xff]  }
 0x64c   :  { %8624 = vmatprep.subr.bf16.mxu0 %v11600_v35  ;;  %v10143_v33 = vpop.f32.mrf.mxu0  ;;  %v11666_v35 = vld [vmem:[#allocation9 + $0x1c54] ss:$20 sps:$4 sm:$0xff]  }
 0x64d   :  { %v10144_v55 = vadd.f32 %v10143_v33, %v10142_v44  ;;  %v11673_v44 = vld [vmem:[#allocation9 + $0x1ed0] ss:$20 sps:$4 sm:$0xff]   ;;  %v11676_v33 = vld [vmem:[#allocation9 + $0x1c00] ss:$20 sps:$4 sm:$0xff]  }
 0x64e   :  { %v10145_v21 = vpop.f32.mrf.mxu0 }
 0x64f   :  { %8625 = vmatpush1.bf16.msra.mxu0 %v11598_v36  ;;  %v7071_v49 = vadd.f32 %v10144_v55, %v5732_v54  ;;  %v11669_v36 = vld [vmem:[#allocation9 + $0x1efc] ss:$20 sps:$4 sm:$0xff]   ;;  %v11699_v55 = vld [vmem:[#allocation9 + $0x1e34] ss:$20 sps:$4 sm:$0xff]  }
 0x650   :  { %8626 = vmatprep.subr.bf16.mxu0 %v11603_v37  ;;  %v10146_v10 = vpop.f32.mrf.mxu0  ;;  %v11664_v37 = vld [vmem:[#allocation9 + $0x1c50] ss:$20 sps:$4 sm:$0xff]  }
 0x651   :  { %v10147_v62 = vadd.f32 %v10146_v10, %v10145_v21  ;;  %v7112_v11 = vadd.f32 %v10166_v4, %v7071_v49  ;;  %v11682_v21 = vld [vmem:[#allocation9 + $0x1bd8] ss:$20 sps:$4 sm:$0xff]   ;;  %v11700_v49 = vld [vmem:[#allocation9 + $0x1de0] ss:$20 sps:$4 sm:$0xff]  }
 0x652   :  { %v11691_v10 = vld [vmem:[#allocation9 + $0x1e58] ss:$20 sps:$4 sm:$0xff]  }
 0x653   :  { %8627 = vmatpush1.bf16.msra.mxu0 %v11601_v40  ;;  %v7074_v5 = vadd.f32 %v10147_v62, %v5732_v54  ;;  %v11667_v40 = vld [vmem:[#allocation9 + $0x1ef8] ss:$20 sps:$4 sm:$0xff]  }
 0x654   :  { %8628 = vmatprep.subr.bf16.mxu0 %v11609_v3  ;;  %v11672_v3 = vld [vmem:[#allocation9 + $0x1c2c] ss:$20 sps:$4 sm:$0xff]  }
 0x655   :  { %v7115_v14 = vadd.f32 %v10169_v8, %v7074_v5  ;;  %v11696_v54 = vld [vmem:[#allocation9 + $0x1b8c] ss:$20 sps:$4 sm:$0xff]   ;;  %v11710_v5 = vld [vmem:[#allocation9 + $0x1ca8] ss:$20 sps:$4 sm:$0xff]  }
 0x656   :  { %v11705_v62 = vld [vmem:[#allocation9 + $0x1e0c] ss:$20 sps:$4 sm:$0xff]  }
 0x657   :  { %8629 = vmatpush1.bf16.msra.mxu0 %v11607_v41  ;;  %v11675_v41 = vld [vmem:[#allocation9 + $0x1ed4] ss:$20 sps:$4 sm:$0xff]   ;;  %v11706_v4 = vld [vmem:[#allocation9 + $0x1db8] ss:$20 sps:$4 sm:$0xff]  }
 0x658   :  { %8630 = vmatprep.subr.bf16.mxu0 %v11615_v43  ;;  %v11670_v43 = vld [vmem:[#allocation9 + $0x1c28] ss:$20 sps:$4 sm:$0xff]   ;;  %v11714_v8 = vld [vmem:[#allocation9 + $0x1dc0] ss:$20 sps:$4 sm:$0xff]  }
 0x65b   :  { %8631 = vmatpush2.bf16.msra.mxu0 %v11613_v29  ;;  %v11678_v29 = vld [vmem:[#allocation9 + $0x1c04] ss:$20 sps:$4 sm:$0xff]  }
 0x65c   :  { %8632 = vmatprep.subr.bf16.mxu0 %v11621_v45  ;;  %v11681_v45 = vld [vmem:[#allocation9 + $0x1eac] ss:$20 sps:$4 sm:$0xff]  }
 0x65f   :  { %8633 = vmatpush2.bf16.msra.mxu0 %v11619_v46  ;;  %v11679_v46 = vld [vmem:[#allocation9 + $0x1ea8] ss:$20 sps:$4 sm:$0xff]  }
 0x660   :  { %8634 = vmatprep.subr.bf16.mxu0 %v11627_v48  ;;  %v11687_v48 = vld [vmem:[#allocation9 + $0x1e84] ss:$20 sps:$4 sm:$0xff]  }
 0x663   :  { %8635 = vmatpush2.bf16.msra.mxu0 %v11625_v50  ;;  %v11690_v50 = vld [vmem:[#allocation9 + $0x1bb4] ss:$20 sps:$4 sm:$0xff]  }
 0x664   :  { %8636 = vmatprep.subr.bf16.mxu0 %v11633_v42  ;;  %v11688_v42 = vld [vmem:[#allocation9 + $0x1bb0] ss:$20 sps:$4 sm:$0xff]  }
 0x667   :  { %8637 = vmatpush2.bf16.msra.mxu0 %v11631_v56  ;;  %v11694_v56 = vld [vmem:[#allocation9 + $0x1b88] ss:$20 sps:$4 sm:$0xff]  }
 0x668   :  { %8638 = vmatprep.subr.bf16.mxu0 %v11639_v61  ;;  %v11702_v61 = vld [vmem:[#allocation9 + $0x1de4] ss:$20 sps:$4 sm:$0xff]  }
 0x66a   :  { %v7152_v7 = vpop.f32.mrf.mxu0 }
 0x66b   :  { %8639 = vmatpush2.bf16.msra.mxu0 %v11637_v1  ;;  %v7153_v12 = vadd.f32 %v7152_v7, %v7112_v11  ;;  %v11703_v1 = vld [vmem:[#allocation9 + $0x1e08] ss:$20 sps:$4 sm:$0xff]   ;;  %v11711_v11 = vld [vmem:[#allocation9 + $0x1d90] ss:$20 sps:$4 sm:$0xff]  }
 0x66c   :  { %v10318_v63 = vpop.f32.mrf.mxu0  ;;  %8640 = vmatprep.subr.bf16.mxu0 %v11645_v24  ;;  %v11709_v24 = vld [vmem:[#allocation9 + $0x1de8] ss:$20 sps:$4 sm:$0xff]  }
 0x66d   :  { %v7163_v18 = vmax.f32 %v7153_v12, 0.0  ;;  %v11713_v7 = vld [vmem:[#allocation9 + $0x1d94] ss:$20 sps:$4 sm:$0xff]   ;;  %v11718_v63 = vld [vmem:[#allocation9 + $0x1d6c] ss:$20 sps:$4 sm:$0xff]  }
 0x66e   :  { %v7155_v15 = vpop.f32.mrf.mxu0  ;;  %v11716_v12 = vld [vmem:[#allocation9 + $0x1d68] ss:$20 sps:$4 sm:$0xff]  }
 0x66f   :  { %v7156_v16 = vadd.f32 %v7155_v15, %v7115_v14  ;;  %8641 = vmatpush2.bf16.msra.mxu0 %v11643_v60  ;;  %v11715_v60 = vld [vmem:[#allocation9 + $0x1c80] ss:$20 sps:$4 sm:$0xff]   ;;  %v11720_v14 = vld [vmem:[#allocation9 + $0x1c58] ss:$20 sps:$4 sm:$0xff]  }
 0x670   :  { %v10319_v34 = vpop.f32.mrf.mxu0  ;;  %8642 = vmatprep.subr.bf16.mxu0 %v11651_v51  ;;  %v11719_v51 = vld [vmem:[#allocation9 + $0x1d98] ss:$20 sps:$4 sm:$0xff]  }
 0x671   :  { %v7168_v22 = vmax.f32 %v7156_v16, 0.0  ;;  %v11723_v15 = vld [vmem:[#allocation9 + $0x1d44] ss:$20 sps:$4 sm:$0xff]  }
 0x672   :  { %v11724_v16 = vld [vmem:[#allocation9 + $0x1d70] ss:$20 sps:$4 sm:$0xff]  }
 0x673   :  { %v12241_v13 = vpack.c.bf16 %v7168_v22, %v7163_v18  ;;  %8643 = vmatpush2.bf16.msra.mxu0 %v11649_v59  ;;  %v11721_v59 = vld [vmem:[#allocation9 + $0x1d40] ss:$20 sps:$4 sm:$0xff]   ;;  %v11725_v34 = vld [vmem:[#allocation9 + $0x1c30] ss:$20 sps:$4 sm:$0xff]   ;;  %v11726_v18 = vld [vmem:[#allocation9 + $0x1d18] ss:$20 sps:$4 sm:$0xff]  }
 0x674   :  { %8644 = vmatprep.subr.bf16.mxu0 %v11657_v57  ;;  %v11728_v57 = vld [vmem:[#allocation9 + $0x1d1c] ss:$20 sps:$4 sm:$0xff]  }
 0x675   :  { %8604 = vmatmul.mubr.bf16.vlgmr.msra.gmra.mxu1 %v12241_v13  ;;  %v11730_v22 = vld [vmem:[#allocation9 + $0x1c08] ss:$20 sps:$4 sm:$0xff]  }
 0x676   :  { %8658 = vmatpush1.bf16.msra.mxu1 %v11652_v25  ;;  %8689 = vmatprep.mubr.bf16.mxu1 %v12232_v17  ;;  %v11733_v25 = vld [vmem:[#allocation9 + $0x1cf4] ss:$20 sps:$4 sm:$0xff]  }
 0x677   :  { %8645 = vmatpush2.bf16.msra.mxu0 %v11655_v23  ;;  %8659 = vmatprep.subr.bf16.mxu1 %v11660_v26  ;;  %v11734_v23 = vld [vmem:[#allocation9 + $0x1d20] ss:$20 sps:$4 sm:$0xff]   ;;  %v11731_v26 = vld [vmem:[#allocation9 + $0x1cf0] ss:$20 sps:$4 sm:$0xff]  }
 0x678   :  { %8700 = vmatprep.subr.bf16.mxu0 %v11663_v28  ;;  %v11735_v28 = vld [vmem:[#allocation9 + $0x1be0] ss:$20 sps:$4 sm:$0xff]  }
 0x67a   :  { %8647 = vmatmul.mubr.bf16.vlgmr.msra.gmra.mxu0 %v12223_v6  ;;  %8660 = vmatpush1.bf16.msra.mxu1 %v11658_v52  ;;  %v11738_v52 = vld [vmem:[#allocation9 + $0x1ccc] ss:$20 sps:$4 sm:$0xff]  }
 0x67b   :  { %8701 = vmatpush1.bf16.msra.mxu0 %v11661_v9  ;;  %8661 = vmatprep.subr.bf16.mxu1 %v11666_v35  ;;  %v11739_v9 = vld [vmem:[#allocation9 + $0x1cf8] ss:$20 sps:$4 sm:$0xff]   ;;  %v11736_v35 = vld [vmem:[#allocation9 + $0x1cc8] ss:$20 sps:$4 sm:$0xff]  }
 0x67c   :  { %8702 = vmatprep.subr.bf16.mxu0 %v11669_v36  ;;  %8732 = vmatprep.mubr.bf16.mxu0 %v11927_v0  ;;  %v11685_v0 = vld [vmem:[#allocation9 + $0x1e80] ss:$20 sps:$4 sm:$0xff]   ;;  %v11740_v36 = vld [vmem:[#allocation9 + $0x1bb8] ss:$20 sps:$4 sm:$0xff]  }
 0x67e   :  { %8662 = vmatpush1.bf16.msra.mxu1 %v11664_v37  ;;  %v11741_v37 = vld [vmem:[#allocation9 + $0x1b68] ss:$20 sps:$4 sm:$0xff]  }
 0x67f   :  { %8703 = vmatpush1.bf16.msra.mxu0 %v11667_v40  ;;  %8663 = vmatprep.subr.bf16.mxu1 %v11672_v3  ;;  %v11743_v40 = vld [vmem:[#allocation9 + $0x1cd0] ss:$20 sps:$4 sm:$0xff]   ;;  %v11742_v3 = vld [vmem:[#allocation9 + $0x1a28] ss:$20 sps:$4 sm:$0xff]  }
 0x680   :  { %8704 = vmatprep.subr.bf16.mxu0 %v11675_v41  ;;  %v11744_v41 = vld [vmem:[#allocation9 + $0x1b90] ss:$20 sps:$4 sm:$0xff]  }
 0x682   :  { %8664 = vmatpush1.bf16.msra.mxu1 %v11670_v43  ;;  %v11745_v43 = vld [vmem:[#allocation9 + $0x1b40] ss:$20 sps:$4 sm:$0xff]  }
 0x683   :  { %8705 = vmatpush1.bf16.msra.mxu0 %v11673_v44  ;;  %8665 = vmatprep.subr.bf16.mxu1 %v11678_v29  ;;  %v11746_v44 = vld [vmem:[#allocation9 + $0x1a00] ss:$20 sps:$4 sm:$0xff]   ;;  %v11747_v29 = vld [vmem:[#allocation9 + $0x1b18] ss:$20 sps:$4 sm:$0xff]  }
 0x684   :  { %8706 = vmatprep.subr.bf16.mxu0 %v11681_v45  ;;  %v11748_v45 = vld [vmem:[#allocation9 + $0x19d8] ss:$20 sps:$4 sm:$0xff]  }
 0x686   :  { %8666 = vmatpush1.bf16.msra.mxu1 %v11676_v33  ;;  %v11749_v33 = vld [vmem:[#allocation9 + $0x1af0] ss:$20 sps:$4 sm:$0xff]  }
 0x687   :  { %8707 = vmatpush1.bf16.msra.mxu0 %v11679_v46  ;;  %8667 = vmatprep.subr.bf16.mxu1 %v11684_v47  ;;  %v11750_v46 = vld [vmem:[#allocation9 + $0x19b0] ss:$20 sps:$4 sm:$0xff]   ;;  %v11751_v47 = vld [vmem:[#allocation9 + $0x1ac8] ss:$20 sps:$4 sm:$0xff]  }
 0x688   :  { %8708 = vmatprep.subr.bf16.mxu0 %v11687_v48  ;;  %v11752_v48 = vld [vmem:[#allocation9 + $0x1988] ss:$20 sps:$4 sm:$0xff]  }
 0x68a   :  { %8668 = vmatpush1.bf16.msra.mxu1 %v11682_v21  ;;  %v11753_v21 = vld [vmem:[#allocation9 + $0x1aa0] ss:$20 sps:$4 sm:$0xff]  }
 0x68b   :  { %8709 = vmatpush1.bf16.msra.mxu0 %v11685_v0  ;;  %8669 = vmatprep.subr.bf16.mxu1 %v11690_v50  ;;  %v11755_v0 = vld [vmem:[#allocation9 + $0x1a78] ss:$20 sps:$4 sm:$0xff]  }
 0x68c   :  { %8710 = vmatprep.subr.bf16.mxu0 %v11693_v53  ;;  %v11756_v50 = vld [vmem:[#allocation9 + $0x1938] ss:$20 sps:$4 sm:$0xff]   ;;  %v11757_v53 = vld [vmem:[#allocation9 + $0x1a50] ss:$20 sps:$4 sm:$0xff]  }
 0x68e   :  { %8670 = vmatpush1.bf16.msra.mxu1 %v11688_v42  ;;  %v11759_v42 = vld [vmem:[#allocation9 + $0x1f28] ss:$20 sps:$4 sm:$0xff]  }
 0x68f   :  { %8711 = vmatpush1.bf16.msra.mxu0 %v11691_v10  ;;  %8671 = vmatprep.subr.bf16.mxu1 %v11696_v54  ;;  %v11760_v10 = vld [vmem:[#allocation9 + $0x1f00] ss:$20 sps:$4 sm:$0xff]   ;;  %v11761_v54 = vld [vmem:[#allocation9 + $0x1ed8] ss:$20 sps:$4 sm:$0xff]  }
 0x690   :  { %8712 = vmatprep.subr.bf16.mxu0 %v11699_v55  ;;  %v11762_v55 = vld [vmem:[#allocation9 + $0x1eb0] ss:$20 sps:$4 sm:$0xff]  }
 0x692   :  { %8672 = vmatpush1.bf16.msra.mxu1 %v11694_v56  ;;  %v11763_v56 = vld [vmem:[#allocation9 + $0x1e88] ss:$20 sps:$4 sm:$0xff]  }
 0x693   :  { %8713 = vmatpush1.bf16.msra.mxu0 %v11697_v58  ;;  %8673 = vmatprep.subr.bf16.mxu1 %v11702_v61  ;;  %v11765_v58 = vld [vmem:[#allocation9 + $0x1e38] ss:$20 sps:$4 sm:$0xff]   ;;  %v11766_v61 = vld [vmem:[#allocation9 + $0x1e10] ss:$20 sps:$4 sm:$0xff]  }
 0x694   :  { %8714 = vmatprep.subr.bf16.mxu0 %v11705_v62 }
 0x696   :  { %8674 = vmatpush2.bf16.msra.mxu1 %v11700_v49 }
 0x697   :  { %8715 = vmatpush1.bf16.msra.mxu0 %v11703_v1  ;;  %8675 = vmatprep.subr.bf16.mxu1 %v11708_v2 }
 0x698   :  { %10201 = vmatprep.subr.bf16.mxu0 %v11709_v24 }
 0x69a   :  { %8676 = vmatpush2.bf16.msra.mxu1 %v11706_v4  ;;  %8733 = vmatmul.mubr.bf16.vlgmr.msra.gmra.mxu0 %v12241_v13 }
 0x69b   :  { %10202 = vmatpush3.bf16.msra.mxu0 %v11710_v5  ;;  %8816 = vmatprep.mubr.bf16.mxu0 %v12232_v17  ;;  %v11729_v17 = vld [vmem:[#allocation9 + $0x1d48] ss:$20 sps:$4 sm:$0xff]  }
 0x69c   :  { %8677 = vmatprep.subr.bf16.mxu1 %v11713_v7  ;;  %10203 = vmatprep.subr.bf16.mxu0 %v11714_v8 }
 0x69e   :  { %8678 = vmatpush2.bf16.msra.mxu1 %v11711_v11 }
 0x69f   :  { %10204 = vmatpush3.bf16.msra.mxu0 %v11715_v60  ;;  %8679 = vmatprep.subr.bf16.mxu1 %v11718_v63 }
 0x6a0   :  { %10205 = vmatprep.subr.bf16.mxu0 %v11719_v51 }
 0x6a2   :  { %8680 = vmatpush2.bf16.msra.mxu1 %v11716_v12 }
 0x6a3   :  { %10206 = vmatpush3.bf16.msra.mxu0 %v11720_v14  ;;  %8681 = vmatprep.subr.bf16.mxu1 %v11723_v15 }
 0x6a4   :  { %10207 = vmatprep.subr.bf16.mxu0 %v11724_v16 }
 0x6a6   :  { %8682 = vmatpush2.bf16.msra.mxu1 %v11721_v59 }
 0x6a7   :  { %10208 = vmatpush3.bf16.msra.mxu0 %v11725_v34  ;;  %8683 = vmatprep.subr.bf16.mxu1 %v11728_v57  ;;  %v7417_v34 = vld [vmem:[#allocation11 + $0x4] ss:$8 sm:$0x10] }
 0x6a8   :  { %10209 = vmatprep.subr.bf16.mxu0 %v11729_v17 }
 0x6aa   :  { %8684 = vmatpush2.bf16.msra.mxu1 %v11726_v18 }
 0x6ab   :  { %10210 = vmatpush3.bf16.msra.mxu0 %v11730_v22  ;;  %8685 = vmatprep.subr.bf16.mxu1 %v11733_v25 }
 0x6ac   :  { %10211 = vmatprep.subr.bf16.mxu0 %v11734_v23 }
 0x6ae   :  { %8686 = vmatpush2.bf16.msra.mxu1 %v11731_v26 }
 0x6af   :  { %10212 = vmatpush3.bf16.msra.mxu0 %v11735_v28  ;;  %8687 = vmatprep.subr.bf16.mxu1 %v11738_v52 }
 0x6b0   :  { %10213 = vmatprep.subr.bf16.mxu0 %v11739_v9 }
 0x6b2   :  { %8688 = vmatpush2.bf16.msra.mxu1 %v11736_v35 }
 0x6b3   :  { %10214 = vmatpush3.bf16.msra.mxu0 %v11740_v36  ;;  %10179 = vmatprep.subr.bf16.mxu1 %v11741_v37 }
 0x6b4   :  { %10215 = vmatprep.subr.bf16.mxu0 %v11743_v40 }
 0x6b5   :  { %8690 = vmatmul.mubr.bf16.vlgmr.msra.gmra.mxu1 %v12234_v19 }
 0x6b6   :  { %10180 = vmatpush3.bf16.msra.mxu1 %v11742_v3  ;;  %8775 = vmatprep.mubr.bf16.mxu1 %v12221_v27  ;;  %v11754_v27 = vld [vmem:[#allocation9 + $0x1960] ss:$20 sps:$4 sm:$0xff]  }
 0x6b7   :  { %10216 = vmatpush3.bf16.msra.mxu0 %v11744_v41  ;;  %10181 = vmatprep.subr.bf16.mxu1 %v11745_v43 }
 0x6b8   :  { %v8519_v62 = vpop.f32.mrf.mxu1 }
 0x6ba   :  { %10182 = vmatpush3.bf16.msra.mxu1 %v11746_v44  ;;  %8817 = vmatmul.mubr.bf16.vlgmr.msra.gmra.mxu0 %v12234_v19  ;;  %v11758_v19 = vld [vmem:[#allocation9 + $0x1910] ss:$20 sps:$4 sm:$0xff]   ;;  %v8521_v49 = vpop.f32.mrf.mxu1 }
 0x6bb   :  { %10183 = vmatprep.subr.bf16.mxu1 %v11747_v29  ;;  %v8876_v29 = vld [vmem:[#allocation12] sm:$0x1f] }
 0x6bc   :  { %v8523_v2 = vpop.f32.mrf.mxu1 }
 0x6be   :  { %10184 = vmatpush3.bf16.msra.mxu1 %v11748_v45  ;;  %v8525_v4 = vpop.f32.mrf.mxu1 }
 0x6bf   :  { %10185 = vmatprep.subr.bf16.mxu1 %v11749_v33 }
 0x6c2   :  { %10186 = vmatpush3.bf16.msra.mxu1 %v11750_v46 }
 0x6c3   :  { %10187 = vmatprep.subr.bf16.mxu1 %v11751_v47 }
 0x6c6   :  { %10188 = vmatpush3.bf16.msra.mxu1 %v11752_v48 }
 0x6c7   :  { %10189 = vmatprep.subr.bf16.mxu1 %v11753_v21 }
 0x6ca   :  { %10190 = vmatpush3.bf16.msra.mxu1 %v11754_v27 }
 0x6cb   :  { %10191 = vmatprep.subr.bf16.mxu1 %v11755_v0 }
 0x6ce   :  { %10192 = vmatpush3.bf16.msra.mxu1 %v11756_v50 }
 0x6cf   :  { %10193 = vmatprep.subr.bf16.mxu1 %v11757_v53 }
 0x6d2   :  { %10194 = vmatpush3.bf16.msra.mxu1 %v11758_v19 }
 0x6d3   :  { %10320 = vmatprep.subr.bf16.mxu1 %v11929_v31 }
 0x6d5   :  { %8776 = vmatmul.mubr.bf16.vlgmr.msra.gmra.mxu1 %v12223_v6  ;;  %v11764_v6 = vld [vmem:[#allocation9 + $0x1e60] ss:$20 sps:$4 sm:$0xff]  }
 0x6d6   :  { %10321 = vmatpush3.bf16.msra.mxu1 %v11759_v42  ;;  %10336 = vmatprep.mubr.msk.bf16.mxu1 %vm11930_vm3, %v11929_v31  ;;  %v8881_v42 = vrot.slane %v8876_v29, %v12008_v32 }
 0x6d7   :  { %10322 = vmatprep.subr.bf16.mxu1 %v11929_v31 }
 0x6da   :  { %10323 = vmatpush3.bf16.msra.mxu1 %v11760_v10 }
 0x6db   :  { %10324 = vmatprep.subr.bf16.mxu1 %v11929_v31 }
 0x6de   :  { %10325 = vmatpush3.bf16.msra.mxu1 %v11761_v54 }
 0x6df   :  { %10326 = vmatprep.subr.bf16.mxu1 %v11929_v31 }
 0x6e2   :  { %10327 = vmatpush3.bf16.msra.mxu1 %v11762_v55 }
 0x6e3   :  { %10328 = vmatprep.subr.bf16.mxu1 %v11929_v31 }
 0x6e6   :  { %10329 = vmatpush3.bf16.msra.mxu1 %v11763_v56  ;;  %v8885_v56 = vrot.slane %v8876_v29, %v12005_v30 }
 0x6e7   :  { %10330 = vmatprep.subr.bf16.mxu1 %v11929_v31 }
 0x6ea   :  { %10331 = vmatpush3.bf16.msra.mxu1 %v11764_v6  ;;  %v8889_v6 = vrot.slane %v8876_v29, %v12017_v38 }
 0x6eb   :  { %10332 = vmatprep.subr.bf16.mxu1 %v11929_v31 }
 0x6ee   :  { %10333 = vmatpush3.bf16.msra.mxu1 %v11765_v58 }
 0x6ef   :  { %10334 = vmatprep.subr.bf16.mxu1 %v11929_v31 }
 0x6f2   :  { %10335 = vmatpush3.bf16.msra.mxu1 %v11766_v61 }
 0x6f5   :  { %10337 = vmatmul.mubr.bf16.vlgmr.msra.gmra.mxu1 %v12241_v13  ;;  %v7416_v13 = vld [vmem:[#allocation11 + $0x4] ss:$8 sm:$0xf] }
 0x6f6   :  { %v7418_v17 = vor.u32 %v7417_v34, %v7416_v13 }
 0x6f8   :  { %v7427_v22 = vrot.slane %v7418_v17, %v12005_v30  ;;  %v7431_v25 = vrot.slane %v7418_v17, %v12017_v38  ;;  %v7423_v26 = vrot.slane %v7418_v17, %v12008_v32  ;;  %v7435_v36 = vrot.slane %v7418_v17, %v12020_v39 }
 0x6f9   :  { %v8893_v30 = vrot.slane %v8876_v29, %v12020_v39 }
 0x6fa   :  { %v8562_v1 = vpop.f32.mrf.mxu0  ;;  %v8522_v9 = vadd.f32 %v8521_v49, %v7427_v22  ;;  %v8520_v37 = vadd.f32 %v8519_v62, %v7423_v26  ;;  %v8526_v47 = vadd.f32 %v8525_v4, %v7427_v22  ;;  %v8524_v21 = vadd.f32 %v8523_v2, %v7423_v26 }
 0x6fb   :  { %v7439_v49 = vrot.slane %v7418_v17, %v12040_v20  ;;  %v8897_v26 = vrot.slane %v8876_v29, %v12040_v20 }
 0x6fc   :  { %v8564_v24 = vpop.f32.mrf.mxu0  ;;  %v8563_v44 = vadd.f32 %v8562_v1, %v8520_v37 }
 0x6fd   :  { %v8565_v40 = vadd.f32 %v8564_v24, %v8522_v9 }
 0x6fe   :  { %v8566_v5 = vpop.f32.mrf.mxu0 }
 0x6ff   :  { %v8567_v54 = vadd.f32 %v8566_v5, %v8524_v21 }
 0x700   :  { %v8568_v8 = vpop.f32.mrf.mxu0 }
 0x701   :  { %v8569_v19 = vadd.f32 %v8568_v8, %v8526_v47 }
 0x735   :  { %v8605_v7 = vpop.f32.mrf.mxu1 }
 0x736   :  { %v8606_v27 = vadd.f32 %v8605_v7, %v8563_v44 }
 0x737   :  { %v8607_v11 = vpop.f32.mrf.mxu1 }
 0x738   :  { %v8608_v45 = vadd.f32 %v8607_v11, %v8565_v40  ;;  %v8866_v2 = vmax.f32 %v8606_v27, 0.0 }
 0x739   :  { %v8609_v63 = vpop.f32.mrf.mxu1 }
 0x73a   :  { %v8648_v60 = vpop.f32.mrf.mxu0  ;;  %v8867_v55 = vmax.f32 %v8608_v45, 0.0  ;;  %v8610_v24 = vadd.f32 %v8609_v63, %v8567_v54 }
 0x73b   :  { %v8611_v12 = vpop.f32.mrf.mxu1  ;;  %v8649_v35 = vadd.f32 %v8648_v60, %v7431_v25 }
 0x73c   :  { %v8650_v51 = vpop.f32.mrf.mxu0  ;;  %v8612_v61 = vadd.f32 %v8611_v12, %v8569_v19  ;;  %v8904_v60 = vmul.f32 %v8885_v56, %v8867_v55  ;;  %v8871_v12 = vmax.f32 %v8610_v24, 0.0 }
 0x73d   :  { %v8651_v33 = vadd.f32 %v8650_v51, %v7435_v36 }
 0x73e   :  { %v8652_v14 = vpop.f32.mrf.mxu0  ;;  %v8872_v51 = vmax.f32 %v8612_v61, 0.0 }
 0x73f   :  { %v8653_v48 = vadd.f32 %v8652_v14, %v7431_v25  ;;  %v8908_v25 = vmul.f32 %v8881_v42, %v8871_v12 }
 0x740   :  { %v8654_v31 = vpop.f32.mrf.mxu0  ;;  %v8909_v17 = vmul.f32 %v8885_v56, %v8872_v51 }
 0x741   :  { %v8655_v62 = vadd.f32 %v8654_v31, %v7435_v36 }
 0x742   :  { %v8919_v40 = vadd.f32 %v8909_v17, %v8908_v25 }
 0x75a   :  { %v8734_v59 = vpop.f32.mrf.mxu0 }
 0x75c   :  { %v8736_v18 = vpop.f32.mrf.mxu0 }
 0x75e   :  { %v8738_v28 = vpop.f32.mrf.mxu0 }
 0x760   :  { %v8740_v3 = vpop.f32.mrf.mxu0 }
 0x775   :  { %v8691_v15 = vpop.f32.mrf.mxu1 }
 0x776   :  { %v8692_v41 = vadd.f32 %v8691_v15, %v8649_v35  ;;  %v8903_v15 = vmul.f32 %v8881_v42, %v8866_v2 }
 0x777   :  { %v8693_v16 = vpop.f32.mrf.mxu1 }
 0x778   :  { %v8735_v0 = vadd.f32 %v8734_v59, %v8692_v41  ;;  %v8694_v50 = vadd.f32 %v8693_v16, %v8651_v33  ;;  %v8913_v63 = vadd.f32 %v8904_v60, %v8903_v15 }
 0x779   :  { %v8695_v57 = vpop.f32.mrf.mxu1 }
 0x77a   :  { %v10217_v46 = vpop.f32.mrf.mxu0  ;;  %v8696_v10 = vadd.f32 %v8695_v57, %v8653_v48  ;;  %v8868_v4 = vmax.f32 %v8735_v0, 0.0  ;;  %v8737_v7 = vadd.f32 %v8736_v18, %v8694_v50  ;;  %v8926_v50 = vstv %s12289_s6 }
 0x77b   :  { %v8697_v23 = vpop.f32.mrf.mxu1 }
 0x77c   :  { %v10218_v58 = vpop.f32.mrf.mxu0  ;;  %v8739_v11 = vadd.f32 %v8738_v28, %v8696_v10  ;;  %v8698_v32 = vadd.f32 %v8697_v23, %v8655_v62  ;;  %v8905_v31 = vmul.f32 %v8889_v6, %v8868_v4  ;;  %v8869_v16 = vmax.f32 %v8737_v7, 0.0 }
 0x77d   :  { %v10219_v34 = vadd.f32 %v10218_v58, %v10217_v46 }
 0x77e   :  { %v10220_v5 = vpop.f32.mrf.mxu0  ;;  %v8873_v59 = vmax.f32 %v8739_v11, 0.0  ;;  %v8741_v13 = vadd.f32 %v8740_v3, %v8698_v32  ;;  %v8906_v28 = vmul.f32 %v8893_v30, %v8869_v16  ;;  %v8914_v39 = vadd.f32 %v8913_v63, %v8905_v31 }
 0x780   :  { %v10221_v57 = vpop.f32.mrf.mxu0  ;;  %v8874_v9 = vmax.f32 %v8741_v13, 0.0  ;;  %v8915_v44 = vadd.f32 %v8914_v39, %v8906_v28 }
 0x781   :  { %v10222_v35 = vadd.f32 %v10221_v57, %v10220_v5 }
 0x782   :  { %v8911_v45 = vmul.f32 %v8893_v30, %v8874_v9 }
 0x795   :  { %v10195_v52 = vpop.f32.mrf.mxu1 }
 0x797   :  { %v10196_v43 = vpop.f32.mrf.mxu1 }
 0x798   :  { %v10197_v1 = vadd.f32 %v10196_v43, %v10195_v52  ;;  %v8910_v52 = vmul.f32 %v8889_v6, %v8873_v59 }
 0x799   :  { %v10198_v53 = vpop.f32.mrf.mxu1 }
 0x79a   :  { %v8778_v14 = vadd.f32 %v10197_v1, %v7439_v49  ;;  %v8920_v47 = vadd.f32 %v8919_v40, %v8910_v52 }
 0x79b   :  { %v10199_v8 = vpop.f32.mrf.mxu1 }
 0x79c   :  { %v10200_v38 = vadd.f32 %v10199_v8, %v10198_v53  ;;  %v8819_v22 = vadd.f32 %v10219_v34, %v8778_v14  ;;  %v8921_v29 = vadd.f32 %v8920_v47, %v8911_v45 }
 0x79e   :  { %v8781_v18 = vadd.f32 %v10200_v38, %v7439_v49 }
 0x7a0   :  { %v8822_v3 = vadd.f32 %v10222_v35, %v8781_v18 }
 0x7b5   :  { %v8859_v23 = vpop.f32.mrf.mxu1 }
 0x7b6   :  { %v8860_v36 = vadd.f32 %v8859_v23, %v8819_v22 }
 0x7b7   :  { %v10338_v37 = vpop.f32.mrf.mxu1 }
 0x7b8   :  { %v8870_v41 = vmax.f32 %v8860_v36, 0.0 }
 0x7b9   :  { %v8862_v43 = vpop.f32.mrf.mxu1 }
 0x7ba   :  { %v8863_v33 = vadd.f32 %v8862_v43, %v8822_v3  ;;  %v8907_v46 = vmul.f32 %v8897_v26, %v8870_v41 }
 0x7bb   :  { %v10339_v48 = vpop.f32.mrf.mxu1 }
 0x7bc   :  { %v8875_v21 = vmax.f32 %v8863_v33, 0.0  ;;  %v8916_v27 = vadd.f32 %v8915_v44, %v8907_v46 }
 0x7be   :  { %v8912_v20 = vmul.f32 %v8897_v26, %v8875_v21  ;;  %8917 = vadd.xlane.f32.xlu0 %v8916_v27 }
 0x7c0   :  { %v8922_v0 = vadd.f32 %v8921_v29, %v8912_v20 }
 0x7c2   :  { %8923 = vadd.xlane.f32.xlu0 %v8922_v0 }
 0x847   :  { %v8918_v53 = vpop.xlane.xlu0 %8917 }
 0x848   :  { %v8927_v19 = vadd.f32 %v8926_v50, %v8918_v53 }
 0x84a   :  { %8929 = vst [vmem:[#allocation14] sm:$0xff] %v8927_v19 }
 0x84b   :  { %v8924_v42 = vpop.xlane.xlu0 %8923 }
 0x84c   :  { %v8928_v10 = vadd.f32 %v8926_v50, %v8924_v42 }
 0x84e   :  { %8930 = vst [vmem:[#allocation14 + $0x8] sm:$0xff] %v8928_v10 }
 0x84f   :  { %11898 = shalt.err (!%p11895_p6)
}
 0x850   :  { %8942 = dma.vmem_to_hbm [thread:$0]  %s8937_s11, 256, %s12290_s7, [#allocation5], %s11922_s1, %s11922_s1, %s11923_s16  }
 0x851   :  { %11915 = dma.done.wait [#allocation5], 256  }
 0x852   :  { %11916 = vsyncadd [#allocation5], 4294967040 }
 0x853   :  { %8946 = vsyncpa [#allocation4], 1 }
 0x854   :  { %8947 = vsyncpa [#allocation7], 1 }
 0x855   :  { %8948 = vsyncpa [#allocation10], 1 }
 0x856   :  { %8949 = vsyncpa [#allocation13], 1 }
 0x857   :  { %8950 = vsyncpa [#allocation5], 1 }

</bundles_post_ra>
